<compile_context>
chip_gen: v7x
topology: tpu7x:2x2x1
jax: 0.10.0
libtpu: 0.0.40
codegen_flags: <defaults>
</compile_context>

<pallas_src>
import jax
import jax.numpy as jnp
from jax import lax
from jax.experimental import pallas as pl
from jax.experimental.pallas import tpu as pltpu


def _round_up(a, b):
    return ((a + b - 1) // b) * b


# ----------------------------- Pallas kernel ------------------------------- #

def fused_cnn_kernel(x_ref, wt_ref, bt_ref, w1_ref, b1_ref, w2_ref, b2_ref, o_ref):
    """One batch block of the whole CNNLayer forward.

    x_ref:  (NB, C_in*H*W)   bf16 raw pixels, flattened in (c, h, w) order.
    wt_ref: (C_in*H*W, F)    bf16 Toeplitz conv weight (1/255 folded in),
                             F = C_out*H_out*W_out in PyTorch flatten order.
    bt_ref: (1, F)           f32 conv bias broadcast over spatial positions.
    w1_ref: (F, hidden) bf16; b1_ref: (1, hidden) f32.
    w2_ref: (hidden, hidden) bf16; b2_ref: (1, hidden) f32.
    o_ref:  (NB, hidden)     f32 output block.
    """
    # Conv (as one dense matmul) + bias + ReLU.  Result is already in PyTorch
    # flatten order, so it feeds fc1 with no relayout.
    conv = jnp.dot(x_ref[...], wt_ref[...], preferred_element_type=jnp.float32)
    conv = jnp.maximum(conv + bt_ref[...], 0.0)                        # (NB, F) f32

    # fc1 + ReLU
    h = jnp.dot(conv.astype(jnp.bfloat16), w1_ref[...],
                preferred_element_type=jnp.float32) + b1_ref[...]
    h = jnp.maximum(h, 0.0)                                            # (NB, hidden)

    # fc2 + ReLU
    y = jnp.dot(h.astype(jnp.bfloat16), w2_ref[...],
                preferred_element_type=jnp.float32) + b2_ref[...]
    o_ref[...] = jnp.maximum(y, 0.0)                                   # (NB, hidden)


# ------------------------- parameter prep (one-time) ------------------------ #

def prepare_params(conv_w, conv_b, fc1_w, fc1_b, fc2_w, fc2_b, input_hw):
    """One-time re-layout of PyTorch-convention parameters (hoisted out of forward).

    conv_w: (C_out, C_in, KH, KW) OIHW.  The conv is expanded to a dense Toeplitz
    matrix T[(c,h,w), (co,i,j)] = conv_w[co, c, h-i, w-j] / 255 (valid taps only), so
    x_flat @ T reproduces Conv2d(x/255) already flattened in PyTorch (c, h, w) order.
    """
    H, W = input_hw
    C_out, C_in, KH, KW = conv_w.shape
    H_out, W_out = H - KH + 1, W - KW + 1
    F = C_out * H_out * W_out
    hidden = fc2_w.shape[0]
    assert fc1_w.shape == (hidden, F), (fc1_w.shape, (hidden, F))

    # Shift-selection matrices: A[a, h, i] = 1 iff h == i + a (rows), same for B (cols).
    A = (jnp.arange(H)[None, :, None]
         == jnp.arange(H_out)[None, None, :] + jnp.arange(KH)[:, None, None]
         ).astype(jnp.float32)
    B = (jnp.arange(W)[None, :, None]
         == jnp.arange(W_out)[None, None, :] + jnp.arange(KW)[:, None, None]
         ).astype(jnp.float32)
    T = jnp.einsum('ocab,ahi,bwj->chwoij', conv_w.astype(jnp.float32), A, B) / 255.0
    wt = T.reshape(C_in * H * W, F).astype(jnp.bfloat16)               # (G, F)

    bt = jnp.repeat(conv_b.astype(jnp.float32), H_out * W_out).reshape(1, F)
    w1t = fc1_w.T.astype(jnp.bfloat16)                                 # (F, hidden)
    b1 = fc1_b.reshape(1, hidden).astype(jnp.float32)
    w2t = fc2_w.T.astype(jnp.bfloat16)                                 # (hidden, hidden)
    b2 = fc2_b.reshape(1, hidden).astype(jnp.float32)
    return wt, bt, w1t, b1, w2t, b2


# ------------------------------ JAX wrapper -------------------------------- #

def cnn_layer_forward(x_nchw, params):
    """CNNLayer forward. x_nchw: (N, C, H, W) raw pixels like PyTorch; returns (N, hidden)."""
    wt, bt, w1t, b1, w2t, b2 = params
    N = x_nchw.shape[0]
    G, F = wt.shape
    hidden = w2t.shape[0]

    x_flat = x_nchw.reshape(N, G).astype(jnp.bfloat16)                 # (N, C*H*W)

    # Batch tiling: blocks of >=16 rows (bf16 sublane tile); "parallel" so v7x's two
    # TensorCores split the batch and x/out blocks pipeline.  Weights use constant
    # index maps, so they are not re-fetched across grid steps.
    NB = min(64, _round_up(N, 16))
    N_pad = _round_up(N, NB)
    if N_pad != N:
        x_flat = jnp.pad(x_flat, ((0, N_pad - N), (0, 0)))

    out = pl.pallas_call(
        fused_cnn_kernel,
        out_shape=jax.ShapeDtypeStruct((N_pad, hidden), jnp.float32),
        grid=(N_pad // NB,),
        in_specs=[
            pl.BlockSpec((NB, G), lambda i: (i, 0)),           # x batch block
            pl.BlockSpec((G, F), lambda i: (0, 0)),            # Toeplitz conv weight
            pl.BlockSpec((1, F), lambda i: (0, 0)),            # conv bias (flattened)
            pl.BlockSpec((F, hidden), lambda i: (0, 0)),       # fc1 weight
            pl.BlockSpec((1, hidden), lambda i: (0, 0)),       # fc1 bias
            pl.BlockSpec((hidden, hidden), lambda i: (0, 0)),  # fc2 weight
            pl.BlockSpec((1, hidden), lambda i: (0, 0)),       # fc2 bias
        ],
        out_specs=pl.BlockSpec((NB, hidden), lambda i: (i, 0)),
        compiler_params=pltpu.CompilerParams(
            dimension_semantics=("parallel",),
            vmem_limit_bytes=32 * 1024 * 1024),
    )(x_flat, wt, bt, w1t, b1, w2t, b2)
    return out[:N]                                                     # (N, hidden)


# ------------------------------ reference ---------------------------------- #

def reference_forward(x_nchw, conv_w, conv_b, fc1_w, fc1_b, fc2_w, fc2_b):
    xn = x_nchw.astype(jnp.float32) / 255.0
    y = lax.conv_general_dilated(
        xn, conv_w, window_strides=(1, 1), padding="VALID",
        dimension_numbers=("NCHW", "OIHW", "NCHW"),
        precision=lax.Precision.HIGHEST)
    y = jnp.maximum(y + conv_b.reshape(1, -1, 1, 1), 0.0)
    flat = y.reshape(y.shape[0], -1)
    h = jnp.maximum(
        jnp.dot(flat, fc1_w.T, precision=lax.Precision.HIGHEST) + fc1_b, 0.0)
    return jnp.maximum(
        jnp.dot(h, fc2_w.T, precision=lax.Precision.HIGHEST) + fc2_b, 0.0)


# --------------------------------- main ------------------------------------ #

if __name__ == "__main__":
    # obs_shape = (C, W, H) = (4, 16, 16), hidden_size = 32, kernel=3, stride=1
    N, C, H, W = 2, 4, 16, 16
    hidden = 32
    K = 3
    C_mid = hidden // 2                          # conv out channels = 16
    F = C_mid * (H - K + 1) * (W - K + 1)        # 16 * 14 * 14 = 3136

    key = jax.random.PRNGKey(0)
    k_conv, k_fc1, k_fc2, k_x = jax.random.split(key, 4)

    # Deterministic synthetic parameters (PyTorch-convention shapes); biases = 0
    # matching nn.init.constant_(bias, 0).
    conv_w = 0.10 * jax.random.normal(k_conv, (C_mid, C, K, K), jnp.float32)   # OIHW
    conv_b = jnp.zeros((C_mid,), jnp.float32)
    fc1_w = 0.02 * jax.random.normal(k_fc1, (hidden, F), jnp.float32)
    fc1_b = jnp.zeros((hidden,), jnp.float32)
    fc2_w = 0.10 * jax.random.normal(k_fc2, (hidden, hidden), jnp.float32)
    fc2_b = jnp.zeros((hidden,), jnp.float32)

    # Input like raw pixel observations in [0, 255), NCHW as PyTorch expects.
    x = 255.0 * jax.random.uniform(k_x, (N, C, H, W), jnp.float32)

    # One-time parameter re-layout (hoisted out of the forward path).
    params = jax.tree_util.tree_map(
        jax.block_until_ready,
        prepare_params(conv_w, conv_b, fc1_w, fc1_b, fc2_w, fc2_b, input_hw=(H, W)))

    fwd = jax.jit(cnn_layer_forward)
    out = jax.block_until_ready(fwd(x, params))

    ref = jax.block_until_ready(
        reference_forward(x, conv_w, conv_b, fc1_w, fc1_b, fc2_w, fc2_b))

    assert out.shape == (N, hidden), out.shape
    assert jnp.allclose(out, ref, rtol=1e-2, atol=1e-2), (
        float(jnp.max(jnp.abs(out - ref))))

    print("KERNEL_OK")
</pallas_src>

<mosaic_0001>
module attributes {stable_mosaic.version = 11 : i64} {
  func.func @fused_cnn_kernel(%arg0: i32, %arg1: memref<16x1024xbf16, #tpu.memory_space<vmem>>, %arg2: memref<1024x3136xbf16, #tpu.memory_space<vmem>>, %arg3: memref<1x3136xf32, #tpu.memory_space<vmem>>, %arg4: memref<3136x32xbf16, #tpu.memory_space<vmem>>, %arg5: memref<1x32xf32, #tpu.memory_space<vmem>>, %arg6: memref<32x32xbf16, #tpu.memory_space<vmem>>, %arg7: memref<1x32xf32, #tpu.memory_space<vmem>>, %arg8: memref<16x32xf32, #tpu.memory_space<vmem>>) attributes {dimension_semantics = [#tpu.dimension_semantics<parallel>], iteration_bounds = array<i64: 1>, scalar_prefetch = 0 : i64, scratch_operands = 0 : i64, tpu.core_type = #tpu.core_type<tc>, window_params = [{transform_indices = @transform_0, window_bounds = array<i64: 16, 1024>}, {pipeline_mode = #tpu.pipeline_mode<synchronous>, transform_indices = @transform_1, window_bounds = array<i64: 1024, 3136>}, {pipeline_mode = #tpu.pipeline_mode<synchronous>, transform_indices = @transform_2, window_bounds = array<i64: 1, 3136>}, {pipeline_mode = #tpu.pipeline_mode<synchronous>, transform_indices = @transform_3, window_bounds = array<i64: 3136, 32>}, {pipeline_mode = #tpu.pipeline_mode<synchronous>, transform_indices = @transform_4, window_bounds = array<i64: 1, 32>}, {pipeline_mode = #tpu.pipeline_mode<synchronous>, transform_indices = @transform_5, window_bounds = array<i64: 32, 32>}, {pipeline_mode = #tpu.pipeline_mode<synchronous>, transform_indices = @transform_6, window_bounds = array<i64: 1, 32>}, {transform_indices = @transform_7, window_bounds = array<i64: 16, 32>}]} {
    %c0 = arith.constant 0 : index
    %c0_0 = arith.constant 0 : index
    %0 = vector.load %arg1[%c0, %c0_0] : memref<16x1024xbf16, #tpu.memory_space<vmem>>, vector<16x1024xbf16>
    %c0_1 = arith.constant 0 : index
    %c0_2 = arith.constant 0 : index
    %1 = vector.load %arg2[%c0_1, %c0_2] : memref<1024x3136xbf16, #tpu.memory_space<vmem>>, vector<1024x3136xbf16>
    %cst = arith.constant dense<0.000000e+00> : vector<16x3136xf32>
    %2 = tpu.matmul %0, %1, %cst {dimension_numbers = #tpu.dot_dimension_numbers<[1], [0], [0], [1], [0, 0, 1, 1], [], []>} : vector<16x1024xbf16>, vector<1024x3136xbf16>, vector<16x3136xf32> -> vector<16x3136xf32>
    %c0_3 = arith.constant 0 : index
    %c0_4 = arith.constant 0 : index
    %3 = vector.load %arg3[%c0_3, %c0_4] : memref<1x3136xf32, #tpu.memory_space<vmem>>, vector<1x3136xf32>
    %4 = vector.broadcast %3 : vector<1x3136xf32> to vector<16x3136xf32>
    %5 = arith.addf %2, %4 : vector<16x3136xf32>
    %cst_5 = arith.constant 0.000000e+00 : f32
    %6 = vector.broadcast %cst_5 : f32 to vector<16x3136xf32>
    %7 = arith.maximumf %5, %6 : vector<16x3136xf32>
    %8 = arith.truncf %7 : vector<16x3136xf32> to vector<16x3136xbf16>
    %c0_6 = arith.constant 0 : index
    %c0_7 = arith.constant 0 : index
    %9 = vector.load %arg4[%c0_6, %c0_7] : memref<3136x32xbf16, #tpu.memory_space<vmem>>, vector<3136x32xbf16>
    %cst_8 = arith.constant dense<0.000000e+00> : vector<16x32xf32>
    %10 = tpu.matmul %8, %9, %cst_8 {dimension_numbers = #tpu.dot_dimension_numbers<[1], [0], [0], [1], [0, 0, 1, 1], [], []>} : vector<16x3136xbf16>, vector<3136x32xbf16>, vector<16x32xf32> -> vector<16x32xf32>
    %c0_9 = arith.constant 0 : index
    %c0_10 = arith.constant 0 : index
    %11 = vector.load %arg5[%c0_9, %c0_10] : memref<1x32xf32, #tpu.memory_space<vmem>>, vector<1x32xf32>
    %12 = vector.broadcast %11 : vector<1x32xf32> to vector<16x32xf32>
    %13 = arith.addf %10, %12 : vector<16x32xf32>
    %cst_11 = arith.constant 0.000000e+00 : f32
    %14 = vector.broadcast %cst_11 : f32 to vector<16x32xf32>
    %15 = arith.maximumf %13, %14 : vector<16x32xf32>
    %16 = arith.truncf %15 : vector<16x32xf32> to vector<16x32xbf16>
    %c0_12 = arith.constant 0 : index
    %c0_13 = arith.constant 0 : index
    %17 = vector.load %arg6[%c0_12, %c0_13] : memref<32x32xbf16, #tpu.memory_space<vmem>>, vector<32x32xbf16>
    %cst_14 = arith.constant dense<0.000000e+00> : vector<16x32xf32>
    %18 = tpu.matmul %16, %17, %cst_14 {dimension_numbers = #tpu.dot_dimension_numbers<[1], [0], [0], [1], [0, 0, 1, 1], [], []>} : vector<16x32xbf16>, vector<32x32xbf16>, vector<16x32xf32> -> vector<16x32xf32>
    %c0_15 = arith.constant 0 : index
    %c0_16 = arith.constant 0 : index
    %19 = vector.load %arg7[%c0_15, %c0_16] : memref<1x32xf32, #tpu.memory_space<vmem>>, vector<1x32xf32>
    %20 = vector.broadcast %19 : vector<1x32xf32> to vector<16x32xf32>
    %21 = arith.addf %18, %20 : vector<16x32xf32>
    %cst_17 = arith.constant 0.000000e+00 : f32
    %22 = vector.broadcast %cst_17 : f32 to vector<16x32xf32>
    %23 = arith.maximumf %21, %22 : vector<16x32xf32>
    %c0_18 = arith.constant 0 : index
    %c0_19 = arith.constant 0 : index
    %24 = vector.load %arg8[%c0_18, %c0_19] : memref<16x32xf32, #tpu.memory_space<vmem>>, vector<16x32xf32>
    tpu.vector_store %arg8[%c0_18, %c0_19], %23 {strides = array<i32>} : memref<16x32xf32, #tpu.memory_space<vmem>>, vector<16x32xf32>,
    return
  }
  func.func @transform_0(%arg0: i32) -> (i32, i32) {
    %c0_i32 = arith.constant 0 : i32
    %c0_i32_0 = arith.constant 0 : i32
    return %arg0, %c0_i32 : i32, i32
  }
  func.func @transform_1(%arg0: i32) -> (i32, i32) {
    %c0_i32 = arith.constant 0 : i32
    %c0_i32_0 = arith.constant 0 : i32
    %c0_i32_1 = arith.constant 0 : i32
    return %c0_i32, %c0_i32_0 : i32, i32
  }
  func.func @transform_2(%arg0: i32) -> (i32, i32) {
    %c0_i32 = arith.constant 0 : i32
    %c0_i32_0 = arith.constant 0 : i32
    %c0_i32_1 = arith.constant 0 : i32
    return %c0_i32, %c0_i32_0 : i32, i32
  }
  func.func @transform_3(%arg0: i32) -> (i32, i32) {
    %c0_i32 = arith.constant 0 : i32
    %c0_i32_0 = arith.constant 0 : i32
    %c0_i32_1 = arith.constant 0 : i32
    return %c0_i32, %c0_i32_0 : i32, i32
  }
  func.func @transform_4(%arg0: i32) -> (i32, i32) {
    %c0_i32 = arith.constant 0 : i32
    %c0_i32_0 = arith.constant 0 : i32
    %c0_i32_1 = arith.constant 0 : i32
    return %c0_i32, %c0_i32_0 : i32, i32
  }
  func.func @transform_5(%arg0: i32) -> (i32, i32) {
    %c0_i32 = arith.constant 0 : i32
    %c0_i32_0 = arith.constant 0 : i32
    %c0_i32_1 = arith.constant 0 : i32
    return %c0_i32, %c0_i32_0 : i32, i32
  }
  func.func @transform_6(%arg0: i32) -> (i32, i32) {
    %c0_i32 = arith.constant 0 : i32
    %c0_i32_0 = arith.constant 0 : i32
    %c0_i32_1 = arith.constant 0 : i32
    return %c0_i32, %c0_i32_0 : i32, i32
  }
  func.func @transform_7(%arg0: i32) -> (i32, i32) {
    %c0_i32 = arith.constant 0 : i32
    %c0_i32_0 = arith.constant 0 : i32
    return %arg0, %c0_i32 : i32, i32
  }
}

</mosaic_0001>

<bundles_post_ra>
// kernel: cnn_layer_forward.1
= control target key start
LH: loop header
LB: loop body
LE: loop exit
PB: predicated region body
PF: predicated region fallthrough
CT: control target
= control target key end

     0   :  { %vm19385_vm0 = vmmov 0   ;;  %vm13814_vm1 = vcmask 523264   ;;  %vm14377_vm2 = vcmask 261120   ;;  %s25145_s1 = inlined_call_operand.vmem [shape: bf16[1024,3136], index: 1, kind: input, shape index: {}]   ;;  %s25146_s0 = inlined_call_operand.vmem [shape: bf16[16,1024], index: 0, kind: input, shape index: {}]   ;;  %s25147_s2 = inlined_call_operand.vmem [shape: f32[1,3136], index: 2, kind: input, shape index: {}]   ;;  %s25148_s3 = inlined_call_operand.vmem [shape: bf16[3136,32], index: 3, kind: input, shape index: {}]   ;;  %s25149_s4 = inlined_call_operand.vmem [shape: f32[1,32], index: 4, kind: input, shape index: {}]   ;;  %s25150_s5 = inlined_call_operand.vmem [shape: bf16[32,32], index: 5, kind: input, shape index: {}]   ;;  %s25151_s6 = inlined_call_operand.vmem [shape: f32[1,32], index: 6, kind: input, shape index: {}]   ;;  %s25152_s7 = inlined_call_operand.vmem [shape: f32[16,32], index: 7, kind: output, shape index: {}]  }
   0x1   :  { %v16815_v0 = vld [vmem:[%s25145_s1 + $0x4] ss:$100 sps:$4 sm:$0xff]   ;;  %v16817_v1 = vld [vmem:[%s25145_s1 + $0xc] ss:$100 sps:$4 sm:$0xff]   ;;  %v16823_v5 = vld [vmem:[%s25145_s1 + $0xd4] ss:$100 sps:$4 sm:$0xff]  }
   0x2   :  { %9936 = vmatprep.subr.bf16.mxu0 %v16815_v0  ;;  %v16819_v2 = vld [vmem:[%s25145_s1] ss:$100 sps:$4 sm:$0xff]   ;;  %v16820_v3 = vld [vmem:[%s25145_s1 + $0x8] ss:$100 sps:$4 sm:$0xff]   ;;  %10108 = vmatprep.subr.bf16.mxu1 %v16817_v1  ;;  %v16826_v7 = vld [vmem:[%s25145_s1 + $0xd0] ss:$100 sps:$4 sm:$0xff]  }
   0x3   :  { %v16821_v4 = vld [vmem:[%s25145_s1 + $0xcc] ss:$100 sps:$4 sm:$0xff]   ;;  %9937 = vmatpush1.bf16.msra.mxu0 %v16819_v2  ;;  %10109 = vmatpush1.bf16.msra.mxu1 %v16820_v3  ;;  %v16827_v8 = vld [vmem:[%s25145_s1 + $0x194] ss:$100 sps:$4 sm:$0xff]   ;;  %v16829_v9 = vld [vmem:[%s25145_s1 + $0x19c] ss:$100 sps:$4 sm:$0xff]  }
   0x4   :  { %v16825_v6 = vld [vmem:[%s25145_s1 + $0xc8] ss:$100 sps:$4 sm:$0xff]   ;;  %9938 = vmatprep.subr.bf16.mxu0 %v16821_v4  ;;  %10110 = vmatprep.subr.bf16.mxu1 %v16823_v5  ;;  %v16831_v10 = vld [vmem:[%s25145_s1 + $0x190] ss:$100 sps:$4 sm:$0xff]   ;;  %v16832_v11 = vld [vmem:[%s25145_s1 + $0x198] ss:$100 sps:$4 sm:$0xff]  }
   0x5   :  { %v16833_v12 = vld [vmem:[%s25145_s1 + $0x25c] ss:$100 sps:$4 sm:$0xff]   ;;  %v16835_v13 = vld [vmem:[%s25145_s1 + $0x264] ss:$100 sps:$4 sm:$0xff]   ;;  %v16841_v17 = vld [vmem:[%s25145_s1 + $0x32c] ss:$100 sps:$4 sm:$0xff]  }
   0x6   :  { %v16837_v14 = vld [vmem:[%s25145_s1 + $0x258] ss:$100 sps:$4 sm:$0xff]   ;;  %v16838_v15 = vld [vmem:[%s25145_s1 + $0x260] ss:$100 sps:$4 sm:$0xff]   ;;  %v16844_v19 = vld [vmem:[%s25145_s1 + $0x328] ss:$100 sps:$4 sm:$0xff]  }
   0x7   :  { %9939 = vmatpush1.bf16.msra.mxu0 %v16825_v6  ;;  %10111 = vmatpush1.bf16.msra.mxu1 %v16826_v7  ;;  %v16839_v16 = vld [vmem:[%s25145_s1 + $0x324] ss:$100 sps:$4 sm:$0xff]   ;;  %v16845_v20 = vld [vmem:[%s25145_s1 + $0x3ec] ss:$100 sps:$4 sm:$0xff]   ;;  %v16847_v21 = vld [vmem:[%s25145_s1 + $0x3f4] ss:$100 sps:$4 sm:$0xff]  }
   0x8   :  { %9940 = vmatprep.subr.bf16.mxu0 %v16827_v8  ;;  %10112 = vmatprep.subr.bf16.mxu1 %v16829_v9  ;;  %v16843_v18 = vld [vmem:[%s25145_s1 + $0x320] ss:$100 sps:$4 sm:$0xff]   ;;  %v16849_v22 = vld [vmem:[%s25145_s1 + $0x3e8] ss:$100 sps:$4 sm:$0xff]   ;;  %v16850_v23 = vld [vmem:[%s25145_s1 + $0x3f0] ss:$100 sps:$4 sm:$0xff]  }
   0x9   :  { %v16851_v24 = vld [vmem:[%s25145_s1 + $0x4b4] ss:$100 sps:$4 sm:$0xff]   ;;  %v16853_v25 = vld [vmem:[%s25145_s1 + $0x4bc] ss:$100 sps:$4 sm:$0xff]   ;;  %v16859_v29 = vld [vmem:[%s25145_s1 + $0x584] ss:$100 sps:$4 sm:$0xff]  }
   0xa   :  { %v16855_v26 = vld [vmem:[%s25145_s1 + $0x4b0] ss:$100 sps:$4 sm:$0xff]   ;;  %v16856_v27 = vld [vmem:[%s25145_s1 + $0x4b8] ss:$100 sps:$4 sm:$0xff]   ;;  %v16862_v31 = vld [vmem:[%s25145_s1 + $0x580] ss:$100 sps:$4 sm:$0xff]  }
   0xb   :  { %9941 = vmatpush1.bf16.msra.mxu0 %v16831_v10  ;;  %10113 = vmatpush1.bf16.msra.mxu1 %v16832_v11  ;;  %v16857_v28 = vld [vmem:[%s25145_s1 + $0x57c] ss:$100 sps:$4 sm:$0xff]   ;;  %v16863_v32 = vld [vmem:[%s25145_s1 + $0x644] ss:$100 sps:$4 sm:$0xff]   ;;  %v16865_v33 = vld [vmem:[%s25145_s1 + $0x64c] ss:$100 sps:$4 sm:$0xff]  }
   0xc   :  { %9942 = vmatprep.subr.bf16.mxu0 %v16833_v12  ;;  %10114 = vmatprep.subr.bf16.mxu1 %v16835_v13  ;;  %v16861_v30 = vld [vmem:[%s25145_s1 + $0x578] ss:$100 sps:$4 sm:$0xff]   ;;  %v16867_v34 = vld [vmem:[%s25145_s1 + $0x640] ss:$100 sps:$4 sm:$0xff]   ;;  %v16868_v35 = vld [vmem:[%s25145_s1 + $0x648] ss:$100 sps:$4 sm:$0xff]  }
   0xd   :  { %v16869_v36 = vld [vmem:[%s25145_s1 + $0x70c] ss:$100 sps:$4 sm:$0xff]   ;;  %v16871_v37 = vld [vmem:[%s25145_s1 + $0x714] ss:$100 sps:$4 sm:$0xff]   ;;  %v16877_v41 = vld [vmem:[%s25145_s1 + $0x7dc] ss:$100 sps:$4 sm:$0xff]  }
   0xe   :  { %v16873_v38 = vld [vmem:[%s25145_s1 + $0x708] ss:$100 sps:$4 sm:$0xff]   ;;  %v16874_v39 = vld [vmem:[%s25145_s1 + $0x710] ss:$100 sps:$4 sm:$0xff]   ;;  %v16880_v43 = vld [vmem:[%s25145_s1 + $0x7d8] ss:$100 sps:$4 sm:$0xff]  }
   0xf   :  { %9943 = vmatpush1.bf16.msra.mxu0 %v16837_v14  ;;  %10115 = vmatpush1.bf16.msra.mxu1 %v16838_v15  ;;  %v16875_v40 = vld [vmem:[%s25145_s1 + $0x7d4] ss:$100 sps:$4 sm:$0xff]   ;;  %v16881_v44 = vld [vmem:[%s25145_s1 + $0x89c] ss:$100 sps:$4 sm:$0xff]   ;;  %v16883_v45 = vld [vmem:[%s25145_s1 + $0x8a4] ss:$100 sps:$4 sm:$0xff]  }
  0x10   :  { %9944 = vmatprep.subr.bf16.mxu0 %v16839_v16  ;;  %10116 = vmatprep.subr.bf16.mxu1 %v16841_v17  ;;  %v16879_v42 = vld [vmem:[%s25145_s1 + $0x7d0] ss:$100 sps:$4 sm:$0xff]   ;;  %v27_v46 = vld [vmem:[%s25146_s0] sm:$0xff]  ;;  %v16885_v48 = vld [vmem:[%s25145_s1 + $0x898] ss:$100 sps:$4 sm:$0xff]  }
  0x11   :  { %v31_v47 = vld [vmem:[%s25146_s0 + $0x20] sm:$0xff]  ;;  %v16889_v52 = vld [vmem:[%s25145_s1 + $0x96c] ss:$100 sps:$4 sm:$0xff]   ;;  %v16895_v56 = vld [vmem:[%s25145_s1 + $0xa34] ss:$100 sps:$4 sm:$0xff]  }
  0x12   :  { %v16886_v49 = vld [vmem:[%s25145_s1 + $0x8a0] ss:$100 sps:$4 sm:$0xff]   ;;  %v19576_v50 = vcombine.high %v27_v46, %v31_v47  ;;  %v16892_v54 = vld [vmem:[%s25145_s1 + $0x968] ss:$100 sps:$4 sm:$0xff]   ;;  %v16898_v58 = vld [vmem:[%s25145_s1 + $0xa30] ss:$100 sps:$4 sm:$0xff]   ;;  %v19634_v5 = vcombine.low %v27_v46, %v31_v47 }
  0x13   :  { %9945 = vmatpush1.bf16.msra.mxu0 %v16843_v18  ;;  %10117 = vmatpush1.bf16.msra.mxu1 %v16844_v19  ;;  %v16887_v51 = vld [vmem:[%s25145_s1 + $0x964] ss:$100 sps:$4 sm:$0xff]   ;;  %v16893_v55 = vld [vmem:[%s25145_s1 + $0xa2c] ss:$100 sps:$4 sm:$0xff]   ;;  %v16899_v59 = vld [vmem:[%s25145_s1 + $0xaf4] ss:$100 sps:$4 sm:$0xff]  }
  0x14   :  { %9946 = vmatprep.subr.bf16.mxu0 %v16845_v20  ;;  %10118 = vmatprep.subr.bf16.mxu1 %v16847_v21  ;;  %v16891_v53 = vld [vmem:[%s25145_s1 + $0x960] ss:$100 sps:$4 sm:$0xff]   ;;  %v16897_v57 = vld [vmem:[%s25145_s1 + $0xa28] ss:$100 sps:$4 sm:$0xff]   ;;  %v16903_v61 = vld [vmem:[%s25145_s1 + $0xaf0] ss:$100 sps:$4 sm:$0xff]  }
  0x15   :  { %9968 = vmatprep.mubr.bf16.mxu0 %v19576_v50  ;;  %10140 = vmatprep.mubr.bf16.mxu1 %v19576_v50  ;;  %v16901_v60 = vld [vmem:[%s25145_s1 + $0xafc] ss:$100 sps:$4 sm:$0xff]   ;;  %v16907_v0 = vld [vmem:[%s25145_s1 + $0xbc4] ss:$100 sps:$4 sm:$0xff]   ;;  %v16916_v4 = vld [vmem:[%s25145_s1 + $0xc8c] ss:$100 sps:$4 sm:$0xff]  }
  0x16   :  { %v16904_v62 = vld [vmem:[%s25145_s1 + $0xaf8] ss:$100 sps:$4 sm:$0xff]   ;;  %v16910_v2 = vld [vmem:[%s25145_s1 + $0xbc0] ss:$100 sps:$4 sm:$0xff]   ;;  %v16914_v7 = vld [vmem:[%s25145_s1 + $0xc88] ss:$100 sps:$4 sm:$0xff]  }
  0x17   :  { %9947 = vmatpush1.bf16.msra.mxu0 %v16849_v22  ;;  %10119 = vmatpush1.bf16.msra.mxu1 %v16850_v23  ;;  %v16905_v63 = vld [vmem:[%s25145_s1 + $0xbbc] ss:$100 sps:$4 sm:$0xff]   ;;  %v16913_v3 = vld [vmem:[%s25145_s1 + $0xc84] ss:$100 sps:$4 sm:$0xff]   ;;  %v16919_v8 = vld [vmem:[%s25145_s1 + $0xd4c] ss:$100 sps:$4 sm:$0xff]  }
  0x18   :  { %9948 = vmatprep.subr.bf16.mxu0 %v16851_v24  ;;  %10120 = vmatprep.subr.bf16.mxu1 %v16853_v25  ;;  %v16909_v1 = vld [vmem:[%s25145_s1 + $0xbb8] ss:$100 sps:$4 sm:$0xff]   ;;  %v16911_v6 = vld [vmem:[%s25145_s1 + $0xc80] ss:$100 sps:$4 sm:$0xff]   ;;  %v16917_v10 = vld [vmem:[%s25145_s1 + $0xd48] ss:$100 sps:$4 sm:$0xff]  }
  0x19   :  { %v16922_v9 = vld [vmem:[%s25145_s1 + $0xd54] ss:$100 sps:$4 sm:$0xff]   ;;  %v16928_v13 = vld [vmem:[%s25145_s1 + $0xe1c] ss:$100 sps:$4 sm:$0xff]   ;;  %v16934_v17 = vld [vmem:[%s25145_s1 + $0xee4] ss:$100 sps:$4 sm:$0xff]  }
  0x1a   :  { %v16920_v11 = vld [vmem:[%s25145_s1 + $0xd50] ss:$100 sps:$4 sm:$0xff]   ;;  %v16926_v15 = vld [vmem:[%s25145_s1 + $0xe18] ss:$100 sps:$4 sm:$0xff]   ;;  %v16932_v19 = vld [vmem:[%s25145_s1 + $0xee0] ss:$100 sps:$4 sm:$0xff]  }
  0x1b   :  { %9949 = vmatpush1.bf16.msra.mxu0 %v16855_v26  ;;  %10121 = vmatpush1.bf16.msra.mxu1 %v16856_v27  ;;  %v16925_v12 = vld [vmem:[%s25145_s1 + $0xe14] ss:$100 sps:$4 sm:$0xff]   ;;  %v16931_v16 = vld [vmem:[%s25145_s1 + $0xedc] ss:$100 sps:$4 sm:$0xff]   ;;  %v16937_v20 = vld [vmem:[%s25145_s1 + $0xfa4] ss:$100 sps:$4 sm:$0xff]  }
  0x1c   :  { %9950 = vmatprep.subr.bf16.mxu0 %v16857_v28  ;;  %10122 = vmatprep.subr.bf16.mxu1 %v16859_v29  ;;  %v16923_v14 = vld [vmem:[%s25145_s1 + $0xe10] ss:$100 sps:$4 sm:$0xff]   ;;  %v16929_v18 = vld [vmem:[%s25145_s1 + $0xed8] ss:$100 sps:$4 sm:$0xff]   ;;  %v16935_v22 = vld [vmem:[%s25145_s1 + $0xfa0] ss:$100 sps:$4 sm:$0xff]  }
  0x1d   :  { %v16940_v21 = vld [vmem:[%s25145_s1 + $0xfac] ss:$100 sps:$4 sm:$0xff]   ;;  %v16946_v25 = vld [vmem:[%s25145_s1 + $0x1074] ss:$100 sps:$4 sm:$0xff]   ;;  %v16952_v29 = vld [vmem:[%s25145_s1 + $0x113c] ss:$100 sps:$4 sm:$0xff]  }
  0x1e   :  { %v16938_v23 = vld [vmem:[%s25145_s1 + $0xfa8] ss:$100 sps:$4 sm:$0xff]   ;;  %v16944_v27 = vld [vmem:[%s25145_s1 + $0x1070] ss:$100 sps:$4 sm:$0xff]  }
  0x1f   :  { %9951 = vmatpush1.bf16.msra.mxu0 %v16861_v30  ;;  %10123 = vmatpush1.bf16.msra.mxu1 %v16862_v31  ;;  %v16943_v24 = vld [vmem:[%s25145_s1 + $0x106c] ss:$100 sps:$4 sm:$0xff]   ;;  %v16949_v28 = vld [vmem:[%s25145_s1 + $0x1134] ss:$100 sps:$4 sm:$0xff]  }
  0x20   :  { %9952 = vmatprep.subr.bf16.mxu0 %v16863_v32  ;;  %10124 = vmatprep.subr.bf16.mxu1 %v16865_v33  ;;  %v16941_v26 = vld [vmem:[%s25145_s1 + $0x1068] ss:$100 sps:$4 sm:$0xff]   ;;  %v16947_v32 = vld [vmem:[%s25145_s1 + $0x1130] ss:$100 sps:$4 sm:$0xff]   ;;  %v16950_v33 = vld [vmem:[%s25145_s1 + $0x1138] ss:$100 sps:$4 sm:$0xff]  }
  0x21   :  { %v19713_v30 = vld [vmem:[%s25146_s0 + $0x8] sm:$0xff]  ;;  %v16968_v46 = vld [vmem:[%s25145_s1 + $0x1390] ss:$100 sps:$4 sm:$0xff]  }
  0x22   :  { %v19718_v31 = vld [vmem:[%s25146_s0 + $0x28] sm:$0xff]  ;;  %v16973_v47 = vld [vmem:[%s25145_s1 + $0x1454] ss:$100 sps:$4 sm:$0xff]  }
  0x23   :  { %9953 = vmatpush1.bf16.msra.mxu0 %v16867_v34  ;;  %10125 = vmatpush1.bf16.msra.mxu1 %v16868_v35  ;;  %v19728_v34 = vcombine.high %v19713_v30, %v19718_v31  ;;  %v16955_v35 = vld [vmem:[%s25145_s1 + $0x11fc] ss:$100 sps:$4 sm:$0xff]  }
  0x24   :  { %9954 = vmatprep.subr.bf16.mxu0 %v16869_v36  ;;  %10126 = vmatprep.subr.bf16.mxu1 %v16871_v37  ;;  %v16958_v36 = vld [vmem:[%s25145_s1 + $0x1204] ss:$100 sps:$4 sm:$0xff]   ;;  %v16953_v37 = vld [vmem:[%s25145_s1 + $0x11f8] ss:$100 sps:$4 sm:$0xff]  }
  0x27   :  { %9955 = vmatpush1.bf16.msra.mxu0 %v16873_v38  ;;  %10127 = vmatpush1.bf16.msra.mxu1 %v16874_v39  ;;  %v16956_v38 = vld [vmem:[%s25145_s1 + $0x1200] ss:$100 sps:$4 sm:$0xff]  }
  0x28   :  { %9956 = vmatprep.subr.bf16.mxu0 %v16875_v40  ;;  %10128 = vmatprep.subr.bf16.mxu1 %v16877_v41  ;;  %v16961_v39 = vld [vmem:[%s25145_s1 + $0x12c4] ss:$100 sps:$4 sm:$0xff]   ;;  %v16964_v40 = vld [vmem:[%s25145_s1 + $0x12cc] ss:$100 sps:$4 sm:$0xff]  }
  0x29   :  { %v16959_v41 = vld [vmem:[%s25145_s1 + $0x12c0] ss:$100 sps:$4 sm:$0xff]  }
  0x2b   :  { %9957 = vmatpush1.bf16.msra.mxu0 %v16879_v42  ;;  %10129 = vmatpush1.bf16.msra.mxu1 %v16880_v43  ;;  %v16962_v42 = vld [vmem:[%s25145_s1 + $0x12c8] ss:$100 sps:$4 sm:$0xff]  }
  0x2c   :  { %9958 = vmatprep.subr.bf16.mxu0 %v16881_v44  ;;  %10130 = vmatprep.subr.bf16.mxu1 %v16883_v45  ;;  %v16967_v43 = vld [vmem:[%s25145_s1 + $0x138c] ss:$100 sps:$4 sm:$0xff]   ;;  %v16970_v44 = vld [vmem:[%s25145_s1 + $0x1394] ss:$100 sps:$4 sm:$0xff]  }
  0x2d   :  { %v16965_v45 = vld [vmem:[%s25145_s1 + $0x1388] ss:$100 sps:$4 sm:$0xff]  }
  0x2f   :  { %9959 = vmatpush1.bf16.msra.mxu0 %v16885_v48  ;;  %10131 = vmatpush1.bf16.msra.mxu1 %v16886_v49  ;;  %v16976_v48 = vld [vmem:[%s25145_s1 + $0x145c] ss:$100 sps:$4 sm:$0xff]   ;;  %v16971_v49 = vld [vmem:[%s25145_s1 + $0x1450] ss:$100 sps:$4 sm:$0xff]  }
  0x30   :  { %9960 = vmatprep.subr.bf16.mxu0 %v16887_v51  ;;  %10132 = vmatprep.subr.bf16.mxu1 %v16889_v52  ;;  %v16974_v51 = vld [vmem:[%s25145_s1 + $0x1458] ss:$100 sps:$4 sm:$0xff]  }
  0x31   :  { %v16979_v52 = vld [vmem:[%s25145_s1 + $0x151c] ss:$100 sps:$4 sm:$0xff]  }
  0x33   :  { %9961 = vmatpush1.bf16.msra.mxu0 %v16891_v53  ;;  %10133 = vmatpush1.bf16.msra.mxu1 %v16892_v54  ;;  %v16982_v53 = vld [vmem:[%s25145_s1 + $0x1524] ss:$100 sps:$4 sm:$0xff]   ;;  %v16977_v54 = vld [vmem:[%s25145_s1 + $0x1518] ss:$100 sps:$4 sm:$0xff]  }
  0x34   :  { %9962 = vmatprep.subr.bf16.mxu0 %v16893_v55  ;;  %10134 = vmatprep.subr.bf16.mxu1 %v16895_v56  ;;  %v16980_v55 = vld [vmem:[%s25145_s1 + $0x1520] ss:$100 sps:$4 sm:$0xff]  }
  0x35   :  { %v16985_v56 = vld [vmem:[%s25145_s1 + $0x15e4] ss:$100 sps:$4 sm:$0xff]  }
  0x37   :  { %9963 = vmatpush1.bf16.msra.mxu0 %v16897_v57  ;;  %10135 = vmatpush1.bf16.msra.mxu1 %v16898_v58  ;;  %v16988_v57 = vld [vmem:[%s25145_s1 + $0x15ec] ss:$100 sps:$4 sm:$0xff]   ;;  %v16983_v58 = vld [vmem:[%s25145_s1 + $0x15e0] ss:$100 sps:$4 sm:$0xff]  }
  0x38   :  { %9964 = vmatprep.subr.bf16.mxu0 %v16899_v59  ;;  %10136 = vmatprep.subr.bf16.mxu1 %v16901_v60  ;;  %v16986_v59 = vld [vmem:[%s25145_s1 + $0x15e8] ss:$100 sps:$4 sm:$0xff]  }
  0x39   :  { %v16991_v60 = vld [vmem:[%s25145_s1 + $0x16ac] ss:$100 sps:$4 sm:$0xff]  }
  0x3b   :  { %9965 = vmatpush1.bf16.msra.mxu0 %v16903_v61  ;;  %10137 = vmatpush1.bf16.msra.mxu1 %v16904_v62  ;;  %v16994_v61 = vld [vmem:[%s25145_s1 + $0x16b4] ss:$100 sps:$4 sm:$0xff]   ;;  %v16989_v62 = vld [vmem:[%s25145_s1 + $0x16a8] ss:$100 sps:$4 sm:$0xff]  }
  0x3c   :  { %9966 = vmatprep.subr.bf16.mxu0 %v16905_v63  ;;  %10138 = vmatprep.subr.bf16.mxu1 %v16907_v0  ;;  %v16992_v63 = vld [vmem:[%s25145_s1 + $0x16b0] ss:$100 sps:$4 sm:$0xff]  }
  0x3d   :  { %v16997_v0 = vld [vmem:[%s25145_s1 + $0x1774] ss:$100 sps:$4 sm:$0xff]  }
  0x3f   :  { %9967 = vmatpush1.bf16.msra.mxu0 %v16909_v1  ;;  %10139 = vmatpush1.bf16.msra.mxu1 %v16910_v2  ;;  %v17000_v1 = vld [vmem:[%s25145_s1 + $0x177c] ss:$100 sps:$4 sm:$0xff]   ;;  %v16995_v2 = vld [vmem:[%s25145_s1 + $0x1770] ss:$100 sps:$4 sm:$0xff]  }
  0x40   :  { %9979 = vmatprep.subr.bf16.mxu0 %v16913_v3  ;;  %10151 = vmatprep.subr.bf16.mxu1 %v16916_v4  ;;  %v16998_v3 = vld [vmem:[%s25145_s1 + $0x1778] ss:$100 sps:$4 sm:$0xff]  }
  0x41   :  { %v17003_v4 = vld [vmem:[%s25145_s1 + $0x183c] ss:$100 sps:$4 sm:$0xff]  }
  0x42   :  { %9969 = vmatmul.mubr.bf16.vlgmr.msra.gmra.mrb[0].mxu0 %v19634_v5  ;;  %10141 = vmatmul.mubr.bf16.vlgmr.msra.gmra.mrb[0].mxu1 %v19634_v5 }
  0x43   :  { %9980 = vmatpush1.bf16.msra.mxu0 %v16911_v6  ;;  %10152 = vmatpush1.bf16.msra.mxu1 %v16914_v7  ;;  %v17006_v6 = vld [vmem:[%s25145_s1 + $0x1844] ss:$100 sps:$4 sm:$0xff]   ;;  %v17001_v7 = vld [vmem:[%s25145_s1 + $0x1838] ss:$100 sps:$4 sm:$0xff]  }
  0x44   :  { %9981 = vmatprep.subr.bf16.mxu0 %v16919_v8  ;;  %10153 = vmatprep.subr.bf16.mxu1 %v16922_v9  ;;  %v17004_v8 = vld [vmem:[%s25145_s1 + $0x1840] ss:$100 sps:$4 sm:$0xff]  }
  0x45   :  { %10011 = vmatprep.mubr.bf16.mxu0 %v19728_v34  ;;  %10183 = vmatprep.mubr.bf16.mxu1 %v19728_v34  ;;  %v17009_v9 = vld [vmem:[%s25145_s1 + $0x1904] ss:$100 sps:$4 sm:$0xff]  }
  0x47   :  { %9982 = vmatpush1.bf16.msra.mxu0 %v16917_v10  ;;  %10154 = vmatpush1.bf16.msra.mxu1 %v16920_v11  ;;  %v17012_v10 = vld [vmem:[%s25145_s1 + $0x190c] ss:$100 sps:$4 sm:$0xff]   ;;  %v17007_v11 = vld [vmem:[%s25145_s1 + $0x1900] ss:$100 sps:$4 sm:$0xff]  }
  0x48   :  { %9983 = vmatprep.subr.bf16.mxu0 %v16925_v12  ;;  %10155 = vmatprep.subr.bf16.mxu1 %v16928_v13  ;;  %v17010_v12 = vld [vmem:[%s25145_s1 + $0x1908] ss:$100 sps:$4 sm:$0xff]   ;;  %v19854_v13 = vcombine.low %v19713_v30, %v19718_v31  ;;  %v17031_v31 = vld [vmem:[%s25145_s1 + $0x1c20] ss:$100 sps:$4 sm:$0xff]  }
  0x49   :  { %v17036_v30 = vld [vmem:[%s25145_s1 + $0x1c2c] ss:$100 sps:$4 sm:$0xff]  }
  0x4b   :  { %9984 = vmatpush1.bf16.msra.mxu0 %v16923_v14  ;;  %10156 = vmatpush1.bf16.msra.mxu1 %v16926_v15  ;;  %v17015_v14 = vld [vmem:[%s25145_s1 + $0x19cc] ss:$100 sps:$4 sm:$0xff]   ;;  %v17018_v15 = vld [vmem:[%s25145_s1 + $0x19d4] ss:$100 sps:$4 sm:$0xff]  }
  0x4c   :  { %9985 = vmatprep.subr.bf16.mxu0 %v16931_v16  ;;  %10157 = vmatprep.subr.bf16.mxu1 %v16934_v17  ;;  %v19865_v16 = vld [vmem:[%s25146_s0 + $0x10] sm:$0xff] }
  0x4d   :  { %v19870_v17 = vld [vmem:[%s25146_s0 + $0x30] sm:$0xff] }
  0x4f   :  { %9986 = vmatpush1.bf16.msra.mxu0 %v16929_v18  ;;  %10158 = vmatpush1.bf16.msra.mxu1 %v16932_v19  ;;  %v19874_v18 = vcombine.high %v19865_v16, %v19870_v17  ;;  %v17013_v19 = vld [vmem:[%s25145_s1 + $0x19c8] ss:$100 sps:$4 sm:$0xff]  }
  0x50   :  { %9987 = vmatprep.subr.bf16.mxu0 %v16937_v20  ;;  %10159 = vmatprep.subr.bf16.mxu1 %v16940_v21  ;;  %v17016_v20 = vld [vmem:[%s25145_s1 + $0x19d0] ss:$100 sps:$4 sm:$0xff]  }
  0x51   :  { %v17021_v21 = vld [vmem:[%s25145_s1 + $0x1a94] ss:$100 sps:$4 sm:$0xff]  }
  0x53   :  { %9988 = vmatpush1.bf16.msra.mxu0 %v16935_v22  ;;  %10160 = vmatpush1.bf16.msra.mxu1 %v16938_v23  ;;  %v17024_v22 = vld [vmem:[%s25145_s1 + $0x1a9c] ss:$100 sps:$4 sm:$0xff]   ;;  %v17019_v23 = vld [vmem:[%s25145_s1 + $0x1a90] ss:$100 sps:$4 sm:$0xff]  }
  0x54   :  { %9989 = vmatprep.subr.bf16.mxu0 %v16943_v24  ;;  %10161 = vmatprep.subr.bf16.mxu1 %v16946_v25  ;;  %v17022_v24 = vld [vmem:[%s25145_s1 + $0x1a98] ss:$100 sps:$4 sm:$0xff]  }
  0x55   :  { %v17027_v25 = vld [vmem:[%s25145_s1 + $0x1b5c] ss:$100 sps:$4 sm:$0xff]  }
  0x57   :  { %9990 = vmatpush1.bf16.msra.mxu0 %v16941_v26  ;;  %10162 = vmatpush1.bf16.msra.mxu1 %v16944_v27  ;;  %v17030_v26 = vld [vmem:[%s25145_s1 + $0x1b64] ss:$100 sps:$4 sm:$0xff]   ;;  %v17025_v27 = vld [vmem:[%s25145_s1 + $0x1b58] ss:$100 sps:$4 sm:$0xff]  }
  0x58   :  { %9991 = vmatprep.subr.bf16.mxu0 %v16949_v28  ;;  %10163 = vmatprep.subr.bf16.mxu1 %v16952_v29  ;;  %v17028_v28 = vld [vmem:[%s25145_s1 + $0x1b60] ss:$100 sps:$4 sm:$0xff]  }
  0x59   :  { %v17033_v29 = vld [vmem:[%s25145_s1 + $0x1c24] ss:$100 sps:$4 sm:$0xff]  }
  0x5b   :  { %9992 = vmatpush1.bf16.msra.mxu0 %v16947_v32  ;;  %10164 = vmatpush1.bf16.msra.mxu1 %v16950_v33  ;;  %v17034_v32 = vld [vmem:[%s25145_s1 + $0x1c28] ss:$100 sps:$4 sm:$0xff]  }
  0x5c   :  { %9993 = vmatprep.subr.bf16.mxu0 %v16955_v35  ;;  %10165 = vmatprep.subr.bf16.mxu1 %v16958_v36  ;;  %v17039_v33 = vld [vmem:[%s25145_s1 + $0x1cec] ss:$100 sps:$4 sm:$0xff]   ;;  %v17042_v35 = vld [vmem:[%s25145_s1 + $0x1cf4] ss:$100 sps:$4 sm:$0xff]  }
  0x5d   :  { %v17037_v36 = vld [vmem:[%s25145_s1 + $0x1ce8] ss:$100 sps:$4 sm:$0xff]  }
  0x5f   :  { %9994 = vmatpush1.bf16.msra.mxu0 %v16953_v37  ;;  %10166 = vmatpush1.bf16.msra.mxu1 %v16956_v38  ;;  %v17040_v37 = vld [vmem:[%s25145_s1 + $0x1cf0] ss:$100 sps:$4 sm:$0xff]  }
  0x60   :  { %9995 = vmatprep.subr.bf16.mxu0 %v16961_v39  ;;  %10167 = vmatprep.subr.bf16.mxu1 %v16964_v40  ;;  %v17045_v38 = vld [vmem:[%s25145_s1 + $0x1db4] ss:$100 sps:$4 sm:$0xff]   ;;  %v17048_v39 = vld [vmem:[%s25145_s1 + $0x1dbc] ss:$100 sps:$4 sm:$0xff]  }
  0x61   :  { %v17043_v40 = vld [vmem:[%s25145_s1 + $0x1db0] ss:$100 sps:$4 sm:$0xff]  }
  0x63   :  { %9996 = vmatpush1.bf16.msra.mxu0 %v16959_v41  ;;  %10168 = vmatpush1.bf16.msra.mxu1 %v16962_v42  ;;  %v17046_v41 = vld [vmem:[%s25145_s1 + $0x1db8] ss:$100 sps:$4 sm:$0xff]  }
  0x64   :  { %9997 = vmatprep.subr.bf16.mxu0 %v16967_v43  ;;  %10169 = vmatprep.subr.bf16.mxu1 %v16970_v44  ;;  %v17051_v42 = vld [vmem:[%s25145_s1 + $0x1e7c] ss:$100 sps:$4 sm:$0xff]   ;;  %v17054_v43 = vld [vmem:[%s25145_s1 + $0x1e84] ss:$100 sps:$4 sm:$0xff]  }
  0x65   :  { %v17049_v44 = vld [vmem:[%s25145_s1 + $0x1e78] ss:$100 sps:$4 sm:$0xff]  }
  0x67   :  { %9998 = vmatpush1.bf16.msra.mxu0 %v16965_v45  ;;  %10170 = vmatpush1.bf16.msra.mxu1 %v16968_v46  ;;  %v17052_v45 = vld [vmem:[%s25145_s1 + $0x1e80] ss:$100 sps:$4 sm:$0xff]  }
  0x68   :  { %9999 = vmatprep.subr.bf16.mxu0 %v16973_v47  ;;  %10171 = vmatprep.subr.bf16.mxu1 %v16976_v48  ;;  %v17057_v46 = vld [vmem:[%s25145_s1 + $0x1f44] ss:$100 sps:$4 sm:$0xff]   ;;  %v17060_v47 = vld [vmem:[%s25145_s1 + $0x1f4c] ss:$100 sps:$4 sm:$0xff]  }
  0x69   :  { %v17055_v48 = vld [vmem:[%s25145_s1 + $0x1f40] ss:$100 sps:$4 sm:$0xff]  }
  0x6b   :  { %10000 = vmatpush1.bf16.msra.mxu0 %v16971_v49  ;;  %10172 = vmatpush1.bf16.msra.mxu1 %v16974_v51  ;;  %v17058_v49 = vld [vmem:[%s25145_s1 + $0x1f48] ss:$100 sps:$4 sm:$0xff]  }
  0x6c   :  { %10001 = vmatprep.subr.bf16.mxu0 %v16979_v52  ;;  %10173 = vmatprep.subr.bf16.mxu1 %v16982_v53  ;;  %v17063_v51 = vld [vmem:[%s25145_s1 + $0x200c] ss:$100 sps:$4 sm:$0xff]   ;;  %v17066_v52 = vld [vmem:[%s25145_s1 + $0x2014] ss:$100 sps:$4 sm:$0xff]  }
  0x6d   :  { %v17061_v53 = vld [vmem:[%s25145_s1 + $0x2008] ss:$100 sps:$4 sm:$0xff]  }
  0x6f   :  { %10002 = vmatpush1.bf16.msra.mxu0 %v16977_v54  ;;  %10174 = vmatpush1.bf16.msra.mxu1 %v16980_v55  ;;  %v17064_v54 = vld [vmem:[%s25145_s1 + $0x2010] ss:$100 sps:$4 sm:$0xff]  }
  0x70   :  { %10003 = vmatprep.subr.bf16.mxu0 %v16985_v56  ;;  %10175 = vmatprep.subr.bf16.mxu1 %v16988_v57  ;;  %v17069_v55 = vld [vmem:[%s25145_s1 + $0x20d4] ss:$100 sps:$4 sm:$0xff]   ;;  %v17072_v56 = vld [vmem:[%s25145_s1 + $0x20dc] ss:$100 sps:$4 sm:$0xff]  }
  0x71   :  { %v17067_v57 = vld [vmem:[%s25145_s1 + $0x20d0] ss:$100 sps:$4 sm:$0xff]  }
  0x73   :  { %10004 = vmatpush1.bf16.msra.mxu0 %v16983_v58  ;;  %10176 = vmatpush1.bf16.msra.mxu1 %v16986_v59  ;;  %v17070_v58 = vld [vmem:[%s25145_s1 + $0x20d8] ss:$100 sps:$4 sm:$0xff]  }
  0x74   :  { %10005 = vmatprep.subr.bf16.mxu0 %v16991_v60  ;;  %10177 = vmatprep.subr.bf16.mxu1 %v16994_v61  ;;  %v17075_v59 = vld [vmem:[%s25145_s1 + $0x219c] ss:$100 sps:$4 sm:$0xff]   ;;  %v17078_v60 = vld [vmem:[%s25145_s1 + $0x21a4] ss:$100 sps:$4 sm:$0xff]  }
  0x75   :  { %v17073_v61 = vld [vmem:[%s25145_s1 + $0x2198] ss:$100 sps:$4 sm:$0xff]  }
  0x77   :  { %10006 = vmatpush1.bf16.msra.mxu0 %v16989_v62  ;;  %10178 = vmatpush1.bf16.msra.mxu1 %v16992_v63  ;;  %v17076_v62 = vld [vmem:[%s25145_s1 + $0x21a0] ss:$100 sps:$4 sm:$0xff]  }
  0x78   :  { %10007 = vmatprep.subr.bf16.mxu0 %v16997_v0  ;;  %10179 = vmatprep.subr.bf16.mxu1 %v17000_v1  ;;  %v17081_v63 = vld [vmem:[%s25145_s1 + $0x2264] ss:$100 sps:$4 sm:$0xff]   ;;  %v17084_v0 = vld [vmem:[%s25145_s1 + $0x226c] ss:$100 sps:$4 sm:$0xff]  }
  0x79   :  { %v17079_v1 = vld [vmem:[%s25145_s1 + $0x2260] ss:$100 sps:$4 sm:$0xff]  }
  0x7b   :  { %10008 = vmatpush1.bf16.msra.mxu0 %v16995_v2  ;;  %10180 = vmatpush1.bf16.msra.mxu1 %v16998_v3  ;;  %v17082_v2 = vld [vmem:[%s25145_s1 + $0x2268] ss:$100 sps:$4 sm:$0xff]  }
  0x7c   :  { %10009 = vmatprep.subr.bf16.mxu0 %v17003_v4  ;;  %10181 = vmatprep.subr.bf16.mxu1 %v17006_v6  ;;  %v17087_v3 = vld [vmem:[%s25145_s1 + $0x232c] ss:$100 sps:$4 sm:$0xff]   ;;  %v17090_v4 = vld [vmem:[%s25145_s1 + $0x2334] ss:$100 sps:$4 sm:$0xff]  }
  0x7d   :  { %v17085_v6 = vld [vmem:[%s25145_s1 + $0x2328] ss:$100 sps:$4 sm:$0xff]  }
  0x7f   :  { %10010 = vmatpush1.bf16.msra.mxu0 %v17001_v7  ;;  %10182 = vmatpush1.bf16.msra.mxu1 %v17004_v8  ;;  %v17088_v7 = vld [vmem:[%s25145_s1 + $0x2330] ss:$100 sps:$4 sm:$0xff]  }
  0x80   :  { %10022 = vmatprep.subr.bf16.mxu0 %v17009_v9  ;;  %10194 = vmatprep.subr.bf16.mxu1 %v17012_v10  ;;  %v17093_v8 = vld [vmem:[%s25145_s1 + $0x23f4] ss:$100 sps:$4 sm:$0xff]   ;;  %v17096_v9 = vld [vmem:[%s25145_s1 + $0x23fc] ss:$100 sps:$4 sm:$0xff]  }
  0x81   :  { %v17091_v10 = vld [vmem:[%s25145_s1 + $0x23f0] ss:$100 sps:$4 sm:$0xff]  }
  0x82   :  { %10012 = vmatmul.mubr.bf16.vlgmr.msra.gmra.mrb[0].mxu0 %v19854_v13  ;;  %10184 = vmatmul.mubr.bf16.vlgmr.msra.gmra.mrb[0].mxu1 %v19854_v13 }
  0x83   :  { %10023 = vmatpush1.bf16.msra.mxu0 %v17007_v11  ;;  %10195 = vmatpush1.bf16.msra.mxu1 %v17010_v12  ;;  %v17094_v11 = vld [vmem:[%s25145_s1 + $0x23f8] ss:$100 sps:$4 sm:$0xff]  }
  0x84   :  { %10024 = vmatprep.subr.bf16.mxu0 %v17015_v14  ;;  %10196 = vmatprep.subr.bf16.mxu1 %v17018_v15  ;;  %v17099_v12 = vld [vmem:[%s25145_s1 + $0x24bc] ss:$100 sps:$4 sm:$0xff]   ;;  %v17102_v14 = vld [vmem:[%s25145_s1 + $0x24c4] ss:$100 sps:$4 sm:$0xff]  }
  0x85   :  { %10054 = vmatprep.mubr.bf16.mxu0 %v19874_v18  ;;  %10226 = vmatprep.mubr.bf16.mxu1 %v19874_v18  ;;  %v17097_v15 = vld [vmem:[%s25145_s1 + $0x24b8] ss:$100 sps:$4 sm:$0xff]  }
  0x87   :  { %10025 = vmatpush1.bf16.msra.mxu0 %v17013_v19  ;;  %10197 = vmatpush1.bf16.msra.mxu1 %v17016_v20  ;;  %v17100_v19 = vld [vmem:[%s25145_s1 + $0x24c0] ss:$100 sps:$4 sm:$0xff]  }
  0x88   :  { %10026 = vmatprep.subr.bf16.mxu0 %v17021_v21  ;;  %10198 = vmatprep.subr.bf16.mxu1 %v17024_v22  ;;  %v17105_v20 = vld [vmem:[%s25145_s1 + $0x2584] ss:$100 sps:$4 sm:$0xff]   ;;  %v17108_v21 = vld [vmem:[%s25145_s1 + $0x258c] ss:$100 sps:$4 sm:$0xff]  }
  0x89   :  { %v17103_v22 = vld [vmem:[%s25145_s1 + $0x2580] ss:$100 sps:$4 sm:$0xff]  }
  0x8b   :  { %10027 = vmatpush1.bf16.msra.mxu0 %v17019_v23  ;;  %10199 = vmatpush1.bf16.msra.mxu1 %v17022_v24  ;;  %v17106_v23 = vld [vmem:[%s25145_s1 + $0x2588] ss:$100 sps:$4 sm:$0xff]   ;;  %v20068_v24 = vcombine.low %v19865_v16, %v19870_v17  ;;  %v17114_v16 = vld [vmem:[%s25145_s1 + $0x2654] ss:$100 sps:$4 sm:$0xff]  }
  0x8c   :  { %10028 = vmatprep.subr.bf16.mxu0 %v17027_v25  ;;  %10200 = vmatprep.subr.bf16.mxu1 %v17030_v26  ;;  %v20073_v25 = vld [vmem:[%s25146_s0 + $0x18] sm:$0xff] }
  0x8d   :  { %v20078_v26 = vld [vmem:[%s25146_s0 + $0x38] sm:$0xff] }
  0x8e   :  { %v20088_v17 = vcombine.high %v20073_v25, %v20078_v26 }
  0x8f   :  { %10029 = vmatpush1.bf16.msra.mxu0 %v17025_v27  ;;  %10201 = vmatpush1.bf16.msra.mxu1 %v17028_v28  ;;  %v17111_v27 = vld [vmem:[%s25145_s1 + $0x264c] ss:$100 sps:$4 sm:$0xff]  }
  0x90   :  { %10030 = vmatprep.subr.bf16.mxu0 %v17033_v29  ;;  %10202 = vmatprep.subr.bf16.mxu1 %v17036_v30  ;;  %v17109_v28 = vld [vmem:[%s25145_s1 + $0x2648] ss:$100 sps:$4 sm:$0xff]   ;;  %v17112_v29 = vld [vmem:[%s25145_s1 + $0x2650] ss:$100 sps:$4 sm:$0xff]  }
  0x91   :  { %v17117_v30 = vld [vmem:[%s25145_s1 + $0x2714] ss:$100 sps:$4 sm:$0xff]  }
  0x93   :  { %10031 = vmatpush1.bf16.msra.mxu0 %v17031_v31  ;;  %10203 = vmatpush1.bf16.msra.mxu1 %v17034_v32  ;;  %v17120_v31 = vld [vmem:[%s25145_s1 + $0x271c] ss:$100 sps:$4 sm:$0xff]   ;;  %v17115_v32 = vld [vmem:[%s25145_s1 + $0x2710] ss:$100 sps:$4 sm:$0xff]  }
  0x94   :  { %10032 = vmatprep.subr.bf16.mxu0 %v17039_v33  ;;  %10204 = vmatprep.subr.bf16.mxu1 %v17042_v35  ;;  %v17118_v33 = vld [vmem:[%s25145_s1 + $0x2718] ss:$100 sps:$4 sm:$0xff]  }
  0x95   :  { %v17123_v35 = vld [vmem:[%s25145_s1 + $0x27dc] ss:$100 sps:$4 sm:$0xff]  }
  0x97   :  { %10033 = vmatpush1.bf16.msra.mxu0 %v17037_v36  ;;  %10205 = vmatpush1.bf16.msra.mxu1 %v17040_v37  ;;  %v17126_v36 = vld [vmem:[%s25145_s1 + $0x27e4] ss:$100 sps:$4 sm:$0xff]   ;;  %v17121_v37 = vld [vmem:[%s25145_s1 + $0x27d8] ss:$100 sps:$4 sm:$0xff]  }
  0x98   :  { %10034 = vmatprep.subr.bf16.mxu0 %v17045_v38  ;;  %10206 = vmatprep.subr.bf16.mxu1 %v17048_v39  ;;  %v17124_v38 = vld [vmem:[%s25145_s1 + $0x27e0] ss:$100 sps:$4 sm:$0xff]  }
  0x99   :  { %v17129_v39 = vld [vmem:[%s25145_s1 + $0x28a4] ss:$100 sps:$4 sm:$0xff]  }
  0x9b   :  { %10035 = vmatpush1.bf16.msra.mxu0 %v17043_v40  ;;  %10207 = vmatpush1.bf16.msra.mxu1 %v17046_v41  ;;  %v17132_v40 = vld [vmem:[%s25145_s1 + $0x28ac] ss:$100 sps:$4 sm:$0xff]   ;;  %v17127_v41 = vld [vmem:[%s25145_s1 + $0x28a0] ss:$100 sps:$4 sm:$0xff]  }
  0x9c   :  { %10036 = vmatprep.subr.bf16.mxu0 %v17051_v42  ;;  %10208 = vmatprep.subr.bf16.mxu1 %v17054_v43  ;;  %v17130_v42 = vld [vmem:[%s25145_s1 + $0x28a8] ss:$100 sps:$4 sm:$0xff]  }
  0x9d   :  { %v17135_v43 = vld [vmem:[%s25145_s1 + $0x296c] ss:$100 sps:$4 sm:$0xff]  }
  0x9f   :  { %10037 = vmatpush1.bf16.msra.mxu0 %v17049_v44  ;;  %10209 = vmatpush1.bf16.msra.mxu1 %v17052_v45  ;;  %v17138_v44 = vld [vmem:[%s25145_s1 + $0x2974] ss:$100 sps:$4 sm:$0xff]   ;;  %v17133_v45 = vld [vmem:[%s25145_s1 + $0x2968] ss:$100 sps:$4 sm:$0xff]  }
  0xa0   :  { %10038 = vmatprep.subr.bf16.mxu0 %v17057_v46  ;;  %10210 = vmatprep.subr.bf16.mxu1 %v17060_v47  ;;  %v17136_v46 = vld [vmem:[%s25145_s1 + $0x2970] ss:$100 sps:$4 sm:$0xff]  }
  0xa1   :  { %v17141_v47 = vld [vmem:[%s25145_s1 + $0x2a34] ss:$100 sps:$4 sm:$0xff]  }
  0xa3   :  { %10039 = vmatpush1.bf16.msra.mxu0 %v17055_v48  ;;  %10211 = vmatpush1.bf16.msra.mxu1 %v17058_v49  ;;  %v17144_v48 = vld [vmem:[%s25145_s1 + $0x2a3c] ss:$100 sps:$4 sm:$0xff]   ;;  %v17139_v49 = vld [vmem:[%s25145_s1 + $0x2a30] ss:$100 sps:$4 sm:$0xff]  }
  0xa4   :  { %10040 = vmatprep.subr.bf16.mxu0 %v17063_v51  ;;  %10212 = vmatprep.subr.bf16.mxu1 %v17066_v52  ;;  %v17142_v51 = vld [vmem:[%s25145_s1 + $0x2a38] ss:$100 sps:$4 sm:$0xff]  }
  0xa5   :  { %v17147_v52 = vld [vmem:[%s25145_s1 + $0x2afc] ss:$100 sps:$4 sm:$0xff]  }
  0xa7   :  { %10041 = vmatpush1.bf16.msra.mxu0 %v17061_v53  ;;  %10213 = vmatpush1.bf16.msra.mxu1 %v17064_v54  ;;  %v17150_v53 = vld [vmem:[%s25145_s1 + $0x2b04] ss:$100 sps:$4 sm:$0xff]   ;;  %v17145_v54 = vld [vmem:[%s25145_s1 + $0x2af8] ss:$100 sps:$4 sm:$0xff]  }
  0xa8   :  { %10042 = vmatprep.subr.bf16.mxu0 %v17069_v55  ;;  %10214 = vmatprep.subr.bf16.mxu1 %v17072_v56  ;;  %v17148_v55 = vld [vmem:[%s25145_s1 + $0x2b00] ss:$100 sps:$4 sm:$0xff]  }
  0xa9   :  { %v17153_v56 = vld [vmem:[%s25145_s1 + $0x2bc4] ss:$100 sps:$4 sm:$0xff]  }
  0xab   :  { %10043 = vmatpush1.bf16.msra.mxu0 %v17067_v57  ;;  %10215 = vmatpush1.bf16.msra.mxu1 %v17070_v58  ;;  %v17156_v57 = vld [vmem:[%s25145_s1 + $0x2bcc] ss:$100 sps:$4 sm:$0xff]   ;;  %v17151_v58 = vld [vmem:[%s25145_s1 + $0x2bc0] ss:$100 sps:$4 sm:$0xff]  }
  0xac   :  { %10044 = vmatprep.subr.bf16.mxu0 %v17075_v59  ;;  %10216 = vmatprep.subr.bf16.mxu1 %v17078_v60  ;;  %v17154_v59 = vld [vmem:[%s25145_s1 + $0x2bc8] ss:$100 sps:$4 sm:$0xff]  }
  0xad   :  { %v17159_v60 = vld [vmem:[%s25145_s1 + $0x2c8c] ss:$100 sps:$4 sm:$0xff]  }
  0xaf   :  { %10045 = vmatpush1.bf16.msra.mxu0 %v17073_v61  ;;  %10217 = vmatpush1.bf16.msra.mxu1 %v17076_v62  ;;  %v17162_v61 = vld [vmem:[%s25145_s1 + $0x2c94] ss:$100 sps:$4 sm:$0xff]   ;;  %v17157_v62 = vld [vmem:[%s25145_s1 + $0x2c88] ss:$100 sps:$4 sm:$0xff]  }
  0xb0   :  { %10046 = vmatprep.subr.bf16.mxu0 %v17081_v63  ;;  %10218 = vmatprep.subr.bf16.mxu1 %v17084_v0  ;;  %v17160_v63 = vld [vmem:[%s25145_s1 + $0x2c90] ss:$100 sps:$4 sm:$0xff]  }
  0xb1   :  { %v17165_v0 = vld [vmem:[%s25145_s1 + $0x2d54] ss:$100 sps:$4 sm:$0xff]  }
  0xb3   :  { %10047 = vmatpush1.bf16.msra.mxu0 %v17079_v1  ;;  %10219 = vmatpush1.bf16.msra.mxu1 %v17082_v2  ;;  %v17168_v1 = vld [vmem:[%s25145_s1 + $0x2d5c] ss:$100 sps:$4 sm:$0xff]   ;;  %v17163_v2 = vld [vmem:[%s25145_s1 + $0x2d50] ss:$100 sps:$4 sm:$0xff]  }
  0xb4   :  { %10048 = vmatprep.subr.bf16.mxu0 %v17087_v3  ;;  %10220 = vmatprep.subr.bf16.mxu1 %v17090_v4  ;;  %v17166_v3 = vld [vmem:[%s25145_s1 + $0x2d58] ss:$100 sps:$4 sm:$0xff]  }
  0xb5   :  { %v17171_v4 = vld [vmem:[%s25145_s1 + $0x2e1c] ss:$100 sps:$4 sm:$0xff]  }
  0xb7   :  { %10049 = vmatpush1.bf16.msra.mxu0 %v17085_v6  ;;  %10221 = vmatpush1.bf16.msra.mxu1 %v17088_v7  ;;  %v17174_v6 = vld [vmem:[%s25145_s1 + $0x2e24] ss:$100 sps:$4 sm:$0xff]   ;;  %v17169_v7 = vld [vmem:[%s25145_s1 + $0x2e18] ss:$100 sps:$4 sm:$0xff]  }
  0xb8   :  { %10050 = vmatprep.subr.bf16.mxu0 %v17093_v8  ;;  %10222 = vmatprep.subr.bf16.mxu1 %v17096_v9  ;;  %v17172_v8 = vld [vmem:[%s25145_s1 + $0x2e20] ss:$100 sps:$4 sm:$0xff]  }
  0xb9   :  { %v17177_v9 = vld [vmem:[%s25145_s1 + $0x2ee4] ss:$100 sps:$4 sm:$0xff]  }
  0xbb   :  { %10051 = vmatpush1.bf16.msra.mxu0 %v17091_v10  ;;  %10223 = vmatpush1.bf16.msra.mxu1 %v17094_v11  ;;  %v17180_v10 = vld [vmem:[%s25145_s1 + $0x2eec] ss:$100 sps:$4 sm:$0xff]   ;;  %v17175_v11 = vld [vmem:[%s25145_s1 + $0x2ee0] ss:$100 sps:$4 sm:$0xff]  }
  0xbc   :  { %10052 = vmatprep.subr.bf16.mxu0 %v17099_v12  ;;  %10224 = vmatprep.subr.bf16.mxu1 %v17102_v14  ;;  %v17178_v12 = vld [vmem:[%s25145_s1 + $0x2ee8] ss:$100 sps:$4 sm:$0xff]  }
  0xbd   :  { %v17183_v14 = vld [vmem:[%s25145_s1 + $0x2fac] ss:$100 sps:$4 sm:$0xff]  }
  0xbf   :  { %10053 = vmatpush1.bf16.msra.mxu0 %v17097_v15  ;;  %10225 = vmatpush1.bf16.msra.mxu1 %v17100_v19  ;;  %v17186_v15 = vld [vmem:[%s25145_s1 + $0x2fb4] ss:$100 sps:$4 sm:$0xff]   ;;  %v17181_v19 = vld [vmem:[%s25145_s1 + $0x2fa8] ss:$100 sps:$4 sm:$0xff]  }
  0xc0   :  { %10065 = vmatprep.subr.bf16.mxu0 %v17105_v20  ;;  %10237 = vmatprep.subr.bf16.mxu1 %v17108_v21  ;;  %v17184_v20 = vld [vmem:[%s25145_s1 + $0x2fb0] ss:$100 sps:$4 sm:$0xff]  }
  0xc1   :  { %v17189_v21 = vld [vmem:[%s25145_s1 + $0x3074] ss:$100 sps:$4 sm:$0xff]  }
  0xc2   :  { %10055 = vmatmul.mubr.bf16.vlgmr.msra.gmra.mrb[0].mxu0 %v20068_v24  ;;  %10227 = vmatmul.mubr.bf16.vlgmr.msra.gmra.mrb[0].mxu1 %v20068_v24 }
  0xc3   :  { %10066 = vmatpush1.bf16.msra.mxu0 %v17103_v22  ;;  %10238 = vmatpush1.bf16.msra.mxu1 %v17106_v23  ;;  %v17192_v22 = vld [vmem:[%s25145_s1 + $0x307c] ss:$100 sps:$4 sm:$0xff]   ;;  %v17187_v23 = vld [vmem:[%s25145_s1 + $0x3070] ss:$100 sps:$4 sm:$0xff]  }
  0xc4   :  { %10067 = vmatprep.subr.bf16.mxu0 %v17111_v27  ;;  %10239 = vmatprep.subr.bf16.mxu1 %v17114_v16  ;;  %v17190_v27 = vld [vmem:[%s25145_s1 + $0x3078] ss:$100 sps:$4 sm:$0xff]  }
  0xc5   :  { %10097 = vmatprep.mubr.bf16.mxu0 %v20088_v17  ;;  %10269 = vmatprep.mubr.bf16.mxu1 %v20088_v17  ;;  %v17195_v16 = vld [vmem:[%s25145_s1 + $0x313c] ss:$100 sps:$4 sm:$0xff]  }
  0xc7   :  { %10068 = vmatpush1.bf16.msra.mxu0 %v17109_v28  ;;  %10240 = vmatpush1.bf16.msra.mxu1 %v17112_v29  ;;  %v17198_v28 = vld [vmem:[%s25145_s1 + $0x3144] ss:$100 sps:$4 sm:$0xff]   ;;  %v17193_v29 = vld [vmem:[%s25145_s1 + $0x3138] ss:$100 sps:$4 sm:$0xff]  }
  0xc8   :  { %10069 = vmatprep.subr.bf16.mxu0 %v17117_v30  ;;  %10241 = vmatprep.subr.bf16.mxu1 %v17120_v31  ;;  %v17196_v30 = vld [vmem:[%s25145_s1 + $0x3140] ss:$100 sps:$4 sm:$0xff]   ;;  %v17201_v31 = vld [vmem:[%s25145_s1 + $0x14] ss:$100 sps:$4 sm:$0xff]  }
  0xcb   :  { %10070 = vmatpush1.bf16.msra.mxu0 %v17115_v32  ;;  %10242 = vmatpush1.bf16.msra.mxu1 %v17118_v33  ;;  %v17204_v32 = vld [vmem:[%s25145_s1 + $0x1c] ss:$100 sps:$4 sm:$0xff]   ;;  %v20276_v33 = vcombine.low %v20073_v25, %v20078_v26  ;;  %v17210_v25 = vld [vmem:[%s25145_s1 + $0xe4] ss:$100 sps:$4 sm:$0xff]  }
  0xcc   :  { %10071 = vmatprep.subr.bf16.mxu0 %v17123_v35  ;;  %10243 = vmatprep.subr.bf16.mxu1 %v17126_v36  ;;  %v17199_v35 = vld [vmem:[%s25145_s1 + $0x10] ss:$100 sps:$4 sm:$0xff]   ;;  %v17202_v36 = vld [vmem:[%s25145_s1 + $0x18] ss:$100 sps:$4 sm:$0xff]  }
  0xcd   :  { %v17205_v26 = vld [vmem:[%s25145_s1 + $0xd8] ss:$100 sps:$4 sm:$0xff]  }
  0xcf   :  { %10072 = vmatpush1.bf16.msra.mxu0 %v17121_v37  ;;  %10244 = vmatpush1.bf16.msra.mxu1 %v17124_v38  ;;  %v17207_v37 = vld [vmem:[%s25145_s1 + $0xdc] ss:$100 sps:$4 sm:$0xff]  }
  0xd0   :  { %10073 = vmatprep.subr.bf16.mxu0 %v17129_v39  ;;  %10245 = vmatprep.subr.bf16.mxu1 %v17132_v40  ;;  %v17208_v38 = vld [vmem:[%s25145_s1 + $0xe0] ss:$100 sps:$4 sm:$0xff]   ;;  %v17216_v40 = vld [vmem:[%s25145_s1 + $0x1ac] ss:$100 sps:$4 sm:$0xff]  }
  0xd1   :  { %v17213_v39 = vld [vmem:[%s25145_s1 + $0x1a4] ss:$100 sps:$4 sm:$0xff]  }
  0xd3   :  { %10074 = vmatpush1.bf16.msra.mxu0 %v17127_v41  ;;  %10246 = vmatpush1.bf16.msra.mxu1 %v17130_v42  ;;  %v17211_v41 = vld [vmem:[%s25145_s1 + $0x1a0] ss:$100 sps:$4 sm:$0xff]   ;;  %v17214_v42 = vld [vmem:[%s25145_s1 + $0x1a8] ss:$100 sps:$4 sm:$0xff]  }
  0xd4   :  { %10075 = vmatprep.subr.bf16.mxu0 %v17135_v43  ;;  %10247 = vmatprep.subr.bf16.mxu1 %v17138_v44  ;;  %v17219_v43 = vld [vmem:[%s25145_s1 + $0x26c] ss:$100 sps:$4 sm:$0xff]   ;;  %v17222_v44 = vld [vmem:[%s25145_s1 + $0x274] ss:$100 sps:$4 sm:$0xff]  }
  0xd7   :  { %10076 = vmatpush1.bf16.msra.mxu0 %v17133_v45  ;;  %10248 = vmatpush1.bf16.msra.mxu1 %v17136_v46  ;;  %v17217_v45 = vld [vmem:[%s25145_s1 + $0x268] ss:$100 sps:$4 sm:$0xff]   ;;  %v17220_v46 = vld [vmem:[%s25145_s1 + $0x270] ss:$100 sps:$4 sm:$0xff]  }
  0xd8   :  { %10077 = vmatprep.subr.bf16.mxu0 %v17141_v47  ;;  %10249 = vmatprep.subr.bf16.mxu1 %v17144_v48  ;;  %v17225_v47 = vld [vmem:[%s25145_s1 + $0x334] ss:$100 sps:$4 sm:$0xff]   ;;  %v17228_v48 = vld [vmem:[%s25145_s1 + $0x33c] ss:$100 sps:$4 sm:$0xff]  }
  0xdb   :  { %10078 = vmatpush1.bf16.msra.mxu0 %v17139_v49  ;;  %10250 = vmatpush1.bf16.msra.mxu1 %v17142_v51  ;;  %v17223_v49 = vld [vmem:[%s25145_s1 + $0x330] ss:$100 sps:$4 sm:$0xff]   ;;  %v17226_v51 = vld [vmem:[%s25145_s1 + $0x338] ss:$100 sps:$4 sm:$0xff]  }
  0xdc   :  { %10079 = vmatprep.subr.bf16.mxu0 %v17147_v52  ;;  %10251 = vmatprep.subr.bf16.mxu1 %v17150_v53  ;;  %v17231_v52 = vld [vmem:[%s25145_s1 + $0x3fc] ss:$100 sps:$4 sm:$0xff]   ;;  %v17234_v53 = vld [vmem:[%s25145_s1 + $0x404] ss:$100 sps:$4 sm:$0xff]  }
  0xdf   :  { %10080 = vmatpush1.bf16.msra.mxu0 %v17145_v54  ;;  %10252 = vmatpush1.bf16.msra.mxu1 %v17148_v55  ;;  %v17229_v54 = vld [vmem:[%s25145_s1 + $0x3f8] ss:$100 sps:$4 sm:$0xff]   ;;  %v17232_v55 = vld [vmem:[%s25145_s1 + $0x400] ss:$100 sps:$4 sm:$0xff]  }
  0xe0   :  { %10081 = vmatprep.subr.bf16.mxu0 %v17153_v56  ;;  %10253 = vmatprep.subr.bf16.mxu1 %v17156_v57  ;;  %v17237_v56 = vld [vmem:[%s25145_s1 + $0x4c4] ss:$100 sps:$4 sm:$0xff]   ;;  %v17240_v57 = vld [vmem:[%s25145_s1 + $0x4cc] ss:$100 sps:$4 sm:$0xff]  }
  0xe3   :  { %10082 = vmatpush1.bf16.msra.mxu0 %v17151_v58  ;;  %10254 = vmatpush1.bf16.msra.mxu1 %v17154_v59  ;;  %v17235_v58 = vld [vmem:[%s25145_s1 + $0x4c0] ss:$100 sps:$4 sm:$0xff]   ;;  %v17238_v59 = vld [vmem:[%s25145_s1 + $0x4c8] ss:$100 sps:$4 sm:$0xff]  }
  0xe4   :  { %10083 = vmatprep.subr.bf16.mxu0 %v17159_v60  ;;  %10255 = vmatprep.subr.bf16.mxu1 %v17162_v61  ;;  %v17243_v60 = vld [vmem:[%s25145_s1 + $0x58c] ss:$100 sps:$4 sm:$0xff]   ;;  %v17246_v61 = vld [vmem:[%s25145_s1 + $0x594] ss:$100 sps:$4 sm:$0xff]  }
  0xe7   :  { %10084 = vmatpush1.bf16.msra.mxu0 %v17157_v62  ;;  %10256 = vmatpush1.bf16.msra.mxu1 %v17160_v63  ;;  %v17241_v62 = vld [vmem:[%s25145_s1 + $0x588] ss:$100 sps:$4 sm:$0xff]   ;;  %v17244_v63 = vld [vmem:[%s25145_s1 + $0x590] ss:$100 sps:$4 sm:$0xff]  }
  0xe8   :  { %10085 = vmatprep.subr.bf16.mxu0 %v17165_v0  ;;  %10257 = vmatprep.subr.bf16.mxu1 %v17168_v1  ;;  %v17249_v0 = vld [vmem:[%s25145_s1 + $0x654] ss:$100 sps:$4 sm:$0xff]   ;;  %v17252_v1 = vld [vmem:[%s25145_s1 + $0x65c] ss:$100 sps:$4 sm:$0xff]  }
  0xeb   :  { %10086 = vmatpush1.bf16.msra.mxu0 %v17163_v2  ;;  %10258 = vmatpush1.bf16.msra.mxu1 %v17166_v3  ;;  %v17247_v2 = vld [vmem:[%s25145_s1 + $0x650] ss:$100 sps:$4 sm:$0xff]   ;;  %v17250_v3 = vld [vmem:[%s25145_s1 + $0x658] ss:$100 sps:$4 sm:$0xff]  }
  0xec   :  { %10087 = vmatprep.subr.bf16.mxu0 %v17171_v4  ;;  %10259 = vmatprep.subr.bf16.mxu1 %v17174_v6  ;;  %v17255_v4 = vld [vmem:[%s25145_s1 + $0x71c] ss:$100 sps:$4 sm:$0xff]   ;;  %v17258_v6 = vld [vmem:[%s25145_s1 + $0x724] ss:$100 sps:$4 sm:$0xff]  }
  0xef   :  { %10088 = vmatpush1.bf16.msra.mxu0 %v17169_v7  ;;  %10260 = vmatpush1.bf16.msra.mxu1 %v17172_v8  ;;  %v17253_v7 = vld [vmem:[%s25145_s1 + $0x718] ss:$100 sps:$4 sm:$0xff]   ;;  %v17256_v8 = vld [vmem:[%s25145_s1 + $0x720] ss:$100 sps:$4 sm:$0xff]  }
  0xf0   :  { %10089 = vmatprep.subr.bf16.mxu0 %v17177_v9  ;;  %10261 = vmatprep.subr.bf16.mxu1 %v17180_v10  ;;  %v17261_v9 = vld [vmem:[%s25145_s1 + $0x7e4] ss:$100 sps:$4 sm:$0xff]   ;;  %v17264_v10 = vld [vmem:[%s25145_s1 + $0x7ec] ss:$100 sps:$4 sm:$0xff]  }
  0xf3   :  { %10090 = vmatpush1.bf16.msra.mxu0 %v17175_v11  ;;  %10262 = vmatpush1.bf16.msra.mxu1 %v17178_v12  ;;  %v17259_v11 = vld [vmem:[%s25145_s1 + $0x7e0] ss:$100 sps:$4 sm:$0xff]   ;;  %v17262_v12 = vld [vmem:[%s25145_s1 + $0x7e8] ss:$100 sps:$4 sm:$0xff]  }
  0xf4   :  { %10091 = vmatprep.subr.bf16.mxu0 %v17183_v14  ;;  %10263 = vmatprep.subr.bf16.mxu1 %v17186_v15  ;;  %v17267_v14 = vld [vmem:[%s25145_s1 + $0x8ac] ss:$100 sps:$4 sm:$0xff]   ;;  %v17270_v15 = vld [vmem:[%s25145_s1 + $0x8b4] ss:$100 sps:$4 sm:$0xff]  }
  0xf7   :  { %10092 = vmatpush1.bf16.msra.mxu0 %v17181_v19  ;;  %10264 = vmatpush1.bf16.msra.mxu1 %v17184_v20  ;;  %v17265_v19 = vld [vmem:[%s25145_s1 + $0x8a8] ss:$100 sps:$4 sm:$0xff]   ;;  %v17268_v20 = vld [vmem:[%s25145_s1 + $0x8b0] ss:$100 sps:$4 sm:$0xff]  }
  0xf8   :  { %10093 = vmatprep.subr.bf16.mxu0 %v17189_v21  ;;  %10265 = vmatprep.subr.bf16.mxu1 %v17192_v22  ;;  %v17273_v21 = vld [vmem:[%s25145_s1 + $0x974] ss:$100 sps:$4 sm:$0xff]   ;;  %v17276_v22 = vld [vmem:[%s25145_s1 + $0x97c] ss:$100 sps:$4 sm:$0xff]  }
  0xfb   :  { %10094 = vmatpush1.bf16.msra.mxu0 %v17187_v23  ;;  %10266 = vmatpush1.bf16.msra.mxu1 %v17190_v27  ;;  %v17271_v23 = vld [vmem:[%s25145_s1 + $0x970] ss:$100 sps:$4 sm:$0xff]   ;;  %v17274_v27 = vld [vmem:[%s25145_s1 + $0x978] ss:$100 sps:$4 sm:$0xff]  }
  0xfc   :  { %10095 = vmatprep.subr.bf16.mxu0 %v17195_v16  ;;  %10267 = vmatprep.subr.bf16.mxu1 %v17198_v28  ;;  %v17279_v16 = vld [vmem:[%s25145_s1 + $0xa3c] ss:$100 sps:$4 sm:$0xff]   ;;  %v17282_v28 = vld [vmem:[%s25145_s1 + $0xa44] ss:$100 sps:$4 sm:$0xff]  }
  0xff   :  { %10096 = vmatpush1.bf16.msra.mxu0 %v17193_v29  ;;  %10268 = vmatpush1.bf16.msra.mxu1 %v17196_v30  ;;  %v17277_v29 = vld [vmem:[%s25145_s1 + $0xa38] ss:$100 sps:$4 sm:$0xff]   ;;  %v17280_v30 = vld [vmem:[%s25145_s1 + $0xa40] ss:$100 sps:$4 sm:$0xff]  }
 0x100   :  { %10280 = vmatprep.subr.bf16.mxu0 %v17201_v31  ;;  %10452 = vmatprep.subr.bf16.mxu1 %v17204_v32  ;;  %v17285_v31 = vld [vmem:[%s25145_s1 + $0xb04] ss:$100 sps:$4 sm:$0xff]   ;;  %v17288_v32 = vld [vmem:[%s25145_s1 + $0xb0c] ss:$100 sps:$4 sm:$0xff]  }
 0x102   :  { %10098 = vmatmul.mubr.bf16.vlgmr.msra.gmra.mrb[0].mxu0 %v20276_v33  ;;  %10270 = vmatmul.mubr.bf16.vlgmr.msra.gmra.mrb[0].mxu1 %v20276_v33 }
 0x103   :  { %10281 = vmatpush1.bf16.msra.mxu0 %v17199_v35  ;;  %10453 = vmatpush1.bf16.msra.mxu1 %v17202_v36  ;;  %v17283_v35 = vld [vmem:[%s25145_s1 + $0xb00] ss:$100 sps:$4 sm:$0xff]   ;;  %v17286_v36 = vld [vmem:[%s25145_s1 + $0xb08] ss:$100 sps:$4 sm:$0xff]  }
 0x104   :  { %10282 = vmatprep.subr.bf16.mxu0 %v17207_v37  ;;  %10454 = vmatprep.subr.bf16.mxu1 %v17210_v25  ;;  %v17291_v37 = vld [vmem:[%s25145_s1 + $0xbcc] ss:$100 sps:$4 sm:$0xff]   ;;  %v17294_v25 = vld [vmem:[%s25145_s1 + $0xbd4] ss:$100 sps:$4 sm:$0xff]  }
 0x105   :  { %10312 = vmatprep.mubr.bf16.mxu0 %v19576_v50  ;;  %10484 = vmatprep.mubr.bf16.mxu1 %v19576_v50 }
 0x107   :  { %10283 = vmatpush1.bf16.msra.mxu0 %v17205_v26  ;;  %10455 = vmatpush1.bf16.msra.mxu1 %v17208_v38  ;;  %v17289_v26 = vld [vmem:[%s25145_s1 + $0xbc8] ss:$100 sps:$4 sm:$0xff]   ;;  %v17292_v38 = vld [vmem:[%s25145_s1 + $0xbd0] ss:$100 sps:$4 sm:$0xff]  }
 0x108   :  { %10284 = vmatprep.subr.bf16.mxu0 %v17213_v39  ;;  %10456 = vmatprep.subr.bf16.mxu1 %v17216_v40  ;;  %v17297_v39 = vld [vmem:[%s25145_s1 + $0xc94] ss:$100 sps:$4 sm:$0xff]   ;;  %v17300_v40 = vld [vmem:[%s25145_s1 + $0xc9c] ss:$100 sps:$4 sm:$0xff]  }
 0x10b   :  { %10285 = vmatpush1.bf16.msra.mxu0 %v17211_v41  ;;  %10457 = vmatpush1.bf16.msra.mxu1 %v17214_v42  ;;  %v17295_v41 = vld [vmem:[%s25145_s1 + $0xc90] ss:$100 sps:$4 sm:$0xff]   ;;  %v17298_v42 = vld [vmem:[%s25145_s1 + $0xc98] ss:$100 sps:$4 sm:$0xff]  }
 0x10c   :  { %10286 = vmatprep.subr.bf16.mxu0 %v17219_v43  ;;  %10458 = vmatprep.subr.bf16.mxu1 %v17222_v44  ;;  %v17303_v43 = vld [vmem:[%s25145_s1 + $0xd5c] ss:$100 sps:$4 sm:$0xff]   ;;  %v17306_v44 = vld [vmem:[%s25145_s1 + $0xd64] ss:$100 sps:$4 sm:$0xff]  }
 0x10f   :  { %10287 = vmatpush1.bf16.msra.mxu0 %v17217_v45  ;;  %10459 = vmatpush1.bf16.msra.mxu1 %v17220_v46  ;;  %v17301_v45 = vld [vmem:[%s25145_s1 + $0xd58] ss:$100 sps:$4 sm:$0xff]   ;;  %v17304_v46 = vld [vmem:[%s25145_s1 + $0xd60] ss:$100 sps:$4 sm:$0xff]  }
 0x110   :  { %10288 = vmatprep.subr.bf16.mxu0 %v17225_v47  ;;  %10460 = vmatprep.subr.bf16.mxu1 %v17228_v48  ;;  %v17309_v47 = vld [vmem:[%s25145_s1 + $0xe24] ss:$100 sps:$4 sm:$0xff]   ;;  %v17312_v48 = vld [vmem:[%s25145_s1 + $0xe2c] ss:$100 sps:$4 sm:$0xff]  }
 0x113   :  { %10289 = vmatpush1.bf16.msra.mxu0 %v17223_v49  ;;  %10461 = vmatpush1.bf16.msra.mxu1 %v17226_v51  ;;  %v17307_v49 = vld [vmem:[%s25145_s1 + $0xe20] ss:$100 sps:$4 sm:$0xff]   ;;  %v17310_v51 = vld [vmem:[%s25145_s1 + $0xe28] ss:$100 sps:$4 sm:$0xff]  }
 0x114   :  { %10290 = vmatprep.subr.bf16.mxu0 %v17231_v52  ;;  %10462 = vmatprep.subr.bf16.mxu1 %v17234_v53  ;;  %v17315_v52 = vld [vmem:[%s25145_s1 + $0xeec] ss:$100 sps:$4 sm:$0xff]   ;;  %v17318_v53 = vld [vmem:[%s25145_s1 + $0xef4] ss:$100 sps:$4 sm:$0xff]  }
 0x117   :  { %10291 = vmatpush1.bf16.msra.mxu0 %v17229_v54  ;;  %10463 = vmatpush1.bf16.msra.mxu1 %v17232_v55  ;;  %v17313_v54 = vld [vmem:[%s25145_s1 + $0xee8] ss:$100 sps:$4 sm:$0xff]   ;;  %v17316_v55 = vld [vmem:[%s25145_s1 + $0xef0] ss:$100 sps:$4 sm:$0xff]  }
 0x118   :  { %10292 = vmatprep.subr.bf16.mxu0 %v17237_v56  ;;  %10464 = vmatprep.subr.bf16.mxu1 %v17240_v57  ;;  %v17321_v56 = vld [vmem:[%s25145_s1 + $0xfb4] ss:$100 sps:$4 sm:$0xff]   ;;  %v17324_v57 = vld [vmem:[%s25145_s1 + $0xfbc] ss:$100 sps:$4 sm:$0xff]  }
 0x11b   :  { %10293 = vmatpush1.bf16.msra.mxu0 %v17235_v58  ;;  %10465 = vmatpush1.bf16.msra.mxu1 %v17238_v59  ;;  %v17319_v58 = vld [vmem:[%s25145_s1 + $0xfb0] ss:$100 sps:$4 sm:$0xff]   ;;  %v17322_v59 = vld [vmem:[%s25145_s1 + $0xfb8] ss:$100 sps:$4 sm:$0xff]  }
 0x11c   :  { %10294 = vmatprep.subr.bf16.mxu0 %v17243_v60  ;;  %10466 = vmatprep.subr.bf16.mxu1 %v17246_v61  ;;  %v17327_v60 = vld [vmem:[%s25145_s1 + $0x107c] ss:$100 sps:$4 sm:$0xff]   ;;  %v17330_v61 = vld [vmem:[%s25145_s1 + $0x1084] ss:$100 sps:$4 sm:$0xff]  }
 0x11f   :  { %10295 = vmatpush1.bf16.msra.mxu0 %v17241_v62  ;;  %10467 = vmatpush1.bf16.msra.mxu1 %v17244_v63  ;;  %v17325_v62 = vld [vmem:[%s25145_s1 + $0x1078] ss:$100 sps:$4 sm:$0xff]   ;;  %v17328_v63 = vld [vmem:[%s25145_s1 + $0x1080] ss:$100 sps:$4 sm:$0xff]  }
 0x120   :  { %10296 = vmatprep.subr.bf16.mxu0 %v17249_v0  ;;  %10468 = vmatprep.subr.bf16.mxu1 %v17252_v1  ;;  %v17333_v0 = vld [vmem:[%s25145_s1 + $0x1144] ss:$100 sps:$4 sm:$0xff]   ;;  %v17336_v1 = vld [vmem:[%s25145_s1 + $0x114c] ss:$100 sps:$4 sm:$0xff]  }
 0x123   :  { %10297 = vmatpush1.bf16.msra.mxu0 %v17247_v2  ;;  %10469 = vmatpush1.bf16.msra.mxu1 %v17250_v3  ;;  %v17331_v2 = vld [vmem:[%s25145_s1 + $0x1140] ss:$100 sps:$4 sm:$0xff]   ;;  %v17334_v3 = vld [vmem:[%s25145_s1 + $0x1148] ss:$100 sps:$4 sm:$0xff]  }
 0x124   :  { %10298 = vmatprep.subr.bf16.mxu0 %v17255_v4  ;;  %10470 = vmatprep.subr.bf16.mxu1 %v17258_v6  ;;  %v17339_v4 = vld [vmem:[%s25145_s1 + $0x120c] ss:$100 sps:$4 sm:$0xff]   ;;  %v17342_v6 = vld [vmem:[%s25145_s1 + $0x1214] ss:$100 sps:$4 sm:$0xff]  }
 0x127   :  { %10299 = vmatpush1.bf16.msra.mxu0 %v17253_v7  ;;  %10471 = vmatpush1.bf16.msra.mxu1 %v17256_v8  ;;  %v17337_v7 = vld [vmem:[%s25145_s1 + $0x1208] ss:$100 sps:$4 sm:$0xff]   ;;  %v17340_v8 = vld [vmem:[%s25145_s1 + $0x1210] ss:$100 sps:$4 sm:$0xff]  }
 0x128   :  { %10300 = vmatprep.subr.bf16.mxu0 %v17261_v9  ;;  %10472 = vmatprep.subr.bf16.mxu1 %v17264_v10  ;;  %v17345_v9 = vld [vmem:[%s25145_s1 + $0x12d4] ss:$100 sps:$4 sm:$0xff]   ;;  %v17348_v10 = vld [vmem:[%s25145_s1 + $0x12dc] ss:$100 sps:$4 sm:$0xff]  }
 0x12b   :  { %10301 = vmatpush1.bf16.msra.mxu0 %v17259_v11  ;;  %10473 = vmatpush1.bf16.msra.mxu1 %v17262_v12  ;;  %v17343_v11 = vld [vmem:[%s25145_s1 + $0x12d0] ss:$100 sps:$4 sm:$0xff]   ;;  %v17346_v12 = vld [vmem:[%s25145_s1 + $0x12d8] ss:$100 sps:$4 sm:$0xff]  }
 0x12c   :  { %10302 = vmatprep.subr.bf16.mxu0 %v17267_v14  ;;  %10474 = vmatprep.subr.bf16.mxu1 %v17270_v15  ;;  %v17351_v14 = vld [vmem:[%s25145_s1 + $0x139c] ss:$100 sps:$4 sm:$0xff]   ;;  %v17354_v15 = vld [vmem:[%s25145_s1 + $0x13a4] ss:$100 sps:$4 sm:$0xff]  }
 0x12f   :  { %10303 = vmatpush1.bf16.msra.mxu0 %v17265_v19  ;;  %10475 = vmatpush1.bf16.msra.mxu1 %v17268_v20  ;;  %v17349_v19 = vld [vmem:[%s25145_s1 + $0x1398] ss:$100 sps:$4 sm:$0xff]   ;;  %v17352_v20 = vld [vmem:[%s25145_s1 + $0x13a0] ss:$100 sps:$4 sm:$0xff]  }
 0x130   :  { %10304 = vmatprep.subr.bf16.mxu0 %v17273_v21  ;;  %10476 = vmatprep.subr.bf16.mxu1 %v17276_v22  ;;  %v17357_v21 = vld [vmem:[%s25145_s1 + $0x1464] ss:$100 sps:$4 sm:$0xff]   ;;  %v17360_v22 = vld [vmem:[%s25145_s1 + $0x146c] ss:$100 sps:$4 sm:$0xff]  }
 0x133   :  { %10305 = vmatpush1.bf16.msra.mxu0 %v17271_v23  ;;  %10477 = vmatpush1.bf16.msra.mxu1 %v17274_v27  ;;  %v17355_v23 = vld [vmem:[%s25145_s1 + $0x1460] ss:$100 sps:$4 sm:$0xff]   ;;  %v17358_v27 = vld [vmem:[%s25145_s1 + $0x1468] ss:$100 sps:$4 sm:$0xff]  }
 0x134   :  { %10306 = vmatprep.subr.bf16.mxu0 %v17279_v16  ;;  %10478 = vmatprep.subr.bf16.mxu1 %v17282_v28  ;;  %v17363_v16 = vld [vmem:[%s25145_s1 + $0x152c] ss:$100 sps:$4 sm:$0xff]   ;;  %v17366_v28 = vld [vmem:[%s25145_s1 + $0x1534] ss:$100 sps:$4 sm:$0xff]  }
 0x137   :  { %10307 = vmatpush1.bf16.msra.mxu0 %v17277_v29  ;;  %10479 = vmatpush1.bf16.msra.mxu1 %v17280_v30  ;;  %v17361_v29 = vld [vmem:[%s25145_s1 + $0x1528] ss:$100 sps:$4 sm:$0xff]   ;;  %v17364_v30 = vld [vmem:[%s25145_s1 + $0x1530] ss:$100 sps:$4 sm:$0xff]  }
 0x138   :  { %10308 = vmatprep.subr.bf16.mxu0 %v17285_v31  ;;  %10480 = vmatprep.subr.bf16.mxu1 %v17288_v32  ;;  %v17369_v31 = vld [vmem:[%s25145_s1 + $0x15f4] ss:$100 sps:$4 sm:$0xff]   ;;  %v17372_v32 = vld [vmem:[%s25145_s1 + $0x15fc] ss:$100 sps:$4 sm:$0xff]  }
 0x13b   :  { %10309 = vmatpush1.bf16.msra.mxu0 %v17283_v35  ;;  %10481 = vmatpush1.bf16.msra.mxu1 %v17286_v36  ;;  %v17367_v35 = vld [vmem:[%s25145_s1 + $0x15f0] ss:$100 sps:$4 sm:$0xff]   ;;  %v17370_v36 = vld [vmem:[%s25145_s1 + $0x15f8] ss:$100 sps:$4 sm:$0xff]  }
 0x13c   :  { %10310 = vmatprep.subr.bf16.mxu0 %v17291_v37  ;;  %10482 = vmatprep.subr.bf16.mxu1 %v17294_v25  ;;  %v17375_v37 = vld [vmem:[%s25145_s1 + $0x16bc] ss:$100 sps:$4 sm:$0xff]   ;;  %v17378_v25 = vld [vmem:[%s25145_s1 + $0x16c4] ss:$100 sps:$4 sm:$0xff]  }
 0x13f   :  { %10311 = vmatpush1.bf16.msra.mxu0 %v17289_v26  ;;  %10483 = vmatpush1.bf16.msra.mxu1 %v17292_v38  ;;  %v17373_v26 = vld [vmem:[%s25145_s1 + $0x16b8] ss:$100 sps:$4 sm:$0xff]   ;;  %v17376_v38 = vld [vmem:[%s25145_s1 + $0x16c0] ss:$100 sps:$4 sm:$0xff]  }
 0x140   :  { %10323 = vmatprep.subr.bf16.mxu0 %v17297_v39  ;;  %10495 = vmatprep.subr.bf16.mxu1 %v17300_v40  ;;  %v17381_v39 = vld [vmem:[%s25145_s1 + $0x1784] ss:$100 sps:$4 sm:$0xff]   ;;  %v17384_v40 = vld [vmem:[%s25145_s1 + $0x178c] ss:$100 sps:$4 sm:$0xff]  }
 0x142   :  { %10313 = vmatmul.mubr.bf16.vlgmr.msra.gmra.mrb[4].mxu0 %v19634_v5  ;;  %10485 = vmatmul.mubr.bf16.vlgmr.msra.gmra.mrb[4].mxu1 %v19634_v5 }
 0x143   :  { %10324 = vmatpush1.bf16.msra.mxu0 %v17295_v41  ;;  %10496 = vmatpush1.bf16.msra.mxu1 %v17298_v42  ;;  %v17379_v41 = vld [vmem:[%s25145_s1 + $0x1780] ss:$100 sps:$4 sm:$0xff]   ;;  %v17382_v42 = vld [vmem:[%s25145_s1 + $0x1788] ss:$100 sps:$4 sm:$0xff]  }
 0x144   :  { %10325 = vmatprep.subr.bf16.mxu0 %v17303_v43  ;;  %10497 = vmatprep.subr.bf16.mxu1 %v17306_v44  ;;  %v17387_v43 = vld [vmem:[%s25145_s1 + $0x184c] ss:$100 sps:$4 sm:$0xff]   ;;  %v17390_v44 = vld [vmem:[%s25145_s1 + $0x1854] ss:$100 sps:$4 sm:$0xff]  }
 0x145   :  { %10355 = vmatprep.mubr.bf16.mxu0 %v19728_v34  ;;  %10527 = vmatprep.mubr.bf16.mxu1 %v19728_v34 }
 0x147   :  { %10326 = vmatpush1.bf16.msra.mxu0 %v17301_v45  ;;  %10498 = vmatpush1.bf16.msra.mxu1 %v17304_v46  ;;  %v17385_v45 = vld [vmem:[%s25145_s1 + $0x1848] ss:$100 sps:$4 sm:$0xff]   ;;  %v17388_v46 = vld [vmem:[%s25145_s1 + $0x1850] ss:$100 sps:$4 sm:$0xff]  }
 0x148   :  { %10327 = vmatprep.subr.bf16.mxu0 %v17309_v47  ;;  %10499 = vmatprep.subr.bf16.mxu1 %v17312_v48  ;;  %v17393_v47 = vld [vmem:[%s25145_s1 + $0x1914] ss:$100 sps:$4 sm:$0xff]   ;;  %v17396_v48 = vld [vmem:[%s25145_s1 + $0x191c] ss:$100 sps:$4 sm:$0xff]  }
 0x14b   :  { %10328 = vmatpush1.bf16.msra.mxu0 %v17307_v49  ;;  %10500 = vmatpush1.bf16.msra.mxu1 %v17310_v51  ;;  %v17391_v49 = vld [vmem:[%s25145_s1 + $0x1910] ss:$100 sps:$4 sm:$0xff]   ;;  %v17394_v51 = vld [vmem:[%s25145_s1 + $0x1918] ss:$100 sps:$4 sm:$0xff]  }
 0x14c   :  { %10329 = vmatprep.subr.bf16.mxu0 %v17315_v52  ;;  %10501 = vmatprep.subr.bf16.mxu1 %v17318_v53  ;;  %v17399_v52 = vld [vmem:[%s25145_s1 + $0x19dc] ss:$100 sps:$4 sm:$0xff]   ;;  %v17402_v53 = vld [vmem:[%s25145_s1 + $0x19e4] ss:$100 sps:$4 sm:$0xff]  }
 0x14f   :  { %10330 = vmatpush1.bf16.msra.mxu0 %v17313_v54  ;;  %10502 = vmatpush1.bf16.msra.mxu1 %v17316_v55  ;;  %v17397_v54 = vld [vmem:[%s25145_s1 + $0x19d8] ss:$100 sps:$4 sm:$0xff]   ;;  %v17400_v55 = vld [vmem:[%s25145_s1 + $0x19e0] ss:$100 sps:$4 sm:$0xff]  }
 0x150   :  { %10331 = vmatprep.subr.bf16.mxu0 %v17321_v56  ;;  %10503 = vmatprep.subr.bf16.mxu1 %v17324_v57  ;;  %v17405_v56 = vld [vmem:[%s25145_s1 + $0x1aa4] ss:$100 sps:$4 sm:$0xff]   ;;  %v17408_v57 = vld [vmem:[%s25145_s1 + $0x1aac] ss:$100 sps:$4 sm:$0xff]  }
 0x153   :  { %10332 = vmatpush1.bf16.msra.mxu0 %v17319_v58  ;;  %10504 = vmatpush1.bf16.msra.mxu1 %v17322_v59  ;;  %v17403_v58 = vld [vmem:[%s25145_s1 + $0x1aa0] ss:$100 sps:$4 sm:$0xff]   ;;  %v17406_v59 = vld [vmem:[%s25145_s1 + $0x1aa8] ss:$100 sps:$4 sm:$0xff]  }
 0x154   :  { %10333 = vmatprep.subr.bf16.mxu0 %v17327_v60  ;;  %10505 = vmatprep.subr.bf16.mxu1 %v17330_v61  ;;  %v17411_v60 = vld [vmem:[%s25145_s1 + $0x1b6c] ss:$100 sps:$4 sm:$0xff]   ;;  %v17414_v61 = vld [vmem:[%s25145_s1 + $0x1b74] ss:$100 sps:$4 sm:$0xff]  }
 0x157   :  { %10334 = vmatpush1.bf16.msra.mxu0 %v17325_v62  ;;  %10506 = vmatpush1.bf16.msra.mxu1 %v17328_v63  ;;  %v17409_v62 = vld [vmem:[%s25145_s1 + $0x1b68] ss:$100 sps:$4 sm:$0xff]   ;;  %v17412_v63 = vld [vmem:[%s25145_s1 + $0x1b70] ss:$100 sps:$4 sm:$0xff]  }
 0x158   :  { %10335 = vmatprep.subr.bf16.mxu0 %v17333_v0  ;;  %10507 = vmatprep.subr.bf16.mxu1 %v17336_v1  ;;  %v17417_v0 = vld [vmem:[%s25145_s1 + $0x1c34] ss:$100 sps:$4 sm:$0xff]   ;;  %v17420_v1 = vld [vmem:[%s25145_s1 + $0x1c3c] ss:$100 sps:$4 sm:$0xff]  }
 0x15b   :  { %10336 = vmatpush1.bf16.msra.mxu0 %v17331_v2  ;;  %10508 = vmatpush1.bf16.msra.mxu1 %v17334_v3  ;;  %v17415_v2 = vld [vmem:[%s25145_s1 + $0x1c30] ss:$100 sps:$4 sm:$0xff]   ;;  %v17418_v3 = vld [vmem:[%s25145_s1 + $0x1c38] ss:$100 sps:$4 sm:$0xff]  }
 0x15c   :  { %10337 = vmatprep.subr.bf16.mxu0 %v17339_v4  ;;  %10509 = vmatprep.subr.bf16.mxu1 %v17342_v6  ;;  %v17423_v4 = vld [vmem:[%s25145_s1 + $0x1cfc] ss:$100 sps:$4 sm:$0xff]   ;;  %v17426_v6 = vld [vmem:[%s25145_s1 + $0x1d04] ss:$100 sps:$4 sm:$0xff]  }
 0x15f   :  { %10338 = vmatpush1.bf16.msra.mxu0 %v17337_v7  ;;  %10510 = vmatpush1.bf16.msra.mxu1 %v17340_v8  ;;  %v17421_v7 = vld [vmem:[%s25145_s1 + $0x1cf8] ss:$100 sps:$4 sm:$0xff]   ;;  %v17424_v8 = vld [vmem:[%s25145_s1 + $0x1d00] ss:$100 sps:$4 sm:$0xff]  }
 0x160   :  { %10339 = vmatprep.subr.bf16.mxu0 %v17345_v9  ;;  %10511 = vmatprep.subr.bf16.mxu1 %v17348_v10  ;;  %v17429_v9 = vld [vmem:[%s25145_s1 + $0x1dc4] ss:$100 sps:$4 sm:$0xff]   ;;  %v17432_v10 = vld [vmem:[%s25145_s1 + $0x1dcc] ss:$100 sps:$4 sm:$0xff]  }
 0x163   :  { %10340 = vmatpush1.bf16.msra.mxu0 %v17343_v11  ;;  %10512 = vmatpush1.bf16.msra.mxu1 %v17346_v12  ;;  %v17427_v11 = vld [vmem:[%s25145_s1 + $0x1dc0] ss:$100 sps:$4 sm:$0xff]   ;;  %v17430_v12 = vld [vmem:[%s25145_s1 + $0x1dc8] ss:$100 sps:$4 sm:$0xff]  }
 0x164   :  { %10341 = vmatprep.subr.bf16.mxu0 %v17351_v14  ;;  %10513 = vmatprep.subr.bf16.mxu1 %v17354_v15  ;;  %v17435_v14 = vld [vmem:[%s25145_s1 + $0x1e8c] ss:$100 sps:$4 sm:$0xff]   ;;  %v17438_v15 = vld [vmem:[%s25145_s1 + $0x1e94] ss:$100 sps:$4 sm:$0xff]  }
 0x167   :  { %10342 = vmatpush1.bf16.msra.mxu0 %v17349_v19  ;;  %10514 = vmatpush1.bf16.msra.mxu1 %v17352_v20  ;;  %v17433_v19 = vld [vmem:[%s25145_s1 + $0x1e88] ss:$100 sps:$4 sm:$0xff]   ;;  %v17436_v20 = vld [vmem:[%s25145_s1 + $0x1e90] ss:$100 sps:$4 sm:$0xff]  }
 0x168   :  { %10343 = vmatprep.subr.bf16.mxu0 %v17357_v21  ;;  %10515 = vmatprep.subr.bf16.mxu1 %v17360_v22  ;;  %v17441_v21 = vld [vmem:[%s25145_s1 + $0x1f54] ss:$100 sps:$4 sm:$0xff]   ;;  %v17444_v22 = vld [vmem:[%s25145_s1 + $0x1f5c] ss:$100 sps:$4 sm:$0xff]  }
 0x16b   :  { %10344 = vmatpush1.bf16.msra.mxu0 %v17355_v23  ;;  %10516 = vmatpush1.bf16.msra.mxu1 %v17358_v27  ;;  %v17439_v23 = vld [vmem:[%s25145_s1 + $0x1f50] ss:$100 sps:$4 sm:$0xff]   ;;  %v17442_v27 = vld [vmem:[%s25145_s1 + $0x1f58] ss:$100 sps:$4 sm:$0xff]  }
 0x16c   :  { %10345 = vmatprep.subr.bf16.mxu0 %v17363_v16  ;;  %10517 = vmatprep.subr.bf16.mxu1 %v17366_v28  ;;  %v17447_v16 = vld [vmem:[%s25145_s1 + $0x201c] ss:$100 sps:$4 sm:$0xff]   ;;  %v17450_v28 = vld [vmem:[%s25145_s1 + $0x2024] ss:$100 sps:$4 sm:$0xff]  }
 0x16f   :  { %10346 = vmatpush1.bf16.msra.mxu0 %v17361_v29  ;;  %10518 = vmatpush1.bf16.msra.mxu1 %v17364_v30  ;;  %v17445_v29 = vld [vmem:[%s25145_s1 + $0x2018] ss:$100 sps:$4 sm:$0xff]   ;;  %v17448_v30 = vld [vmem:[%s25145_s1 + $0x2020] ss:$100 sps:$4 sm:$0xff]  }
 0x170   :  { %10347 = vmatprep.subr.bf16.mxu0 %v17369_v31  ;;  %10519 = vmatprep.subr.bf16.mxu1 %v17372_v32  ;;  %v17453_v31 = vld [vmem:[%s25145_s1 + $0x20e4] ss:$100 sps:$4 sm:$0xff]   ;;  %v17456_v32 = vld [vmem:[%s25145_s1 + $0x20ec] ss:$100 sps:$4 sm:$0xff]  }
 0x173   :  { %10348 = vmatpush1.bf16.msra.mxu0 %v17367_v35  ;;  %10520 = vmatpush1.bf16.msra.mxu1 %v17370_v36  ;;  %v17451_v35 = vld [vmem:[%s25145_s1 + $0x20e0] ss:$100 sps:$4 sm:$0xff]   ;;  %v17454_v36 = vld [vmem:[%s25145_s1 + $0x20e8] ss:$100 sps:$4 sm:$0xff]  }
 0x174   :  { %10349 = vmatprep.subr.bf16.mxu0 %v17375_v37  ;;  %10521 = vmatprep.subr.bf16.mxu1 %v17378_v25  ;;  %v17459_v37 = vld [vmem:[%s25145_s1 + $0x21ac] ss:$100 sps:$4 sm:$0xff]   ;;  %v17462_v25 = vld [vmem:[%s25145_s1 + $0x21b4] ss:$100 sps:$4 sm:$0xff]  }
 0x177   :  { %10350 = vmatpush1.bf16.msra.mxu0 %v17373_v26  ;;  %10522 = vmatpush1.bf16.msra.mxu1 %v17376_v38  ;;  %v17457_v26 = vld [vmem:[%s25145_s1 + $0x21a8] ss:$100 sps:$4 sm:$0xff]   ;;  %v17460_v38 = vld [vmem:[%s25145_s1 + $0x21b0] ss:$100 sps:$4 sm:$0xff]  }
 0x178   :  { %10351 = vmatprep.subr.bf16.mxu0 %v17381_v39  ;;  %10523 = vmatprep.subr.bf16.mxu1 %v17384_v40  ;;  %v17465_v39 = vld [vmem:[%s25145_s1 + $0x2274] ss:$100 sps:$4 sm:$0xff]   ;;  %v17468_v40 = vld [vmem:[%s25145_s1 + $0x227c] ss:$100 sps:$4 sm:$0xff]  }
 0x17b   :  { %10352 = vmatpush1.bf16.msra.mxu0 %v17379_v41  ;;  %10524 = vmatpush1.bf16.msra.mxu1 %v17382_v42  ;;  %v17463_v41 = vld [vmem:[%s25145_s1 + $0x2270] ss:$100 sps:$4 sm:$0xff]   ;;  %v17466_v42 = vld [vmem:[%s25145_s1 + $0x2278] ss:$100 sps:$4 sm:$0xff]  }
 0x17c   :  { %10353 = vmatprep.subr.bf16.mxu0 %v17387_v43  ;;  %10525 = vmatprep.subr.bf16.mxu1 %v17390_v44  ;;  %v17471_v43 = vld [vmem:[%s25145_s1 + $0x233c] ss:$100 sps:$4 sm:$0xff]   ;;  %v17474_v44 = vld [vmem:[%s25145_s1 + $0x2344] ss:$100 sps:$4 sm:$0xff]  }
 0x17f   :  { %10354 = vmatpush1.bf16.msra.mxu0 %v17385_v45  ;;  %10526 = vmatpush1.bf16.msra.mxu1 %v17388_v46  ;;  %v17469_v45 = vld [vmem:[%s25145_s1 + $0x2338] ss:$100 sps:$4 sm:$0xff]   ;;  %v17472_v46 = vld [vmem:[%s25145_s1 + $0x2340] ss:$100 sps:$4 sm:$0xff]  }
 0x180   :  { %10366 = vmatprep.subr.bf16.mxu0 %v17393_v47  ;;  %10538 = vmatprep.subr.bf16.mxu1 %v17396_v48  ;;  %v17477_v47 = vld [vmem:[%s25145_s1 + $0x2404] ss:$100 sps:$4 sm:$0xff]   ;;  %v17480_v48 = vld [vmem:[%s25145_s1 + $0x240c] ss:$100 sps:$4 sm:$0xff]  }
 0x182   :  { %10356 = vmatmul.mubr.bf16.vlgmr.msra.gmra.mrb[4].mxu0 %v19854_v13  ;;  %10528 = vmatmul.mubr.bf16.vlgmr.msra.gmra.mrb[4].mxu1 %v19854_v13 }
 0x183   :  { %10367 = vmatpush1.bf16.msra.mxu0 %v17391_v49  ;;  %10539 = vmatpush1.bf16.msra.mxu1 %v17394_v51  ;;  %v17475_v49 = vld [vmem:[%s25145_s1 + $0x2400] ss:$100 sps:$4 sm:$0xff]   ;;  %v17478_v51 = vld [vmem:[%s25145_s1 + $0x2408] ss:$100 sps:$4 sm:$0xff]  }
 0x184   :  { %10368 = vmatprep.subr.bf16.mxu0 %v17399_v52  ;;  %10540 = vmatprep.subr.bf16.mxu1 %v17402_v53  ;;  %v17483_v52 = vld [vmem:[%s25145_s1 + $0x24cc] ss:$100 sps:$4 sm:$0xff]   ;;  %v17486_v53 = vld [vmem:[%s25145_s1 + $0x24d4] ss:$100 sps:$4 sm:$0xff]  }
 0x185   :  { %10398 = vmatprep.mubr.bf16.mxu0 %v19874_v18  ;;  %10570 = vmatprep.mubr.bf16.mxu1 %v19874_v18 }
 0x187   :  { %10369 = vmatpush1.bf16.msra.mxu0 %v17397_v54  ;;  %10541 = vmatpush1.bf16.msra.mxu1 %v17400_v55  ;;  %v17481_v54 = vld [vmem:[%s25145_s1 + $0x24c8] ss:$100 sps:$4 sm:$0xff]   ;;  %v17484_v55 = vld [vmem:[%s25145_s1 + $0x24d0] ss:$100 sps:$4 sm:$0xff]  }
 0x188   :  { %10370 = vmatprep.subr.bf16.mxu0 %v17405_v56  ;;  %10542 = vmatprep.subr.bf16.mxu1 %v17408_v57  ;;  %v17489_v56 = vld [vmem:[%s25145_s1 + $0x2594] ss:$100 sps:$4 sm:$0xff]   ;;  %v17492_v57 = vld [vmem:[%s25145_s1 + $0x259c] ss:$100 sps:$4 sm:$0xff]  }
 0x18b   :  { %10371 = vmatpush1.bf16.msra.mxu0 %v17403_v58  ;;  %10543 = vmatpush1.bf16.msra.mxu1 %v17406_v59  ;;  %v17487_v58 = vld [vmem:[%s25145_s1 + $0x2590] ss:$100 sps:$4 sm:$0xff]   ;;  %v17490_v59 = vld [vmem:[%s25145_s1 + $0x2598] ss:$100 sps:$4 sm:$0xff]  }
 0x18c   :  { %10372 = vmatprep.subr.bf16.mxu0 %v17411_v60  ;;  %10544 = vmatprep.subr.bf16.mxu1 %v17414_v61  ;;  %v17495_v60 = vld [vmem:[%s25145_s1 + $0x265c] ss:$100 sps:$4 sm:$0xff]   ;;  %v17498_v61 = vld [vmem:[%s25145_s1 + $0x2664] ss:$100 sps:$4 sm:$0xff]  }
 0x18f   :  { %10373 = vmatpush1.bf16.msra.mxu0 %v17409_v62  ;;  %10545 = vmatpush1.bf16.msra.mxu1 %v17412_v63  ;;  %v17493_v62 = vld [vmem:[%s25145_s1 + $0x2658] ss:$100 sps:$4 sm:$0xff]   ;;  %v17496_v63 = vld [vmem:[%s25145_s1 + $0x2660] ss:$100 sps:$4 sm:$0xff]  }
 0x190   :  { %10374 = vmatprep.subr.bf16.mxu0 %v17417_v0  ;;  %10546 = vmatprep.subr.bf16.mxu1 %v17420_v1  ;;  %v17501_v0 = vld [vmem:[%s25145_s1 + $0x2724] ss:$100 sps:$4 sm:$0xff]   ;;  %v17504_v1 = vld [vmem:[%s25145_s1 + $0x272c] ss:$100 sps:$4 sm:$0xff]  }
 0x193   :  { %10375 = vmatpush1.bf16.msra.mxu0 %v17415_v2  ;;  %10547 = vmatpush1.bf16.msra.mxu1 %v17418_v3  ;;  %v1707_v2 = vlaneseq  ;;  %v17499_v3 = vld [vmem:[%s25145_s1 + $0x2720] ss:$100 sps:$4 sm:$0xff]  }
 0x194   :  { %10376 = vmatprep.subr.bf16.mxu0 %v17423_v4  ;;  %10548 = vmatprep.subr.bf16.mxu1 %v17426_v6  ;;  %v17502_v4 = vld [vmem:[%s25145_s1 + $0x2728] ss:$100 sps:$4 sm:$0xff]  }
 0x195   :  { %v17507_v6 = vld [vmem:[%s25145_s1 + $0x27ec] ss:$100 sps:$4 sm:$0xff]  }
 0x197   :  { %10377 = vmatpush1.bf16.msra.mxu0 %v17421_v7  ;;  %10549 = vmatpush1.bf16.msra.mxu1 %v17424_v8  ;;  %v17510_v7 = vld [vmem:[%s25145_s1 + $0x27f4] ss:$100 sps:$4 sm:$0xff]   ;;  %v20906_v8 = vshrl.u32 %v1707_v2, 7 }
 0x198   :  { %10378 = vmatprep.subr.bf16.mxu0 %v17429_v9  ;;  %10550 = vmatprep.subr.bf16.mxu1 %v17432_v10  ;;  %v17505_v9 = vld [vmem:[%s25145_s1 + $0x27e8] ss:$100 sps:$4 sm:$0xff]   ;;  %v17508_v10 = vld [vmem:[%s25145_s1 + $0x27f0] ss:$100 sps:$4 sm:$0xff]  }
 0x199   :  { %v17532_v2 = vld [vmem:[%s25145_s1 + $0x2b10] ss:$100 sps:$4 sm:$0xff]  }
 0x19b   :  { %10379 = vmatpush1.bf16.msra.mxu0 %v17427_v11  ;;  %10551 = vmatpush1.bf16.msra.mxu1 %v17430_v12  ;;  %v17513_v11 = vld [vmem:[%s25145_s1 + $0x28b4] ss:$100 sps:$4 sm:$0xff]   ;;  %v17516_v12 = vld [vmem:[%s25145_s1 + $0x28bc] ss:$100 sps:$4 sm:$0xff]  }
 0x19c   :  { %10380 = vmatprep.subr.bf16.mxu0 %v17435_v14  ;;  %10552 = vmatprep.subr.bf16.mxu1 %v17438_v15  ;;  %v17511_v14 = vld [vmem:[%s25145_s1 + $0x28b0] ss:$100 sps:$4 sm:$0xff]   ;;  %v20924_v15 = vsub.s32 0, %v20906_v8 }
 0x19f   :  { %10381 = vmatpush1.bf16.msra.mxu0 %v17433_v19  ;;  %10553 = vmatpush1.bf16.msra.mxu1 %v17436_v20  ;;  %v20927_v19 = vsub.s32 2, %v20906_v8  ;;  %v17514_v20 = vld [vmem:[%s25145_s1 + $0x28b8] ss:$100 sps:$4 sm:$0xff]  }
 0x1a0   :  { %10382 = vmatprep.subr.bf16.mxu0 %v17441_v21  ;;  %10554 = vmatprep.subr.bf16.mxu1 %v17444_v22  ;;  %v1699_v21 = vld [vmem:[%s25147_s2] sm:$0xff]  ;;  %v20936_v22 = vsub.s32 1, %v20906_v8 }
 0x1a3   :  { %10383 = vmatpush1.bf16.msra.mxu0 %v17439_v23  ;;  %10555 = vmatpush1.bf16.msra.mxu1 %v17442_v27  ;;  %v20939_v23 = vsub.s32 3, %v20906_v8  ;;  %v17519_v27 = vld [vmem:[%s25145_s1 + $0x297c] ss:$100 sps:$4 sm:$0xff]  }
 0x1a4   :  { %10384 = vmatprep.subr.bf16.mxu0 %v17447_v16  ;;  %10556 = vmatprep.subr.bf16.mxu1 %v17450_v28  ;;  %v17522_v16 = vld [vmem:[%s25145_s1 + $0x2984] ss:$100 sps:$4 sm:$0xff]   ;;  %v1710_v28 = vrot.slane %v1699_v21, %v20924_v15 }
 0x1a7   :  { %10385 = vmatpush1.bf16.msra.mxu0 %v17445_v29  ;;  %10557 = vmatpush1.bf16.msra.mxu1 %v17448_v30  ;;  %v1718_v29 = vrot.slane %v1699_v21, %v20927_v19  ;;  %v1714_v30 = vrot.slane %v1699_v21, %v20936_v22 }
 0x1a8   :  { %10386 = vmatprep.subr.bf16.mxu0 %v17453_v31  ;;  %10558 = vmatprep.subr.bf16.mxu1 %v17456_v32  ;;  %v1722_v31 = vrot.slane %v1699_v21, %v20939_v23  ;;  %v17517_v32 = vld [vmem:[%s25145_s1 + $0x2978] ss:$100 sps:$4 sm:$0xff]  }
 0x1a9   :  { %v17541_v21 = vld [vmem:[%s25145_s1 + $0x2c98] ss:$100 sps:$4 sm:$0xff]  }
 0x1ab   :  { %10387 = vmatpush1.bf16.msra.mxu0 %v17451_v35  ;;  %10559 = vmatpush1.bf16.msra.mxu1 %v17454_v36  ;;  %v17520_v35 = vld [vmem:[%s25145_s1 + $0x2980] ss:$100 sps:$4 sm:$0xff]  }
 0x1ac   :  { %10388 = vmatprep.subr.bf16.mxu0 %v17459_v37  ;;  %10560 = vmatprep.subr.bf16.mxu1 %v17462_v25  ;;  %v17525_v36 = vld [vmem:[%s25145_s1 + $0x2a44] ss:$100 sps:$4 sm:$0xff]   ;;  %v17528_v37 = vld [vmem:[%s25145_s1 + $0x2a4c] ss:$100 sps:$4 sm:$0xff]  }
 0x1af   :  { %10389 = vmatpush1.bf16.msra.mxu0 %v17457_v26  ;;  %10561 = vmatpush1.bf16.msra.mxu1 %v17460_v38 }
 0x1b0   :  { %10390 = vmatprep.subr.bf16.mxu0 %v17465_v39  ;;  %10562 = vmatprep.subr.bf16.mxu1 %v17468_v40 }
 0x1b3   :  { %10391 = vmatpush1.bf16.msra.mxu0 %v17463_v41  ;;  %10563 = vmatpush1.bf16.msra.mxu1 %v17466_v42 }
 0x1b4   :  { %10392 = vmatprep.subr.bf16.mxu0 %v17471_v43  ;;  %10564 = vmatprep.subr.bf16.mxu1 %v17474_v44 }
 0x1b7   :  { %10393 = vmatpush1.bf16.msra.mxu0 %v17469_v45  ;;  %10565 = vmatpush1.bf16.msra.mxu1 %v17472_v46  ;;  %v17523_v46 = vld [vmem:[%s25145_s1 + $0x2a40] ss:$100 sps:$4 sm:$0xff]  }
 0x1b8   :  { %10394 = vmatprep.subr.bf16.mxu0 %v17477_v47  ;;  %10566 = vmatprep.subr.bf16.mxu1 %v17480_v48  ;;  %v17526_v47 = vld [vmem:[%s25145_s1 + $0x2a48] ss:$100 sps:$4 sm:$0xff]  }
 0x1bb   :  { %10395 = vmatpush1.bf16.msra.mxu0 %v17475_v49  ;;  %10567 = vmatpush1.bf16.msra.mxu1 %v17478_v51 }
 0x1bc   :  { %10396 = vmatprep.subr.bf16.mxu0 %v17483_v52  ;;  %10568 = vmatprep.subr.bf16.mxu1 %v17486_v53  ;;  %v17531_v53 = vld [vmem:[%s25145_s1 + $0x2b0c] ss:$100 sps:$4 sm:$0xff]  }
 0x1bf   :  { %10397 = vmatpush1.bf16.msra.mxu0 %v17481_v54  ;;  %10569 = vmatpush1.bf16.msra.mxu1 %v17484_v55  ;;  %v17534_v54 = vld [vmem:[%s25145_s1 + $0x2b14] ss:$100 sps:$4 sm:$0xff]  }
 0x1c0   :  { %10409 = vmatprep.subr.bf16.mxu0 %v17489_v56  ;;  %10581 = vmatprep.subr.bf16.mxu1 %v17492_v57 }
 0x1c2   :  { %10399 = vmatmul.mubr.bf16.vlgmr.msra.gmra.mrb[4].mxu0 %v20068_v24  ;;  %10571 = vmatmul.mubr.bf16.vlgmr.msra.gmra.mrb[4].mxu1 %v20068_v24 }
 0x1c3   :  { %10410 = vmatpush1.bf16.msra.mxu0 %v17487_v58  ;;  %10582 = vmatpush1.bf16.msra.mxu1 %v17490_v59  ;;  %v17529_v58 = vld [vmem:[%s25145_s1 + $0x2b08] ss:$100 sps:$4 sm:$0xff]  }
 0x1c4   :  { %10411 = vmatprep.subr.bf16.mxu0 %v17495_v60  ;;  %10583 = vmatprep.subr.bf16.mxu1 %v17498_v61 }
 0x1c5   :  { %10441 = vmatprep.mubr.bf16.mxu0 %v20088_v17  ;;  %10613 = vmatprep.mubr.bf16.mxu1 %v20088_v17 }
 0x1c7   :  { %10412 = vmatpush1.bf16.msra.mxu0 %v17493_v62  ;;  %10584 = vmatpush1.bf16.msra.mxu1 %v17496_v63 }
 0x1c8   :  { %10413 = vmatprep.subr.bf16.mxu0 %v17501_v0  ;;  %10585 = vmatprep.subr.bf16.mxu1 %v17504_v1 }
 0x1cb   :  { %10414 = vmatpush1.bf16.msra.mxu0 %v17499_v3  ;;  %10586 = vmatpush1.bf16.msra.mxu1 %v17502_v4 }
 0x1cc   :  { %10415 = vmatprep.subr.bf16.mxu0 %v17507_v6  ;;  %10587 = vmatprep.subr.bf16.mxu1 %v17510_v7  ;;  %v17537_v6 = vld [vmem:[%s25145_s1 + $0x2bd4] ss:$100 sps:$4 sm:$0xff]   ;;  %v17540_v7 = vld [vmem:[%s25145_s1 + $0x2bdc] ss:$100 sps:$4 sm:$0xff]  }
 0x1cf   :  { %10416 = vmatpush1.bf16.msra.mxu0 %v17505_v9  ;;  %10588 = vmatpush1.bf16.msra.mxu1 %v17508_v10 }
 0x1d0   :  { %10417 = vmatprep.subr.bf16.mxu0 %v17513_v11  ;;  %10589 = vmatprep.subr.bf16.mxu1 %v17516_v12  ;;  %v17535_v11 = vld [vmem:[%s25145_s1 + $0x2bd0] ss:$100 sps:$4 sm:$0xff]   ;;  %v17538_v12 = vld [vmem:[%s25145_s1 + $0x2bd8] ss:$100 sps:$4 sm:$0xff]  }
 0x1d3   :  { %10418 = vmatpush1.bf16.msra.mxu0 %v17511_v14  ;;  %10590 = vmatpush1.bf16.msra.mxu1 %v17514_v20  ;;  %v17543_v14 = vld [vmem:[%s25145_s1 + $0x2c9c] ss:$100 sps:$4 sm:$0xff]   ;;  %v17546_v20 = vld [vmem:[%s25145_s1 + $0x2ca4] ss:$100 sps:$4 sm:$0xff]  }
 0x1d4   :  { %10419 = vmatprep.subr.bf16.mxu0 %v17519_v27  ;;  %10591 = vmatprep.subr.bf16.mxu1 %v17522_v16  ;;  %v17544_v27 = vld [vmem:[%s25145_s1 + $0x2ca0] ss:$100 sps:$4 sm:$0xff]  }
 0x1d5   :  { %v10099_v25 = vpop.f32.mrb[0].mxu0  ;;  %v10271_v26 = vpop.f32.mrb[0].mxu1  ;;  %v17549_v16 = vld [vmem:[%s25145_s1 + $0x2d64] ss:$100 sps:$4 sm:$0xff]  }
 0x1d6   :  { %v16621_v38 = vadd.f32 %v10099_v25, %v1710_v28  ;;  %v16625_v39 = vadd.f32 %v10271_v26, %v1718_v29  ;;  %v10101_v40 = vpop.f32.mrb[1].mxu0  ;;  %v10273_v41 = vpop.f32.mrb[1].mxu1  ;;  %v17564_v25 = vld [vmem:[%s25145_s1 + $0x2efc] ss:$100 sps:$4 sm:$0xff]   ;;  %v17559_v26 = vld [vmem:[%s25145_s1 + $0x2ef0] ss:$100 sps:$4 sm:$0xff]  }
 0x1d7   :  { %v16622_v42 = vadd.f32 %v10101_v40, %v1714_v30  ;;  %v16626_v43 = vadd.f32 %v10273_v41, %v1722_v31  ;;  %v10103_v44 = vpop.f32.mrb[2].mxu0  ;;  %v10275_v45 = vpop.f32.mrb[2].mxu1  ;;  %10420 = vmatpush1.bf16.msra.mxu0 %v17517_v32  ;;  %10592 = vmatpush1.bf16.msra.mxu1 %v17520_v35  ;;  %v17558_v32 = vld [vmem:[%s25145_s1 + $0x2e34] ss:$100 sps:$4 sm:$0xff]   ;;  %v17553_v35 = vld [vmem:[%s25145_s1 + $0x2e28] ss:$100 sps:$4 sm:$0xff]  }
 0x1d8   :  { %v16623_v48 = vadd.f32 %v10103_v44, %v1710_v28  ;;  %v16627_v49 = vadd.f32 %v10275_v45, %v1718_v29  ;;  %v10105_v51 = vpop.f32.mrb[3].mxu0  ;;  %v10277_v52 = vpop.f32.mrb[3].mxu1  ;;  %10421 = vmatprep.subr.bf16.mxu0 %v17525_v36  ;;  %10593 = vmatprep.subr.bf16.mxu1 %v17528_v37  ;;  %v12164_v55 = vmax.f32 %v16621_v38, 0.0  ;;  %v12166_v59 = vmax.f32 %v16625_v39, 0.0  ;;  %v17552_v28 = vld [vmem:[%s25145_s1 + $0x2d6c] ss:$100 sps:$4 sm:$0xff]  }
 0x1d9   :  { %v16624_v56 = vadd.f32 %v10105_v51, %v1714_v30  ;;  %v16628_v57 = vadd.f32 %v10277_v52, %v1722_v31  ;;  %v12165_v62 = vmax.f32 %v16622_v42, 0.0  ;;  %v12167_v63 = vmax.f32 %v16626_v43, 0.0  ;;  %v17547_v29 = vld [vmem:[%s25145_s1 + $0x2d60] ss:$100 sps:$4 sm:$0xff]   ;;  %v17550_v30 = vld [vmem:[%s25145_s1 + $0x2d68] ss:$100 sps:$4 sm:$0xff]  }
 0x1da   :  { %v12189_v60 = vmax.f32 %v16623_v48, 0.0  ;;  %v12191_v61 = vmax.f32 %v16627_v49, 0.0  ;;  %v17555_v31 = vld [vmem:[%s25145_s1 + $0x2e2c] ss:$100 sps:$4 sm:$0xff]   ;;  %v17561_v37 = vld [vmem:[%s25145_s1 + $0x2ef4] ss:$100 sps:$4 sm:$0xff]  }
 0x1db   :  { %v12190_v0 = vmax.f32 %v16624_v56, 0.0  ;;  %v12192_v1 = vmax.f32 %v16628_v57, 0.0  ;;  %10422 = vmatpush1.bf16.msra.mxu0 %v17523_v46  ;;  %10594 = vmatpush1.bf16.msra.mxu1 %v17526_v47  ;;  %v17556_v36 = vld [vmem:[%s25145_s1 + $0x2e30] ss:$100 sps:$4 sm:$0xff]   ;;  %v17562_v38 = vld [vmem:[%s25145_s1 + $0x2ef8] ss:$100 sps:$4 sm:$0xff]  }
 0x1dc   :  { %v20981_v3 = vpack.c.bf16 %v12189_v60, %v12164_v55  ;;  %v20983_v4 = vpack.c.bf16 %v12191_v61, %v12166_v59  ;;  %10423 = vmatprep.subr.bf16.mxu0 %v17531_v53  ;;  %10595 = vmatprep.subr.bf16.mxu1 %v17534_v54  ;;  %v17567_v39 = vld [vmem:[%s25145_s1 + $0x2fbc] ss:$100 sps:$4 sm:$0xff]   ;;  %v17570_v40 = vld [vmem:[%s25145_s1 + $0x2fc4] ss:$100 sps:$4 sm:$0xff]   ;;  %v17576_v44 = vld [vmem:[%s25145_s1 + $0x308c] ss:$100 sps:$4 sm:$0xff]  }
 0x1dd   :  { %v20991_v9 = vpack.c.bf16 %v12190_v0, %v12165_v62  ;;  %v20993_v10 = vpack.c.bf16 %v12192_v1, %v12167_v63  ;;  %v17565_v41 = vld [vmem:[%s25145_s1 + $0x2fb8] ss:$100 sps:$4 sm:$0xff]   ;;  %v17568_v42 = vld [vmem:[%s25145_s1 + $0x2fc0] ss:$100 sps:$4 sm:$0xff]   ;;  %v17574_v46 = vld [vmem:[%s25145_s1 + $0x3088] ss:$100 sps:$4 sm:$0xff]  }
 0x1de   :  { %v17573_v43 = vld [vmem:[%s25145_s1 + $0x3084] ss:$100 sps:$4 sm:$0xff]   ;;  %v17579_v47 = vld [vmem:[%s25145_s1 + $0x314c] ss:$100 sps:$4 sm:$0xff]   ;;  %v17582_v48 = vld [vmem:[%s25145_s1 + $0x3154] ss:$100 sps:$4 sm:$0xff]  }
 0x1df   :  { %10424 = vmatpush1.bf16.msra.mxu0 %v17529_v58  ;;  %10596 = vmatpush1.bf16.msra.mxu1 %v17532_v2  ;;  %v17571_v45 = vld [vmem:[%s25145_s1 + $0x3080] ss:$100 sps:$4 sm:$0xff]   ;;  %v17577_v49 = vld [vmem:[%s25145_s1 + $0x3148] ss:$100 sps:$4 sm:$0xff]   ;;  %v17580_v51 = vld [vmem:[%s25145_s1 + $0x3150] ss:$100 sps:$4 sm:$0xff]  }
 0x1e0   :  { %10425 = vmatprep.subr.bf16.mxu0 %v17537_v6  ;;  %10597 = vmatprep.subr.bf16.mxu1 %v17540_v7  ;;  %v17585_v52 = vld [vmem:[%s25145_s1 + $0x24] ss:$100 sps:$4 sm:$0xff]   ;;  %v17588_v53 = vld [vmem:[%s25145_s1 + $0x2c] ss:$100 sps:$4 sm:$0xff]   ;;  %v17594_v57 = vld [vmem:[%s25145_s1 + $0xf4] ss:$100 sps:$4 sm:$0xff]  }
 0x1e1   :  { %v17583_v54 = vld [vmem:[%s25145_s1 + $0x20] ss:$100 sps:$4 sm:$0xff]   ;;  %v17586_v55 = vld [vmem:[%s25145_s1 + $0x28] ss:$100 sps:$4 sm:$0xff]   ;;  %v17592_v59 = vld [vmem:[%s25145_s1 + $0xf0] ss:$100 sps:$4 sm:$0xff]  }
 0x1e2   :  { %v17591_v56 = vld [vmem:[%s25145_s1 + $0xec] ss:$100 sps:$4 sm:$0xff]   ;;  %v17597_v60 = vld [vmem:[%s25145_s1 + $0x1b4] ss:$100 sps:$4 sm:$0xff]   ;;  %v17600_v61 = vld [vmem:[%s25145_s1 + $0x1bc] ss:$100 sps:$4 sm:$0xff]  }
 0x1e3   :  { %10426 = vmatpush1.bf16.msra.mxu0 %v17535_v11  ;;  %10598 = vmatpush1.bf16.msra.mxu1 %v17538_v12  ;;  %v17589_v58 = vld [vmem:[%s25145_s1 + $0xe8] ss:$100 sps:$4 sm:$0xff]   ;;  %v17595_v62 = vld [vmem:[%s25145_s1 + $0x1b0] ss:$100 sps:$4 sm:$0xff]   ;;  %v17598_v63 = vld [vmem:[%s25145_s1 + $0x1b8] ss:$100 sps:$4 sm:$0xff]  }
 0x1e4   :  { %10427 = vmatprep.subr.bf16.mxu0 %v17543_v14  ;;  %10599 = vmatprep.subr.bf16.mxu1 %v17546_v20  ;;  %v17603_v0 = vld [vmem:[%s25145_s1 + $0x27c] ss:$100 sps:$4 sm:$0xff]   ;;  %v17606_v1 = vld [vmem:[%s25145_s1 + $0x284] ss:$100 sps:$4 sm:$0xff]   ;;  %v17612_v11 = vld [vmem:[%s25145_s1 + $0x34c] ss:$100 sps:$4 sm:$0xff]  }
 0x1e5   :  { %v17601_v2 = vld [vmem:[%s25145_s1 + $0x278] ss:$100 sps:$4 sm:$0xff]   ;;  %v17604_v6 = vld [vmem:[%s25145_s1 + $0x280] ss:$100 sps:$4 sm:$0xff]   ;;  %v17610_v14 = vld [vmem:[%s25145_s1 + $0x348] ss:$100 sps:$4 sm:$0xff]  }
 0x1e6   :  { %v17609_v7 = vld [vmem:[%s25145_s1 + $0x344] ss:$100 sps:$4 sm:$0xff]   ;;  %v17615_v20 = vld [vmem:[%s25145_s1 + $0x40c] ss:$100 sps:$4 sm:$0xff]  }
 0x1e7   :  { %10428 = vmatpush1.bf16.msra.mxu0 %v17541_v21  ;;  %10600 = vmatpush1.bf16.msra.mxu1 %v17544_v27  ;;  %v17607_v12 = vld [vmem:[%s25145_s1 + $0x340] ss:$100 sps:$4 sm:$0xff]   ;;  %v17618_v21 = vld [vmem:[%s25145_s1 + $0x414] ss:$100 sps:$4 sm:$0xff]   ;;  %v17613_v27 = vld [vmem:[%s25145_s1 + $0x408] ss:$100 sps:$4 sm:$0xff]  }
 0x1e8   :  { %10429 = vmatprep.subr.bf16.mxu0 %v17549_v16  ;;  %10601 = vmatprep.subr.bf16.mxu1 %v17552_v28  ;;  %v17616_v16 = vld [vmem:[%s25145_s1 + $0x410] ss:$100 sps:$4 sm:$0xff]  }
 0x1e9   :  { %v17621_v28 = vld [vmem:[%s25145_s1 + $0x4d4] ss:$100 sps:$4 sm:$0xff]  }
 0x1eb   :  { %10430 = vmatpush1.bf16.msra.mxu0 %v17547_v29  ;;  %10602 = vmatpush1.bf16.msra.mxu1 %v17550_v30  ;;  %v17624_v29 = vld [vmem:[%s25145_s1 + $0x4dc] ss:$100 sps:$4 sm:$0xff]   ;;  %v17619_v30 = vld [vmem:[%s25145_s1 + $0x4d0] ss:$100 sps:$4 sm:$0xff]  }
 0x1ec   :  { %10431 = vmatprep.subr.bf16.mxu0 %v17555_v31  ;;  %10603 = vmatprep.subr.bf16.mxu1 %v17558_v32  ;;  %v17622_v31 = vld [vmem:[%s25145_s1 + $0x4d8] ss:$100 sps:$4 sm:$0xff]  }
 0x1ed   :  { %v17627_v32 = vld [vmem:[%s25145_s1 + $0x59c] ss:$100 sps:$4 sm:$0xff]  }
 0x1ef   :  { %10432 = vmatpush1.bf16.msra.mxu0 %v17553_v35  ;;  %10604 = vmatpush1.bf16.msra.mxu1 %v17556_v36  ;;  %v17630_v35 = vld [vmem:[%s25145_s1 + $0x5a4] ss:$100 sps:$4 sm:$0xff]   ;;  %v17625_v36 = vld [vmem:[%s25145_s1 + $0x598] ss:$100 sps:$4 sm:$0xff]  }
 0x1f0   :  { %10433 = vmatprep.subr.bf16.mxu0 %v17561_v37  ;;  %10605 = vmatprep.subr.bf16.mxu1 %v17564_v25  ;;  %v17628_v37 = vld [vmem:[%s25145_s1 + $0x5a0] ss:$100 sps:$4 sm:$0xff]  }
 0x1f1   :  { %v17633_v25 = vld [vmem:[%s25145_s1 + $0x664] ss:$100 sps:$4 sm:$0xff]  }
 0x1f3   :  { %10434 = vmatpush1.bf16.msra.mxu0 %v17559_v26  ;;  %10606 = vmatpush1.bf16.msra.mxu1 %v17562_v38  ;;  %v17636_v26 = vld [vmem:[%s25145_s1 + $0x66c] ss:$100 sps:$4 sm:$0xff]   ;;  %v17631_v38 = vld [vmem:[%s25145_s1 + $0x660] ss:$100 sps:$4 sm:$0xff]  }
 0x1f4   :  { %10435 = vmatprep.subr.bf16.mxu0 %v17567_v39  ;;  %10607 = vmatprep.subr.bf16.mxu1 %v17570_v40  ;;  %v17634_v39 = vld [vmem:[%s25145_s1 + $0x668] ss:$100 sps:$4 sm:$0xff]  }
 0x1f5   :  { %v17639_v40 = vld [vmem:[%s25145_s1 + $0x72c] ss:$100 sps:$4 sm:$0xff]  }
 0x1f7   :  { %10436 = vmatpush1.bf16.msra.mxu0 %v17565_v41  ;;  %10608 = vmatpush1.bf16.msra.mxu1 %v17568_v42  ;;  %v17642_v41 = vld [vmem:[%s25145_s1 + $0x734] ss:$100 sps:$4 sm:$0xff]   ;;  %v17637_v42 = vld [vmem:[%s25145_s1 + $0x728] ss:$100 sps:$4 sm:$0xff]  }
 0x1f8   :  { %10437 = vmatprep.subr.bf16.mxu0 %v17573_v43  ;;  %10609 = vmatprep.subr.bf16.mxu1 %v17576_v44  ;;  %v17640_v43 = vld [vmem:[%s25145_s1 + $0x730] ss:$100 sps:$4 sm:$0xff]  }
 0x1f9   :  { %v17645_v44 = vld [vmem:[%s25145_s1 + $0x7f4] ss:$100 sps:$4 sm:$0xff]  }
 0x1fb   :  { %10438 = vmatpush1.bf16.msra.mxu0 %v17571_v45  ;;  %10610 = vmatpush1.bf16.msra.mxu1 %v17574_v46  ;;  %v17648_v45 = vld [vmem:[%s25145_s1 + $0x7fc] ss:$100 sps:$4 sm:$0xff]   ;;  %v17643_v46 = vld [vmem:[%s25145_s1 + $0x7f0] ss:$100 sps:$4 sm:$0xff]  }
 0x1fc   :  { %10439 = vmatprep.subr.bf16.mxu0 %v17579_v47  ;;  %10611 = vmatprep.subr.bf16.mxu1 %v17582_v48  ;;  %v17646_v47 = vld [vmem:[%s25145_s1 + $0x7f8] ss:$100 sps:$4 sm:$0xff]  }
 0x1fd   :  { %v17651_v48 = vld [vmem:[%s25145_s1 + $0x8bc] ss:$100 sps:$4 sm:$0xff]  }
 0x1ff   :  { %10440 = vmatpush1.bf16.msra.mxu0 %v17577_v49  ;;  %10612 = vmatpush1.bf16.msra.mxu1 %v17580_v51  ;;  %v17654_v49 = vld [vmem:[%s25145_s1 + $0x8c4] ss:$100 sps:$4 sm:$0xff]   ;;  %v17649_v51 = vld [vmem:[%s25145_s1 + $0x8b8] ss:$100 sps:$4 sm:$0xff]  }
 0x200   :  { %10624 = vmatprep.subr.bf16.mxu0 %v17585_v52  ;;  %10796 = vmatprep.subr.bf16.mxu1 %v17588_v53  ;;  %v17652_v52 = vld [vmem:[%s25145_s1 + $0x8c0] ss:$100 sps:$4 sm:$0xff]  }
 0x201   :  { %v17657_v53 = vld [vmem:[%s25145_s1 + $0x984] ss:$100 sps:$4 sm:$0xff]  }
 0x202   :  { %10442 = vmatmul.mubr.bf16.vlgmr.msra.gmra.mrb[4].mxu0 %v20276_v33  ;;  %10614 = vmatmul.mubr.bf16.vlgmr.msra.gmra.mrb[4].mxu1 %v20276_v33 }
 0x203   :  { %10625 = vmatpush1.bf16.msra.mxu0 %v17583_v54  ;;  %10797 = vmatpush1.bf16.msra.mxu1 %v17586_v55  ;;  %v17660_v54 = vld [vmem:[%s25145_s1 + $0x98c] ss:$100 sps:$4 sm:$0xff]   ;;  %v17655_v55 = vld [vmem:[%s25145_s1 + $0x980] ss:$100 sps:$4 sm:$0xff]  }
 0x204   :  { %10626 = vmatprep.subr.bf16.mxu0 %v17591_v56  ;;  %10798 = vmatprep.subr.bf16.mxu1 %v17594_v57  ;;  %v17658_v56 = vld [vmem:[%s25145_s1 + $0x988] ss:$100 sps:$4 sm:$0xff]  }
 0x205   :  { %10656 = vmatprep.mubr.bf16.mxu0 %v19576_v50  ;;  %10828 = vmatprep.mubr.bf16.mxu1 %v19576_v50  ;;  %v17663_v57 = vld [vmem:[%s25145_s1 + $0xa4c] ss:$100 sps:$4 sm:$0xff]  }
 0x207   :  { %10627 = vmatpush1.bf16.msra.mxu0 %v17589_v58  ;;  %10799 = vmatpush1.bf16.msra.mxu1 %v17592_v59  ;;  %v17666_v58 = vld [vmem:[%s25145_s1 + $0xa54] ss:$100 sps:$4 sm:$0xff]   ;;  %v17661_v59 = vld [vmem:[%s25145_s1 + $0xa48] ss:$100 sps:$4 sm:$0xff]  }
 0x208   :  { %10628 = vmatprep.subr.bf16.mxu0 %v17597_v60  ;;  %10800 = vmatprep.subr.bf16.mxu1 %v17600_v61  ;;  %v17664_v60 = vld [vmem:[%s25145_s1 + $0xa50] ss:$100 sps:$4 sm:$0xff]  }
 0x209   :  { %v17669_v61 = vld [vmem:[%s25145_s1 + $0xb14] ss:$100 sps:$4 sm:$0xff]  }
 0x20b   :  { %10629 = vmatpush1.bf16.msra.mxu0 %v17595_v62  ;;  %10801 = vmatpush1.bf16.msra.mxu1 %v17598_v63  ;;  %v17672_v62 = vld [vmem:[%s25145_s1 + $0xb1c] ss:$100 sps:$4 sm:$0xff]   ;;  %v17667_v63 = vld [vmem:[%s25145_s1 + $0xb10] ss:$100 sps:$4 sm:$0xff]  }
 0x20c   :  { %10630 = vmatprep.subr.bf16.mxu0 %v17603_v0  ;;  %10802 = vmatprep.subr.bf16.mxu1 %v17606_v1  ;;  %v17670_v0 = vld [vmem:[%s25145_s1 + $0xb18] ss:$100 sps:$4 sm:$0xff]  }
 0x20d   :  { %v17675_v1 = vld [vmem:[%s25145_s1 + $0xbdc] ss:$100 sps:$4 sm:$0xff]  }
 0x20f   :  { %10631 = vmatpush1.bf16.msra.mxu0 %v17601_v2  ;;  %10803 = vmatpush1.bf16.msra.mxu1 %v17604_v6  ;;  %v17678_v2 = vld [vmem:[%s25145_s1 + $0xbe4] ss:$100 sps:$4 sm:$0xff]   ;;  %v17673_v6 = vld [vmem:[%s25145_s1 + $0xbd8] ss:$100 sps:$4 sm:$0xff]  }
 0x210   :  { %10632 = vmatprep.subr.bf16.mxu0 %v17609_v7  ;;  %10804 = vmatprep.subr.bf16.mxu1 %v17612_v11  ;;  %v17676_v7 = vld [vmem:[%s25145_s1 + $0xbe0] ss:$100 sps:$4 sm:$0xff]  }
 0x211   :  { %v17681_v11 = vld [vmem:[%s25145_s1 + $0xca4] ss:$100 sps:$4 sm:$0xff]  }
 0x213   :  { %10633 = vmatpush1.bf16.msra.mxu0 %v17607_v12  ;;  %10805 = vmatpush1.bf16.msra.mxu1 %v17610_v14  ;;  %v17684_v12 = vld [vmem:[%s25145_s1 + $0xcac] ss:$100 sps:$4 sm:$0xff]   ;;  %v17679_v14 = vld [vmem:[%s25145_s1 + $0xca0] ss:$100 sps:$4 sm:$0xff]  }
 0x214   :  { %10634 = vmatprep.subr.bf16.mxu0 %v17615_v20  ;;  %10806 = vmatprep.subr.bf16.mxu1 %v17618_v21  ;;  %v17682_v20 = vld [vmem:[%s25145_s1 + $0xca8] ss:$100 sps:$4 sm:$0xff]  }
 0x215   :  { %v17687_v21 = vld [vmem:[%s25145_s1 + $0xd6c] ss:$100 sps:$4 sm:$0xff]  }
 0x217   :  { %10635 = vmatpush1.bf16.msra.mxu0 %v17613_v27  ;;  %10807 = vmatpush1.bf16.msra.mxu1 %v17616_v16  ;;  %v17690_v27 = vld [vmem:[%s25145_s1 + $0xd74] ss:$100 sps:$4 sm:$0xff]   ;;  %v17685_v16 = vld [vmem:[%s25145_s1 + $0xd68] ss:$100 sps:$4 sm:$0xff]  }
 0x218   :  { %10636 = vmatprep.subr.bf16.mxu0 %v17621_v28  ;;  %10808 = vmatprep.subr.bf16.mxu1 %v17624_v29  ;;  %v17688_v28 = vld [vmem:[%s25145_s1 + $0xd70] ss:$100 sps:$4 sm:$0xff]  }
 0x219   :  { %v17693_v29 = vld [vmem:[%s25145_s1 + $0xe34] ss:$100 sps:$4 sm:$0xff]  }
 0x21b   :  { %10637 = vmatpush1.bf16.msra.mxu0 %v17619_v30  ;;  %10809 = vmatpush1.bf16.msra.mxu1 %v17622_v31  ;;  %v17696_v30 = vld [vmem:[%s25145_s1 + $0xe3c] ss:$100 sps:$4 sm:$0xff]   ;;  %v17691_v31 = vld [vmem:[%s25145_s1 + $0xe30] ss:$100 sps:$4 sm:$0xff]  }
 0x21c   :  { %10638 = vmatprep.subr.bf16.mxu0 %v17627_v32  ;;  %10810 = vmatprep.subr.bf16.mxu1 %v17630_v35  ;;  %v17694_v32 = vld [vmem:[%s25145_s1 + $0xe38] ss:$100 sps:$4 sm:$0xff]  }
 0x21d   :  { %v17699_v35 = vld [vmem:[%s25145_s1 + $0xefc] ss:$100 sps:$4 sm:$0xff]  }
 0x21f   :  { %10639 = vmatpush1.bf16.msra.mxu0 %v17625_v36  ;;  %10811 = vmatpush1.bf16.msra.mxu1 %v17628_v37  ;;  %v17702_v36 = vld [vmem:[%s25145_s1 + $0xf04] ss:$100 sps:$4 sm:$0xff]   ;;  %v17697_v37 = vld [vmem:[%s25145_s1 + $0xef8] ss:$100 sps:$4 sm:$0xff]  }
 0x220   :  { %10640 = vmatprep.subr.bf16.mxu0 %v17633_v25  ;;  %10812 = vmatprep.subr.bf16.mxu1 %v17636_v26  ;;  %v17700_v25 = vld [vmem:[%s25145_s1 + $0xf00] ss:$100 sps:$4 sm:$0xff]  }
 0x221   :  { %v17705_v26 = vld [vmem:[%s25145_s1 + $0xfc4] ss:$100 sps:$4 sm:$0xff]  }
 0x223   :  { %10641 = vmatpush1.bf16.msra.mxu0 %v17631_v38  ;;  %10813 = vmatpush1.bf16.msra.mxu1 %v17634_v39  ;;  %v17708_v38 = vld [vmem:[%s25145_s1 + $0xfcc] ss:$100 sps:$4 sm:$0xff]   ;;  %v17703_v39 = vld [vmem:[%s25145_s1 + $0xfc0] ss:$100 sps:$4 sm:$0xff]  }
 0x224   :  { %10642 = vmatprep.subr.bf16.mxu0 %v17639_v40  ;;  %10814 = vmatprep.subr.bf16.mxu1 %v17642_v41  ;;  %v17706_v40 = vld [vmem:[%s25145_s1 + $0xfc8] ss:$100 sps:$4 sm:$0xff]  }
 0x225   :  { %v17711_v41 = vld [vmem:[%s25145_s1 + $0x108c] ss:$100 sps:$4 sm:$0xff]  }
 0x227   :  { %10643 = vmatpush1.bf16.msra.mxu0 %v17637_v42  ;;  %10815 = vmatpush1.bf16.msra.mxu1 %v17640_v43  ;;  %v17714_v42 = vld [vmem:[%s25145_s1 + $0x1094] ss:$100 sps:$4 sm:$0xff]   ;;  %v17709_v43 = vld [vmem:[%s25145_s1 + $0x1088] ss:$100 sps:$4 sm:$0xff]  }
 0x228   :  { %10644 = vmatprep.subr.bf16.mxu0 %v17645_v44  ;;  %10816 = vmatprep.subr.bf16.mxu1 %v17648_v45  ;;  %v17712_v44 = vld [vmem:[%s25145_s1 + $0x1090] ss:$100 sps:$4 sm:$0xff]  }
 0x229   :  { %v17717_v45 = vld [vmem:[%s25145_s1 + $0x1154] ss:$100 sps:$4 sm:$0xff]  }
 0x22b   :  { %10645 = vmatpush1.bf16.msra.mxu0 %v17643_v46  ;;  %10817 = vmatpush1.bf16.msra.mxu1 %v17646_v47  ;;  %v17720_v46 = vld [vmem:[%s25145_s1 + $0x115c] ss:$100 sps:$4 sm:$0xff]   ;;  %v17715_v47 = vld [vmem:[%s25145_s1 + $0x1150] ss:$100 sps:$4 sm:$0xff]  }
 0x22c   :  { %10646 = vmatprep.subr.bf16.mxu0 %v17651_v48  ;;  %10818 = vmatprep.subr.bf16.mxu1 %v17654_v49  ;;  %v17718_v48 = vld [vmem:[%s25145_s1 + $0x1158] ss:$100 sps:$4 sm:$0xff]  }
 0x22d   :  { %v17723_v49 = vld [vmem:[%s25145_s1 + $0x121c] ss:$100 sps:$4 sm:$0xff]  }
 0x22f   :  { %10647 = vmatpush1.bf16.msra.mxu0 %v17649_v51  ;;  %10819 = vmatpush1.bf16.msra.mxu1 %v17652_v52  ;;  %v17726_v51 = vld [vmem:[%s25145_s1 + $0x1224] ss:$100 sps:$4 sm:$0xff]   ;;  %v17721_v52 = vld [vmem:[%s25145_s1 + $0x1218] ss:$100 sps:$4 sm:$0xff]  }
 0x230   :  { %10648 = vmatprep.subr.bf16.mxu0 %v17657_v53  ;;  %10820 = vmatprep.subr.bf16.mxu1 %v17660_v54  ;;  %v17724_v53 = vld [vmem:[%s25145_s1 + $0x1220] ss:$100 sps:$4 sm:$0xff]  }
 0x231   :  { %v17729_v54 = vld [vmem:[%s25145_s1 + $0x12e4] ss:$100 sps:$4 sm:$0xff]  }
 0x233   :  { %10649 = vmatpush1.bf16.msra.mxu0 %v17655_v55  ;;  %10821 = vmatpush1.bf16.msra.mxu1 %v17658_v56  ;;  %v17732_v55 = vld [vmem:[%s25145_s1 + $0x12ec] ss:$100 sps:$4 sm:$0xff]   ;;  %v17727_v56 = vld [vmem:[%s25145_s1 + $0x12e0] ss:$100 sps:$4 sm:$0xff]  }
 0x234   :  { %10650 = vmatprep.subr.bf16.mxu0 %v17663_v57  ;;  %10822 = vmatprep.subr.bf16.mxu1 %v17666_v58  ;;  %v17730_v57 = vld [vmem:[%s25145_s1 + $0x12e8] ss:$100 sps:$4 sm:$0xff]  }
 0x235   :  { %v17735_v58 = vld [vmem:[%s25145_s1 + $0x13ac] ss:$100 sps:$4 sm:$0xff]  }
 0x237   :  { %10651 = vmatpush1.bf16.msra.mxu0 %v17661_v59  ;;  %10823 = vmatpush1.bf16.msra.mxu1 %v17664_v60  ;;  %v17738_v59 = vld [vmem:[%s25145_s1 + $0x13b4] ss:$100 sps:$4 sm:$0xff]   ;;  %v17733_v60 = vld [vmem:[%s25145_s1 + $0x13a8] ss:$100 sps:$4 sm:$0xff]  }
 0x238   :  { %10652 = vmatprep.subr.bf16.mxu0 %v17669_v61  ;;  %10824 = vmatprep.subr.bf16.mxu1 %v17672_v62  ;;  %v17736_v61 = vld [vmem:[%s25145_s1 + $0x13b0] ss:$100 sps:$4 sm:$0xff]  }
 0x239   :  { %v17741_v62 = vld [vmem:[%s25145_s1 + $0x1474] ss:$100 sps:$4 sm:$0xff]  }
 0x23b   :  { %10653 = vmatpush1.bf16.msra.mxu0 %v17667_v63  ;;  %10825 = vmatpush1.bf16.msra.mxu1 %v17670_v0  ;;  %v17744_v63 = vld [vmem:[%s25145_s1 + $0x147c] ss:$100 sps:$4 sm:$0xff]   ;;  %v17739_v0 = vld [vmem:[%s25145_s1 + $0x1470] ss:$100 sps:$4 sm:$0xff]  }
 0x23c   :  { %10654 = vmatprep.subr.bf16.mxu0 %v17675_v1  ;;  %10826 = vmatprep.subr.bf16.mxu1 %v17678_v2  ;;  %v17742_v1 = vld [vmem:[%s25145_s1 + $0x1478] ss:$100 sps:$4 sm:$0xff]  }
 0x23d   :  { %v17747_v2 = vld [vmem:[%s25145_s1 + $0x153c] ss:$100 sps:$4 sm:$0xff]  }
 0x23f   :  { %10655 = vmatpush1.bf16.msra.mxu0 %v17673_v6  ;;  %10827 = vmatpush1.bf16.msra.mxu1 %v17676_v7  ;;  %v17750_v6 = vld [vmem:[%s25145_s1 + $0x1544] ss:$100 sps:$4 sm:$0xff]   ;;  %v17745_v7 = vld [vmem:[%s25145_s1 + $0x1538] ss:$100 sps:$4 sm:$0xff]  }
 0x240   :  { %10667 = vmatprep.subr.bf16.mxu0 %v17681_v11  ;;  %10839 = vmatprep.subr.bf16.mxu1 %v17684_v12  ;;  %v17748_v11 = vld [vmem:[%s25145_s1 + $0x1540] ss:$100 sps:$4 sm:$0xff]  }
 0x241   :  { %v17753_v12 = vld [vmem:[%s25145_s1 + $0x1604] ss:$100 sps:$4 sm:$0xff]  }
 0x242   :  { %10657 = vmatmul.mubr.bf16.vlgmr.msra.gmra.mrb[8].mxu0 %v19634_v5  ;;  %10829 = vmatmul.mubr.bf16.vlgmr.msra.gmra.mrb[8].mxu1 %v19634_v5 }
 0x243   :  { %10668 = vmatpush1.bf16.msra.mxu0 %v17679_v14  ;;  %10840 = vmatpush1.bf16.msra.mxu1 %v17682_v20  ;;  %v17756_v14 = vld [vmem:[%s25145_s1 + $0x160c] ss:$100 sps:$4 sm:$0xff]   ;;  %v17751_v20 = vld [vmem:[%s25145_s1 + $0x1600] ss:$100 sps:$4 sm:$0xff]  }
 0x244   :  { %10669 = vmatprep.subr.bf16.mxu0 %v17687_v21  ;;  %10841 = vmatprep.subr.bf16.mxu1 %v17690_v27  ;;  %v17754_v21 = vld [vmem:[%s25145_s1 + $0x1608] ss:$100 sps:$4 sm:$0xff]  }
 0x245   :  { %10699 = vmatprep.mubr.bf16.mxu0 %v19728_v34  ;;  %10871 = vmatprep.mubr.bf16.mxu1 %v19728_v34  ;;  %v17759_v27 = vld [vmem:[%s25145_s1 + $0x16cc] ss:$100 sps:$4 sm:$0xff]  }
 0x247   :  { %10670 = vmatpush1.bf16.msra.mxu0 %v17685_v16  ;;  %10842 = vmatpush1.bf16.msra.mxu1 %v17688_v28  ;;  %v17762_v16 = vld [vmem:[%s25145_s1 + $0x16d4] ss:$100 sps:$4 sm:$0xff]   ;;  %v17757_v28 = vld [vmem:[%s25145_s1 + $0x16c8] ss:$100 sps:$4 sm:$0xff]  }
 0x248   :  { %10671 = vmatprep.subr.bf16.mxu0 %v17693_v29  ;;  %10843 = vmatprep.subr.bf16.mxu1 %v17696_v30  ;;  %v17760_v29 = vld [vmem:[%s25145_s1 + $0x16d0] ss:$100 sps:$4 sm:$0xff]  }
 0x249   :  { %v17765_v30 = vld [vmem:[%s25145_s1 + $0x1794] ss:$100 sps:$4 sm:$0xff]  }
 0x24b   :  { %10672 = vmatpush1.bf16.msra.mxu0 %v17691_v31  ;;  %10844 = vmatpush1.bf16.msra.mxu1 %v17694_v32  ;;  %v17768_v31 = vld [vmem:[%s25145_s1 + $0x179c] ss:$100 sps:$4 sm:$0xff]   ;;  %v17763_v32 = vld [vmem:[%s25145_s1 + $0x1790] ss:$100 sps:$4 sm:$0xff]  }
 0x24c   :  { %10673 = vmatprep.subr.bf16.mxu0 %v17699_v35  ;;  %10845 = vmatprep.subr.bf16.mxu1 %v17702_v36  ;;  %v17766_v35 = vld [vmem:[%s25145_s1 + $0x1798] ss:$100 sps:$4 sm:$0xff]  }
 0x24d   :  { %v17771_v36 = vld [vmem:[%s25145_s1 + $0x185c] ss:$100 sps:$4 sm:$0xff]  }
 0x24f   :  { %10674 = vmatpush1.bf16.msra.mxu0 %v17697_v37  ;;  %10846 = vmatpush1.bf16.msra.mxu1 %v17700_v25  ;;  %v17774_v37 = vld [vmem:[%s25145_s1 + $0x1864] ss:$100 sps:$4 sm:$0xff]   ;;  %v17769_v25 = vld [vmem:[%s25145_s1 + $0x1858] ss:$100 sps:$4 sm:$0xff]  }
 0x250   :  { %10675 = vmatprep.subr.bf16.mxu0 %v17705_v26  ;;  %10847 = vmatprep.subr.bf16.mxu1 %v17708_v38  ;;  %v17772_v26 = vld [vmem:[%s25145_s1 + $0x1860] ss:$100 sps:$4 sm:$0xff]  }
 0x251   :  { %v17777_v38 = vld [vmem:[%s25145_s1 + $0x1924] ss:$100 sps:$4 sm:$0xff]  }
 0x253   :  { %10676 = vmatpush1.bf16.msra.mxu0 %v17703_v39  ;;  %10848 = vmatpush1.bf16.msra.mxu1 %v17706_v40  ;;  %v17780_v39 = vld [vmem:[%s25145_s1 + $0x192c] ss:$100 sps:$4 sm:$0xff]   ;;  %v17775_v40 = vld [vmem:[%s25145_s1 + $0x1920] ss:$100 sps:$4 sm:$0xff]  }
 0x254   :  { %10677 = vmatprep.subr.bf16.mxu0 %v17711_v41  ;;  %10849 = vmatprep.subr.bf16.mxu1 %v17714_v42  ;;  %v17778_v41 = vld [vmem:[%s25145_s1 + $0x1928] ss:$100 sps:$4 sm:$0xff]  }
 0x255   :  { %v17783_v42 = vld [vmem:[%s25145_s1 + $0x19ec] ss:$100 sps:$4 sm:$0xff]  }
 0x257   :  { %10678 = vmatpush1.bf16.msra.mxu0 %v17709_v43  ;;  %10850 = vmatpush1.bf16.msra.mxu1 %v17712_v44  ;;  %v17786_v43 = vld [vmem:[%s25145_s1 + $0x19f4] ss:$100 sps:$4 sm:$0xff]   ;;  %v17781_v44 = vld [vmem:[%s25145_s1 + $0x19e8] ss:$100 sps:$4 sm:$0xff]  }
 0x258   :  { %10679 = vmatprep.subr.bf16.mxu0 %v17717_v45  ;;  %10851 = vmatprep.subr.bf16.mxu1 %v17720_v46  ;;  %v17784_v45 = vld [vmem:[%s25145_s1 + $0x19f0] ss:$100 sps:$4 sm:$0xff]  }
 0x259   :  { %v17789_v46 = vld [vmem:[%s25145_s1 + $0x1ab4] ss:$100 sps:$4 sm:$0xff]  }
 0x25b   :  { %10680 = vmatpush1.bf16.msra.mxu0 %v17715_v47  ;;  %10852 = vmatpush1.bf16.msra.mxu1 %v17718_v48  ;;  %v17792_v47 = vld [vmem:[%s25145_s1 + $0x1abc] ss:$100 sps:$4 sm:$0xff]   ;;  %v17787_v48 = vld [vmem:[%s25145_s1 + $0x1ab0] ss:$100 sps:$4 sm:$0xff]  }
 0x25c   :  { %10681 = vmatprep.subr.bf16.mxu0 %v17723_v49  ;;  %10853 = vmatprep.subr.bf16.mxu1 %v17726_v51  ;;  %v17790_v49 = vld [vmem:[%s25145_s1 + $0x1ab8] ss:$100 sps:$4 sm:$0xff]  }
 0x25d   :  { %v17795_v51 = vld [vmem:[%s25145_s1 + $0x1b7c] ss:$100 sps:$4 sm:$0xff]  }
 0x25f   :  { %10682 = vmatpush1.bf16.msra.mxu0 %v17721_v52  ;;  %10854 = vmatpush1.bf16.msra.mxu1 %v17724_v53  ;;  %v17798_v52 = vld [vmem:[%s25145_s1 + $0x1b84] ss:$100 sps:$4 sm:$0xff]   ;;  %v17793_v53 = vld [vmem:[%s25145_s1 + $0x1b78] ss:$100 sps:$4 sm:$0xff]  }
 0x260   :  { %10683 = vmatprep.subr.bf16.mxu0 %v17729_v54  ;;  %10855 = vmatprep.subr.bf16.mxu1 %v17732_v55  ;;  %v17796_v54 = vld [vmem:[%s25145_s1 + $0x1b80] ss:$100 sps:$4 sm:$0xff]  }
 0x261   :  { %v17801_v55 = vld [vmem:[%s25145_s1 + $0x1c44] ss:$100 sps:$4 sm:$0xff]  }
 0x263   :  { %10684 = vmatpush1.bf16.msra.mxu0 %v17727_v56  ;;  %10856 = vmatpush1.bf16.msra.mxu1 %v17730_v57  ;;  %v17804_v56 = vld [vmem:[%s25145_s1 + $0x1c4c] ss:$100 sps:$4 sm:$0xff]   ;;  %v17799_v57 = vld [vmem:[%s25145_s1 + $0x1c40] ss:$100 sps:$4 sm:$0xff]  }
 0x264   :  { %10685 = vmatprep.subr.bf16.mxu0 %v17735_v58  ;;  %10857 = vmatprep.subr.bf16.mxu1 %v17738_v59  ;;  %v17802_v58 = vld [vmem:[%s25145_s1 + $0x1c48] ss:$100 sps:$4 sm:$0xff]  }
 0x265   :  { %v17807_v59 = vld [vmem:[%s25145_s1 + $0x1d0c] ss:$100 sps:$4 sm:$0xff]  }
 0x267   :  { %10686 = vmatpush1.bf16.msra.mxu0 %v17733_v60  ;;  %10858 = vmatpush1.bf16.msra.mxu1 %v17736_v61  ;;  %v17810_v60 = vld [vmem:[%s25145_s1 + $0x1d14] ss:$100 sps:$4 sm:$0xff]   ;;  %v17805_v61 = vld [vmem:[%s25145_s1 + $0x1d08] ss:$100 sps:$4 sm:$0xff]  }
 0x268   :  { %10687 = vmatprep.subr.bf16.mxu0 %v17741_v62  ;;  %10859 = vmatprep.subr.bf16.mxu1 %v17744_v63  ;;  %v17808_v62 = vld [vmem:[%s25145_s1 + $0x1d10] ss:$100 sps:$4 sm:$0xff]  }
 0x269   :  { %v17813_v63 = vld [vmem:[%s25145_s1 + $0x1dd4] ss:$100 sps:$4 sm:$0xff]  }
 0x26b   :  { %10688 = vmatpush1.bf16.msra.mxu0 %v17739_v0  ;;  %10860 = vmatpush1.bf16.msra.mxu1 %v17742_v1  ;;  %v17816_v0 = vld [vmem:[%s25145_s1 + $0x1ddc] ss:$100 sps:$4 sm:$0xff]   ;;  %v17811_v1 = vld [vmem:[%s25145_s1 + $0x1dd0] ss:$100 sps:$4 sm:$0xff]  }
 0x26c   :  { %10689 = vmatprep.subr.bf16.mxu0 %v17747_v2  ;;  %10861 = vmatprep.subr.bf16.mxu1 %v17750_v6  ;;  %v17814_v2 = vld [vmem:[%s25145_s1 + $0x1dd8] ss:$100 sps:$4 sm:$0xff]  }
 0x26d   :  { %v17819_v6 = vld [vmem:[%s25145_s1 + $0x1e9c] ss:$100 sps:$4 sm:$0xff]  }
 0x26f   :  { %10690 = vmatpush1.bf16.msra.mxu0 %v17745_v7  ;;  %10862 = vmatpush1.bf16.msra.mxu1 %v17748_v11  ;;  %v17822_v7 = vld [vmem:[%s25145_s1 + $0x1ea4] ss:$100 sps:$4 sm:$0xff]   ;;  %v17817_v11 = vld [vmem:[%s25145_s1 + $0x1e98] ss:$100 sps:$4 sm:$0xff]  }
 0x270   :  { %10691 = vmatprep.subr.bf16.mxu0 %v17753_v12  ;;  %10863 = vmatprep.subr.bf16.mxu1 %v17756_v14  ;;  %v17820_v12 = vld [vmem:[%s25145_s1 + $0x1ea0] ss:$100 sps:$4 sm:$0xff]  }
 0x271   :  { %v17825_v14 = vld [vmem:[%s25145_s1 + $0x1f64] ss:$100 sps:$4 sm:$0xff]  }
 0x273   :  { %10692 = vmatpush1.bf16.msra.mxu0 %v17751_v20  ;;  %10864 = vmatpush1.bf16.msra.mxu1 %v17754_v21  ;;  %v17828_v20 = vld [vmem:[%s25145_s1 + $0x1f6c] ss:$100 sps:$4 sm:$0xff]   ;;  %v17823_v21 = vld [vmem:[%s25145_s1 + $0x1f60] ss:$100 sps:$4 sm:$0xff]  }
 0x274   :  { %10693 = vmatprep.subr.bf16.mxu0 %v17759_v27  ;;  %10865 = vmatprep.subr.bf16.mxu1 %v17762_v16  ;;  %v17826_v27 = vld [vmem:[%s25145_s1 + $0x1f68] ss:$100 sps:$4 sm:$0xff]  }
 0x275   :  { %v17831_v16 = vld [vmem:[%s25145_s1 + $0x202c] ss:$100 sps:$4 sm:$0xff]  }
 0x277   :  { %10694 = vmatpush1.bf16.msra.mxu0 %v17757_v28  ;;  %10866 = vmatpush1.bf16.msra.mxu1 %v17760_v29  ;;  %v17834_v28 = vld [vmem:[%s25145_s1 + $0x2034] ss:$100 sps:$4 sm:$0xff]   ;;  %v17829_v29 = vld [vmem:[%s25145_s1 + $0x2028] ss:$100 sps:$4 sm:$0xff]  }
 0x278   :  { %10695 = vmatprep.subr.bf16.mxu0 %v17765_v30  ;;  %10867 = vmatprep.subr.bf16.mxu1 %v17768_v31  ;;  %v17832_v30 = vld [vmem:[%s25145_s1 + $0x2030] ss:$100 sps:$4 sm:$0xff]  }
 0x279   :  { %v17837_v31 = vld [vmem:[%s25145_s1 + $0x20f4] ss:$100 sps:$4 sm:$0xff]  }
 0x27b   :  { %10696 = vmatpush1.bf16.msra.mxu0 %v17763_v32  ;;  %10868 = vmatpush1.bf16.msra.mxu1 %v17766_v35  ;;  %v17840_v32 = vld [vmem:[%s25145_s1 + $0x20fc] ss:$100 sps:$4 sm:$0xff]   ;;  %v17835_v35 = vld [vmem:[%s25145_s1 + $0x20f0] ss:$100 sps:$4 sm:$0xff]  }
 0x27c   :  { %10697 = vmatprep.subr.bf16.mxu0 %v17771_v36  ;;  %10869 = vmatprep.subr.bf16.mxu1 %v17774_v37  ;;  %v17838_v36 = vld [vmem:[%s25145_s1 + $0x20f8] ss:$100 sps:$4 sm:$0xff]  }
 0x27d   :  { %v17843_v37 = vld [vmem:[%s25145_s1 + $0x21bc] ss:$100 sps:$4 sm:$0xff]  }
 0x27f   :  { %10698 = vmatpush1.bf16.msra.mxu0 %v17769_v25  ;;  %10870 = vmatpush1.bf16.msra.mxu1 %v17772_v26  ;;  %v17846_v25 = vld [vmem:[%s25145_s1 + $0x21c4] ss:$100 sps:$4 sm:$0xff]   ;;  %v17841_v26 = vld [vmem:[%s25145_s1 + $0x21b8] ss:$100 sps:$4 sm:$0xff]  }
 0x280   :  { %10710 = vmatprep.subr.bf16.mxu0 %v17777_v38  ;;  %10882 = vmatprep.subr.bf16.mxu1 %v17780_v39  ;;  %v17844_v38 = vld [vmem:[%s25145_s1 + $0x21c0] ss:$100 sps:$4 sm:$0xff]  }
 0x281   :  { %v17849_v39 = vld [vmem:[%s25145_s1 + $0x2284] ss:$100 sps:$4 sm:$0xff]  }
 0x282   :  { %10700 = vmatmul.mubr.bf16.vlgmr.msra.gmra.mrb[8].mxu0 %v19854_v13  ;;  %10872 = vmatmul.mubr.bf16.vlgmr.msra.gmra.mrb[8].mxu1 %v19854_v13 }
 0x283   :  { %10711 = vmatpush1.bf16.msra.mxu0 %v17775_v40  ;;  %10883 = vmatpush1.bf16.msra.mxu1 %v17778_v41  ;;  %v17852_v40 = vld [vmem:[%s25145_s1 + $0x228c] ss:$100 sps:$4 sm:$0xff]   ;;  %v17847_v41 = vld [vmem:[%s25145_s1 + $0x2280] ss:$100 sps:$4 sm:$0xff]  }
 0x284   :  { %10712 = vmatprep.subr.bf16.mxu0 %v17783_v42  ;;  %10884 = vmatprep.subr.bf16.mxu1 %v17786_v43  ;;  %v17850_v42 = vld [vmem:[%s25145_s1 + $0x2288] ss:$100 sps:$4 sm:$0xff]  }
 0x285   :  { %10742 = vmatprep.mubr.bf16.mxu0 %v19874_v18  ;;  %10914 = vmatprep.mubr.bf16.mxu1 %v19874_v18  ;;  %v17855_v43 = vld [vmem:[%s25145_s1 + $0x234c] ss:$100 sps:$4 sm:$0xff]  }
 0x287   :  { %10713 = vmatpush1.bf16.msra.mxu0 %v17781_v44  ;;  %10885 = vmatpush1.bf16.msra.mxu1 %v17784_v45  ;;  %v17858_v44 = vld [vmem:[%s25145_s1 + $0x2354] ss:$100 sps:$4 sm:$0xff]   ;;  %v17853_v45 = vld [vmem:[%s25145_s1 + $0x2348] ss:$100 sps:$4 sm:$0xff]  }
 0x288   :  { %10714 = vmatprep.subr.bf16.mxu0 %v17789_v46  ;;  %10886 = vmatprep.subr.bf16.mxu1 %v17792_v47  ;;  %v17856_v46 = vld [vmem:[%s25145_s1 + $0x2350] ss:$100 sps:$4 sm:$0xff]  }
 0x289   :  { %v17861_v47 = vld [vmem:[%s25145_s1 + $0x2414] ss:$100 sps:$4 sm:$0xff]  }
 0x28b   :  { %10715 = vmatpush1.bf16.msra.mxu0 %v17787_v48  ;;  %10887 = vmatpush1.bf16.msra.mxu1 %v17790_v49  ;;  %v17864_v48 = vld [vmem:[%s25145_s1 + $0x241c] ss:$100 sps:$4 sm:$0xff]   ;;  %v17859_v49 = vld [vmem:[%s25145_s1 + $0x2410] ss:$100 sps:$4 sm:$0xff]  }
 0x28c   :  { %10716 = vmatprep.subr.bf16.mxu0 %v17795_v51  ;;  %10888 = vmatprep.subr.bf16.mxu1 %v17798_v52  ;;  %v17862_v51 = vld [vmem:[%s25145_s1 + $0x2418] ss:$100 sps:$4 sm:$0xff]  }
 0x28d   :  { %v17867_v52 = vld [vmem:[%s25145_s1 + $0x24dc] ss:$100 sps:$4 sm:$0xff]  }
 0x28f   :  { %10717 = vmatpush1.bf16.msra.mxu0 %v17793_v53  ;;  %10889 = vmatpush1.bf16.msra.mxu1 %v17796_v54  ;;  %v17870_v53 = vld [vmem:[%s25145_s1 + $0x24e4] ss:$100 sps:$4 sm:$0xff]   ;;  %v17865_v54 = vld [vmem:[%s25145_s1 + $0x24d8] ss:$100 sps:$4 sm:$0xff]  }
 0x290   :  { %10718 = vmatprep.subr.bf16.mxu0 %v17801_v55  ;;  %10890 = vmatprep.subr.bf16.mxu1 %v17804_v56  ;;  %v17868_v55 = vld [vmem:[%s25145_s1 + $0x24e0] ss:$100 sps:$4 sm:$0xff]  }
 0x291   :  { %v17873_v56 = vld [vmem:[%s25145_s1 + $0x25a4] ss:$100 sps:$4 sm:$0xff]  }
 0x293   :  { %10719 = vmatpush1.bf16.msra.mxu0 %v17799_v57  ;;  %10891 = vmatpush1.bf16.msra.mxu1 %v17802_v58  ;;  %v17876_v57 = vld [vmem:[%s25145_s1 + $0x25ac] ss:$100 sps:$4 sm:$0xff]   ;;  %v17871_v58 = vld [vmem:[%s25145_s1 + $0x25a0] ss:$100 sps:$4 sm:$0xff]  }
 0x294   :  { %10720 = vmatprep.subr.bf16.mxu0 %v17807_v59  ;;  %10892 = vmatprep.subr.bf16.mxu1 %v17810_v60  ;;  %v17874_v59 = vld [vmem:[%s25145_s1 + $0x25a8] ss:$100 sps:$4 sm:$0xff]  }
 0x295   :  { %v17879_v60 = vld [vmem:[%s25145_s1 + $0x266c] ss:$100 sps:$4 sm:$0xff]  }
 0x297   :  { %10721 = vmatpush1.bf16.msra.mxu0 %v17805_v61  ;;  %10893 = vmatpush1.bf16.msra.mxu1 %v17808_v62  ;;  %v17882_v61 = vld [vmem:[%s25145_s1 + $0x2674] ss:$100 sps:$4 sm:$0xff]   ;;  %v17877_v62 = vld [vmem:[%s25145_s1 + $0x2668] ss:$100 sps:$4 sm:$0xff]  }
 0x298   :  { %10722 = vmatprep.subr.bf16.mxu0 %v17813_v63  ;;  %10894 = vmatprep.subr.bf16.mxu1 %v17816_v0  ;;  %v17880_v63 = vld [vmem:[%s25145_s1 + $0x2670] ss:$100 sps:$4 sm:$0xff]  }
 0x299   :  { %v17885_v0 = vld [vmem:[%s25145_s1 + $0x2734] ss:$100 sps:$4 sm:$0xff]  }
 0x29b   :  { %10723 = vmatpush1.bf16.msra.mxu0 %v17811_v1  ;;  %10895 = vmatpush1.bf16.msra.mxu1 %v17814_v2  ;;  %v17888_v1 = vld [vmem:[%s25145_s1 + $0x273c] ss:$100 sps:$4 sm:$0xff]   ;;  %v17883_v2 = vld [vmem:[%s25145_s1 + $0x2730] ss:$100 sps:$4 sm:$0xff]  }
 0x29c   :  { %10724 = vmatprep.subr.bf16.mxu0 %v17819_v6  ;;  %10896 = vmatprep.subr.bf16.mxu1 %v17822_v7  ;;  %v17886_v6 = vld [vmem:[%s25145_s1 + $0x2738] ss:$100 sps:$4 sm:$0xff]  }
 0x29d   :  { %v17891_v7 = vld [vmem:[%s25145_s1 + $0x27fc] ss:$100 sps:$4 sm:$0xff]  }
 0x29f   :  { %10725 = vmatpush1.bf16.msra.mxu0 %v17817_v11  ;;  %10897 = vmatpush1.bf16.msra.mxu1 %v17820_v12  ;;  %v17894_v11 = vld [vmem:[%s25145_s1 + $0x2804] ss:$100 sps:$4 sm:$0xff]   ;;  %v17889_v12 = vld [vmem:[%s25145_s1 + $0x27f8] ss:$100 sps:$4 sm:$0xff]  }
 0x2a0   :  { %10726 = vmatprep.subr.bf16.mxu0 %v17825_v14  ;;  %10898 = vmatprep.subr.bf16.mxu1 %v17828_v20  ;;  %v17892_v14 = vld [vmem:[%s25145_s1 + $0x2800] ss:$100 sps:$4 sm:$0xff]  }
 0x2a1   :  { %v17897_v20 = vld [vmem:[%s25145_s1 + $0x28c4] ss:$100 sps:$4 sm:$0xff]  }
 0x2a3   :  { %10727 = vmatpush1.bf16.msra.mxu0 %v17823_v21  ;;  %10899 = vmatpush1.bf16.msra.mxu1 %v17826_v27  ;;  %v17900_v21 = vld [vmem:[%s25145_s1 + $0x28cc] ss:$100 sps:$4 sm:$0xff]   ;;  %v17895_v27 = vld [vmem:[%s25145_s1 + $0x28c0] ss:$100 sps:$4 sm:$0xff]  }
 0x2a4   :  { %10728 = vmatprep.subr.bf16.mxu0 %v17831_v16  ;;  %10900 = vmatprep.subr.bf16.mxu1 %v17834_v28  ;;  %v21735_v16 = vsub.s32 4, %v20906_v8  ;;  %v21738_v28 = vsub.s32 6, %v20906_v8 }
 0x2a7   :  { %10729 = vmatpush1.bf16.msra.mxu0 %v17829_v29  ;;  %10901 = vmatpush1.bf16.msra.mxu1 %v17832_v30  ;;  %v17898_v29 = vld [vmem:[%s25145_s1 + $0x28c8] ss:$100 sps:$4 sm:$0xff]   ;;  %v21744_v30 = vsub.s32 5, %v20906_v8 }
 0x2a8   :  { %10730 = vmatprep.subr.bf16.mxu0 %v17837_v31  ;;  %10902 = vmatprep.subr.bf16.mxu1 %v17840_v32  ;;  %v21747_v31 = vsub.s32 7, %v20906_v8  ;;  %v17903_v32 = vld [vmem:[%s25145_s1 + $0x298c] ss:$100 sps:$4 sm:$0xff]  }
 0x2ab   :  { %10731 = vmatpush1.bf16.msra.mxu0 %v17835_v35  ;;  %10903 = vmatpush1.bf16.msra.mxu1 %v17838_v36  ;;  %v17906_v35 = vld [vmem:[%s25145_s1 + $0x2994] ss:$100 sps:$4 sm:$0xff]   ;;  %v19381_v36 = vld [vmem:[%s25147_s2] sm:$0xff] }
 0x2ac   :  { %10732 = vmatprep.subr.bf16.mxu0 %v17843_v37  ;;  %10904 = vmatprep.subr.bf16.mxu1 %v17846_v25  ;;  %v1726_v37 = vrot.slane %v19381_v36, %v21735_v16  ;;  %v1734_v25 = vrot.slane %v19381_v36, %v21738_v28  ;;  %v1730_v8 = vrot.slane %v19381_v36, %v21744_v30 }
 0x2af   :  { %10733 = vmatpush1.bf16.msra.mxu0 %v17841_v26  ;;  %10905 = vmatpush1.bf16.msra.mxu1 %v17844_v38  ;;  %v1738_v26 = vrot.slane %v19381_v36, %v21747_v31  ;;  %v17901_v38 = vld [vmem:[%s25145_s1 + $0x2988] ss:$100 sps:$4 sm:$0xff]  }
 0x2b0   :  { %10734 = vmatprep.subr.bf16.mxu0 %v17849_v39  ;;  %10906 = vmatprep.subr.bf16.mxu1 %v17852_v40  ;;  %v17904_v39 = vld [vmem:[%s25145_s1 + $0x2990] ss:$100 sps:$4 sm:$0xff]  }
 0x2b1   :  { %v17909_v40 = vld [vmem:[%s25145_s1 + $0x2a54] ss:$100 sps:$4 sm:$0xff]  }
 0x2b3   :  { %10735 = vmatpush1.bf16.msra.mxu0 %v17847_v41  ;;  %10907 = vmatpush1.bf16.msra.mxu1 %v17850_v42  ;;  %v17912_v41 = vld [vmem:[%s25145_s1 + $0x2a5c] ss:$100 sps:$4 sm:$0xff]  }
 0x2b4   :  { %10736 = vmatprep.subr.bf16.mxu0 %v17855_v43  ;;  %10908 = vmatprep.subr.bf16.mxu1 %v17858_v44 }
 0x2b7   :  { %10737 = vmatpush1.bf16.msra.mxu0 %v17853_v45  ;;  %10909 = vmatpush1.bf16.msra.mxu1 %v17856_v46 }
 0x2b8   :  { %10738 = vmatprep.subr.bf16.mxu0 %v17861_v47  ;;  %10910 = vmatprep.subr.bf16.mxu1 %v17864_v48 }
 0x2bb   :  { %10739 = vmatpush1.bf16.msra.mxu0 %v17859_v49  ;;  %10911 = vmatpush1.bf16.msra.mxu1 %v17862_v51 }
 0x2bc   :  { %10740 = vmatprep.subr.bf16.mxu0 %v17867_v52  ;;  %10912 = vmatprep.subr.bf16.mxu1 %v17870_v53  ;;  %v17907_v53 = vld [vmem:[%s25145_s1 + $0x2a50] ss:$100 sps:$4 sm:$0xff]  }
 0x2bf   :  { %10741 = vmatpush1.bf16.msra.mxu0 %v17865_v54  ;;  %10913 = vmatpush1.bf16.msra.mxu1 %v17868_v55  ;;  %v17910_v54 = vld [vmem:[%s25145_s1 + $0x2a58] ss:$100 sps:$4 sm:$0xff]  }
 0x2c0   :  { %10753 = vmatprep.subr.bf16.mxu0 %v17873_v56  ;;  %10925 = vmatprep.subr.bf16.mxu1 %v17876_v57 }
 0x2c2   :  { %10743 = vmatmul.mubr.bf16.vlgmr.msra.gmra.mrb[8].mxu0 %v20068_v24  ;;  %10915 = vmatmul.mubr.bf16.vlgmr.msra.gmra.mrb[8].mxu1 %v20068_v24 }
 0x2c3   :  { %10754 = vmatpush1.bf16.msra.mxu0 %v17871_v58  ;;  %10926 = vmatpush1.bf16.msra.mxu1 %v17874_v59  ;;  %v17915_v59 = vld [vmem:[%s25145_s1 + $0x2b1c] ss:$100 sps:$4 sm:$0xff]  }
 0x2c4   :  { %10755 = vmatprep.subr.bf16.mxu0 %v17879_v60  ;;  %10927 = vmatprep.subr.bf16.mxu1 %v17882_v61  ;;  %v17918_v60 = vld [vmem:[%s25145_s1 + $0x2b24] ss:$100 sps:$4 sm:$0xff]  }
 0x2c5   :  { %10785 = vmatprep.mubr.bf16.mxu0 %v20088_v17  ;;  %10957 = vmatprep.mubr.bf16.mxu1 %v20088_v17 }
 0x2c7   :  { %10756 = vmatpush1.bf16.msra.mxu0 %v17877_v62  ;;  %10928 = vmatpush1.bf16.msra.mxu1 %v17880_v63 }
 0x2c8   :  { %10757 = vmatprep.subr.bf16.mxu0 %v17885_v0  ;;  %10929 = vmatprep.subr.bf16.mxu1 %v17888_v1  ;;  %v17913_v0 = vld [vmem:[%s25145_s1 + $0x2b18] ss:$100 sps:$4 sm:$0xff]  }
 0x2cb   :  { %10758 = vmatpush1.bf16.msra.mxu0 %v17883_v2  ;;  %10930 = vmatpush1.bf16.msra.mxu1 %v17886_v6 }
 0x2cc   :  { %10759 = vmatprep.subr.bf16.mxu0 %v17891_v7  ;;  %10931 = vmatprep.subr.bf16.mxu1 %v17894_v11 }
 0x2cf   :  { %10760 = vmatpush1.bf16.msra.mxu0 %v17889_v12  ;;  %10932 = vmatpush1.bf16.msra.mxu1 %v17892_v14 }
 0x2d0   :  { %10761 = vmatprep.subr.bf16.mxu0 %v17897_v20  ;;  %10933 = vmatprep.subr.bf16.mxu1 %v17900_v21  ;;  %v17916_v20 = vld [vmem:[%s25145_s1 + $0x2b20] ss:$100 sps:$4 sm:$0xff]  }
 0x2d3   :  { %10762 = vmatpush1.bf16.msra.mxu0 %v17895_v27  ;;  %10934 = vmatpush1.bf16.msra.mxu1 %v17898_v29  ;;  %v17921_v29 = vld [vmem:[%s25145_s1 + $0x2be4] ss:$100 sps:$4 sm:$0xff]  }
 0x2d4   :  { %10763 = vmatprep.subr.bf16.mxu0 %v17903_v32  ;;  %10935 = vmatprep.subr.bf16.mxu1 %v17906_v35  ;;  %v17924_v32 = vld [vmem:[%s25145_s1 + $0x2bec] ss:$100 sps:$4 sm:$0xff]  }
 0x2d5   :  { %v10443_v42 = vpop.f32.mrb[4].mxu0  ;;  %v10615_v43 = vpop.f32.mrb[4].mxu1 }
 0x2d6   :  { %v16629_v44 = vadd.f32 %v10443_v42, %v1726_v37  ;;  %v16633_v45 = vadd.f32 %v10615_v43, %v1734_v25  ;;  %v10445_v46 = vpop.f32.mrb[5].mxu0  ;;  %v10617_v47 = vpop.f32.mrb[5].mxu1  ;;  %v17931_v42 = vld [vmem:[%s25145_s1 + $0x2d70] ss:$100 sps:$4 sm:$0xff]   ;;  %v17934_v43 = vld [vmem:[%s25145_s1 + $0x2d78] ss:$100 sps:$4 sm:$0xff]  }
 0x2d7   :  { %v16630_v48 = vadd.f32 %v10445_v46, %v1730_v8  ;;  %v16634_v49 = vadd.f32 %v10617_v47, %v1738_v26  ;;  %v10447_v51 = vpop.f32.mrb[6].mxu0  ;;  %v10619_v52 = vpop.f32.mrb[6].mxu1  ;;  %10764 = vmatpush1.bf16.msra.mxu0 %v17901_v38  ;;  %10936 = vmatpush1.bf16.msra.mxu1 %v17904_v39  ;;  %v17925_v38 = vld [vmem:[%s25145_s1 + $0x2ca8] ss:$100 sps:$4 sm:$0xff]   ;;  %v17928_v39 = vld [vmem:[%s25145_s1 + $0x2cb0] ss:$100 sps:$4 sm:$0xff]  }
 0x2d8   :  { %v16631_v55 = vadd.f32 %v10447_v51, %v1726_v37  ;;  %v16635_v56 = vadd.f32 %v10619_v52, %v1734_v25  ;;  %v10449_v57 = vpop.f32.mrb[7].mxu0  ;;  %v10621_v58 = vpop.f32.mrb[7].mxu1  ;;  %10765 = vmatprep.subr.bf16.mxu0 %v17909_v40  ;;  %10937 = vmatprep.subr.bf16.mxu1 %v17912_v41  ;;  %v12168_v61 = vmax.f32 %v16629_v44, 0.0  ;;  %v12170_v1 = vmax.f32 %v16633_v45, 0.0  ;;  %v17919_v37 = vld [vmem:[%s25145_s1 + $0x2be0] ss:$100 sps:$4 sm:$0xff]  }
 0x2d9   :  { %v16632_v62 = vadd.f32 %v10449_v57, %v1730_v8  ;;  %v16636_v63 = vadd.f32 %v10621_v58, %v1738_v26  ;;  %v12169_v7 = vmax.f32 %v16630_v48, 0.0  ;;  %v12171_v11 = vmax.f32 %v16634_v49, 0.0  ;;  %v17922_v25 = vld [vmem:[%s25145_s1 + $0x2be8] ss:$100 sps:$4 sm:$0xff]   ;;  %v17930_v26 = vld [vmem:[%s25145_s1 + $0x2cb4] ss:$100 sps:$4 sm:$0xff]  }
 0x2da   :  { %v12193_v2 = vmax.f32 %v16631_v55, 0.0  ;;  %v12195_v6 = vmax.f32 %v16635_v56, 0.0  ;;  %v17927_v8 = vld [vmem:[%s25145_s1 + $0x2cac] ss:$100 sps:$4 sm:$0xff]   ;;  %v17933_v40 = vld [vmem:[%s25145_s1 + $0x2d74] ss:$100 sps:$4 sm:$0xff]  }
 0x2db   :  { %v12194_v12 = vmax.f32 %v16632_v62, 0.0  ;;  %v12196_v14 = vmax.f32 %v16636_v63, 0.0  ;;  %10766 = vmatpush1.bf16.msra.mxu0 %v17907_v53  ;;  %10938 = vmatpush1.bf16.msra.mxu1 %v17910_v54  ;;  %v17936_v41 = vld [vmem:[%s25145_s1 + $0x2d7c] ss:$100 sps:$4 sm:$0xff]   ;;  %v17942_v45 = vld [vmem:[%s25145_s1 + $0x2e44] ss:$100 sps:$4 sm:$0xff]  }
 0x2dc   :  { %v21792_v21 = vpack.c.bf16 %v12193_v2, %v12168_v61  ;;  %v21794_v27 = vpack.c.bf16 %v12195_v6, %v12170_v1  ;;  %10767 = vmatprep.subr.bf16.mxu0 %v17915_v59  ;;  %10939 = vmatprep.subr.bf16.mxu1 %v17918_v60  ;;  %v17939_v44 = vld [vmem:[%s25145_s1 + $0x2e3c] ss:$100 sps:$4 sm:$0xff]   ;;  %v17945_v48 = vld [vmem:[%s25145_s1 + $0x2f04] ss:$100 sps:$4 sm:$0xff]   ;;  %v17948_v49 = vld [vmem:[%s25145_s1 + $0x2f0c] ss:$100 sps:$4 sm:$0xff]  }
 0x2dd   :  { %v21802_v35 = vpack.c.bf16 %v12194_v12, %v12169_v7  ;;  %v21804_v36 = vpack.c.bf16 %v12196_v14, %v12171_v11  ;;  %v17937_v46 = vld [vmem:[%s25145_s1 + $0x2e38] ss:$100 sps:$4 sm:$0xff]   ;;  %v17940_v47 = vld [vmem:[%s25145_s1 + $0x2e40] ss:$100 sps:$4 sm:$0xff]   ;;  %v17946_v52 = vld [vmem:[%s25145_s1 + $0x2f08] ss:$100 sps:$4 sm:$0xff]  }
 0x2de   :  { %v17943_v51 = vld [vmem:[%s25145_s1 + $0x2f00] ss:$100 sps:$4 sm:$0xff]   ;;  %v17951_v53 = vld [vmem:[%s25145_s1 + $0x2fcc] ss:$100 sps:$4 sm:$0xff]   ;;  %v17954_v54 = vld [vmem:[%s25145_s1 + $0x2fd4] ss:$100 sps:$4 sm:$0xff]  }
 0x2df   :  { %10768 = vmatpush1.bf16.msra.mxu0 %v17913_v0  ;;  %10940 = vmatpush1.bf16.msra.mxu1 %v17916_v20  ;;  %v17949_v55 = vld [vmem:[%s25145_s1 + $0x2fc8] ss:$100 sps:$4 sm:$0xff]   ;;  %v17952_v56 = vld [vmem:[%s25145_s1 + $0x2fd0] ss:$100 sps:$4 sm:$0xff]   ;;  %v17960_v58 = vld [vmem:[%s25145_s1 + $0x309c] ss:$100 sps:$4 sm:$0xff]  }
 0x2e0   :  { %10769 = vmatprep.subr.bf16.mxu0 %v17921_v29  ;;  %10941 = vmatprep.subr.bf16.mxu1 %v17924_v32  ;;  %v17957_v57 = vld [vmem:[%s25145_s1 + $0x3094] ss:$100 sps:$4 sm:$0xff]   ;;  %v17963_v61 = vld [vmem:[%s25145_s1 + $0x315c] ss:$100 sps:$4 sm:$0xff]   ;;  %v17966_v62 = vld [vmem:[%s25145_s1 + $0x3164] ss:$100 sps:$4 sm:$0xff]  }
 0x2e1   :  { %v17955_v59 = vld [vmem:[%s25145_s1 + $0x3090] ss:$100 sps:$4 sm:$0xff]   ;;  %v17958_v60 = vld [vmem:[%s25145_s1 + $0x3098] ss:$100 sps:$4 sm:$0xff]   ;;  %v17964_v0 = vld [vmem:[%s25145_s1 + $0x3160] ss:$100 sps:$4 sm:$0xff]  }
 0x2e2   :  { %v17961_v63 = vld [vmem:[%s25145_s1 + $0x3158] ss:$100 sps:$4 sm:$0xff]   ;;  %v17967_v6 = vld [vmem:[%s25145_s1 + $0x30] ss:$100 sps:$4 sm:$0xff]   ;;  %v17978_v12 = vld [vmem:[%s25145_s1 + $0x104] ss:$100 sps:$4 sm:$0xff]  }
 0x2e3   :  { %10770 = vmatpush1.bf16.msra.mxu0 %v17919_v37  ;;  %10942 = vmatpush1.bf16.msra.mxu1 %v17922_v25  ;;  %v17969_v1 = vld [vmem:[%s25145_s1 + $0x34] ss:$100 sps:$4 sm:$0xff]   ;;  %v17972_v2 = vld [vmem:[%s25145_s1 + $0x3c] ss:$100 sps:$4 sm:$0xff]   ;;  %v17981_v29 = vld [vmem:[%s25145_s1 + $0x1c4] ss:$100 sps:$4 sm:$0xff]  }
 0x2e4   :  { %10771 = vmatprep.subr.bf16.mxu0 %v17927_v8  ;;  %10943 = vmatprep.subr.bf16.mxu1 %v17930_v26  ;;  %v17970_v7 = vld [vmem:[%s25145_s1 + $0x38] ss:$100 sps:$4 sm:$0xff]   ;;  %v17976_v20 = vld [vmem:[%s25145_s1 + $0x100] ss:$100 sps:$4 sm:$0xff]   ;;  %v17984_v32 = vld [vmem:[%s25145_s1 + $0x1cc] ss:$100 sps:$4 sm:$0xff]  }
 0x2e5   :  { %v17975_v11 = vld [vmem:[%s25145_s1 + $0xfc] ss:$100 sps:$4 sm:$0xff]   ;;  %v17982_v25 = vld [vmem:[%s25145_s1 + $0x1c8] ss:$100 sps:$4 sm:$0xff]   ;;  %v17990_v26 = vld [vmem:[%s25145_s1 + $0x294] ss:$100 sps:$4 sm:$0xff]  }
 0x2e6   :  { %v17973_v14 = vld [vmem:[%s25145_s1 + $0xf8] ss:$100 sps:$4 sm:$0xff]   ;;  %v17979_v37 = vld [vmem:[%s25145_s1 + $0x1c0] ss:$100 sps:$4 sm:$0xff]   ;;  %v17987_v8 = vld [vmem:[%s25145_s1 + $0x28c] ss:$100 sps:$4 sm:$0xff]  }
 0x2e7   :  { %10772 = vmatpush1.bf16.msra.mxu0 %v17925_v38  ;;  %10944 = vmatpush1.bf16.msra.mxu1 %v17928_v39  ;;  %v17985_v38 = vld [vmem:[%s25145_s1 + $0x288] ss:$100 sps:$4 sm:$0xff]   ;;  %v17988_v39 = vld [vmem:[%s25145_s1 + $0x290] ss:$100 sps:$4 sm:$0xff]  }
 0x2e8   :  { %10773 = vmatprep.subr.bf16.mxu0 %v17933_v40  ;;  %10945 = vmatprep.subr.bf16.mxu1 %v17936_v41  ;;  %v17993_v40 = vld [vmem:[%s25145_s1 + $0x354] ss:$100 sps:$4 sm:$0xff]   ;;  %v17996_v41 = vld [vmem:[%s25145_s1 + $0x35c] ss:$100 sps:$4 sm:$0xff]  }
 0x2eb   :  { %10774 = vmatpush1.bf16.msra.mxu0 %v17931_v42  ;;  %10946 = vmatpush1.bf16.msra.mxu1 %v17934_v43  ;;  %v17991_v42 = vld [vmem:[%s25145_s1 + $0x350] ss:$100 sps:$4 sm:$0xff]   ;;  %v17994_v43 = vld [vmem:[%s25145_s1 + $0x358] ss:$100 sps:$4 sm:$0xff]  }
 0x2ec   :  { %10775 = vmatprep.subr.bf16.mxu0 %v17939_v44  ;;  %10947 = vmatprep.subr.bf16.mxu1 %v17942_v45  ;;  %v17999_v44 = vld [vmem:[%s25145_s1 + $0x41c] ss:$100 sps:$4 sm:$0xff]   ;;  %v18002_v45 = vld [vmem:[%s25145_s1 + $0x424] ss:$100 sps:$4 sm:$0xff]  }
 0x2ef   :  { %10776 = vmatpush1.bf16.msra.mxu0 %v17937_v46  ;;  %10948 = vmatpush1.bf16.msra.mxu1 %v17940_v47  ;;  %v17997_v46 = vld [vmem:[%s25145_s1 + $0x418] ss:$100 sps:$4 sm:$0xff]   ;;  %v18000_v47 = vld [vmem:[%s25145_s1 + $0x420] ss:$100 sps:$4 sm:$0xff]  }
 0x2f0   :  { %10777 = vmatprep.subr.bf16.mxu0 %v17945_v48  ;;  %10949 = vmatprep.subr.bf16.mxu1 %v17948_v49  ;;  %v18005_v48 = vld [vmem:[%s25145_s1 + $0x4e4] ss:$100 sps:$4 sm:$0xff]   ;;  %v18008_v49 = vld [vmem:[%s25145_s1 + $0x4ec] ss:$100 sps:$4 sm:$0xff]  }
 0x2f3   :  { %10778 = vmatpush1.bf16.msra.mxu0 %v17943_v51  ;;  %10950 = vmatpush1.bf16.msra.mxu1 %v17946_v52  ;;  %v18003_v51 = vld [vmem:[%s25145_s1 + $0x4e0] ss:$100 sps:$4 sm:$0xff]   ;;  %v18006_v52 = vld [vmem:[%s25145_s1 + $0x4e8] ss:$100 sps:$4 sm:$0xff]  }
 0x2f4   :  { %10779 = vmatprep.subr.bf16.mxu0 %v17951_v53  ;;  %10951 = vmatprep.subr.bf16.mxu1 %v17954_v54  ;;  %v18011_v53 = vld [vmem:[%s25145_s1 + $0x5ac] ss:$100 sps:$4 sm:$0xff]   ;;  %v18014_v54 = vld [vmem:[%s25145_s1 + $0x5b4] ss:$100 sps:$4 sm:$0xff]  }
 0x2f7   :  { %10780 = vmatpush1.bf16.msra.mxu0 %v17949_v55  ;;  %10952 = vmatpush1.bf16.msra.mxu1 %v17952_v56  ;;  %v18009_v55 = vld [vmem:[%s25145_s1 + $0x5a8] ss:$100 sps:$4 sm:$0xff]   ;;  %v18012_v56 = vld [vmem:[%s25145_s1 + $0x5b0] ss:$100 sps:$4 sm:$0xff]  }
 0x2f8   :  { %10781 = vmatprep.subr.bf16.mxu0 %v17957_v57  ;;  %10953 = vmatprep.subr.bf16.mxu1 %v17960_v58  ;;  %v18017_v57 = vld [vmem:[%s25145_s1 + $0x674] ss:$100 sps:$4 sm:$0xff]   ;;  %v18020_v58 = vld [vmem:[%s25145_s1 + $0x67c] ss:$100 sps:$4 sm:$0xff]  }
 0x2fb   :  { %10782 = vmatpush1.bf16.msra.mxu0 %v17955_v59  ;;  %10954 = vmatpush1.bf16.msra.mxu1 %v17958_v60  ;;  %v18015_v59 = vld [vmem:[%s25145_s1 + $0x670] ss:$100 sps:$4 sm:$0xff]   ;;  %v18018_v60 = vld [vmem:[%s25145_s1 + $0x678] ss:$100 sps:$4 sm:$0xff]  }
 0x2fc   :  { %10783 = vmatprep.subr.bf16.mxu0 %v17963_v61  ;;  %10955 = vmatprep.subr.bf16.mxu1 %v17966_v62  ;;  %v18023_v61 = vld [vmem:[%s25145_s1 + $0x73c] ss:$100 sps:$4 sm:$0xff]   ;;  %v18026_v62 = vld [vmem:[%s25145_s1 + $0x744] ss:$100 sps:$4 sm:$0xff]  }
 0x2ff   :  { %10784 = vmatpush1.bf16.msra.mxu0 %v17961_v63  ;;  %10956 = vmatpush1.bf16.msra.mxu1 %v17964_v0  ;;  %v18021_v63 = vld [vmem:[%s25145_s1 + $0x738] ss:$100 sps:$4 sm:$0xff]   ;;  %v18024_v0 = vld [vmem:[%s25145_s1 + $0x740] ss:$100 sps:$4 sm:$0xff]  }
 0x300   :  { %10968 = vmatprep.subr.bf16.mxu0 %v17969_v1  ;;  %11140 = vmatprep.subr.bf16.mxu1 %v17972_v2  ;;  %v18029_v1 = vld [vmem:[%s25145_s1 + $0x804] ss:$100 sps:$4 sm:$0xff]   ;;  %v18032_v2 = vld [vmem:[%s25145_s1 + $0x80c] ss:$100 sps:$4 sm:$0xff]  }
 0x302   :  { %10786 = vmatmul.mubr.bf16.vlgmr.msra.gmra.mrb[8].mxu0 %v20276_v33  ;;  %10958 = vmatmul.mubr.bf16.vlgmr.msra.gmra.mrb[8].mxu1 %v20276_v33 }
 0x303   :  { %10969 = vmatpush1.bf16.msra.mxu0 %v17967_v6  ;;  %11141 = vmatpush1.bf16.msra.mxu1 %v17970_v7  ;;  %v18027_v6 = vld [vmem:[%s25145_s1 + $0x800] ss:$100 sps:$4 sm:$0xff]   ;;  %v18030_v7 = vld [vmem:[%s25145_s1 + $0x808] ss:$100 sps:$4 sm:$0xff]  }
 0x304   :  { %10970 = vmatprep.subr.bf16.mxu0 %v17975_v11  ;;  %11142 = vmatprep.subr.bf16.mxu1 %v17978_v12  ;;  %v18035_v11 = vld [vmem:[%s25145_s1 + $0x8cc] ss:$100 sps:$4 sm:$0xff]   ;;  %v18038_v12 = vld [vmem:[%s25145_s1 + $0x8d4] ss:$100 sps:$4 sm:$0xff]  }
 0x305   :  { %11000 = vmatprep.mubr.bf16.mxu0 %v19576_v50  ;;  %11172 = vmatprep.mubr.bf16.mxu1 %v19576_v50 }
 0x307   :  { %10971 = vmatpush1.bf16.msra.mxu0 %v17973_v14  ;;  %11143 = vmatpush1.bf16.msra.mxu1 %v17976_v20  ;;  %v18033_v14 = vld [vmem:[%s25145_s1 + $0x8c8] ss:$100 sps:$4 sm:$0xff]   ;;  %v18036_v20 = vld [vmem:[%s25145_s1 + $0x8d0] ss:$100 sps:$4 sm:$0xff]  }
 0x308   :  { %10972 = vmatprep.subr.bf16.mxu0 %v17981_v29  ;;  %11144 = vmatprep.subr.bf16.mxu1 %v17984_v32  ;;  %v18041_v29 = vld [vmem:[%s25145_s1 + $0x994] ss:$100 sps:$4 sm:$0xff]   ;;  %v18044_v32 = vld [vmem:[%s25145_s1 + $0x99c] ss:$100 sps:$4 sm:$0xff]  }
 0x30b   :  { %10973 = vmatpush1.bf16.msra.mxu0 %v17979_v37  ;;  %11145 = vmatpush1.bf16.msra.mxu1 %v17982_v25  ;;  %v18039_v37 = vld [vmem:[%s25145_s1 + $0x990] ss:$100 sps:$4 sm:$0xff]   ;;  %v18042_v25 = vld [vmem:[%s25145_s1 + $0x998] ss:$100 sps:$4 sm:$0xff]  }
 0x30c   :  { %10974 = vmatprep.subr.bf16.mxu0 %v17987_v8  ;;  %11146 = vmatprep.subr.bf16.mxu1 %v17990_v26  ;;  %v18047_v8 = vld [vmem:[%s25145_s1 + $0xa5c] ss:$100 sps:$4 sm:$0xff]   ;;  %v18050_v26 = vld [vmem:[%s25145_s1 + $0xa64] ss:$100 sps:$4 sm:$0xff]  }
 0x30f   :  { %10975 = vmatpush1.bf16.msra.mxu0 %v17985_v38  ;;  %11147 = vmatpush1.bf16.msra.mxu1 %v17988_v39  ;;  %v18045_v38 = vld [vmem:[%s25145_s1 + $0xa58] ss:$100 sps:$4 sm:$0xff]   ;;  %v18048_v39 = vld [vmem:[%s25145_s1 + $0xa60] ss:$100 sps:$4 sm:$0xff]  }
 0x310   :  { %10976 = vmatprep.subr.bf16.mxu0 %v17993_v40  ;;  %11148 = vmatprep.subr.bf16.mxu1 %v17996_v41  ;;  %v18053_v40 = vld [vmem:[%s25145_s1 + $0xb24] ss:$100 sps:$4 sm:$0xff]   ;;  %v18056_v41 = vld [vmem:[%s25145_s1 + $0xb2c] ss:$100 sps:$4 sm:$0xff]  }
 0x313   :  { %10977 = vmatpush1.bf16.msra.mxu0 %v17991_v42  ;;  %11149 = vmatpush1.bf16.msra.mxu1 %v17994_v43  ;;  %v18051_v42 = vld [vmem:[%s25145_s1 + $0xb20] ss:$100 sps:$4 sm:$0xff]   ;;  %v18054_v43 = vld [vmem:[%s25145_s1 + $0xb28] ss:$100 sps:$4 sm:$0xff]  }
 0x314   :  { %10978 = vmatprep.subr.bf16.mxu0 %v17999_v44  ;;  %11150 = vmatprep.subr.bf16.mxu1 %v18002_v45  ;;  %v18059_v44 = vld [vmem:[%s25145_s1 + $0xbec] ss:$100 sps:$4 sm:$0xff]   ;;  %v18062_v45 = vld [vmem:[%s25145_s1 + $0xbf4] ss:$100 sps:$4 sm:$0xff]  }
 0x317   :  { %10979 = vmatpush1.bf16.msra.mxu0 %v17997_v46  ;;  %11151 = vmatpush1.bf16.msra.mxu1 %v18000_v47  ;;  %v18057_v46 = vld [vmem:[%s25145_s1 + $0xbe8] ss:$100 sps:$4 sm:$0xff]   ;;  %v18060_v47 = vld [vmem:[%s25145_s1 + $0xbf0] ss:$100 sps:$4 sm:$0xff]  }
 0x318   :  { %10980 = vmatprep.subr.bf16.mxu0 %v18005_v48  ;;  %11152 = vmatprep.subr.bf16.mxu1 %v18008_v49  ;;  %v18065_v48 = vld [vmem:[%s25145_s1 + $0xcb4] ss:$100 sps:$4 sm:$0xff]   ;;  %v18068_v49 = vld [vmem:[%s25145_s1 + $0xcbc] ss:$100 sps:$4 sm:$0xff]  }
 0x31b   :  { %10981 = vmatpush1.bf16.msra.mxu0 %v18003_v51  ;;  %11153 = vmatpush1.bf16.msra.mxu1 %v18006_v52  ;;  %v18063_v51 = vld [vmem:[%s25145_s1 + $0xcb0] ss:$100 sps:$4 sm:$0xff]   ;;  %v18066_v52 = vld [vmem:[%s25145_s1 + $0xcb8] ss:$100 sps:$4 sm:$0xff]  }
 0x31c   :  { %10982 = vmatprep.subr.bf16.mxu0 %v18011_v53  ;;  %11154 = vmatprep.subr.bf16.mxu1 %v18014_v54  ;;  %v18071_v53 = vld [vmem:[%s25145_s1 + $0xd7c] ss:$100 sps:$4 sm:$0xff]   ;;  %v18074_v54 = vld [vmem:[%s25145_s1 + $0xd84] ss:$100 sps:$4 sm:$0xff]  }
 0x31f   :  { %10983 = vmatpush1.bf16.msra.mxu0 %v18009_v55  ;;  %11155 = vmatpush1.bf16.msra.mxu1 %v18012_v56  ;;  %v18069_v55 = vld [vmem:[%s25145_s1 + $0xd78] ss:$100 sps:$4 sm:$0xff]   ;;  %v18072_v56 = vld [vmem:[%s25145_s1 + $0xd80] ss:$100 sps:$4 sm:$0xff]  }
 0x320   :  { %10984 = vmatprep.subr.bf16.mxu0 %v18017_v57  ;;  %11156 = vmatprep.subr.bf16.mxu1 %v18020_v58  ;;  %v18077_v57 = vld [vmem:[%s25145_s1 + $0xe44] ss:$100 sps:$4 sm:$0xff]   ;;  %v18080_v58 = vld [vmem:[%s25145_s1 + $0xe4c] ss:$100 sps:$4 sm:$0xff]  }
 0x323   :  { %10985 = vmatpush1.bf16.msra.mxu0 %v18015_v59  ;;  %11157 = vmatpush1.bf16.msra.mxu1 %v18018_v60  ;;  %v18075_v59 = vld [vmem:[%s25145_s1 + $0xe40] ss:$100 sps:$4 sm:$0xff]   ;;  %v18078_v60 = vld [vmem:[%s25145_s1 + $0xe48] ss:$100 sps:$4 sm:$0xff]  }
 0x324   :  { %10986 = vmatprep.subr.bf16.mxu0 %v18023_v61  ;;  %11158 = vmatprep.subr.bf16.mxu1 %v18026_v62  ;;  %v18083_v61 = vld [vmem:[%s25145_s1 + $0xf0c] ss:$100 sps:$4 sm:$0xff]   ;;  %v18086_v62 = vld [vmem:[%s25145_s1 + $0xf14] ss:$100 sps:$4 sm:$0xff]  }
 0x327   :  { %10987 = vmatpush1.bf16.msra.mxu0 %v18021_v63  ;;  %11159 = vmatpush1.bf16.msra.mxu1 %v18024_v0  ;;  %v18081_v63 = vld [vmem:[%s25145_s1 + $0xf08] ss:$100 sps:$4 sm:$0xff]   ;;  %v18084_v0 = vld [vmem:[%s25145_s1 + $0xf10] ss:$100 sps:$4 sm:$0xff]  }
 0x328   :  { %10988 = vmatprep.subr.bf16.mxu0 %v18029_v1  ;;  %11160 = vmatprep.subr.bf16.mxu1 %v18032_v2  ;;  %v18089_v1 = vld [vmem:[%s25145_s1 + $0xfd4] ss:$100 sps:$4 sm:$0xff]   ;;  %v18092_v2 = vld [vmem:[%s25145_s1 + $0xfdc] ss:$100 sps:$4 sm:$0xff]  }
 0x32b   :  { %10989 = vmatpush1.bf16.msra.mxu0 %v18027_v6  ;;  %11161 = vmatpush1.bf16.msra.mxu1 %v18030_v7  ;;  %v18087_v6 = vld [vmem:[%s25145_s1 + $0xfd0] ss:$100 sps:$4 sm:$0xff]   ;;  %v18090_v7 = vld [vmem:[%s25145_s1 + $0xfd8] ss:$100 sps:$4 sm:$0xff]  }
 0x32c   :  { %10990 = vmatprep.subr.bf16.mxu0 %v18035_v11  ;;  %11162 = vmatprep.subr.bf16.mxu1 %v18038_v12  ;;  %v18095_v11 = vld [vmem:[%s25145_s1 + $0x109c] ss:$100 sps:$4 sm:$0xff]   ;;  %v18098_v12 = vld [vmem:[%s25145_s1 + $0x10a4] ss:$100 sps:$4 sm:$0xff]  }
 0x32f   :  { %10991 = vmatpush1.bf16.msra.mxu0 %v18033_v14  ;;  %11163 = vmatpush1.bf16.msra.mxu1 %v18036_v20  ;;  %v18093_v14 = vld [vmem:[%s25145_s1 + $0x1098] ss:$100 sps:$4 sm:$0xff]   ;;  %v18096_v20 = vld [vmem:[%s25145_s1 + $0x10a0] ss:$100 sps:$4 sm:$0xff]  }
 0x330   :  { %10992 = vmatprep.subr.bf16.mxu0 %v18041_v29  ;;  %11164 = vmatprep.subr.bf16.mxu1 %v18044_v32  ;;  %v18101_v29 = vld [vmem:[%s25145_s1 + $0x1164] ss:$100 sps:$4 sm:$0xff]   ;;  %v18104_v32 = vld [vmem:[%s25145_s1 + $0x116c] ss:$100 sps:$4 sm:$0xff]  }
 0x333   :  { %10993 = vmatpush1.bf16.msra.mxu0 %v18039_v37  ;;  %11165 = vmatpush1.bf16.msra.mxu1 %v18042_v25  ;;  %v18099_v37 = vld [vmem:[%s25145_s1 + $0x1160] ss:$100 sps:$4 sm:$0xff]   ;;  %v18102_v25 = vld [vmem:[%s25145_s1 + $0x1168] ss:$100 sps:$4 sm:$0xff]  }
 0x334   :  { %10994 = vmatprep.subr.bf16.mxu0 %v18047_v8  ;;  %11166 = vmatprep.subr.bf16.mxu1 %v18050_v26  ;;  %v18107_v8 = vld [vmem:[%s25145_s1 + $0x122c] ss:$100 sps:$4 sm:$0xff]   ;;  %v18110_v26 = vld [vmem:[%s25145_s1 + $0x1234] ss:$100 sps:$4 sm:$0xff]  }
 0x337   :  { %10995 = vmatpush1.bf16.msra.mxu0 %v18045_v38  ;;  %11167 = vmatpush1.bf16.msra.mxu1 %v18048_v39  ;;  %v18105_v38 = vld [vmem:[%s25145_s1 + $0x1228] ss:$100 sps:$4 sm:$0xff]   ;;  %v18108_v39 = vld [vmem:[%s25145_s1 + $0x1230] ss:$100 sps:$4 sm:$0xff]  }
 0x338   :  { %10996 = vmatprep.subr.bf16.mxu0 %v18053_v40  ;;  %11168 = vmatprep.subr.bf16.mxu1 %v18056_v41  ;;  %v18113_v40 = vld [vmem:[%s25145_s1 + $0x12f4] ss:$100 sps:$4 sm:$0xff]   ;;  %v18116_v41 = vld [vmem:[%s25145_s1 + $0x12fc] ss:$100 sps:$4 sm:$0xff]  }
 0x33b   :  { %10997 = vmatpush1.bf16.msra.mxu0 %v18051_v42  ;;  %11169 = vmatpush1.bf16.msra.mxu1 %v18054_v43  ;;  %v18111_v42 = vld [vmem:[%s25145_s1 + $0x12f0] ss:$100 sps:$4 sm:$0xff]   ;;  %v18114_v43 = vld [vmem:[%s25145_s1 + $0x12f8] ss:$100 sps:$4 sm:$0xff]  }
 0x33c   :  { %10998 = vmatprep.subr.bf16.mxu0 %v18059_v44  ;;  %11170 = vmatprep.subr.bf16.mxu1 %v18062_v45  ;;  %v18119_v44 = vld [vmem:[%s25145_s1 + $0x13bc] ss:$100 sps:$4 sm:$0xff]   ;;  %v18122_v45 = vld [vmem:[%s25145_s1 + $0x13c4] ss:$100 sps:$4 sm:$0xff]  }
 0x33f   :  { %10999 = vmatpush1.bf16.msra.mxu0 %v18057_v46  ;;  %11171 = vmatpush1.bf16.msra.mxu1 %v18060_v47  ;;  %v18117_v46 = vld [vmem:[%s25145_s1 + $0x13b8] ss:$100 sps:$4 sm:$0xff]   ;;  %v18120_v47 = vld [vmem:[%s25145_s1 + $0x13c0] ss:$100 sps:$4 sm:$0xff]  }
 0x340   :  { %11011 = vmatprep.subr.bf16.mxu0 %v18065_v48  ;;  %11183 = vmatprep.subr.bf16.mxu1 %v18068_v49  ;;  %v18125_v48 = vld [vmem:[%s25145_s1 + $0x1484] ss:$100 sps:$4 sm:$0xff]   ;;  %v18128_v49 = vld [vmem:[%s25145_s1 + $0x148c] ss:$100 sps:$4 sm:$0xff]  }
 0x342   :  { %11001 = vmatmul.mubr.bf16.vlgmr.msra.gmra.mrb[12].mxu0 %v19634_v5  ;;  %11173 = vmatmul.mubr.bf16.vlgmr.msra.gmra.mrb[12].mxu1 %v19634_v5 }
 0x343   :  { %11012 = vmatpush1.bf16.msra.mxu0 %v18063_v51  ;;  %11184 = vmatpush1.bf16.msra.mxu1 %v18066_v52  ;;  %v18123_v51 = vld [vmem:[%s25145_s1 + $0x1480] ss:$100 sps:$4 sm:$0xff]   ;;  %v18126_v52 = vld [vmem:[%s25145_s1 + $0x1488] ss:$100 sps:$4 sm:$0xff]  }
 0x344   :  { %11013 = vmatprep.subr.bf16.mxu0 %v18071_v53  ;;  %11185 = vmatprep.subr.bf16.mxu1 %v18074_v54  ;;  %v18131_v53 = vld [vmem:[%s25145_s1 + $0x154c] ss:$100 sps:$4 sm:$0xff]   ;;  %v18134_v54 = vld [vmem:[%s25145_s1 + $0x1554] ss:$100 sps:$4 sm:$0xff]  }
 0x345   :  { %11043 = vmatprep.mubr.bf16.mxu0 %v19728_v34  ;;  %11215 = vmatprep.mubr.bf16.mxu1 %v19728_v34 }
 0x347   :  { %11014 = vmatpush1.bf16.msra.mxu0 %v18069_v55  ;;  %11186 = vmatpush1.bf16.msra.mxu1 %v18072_v56  ;;  %v18129_v55 = vld [vmem:[%s25145_s1 + $0x1548] ss:$100 sps:$4 sm:$0xff]   ;;  %v18132_v56 = vld [vmem:[%s25145_s1 + $0x1550] ss:$100 sps:$4 sm:$0xff]  }
 0x348   :  { %11015 = vmatprep.subr.bf16.mxu0 %v18077_v57  ;;  %11187 = vmatprep.subr.bf16.mxu1 %v18080_v58  ;;  %v18137_v57 = vld [vmem:[%s25145_s1 + $0x1614] ss:$100 sps:$4 sm:$0xff]   ;;  %v18140_v58 = vld [vmem:[%s25145_s1 + $0x161c] ss:$100 sps:$4 sm:$0xff]  }
 0x34b   :  { %11016 = vmatpush1.bf16.msra.mxu0 %v18075_v59  ;;  %11188 = vmatpush1.bf16.msra.mxu1 %v18078_v60  ;;  %v18135_v59 = vld [vmem:[%s25145_s1 + $0x1610] ss:$100 sps:$4 sm:$0xff]   ;;  %v18138_v60 = vld [vmem:[%s25145_s1 + $0x1618] ss:$100 sps:$4 sm:$0xff]  }
 0x34c   :  { %11017 = vmatprep.subr.bf16.mxu0 %v18083_v61  ;;  %11189 = vmatprep.subr.bf16.mxu1 %v18086_v62  ;;  %v18143_v61 = vld [vmem:[%s25145_s1 + $0x16dc] ss:$100 sps:$4 sm:$0xff]   ;;  %v18146_v62 = vld [vmem:[%s25145_s1 + $0x16e4] ss:$100 sps:$4 sm:$0xff]  }
 0x34f   :  { %11018 = vmatpush1.bf16.msra.mxu0 %v18081_v63  ;;  %11190 = vmatpush1.bf16.msra.mxu1 %v18084_v0  ;;  %v18141_v63 = vld [vmem:[%s25145_s1 + $0x16d8] ss:$100 sps:$4 sm:$0xff]   ;;  %v18144_v0 = vld [vmem:[%s25145_s1 + $0x16e0] ss:$100 sps:$4 sm:$0xff]  }
 0x350   :  { %11019 = vmatprep.subr.bf16.mxu0 %v18089_v1  ;;  %11191 = vmatprep.subr.bf16.mxu1 %v18092_v2  ;;  %v18149_v1 = vld [vmem:[%s25145_s1 + $0x17a4] ss:$100 sps:$4 sm:$0xff]   ;;  %v18152_v2 = vld [vmem:[%s25145_s1 + $0x17ac] ss:$100 sps:$4 sm:$0xff]  }
 0x353   :  { %11020 = vmatpush1.bf16.msra.mxu0 %v18087_v6  ;;  %11192 = vmatpush1.bf16.msra.mxu1 %v18090_v7  ;;  %v18147_v6 = vld [vmem:[%s25145_s1 + $0x17a0] ss:$100 sps:$4 sm:$0xff]   ;;  %v18150_v7 = vld [vmem:[%s25145_s1 + $0x17a8] ss:$100 sps:$4 sm:$0xff]  }
 0x354   :  { %11021 = vmatprep.subr.bf16.mxu0 %v18095_v11  ;;  %11193 = vmatprep.subr.bf16.mxu1 %v18098_v12  ;;  %v18155_v11 = vld [vmem:[%s25145_s1 + $0x186c] ss:$100 sps:$4 sm:$0xff]   ;;  %v18158_v12 = vld [vmem:[%s25145_s1 + $0x1874] ss:$100 sps:$4 sm:$0xff]  }
 0x357   :  { %11022 = vmatpush1.bf16.msra.mxu0 %v18093_v14  ;;  %11194 = vmatpush1.bf16.msra.mxu1 %v18096_v20  ;;  %v18153_v14 = vld [vmem:[%s25145_s1 + $0x1868] ss:$100 sps:$4 sm:$0xff]   ;;  %v18156_v20 = vld [vmem:[%s25145_s1 + $0x1870] ss:$100 sps:$4 sm:$0xff]  }
 0x358   :  { %11023 = vmatprep.subr.bf16.mxu0 %v18101_v29  ;;  %11195 = vmatprep.subr.bf16.mxu1 %v18104_v32  ;;  %v18161_v29 = vld [vmem:[%s25145_s1 + $0x1934] ss:$100 sps:$4 sm:$0xff]   ;;  %v18164_v32 = vld [vmem:[%s25145_s1 + $0x193c] ss:$100 sps:$4 sm:$0xff]  }
 0x35b   :  { %11024 = vmatpush1.bf16.msra.mxu0 %v18099_v37  ;;  %11196 = vmatpush1.bf16.msra.mxu1 %v18102_v25  ;;  %v18159_v37 = vld [vmem:[%s25145_s1 + $0x1930] ss:$100 sps:$4 sm:$0xff]   ;;  %v18162_v25 = vld [vmem:[%s25145_s1 + $0x1938] ss:$100 sps:$4 sm:$0xff]  }
 0x35c   :  { %11025 = vmatprep.subr.bf16.mxu0 %v18107_v8  ;;  %11197 = vmatprep.subr.bf16.mxu1 %v18110_v26  ;;  %v18167_v8 = vld [vmem:[%s25145_s1 + $0x19fc] ss:$100 sps:$4 sm:$0xff]   ;;  %v18170_v26 = vld [vmem:[%s25145_s1 + $0x1a04] ss:$100 sps:$4 sm:$0xff]  }
 0x35f   :  { %11026 = vmatpush1.bf16.msra.mxu0 %v18105_v38  ;;  %11198 = vmatpush1.bf16.msra.mxu1 %v18108_v39  ;;  %v18165_v38 = vld [vmem:[%s25145_s1 + $0x19f8] ss:$100 sps:$4 sm:$0xff]   ;;  %v18168_v39 = vld [vmem:[%s25145_s1 + $0x1a00] ss:$100 sps:$4 sm:$0xff]  }
 0x360   :  { %11027 = vmatprep.subr.bf16.mxu0 %v18113_v40  ;;  %11199 = vmatprep.subr.bf16.mxu1 %v18116_v41  ;;  %v18173_v40 = vld [vmem:[%s25145_s1 + $0x1ac4] ss:$100 sps:$4 sm:$0xff]   ;;  %v18176_v41 = vld [vmem:[%s25145_s1 + $0x1acc] ss:$100 sps:$4 sm:$0xff]  }
 0x363   :  { %11028 = vmatpush1.bf16.msra.mxu0 %v18111_v42  ;;  %11200 = vmatpush1.bf16.msra.mxu1 %v18114_v43  ;;  %v18171_v42 = vld [vmem:[%s25145_s1 + $0x1ac0] ss:$100 sps:$4 sm:$0xff]   ;;  %v18174_v43 = vld [vmem:[%s25145_s1 + $0x1ac8] ss:$100 sps:$4 sm:$0xff]  }
 0x364   :  { %11029 = vmatprep.subr.bf16.mxu0 %v18119_v44  ;;  %11201 = vmatprep.subr.bf16.mxu1 %v18122_v45  ;;  %v18179_v44 = vld [vmem:[%s25145_s1 + $0x1b8c] ss:$100 sps:$4 sm:$0xff]   ;;  %v18182_v45 = vld [vmem:[%s25145_s1 + $0x1b94] ss:$100 sps:$4 sm:$0xff]  }
 0x367   :  { %11030 = vmatpush1.bf16.msra.mxu0 %v18117_v46  ;;  %11202 = vmatpush1.bf16.msra.mxu1 %v18120_v47  ;;  %v18177_v46 = vld [vmem:[%s25145_s1 + $0x1b88] ss:$100 sps:$4 sm:$0xff]   ;;  %v18180_v47 = vld [vmem:[%s25145_s1 + $0x1b90] ss:$100 sps:$4 sm:$0xff]  }
 0x368   :  { %11031 = vmatprep.subr.bf16.mxu0 %v18125_v48  ;;  %11203 = vmatprep.subr.bf16.mxu1 %v18128_v49  ;;  %v18185_v48 = vld [vmem:[%s25145_s1 + $0x1c54] ss:$100 sps:$4 sm:$0xff]   ;;  %v18188_v49 = vld [vmem:[%s25145_s1 + $0x1c5c] ss:$100 sps:$4 sm:$0xff]  }
 0x36b   :  { %11032 = vmatpush1.bf16.msra.mxu0 %v18123_v51  ;;  %11204 = vmatpush1.bf16.msra.mxu1 %v18126_v52  ;;  %v18183_v51 = vld [vmem:[%s25145_s1 + $0x1c50] ss:$100 sps:$4 sm:$0xff]   ;;  %v18186_v52 = vld [vmem:[%s25145_s1 + $0x1c58] ss:$100 sps:$4 sm:$0xff]  }
 0x36c   :  { %11033 = vmatprep.subr.bf16.mxu0 %v18131_v53  ;;  %11205 = vmatprep.subr.bf16.mxu1 %v18134_v54  ;;  %v18191_v53 = vld [vmem:[%s25145_s1 + $0x1d1c] ss:$100 sps:$4 sm:$0xff]   ;;  %v18194_v54 = vld [vmem:[%s25145_s1 + $0x1d24] ss:$100 sps:$4 sm:$0xff]  }
 0x36f   :  { %11034 = vmatpush1.bf16.msra.mxu0 %v18129_v55  ;;  %11206 = vmatpush1.bf16.msra.mxu1 %v18132_v56  ;;  %v18189_v55 = vld [vmem:[%s25145_s1 + $0x1d18] ss:$100 sps:$4 sm:$0xff]   ;;  %v18192_v56 = vld [vmem:[%s25145_s1 + $0x1d20] ss:$100 sps:$4 sm:$0xff]  }
 0x370   :  { %11035 = vmatprep.subr.bf16.mxu0 %v18137_v57  ;;  %11207 = vmatprep.subr.bf16.mxu1 %v18140_v58  ;;  %v18197_v57 = vld [vmem:[%s25145_s1 + $0x1de4] ss:$100 sps:$4 sm:$0xff]   ;;  %v18200_v58 = vld [vmem:[%s25145_s1 + $0x1dec] ss:$100 sps:$4 sm:$0xff]  }
 0x373   :  { %11036 = vmatpush1.bf16.msra.mxu0 %v18135_v59  ;;  %11208 = vmatpush1.bf16.msra.mxu1 %v18138_v60  ;;  %v18195_v59 = vld [vmem:[%s25145_s1 + $0x1de0] ss:$100 sps:$4 sm:$0xff]   ;;  %v18198_v60 = vld [vmem:[%s25145_s1 + $0x1de8] ss:$100 sps:$4 sm:$0xff]  }
 0x374   :  { %11037 = vmatprep.subr.bf16.mxu0 %v18143_v61  ;;  %11209 = vmatprep.subr.bf16.mxu1 %v18146_v62  ;;  %v18203_v61 = vld [vmem:[%s25145_s1 + $0x1eac] ss:$100 sps:$4 sm:$0xff]   ;;  %v18206_v62 = vld [vmem:[%s25145_s1 + $0x1eb4] ss:$100 sps:$4 sm:$0xff]  }
 0x377   :  { %11038 = vmatpush1.bf16.msra.mxu0 %v18141_v63  ;;  %11210 = vmatpush1.bf16.msra.mxu1 %v18144_v0  ;;  %v18201_v63 = vld [vmem:[%s25145_s1 + $0x1ea8] ss:$100 sps:$4 sm:$0xff]   ;;  %v18204_v0 = vld [vmem:[%s25145_s1 + $0x1eb0] ss:$100 sps:$4 sm:$0xff]  }
 0x378   :  { %11039 = vmatprep.subr.bf16.mxu0 %v18149_v1  ;;  %11211 = vmatprep.subr.bf16.mxu1 %v18152_v2  ;;  %v18209_v1 = vld [vmem:[%s25145_s1 + $0x1f74] ss:$100 sps:$4 sm:$0xff]   ;;  %v18212_v2 = vld [vmem:[%s25145_s1 + $0x1f7c] ss:$100 sps:$4 sm:$0xff]  }
 0x37b   :  { %11040 = vmatpush1.bf16.msra.mxu0 %v18147_v6  ;;  %11212 = vmatpush1.bf16.msra.mxu1 %v18150_v7  ;;  %v18207_v6 = vld [vmem:[%s25145_s1 + $0x1f70] ss:$100 sps:$4 sm:$0xff]   ;;  %v18210_v7 = vld [vmem:[%s25145_s1 + $0x1f78] ss:$100 sps:$4 sm:$0xff]  }
 0x37c   :  { %11041 = vmatprep.subr.bf16.mxu0 %v18155_v11  ;;  %11213 = vmatprep.subr.bf16.mxu1 %v18158_v12  ;;  %v18215_v11 = vld [vmem:[%s25145_s1 + $0x203c] ss:$100 sps:$4 sm:$0xff]   ;;  %v18218_v12 = vld [vmem:[%s25145_s1 + $0x2044] ss:$100 sps:$4 sm:$0xff]  }
 0x37f   :  { %11042 = vmatpush1.bf16.msra.mxu0 %v18153_v14  ;;  %11214 = vmatpush1.bf16.msra.mxu1 %v18156_v20  ;;  %v18213_v14 = vld [vmem:[%s25145_s1 + $0x2038] ss:$100 sps:$4 sm:$0xff]   ;;  %v18216_v20 = vld [vmem:[%s25145_s1 + $0x2040] ss:$100 sps:$4 sm:$0xff]  }
 0x380   :  { %11054 = vmatprep.subr.bf16.mxu0 %v18161_v29  ;;  %11226 = vmatprep.subr.bf16.mxu1 %v18164_v32  ;;  %v18221_v29 = vld [vmem:[%s25145_s1 + $0x2104] ss:$100 sps:$4 sm:$0xff]   ;;  %v18224_v32 = vld [vmem:[%s25145_s1 + $0x210c] ss:$100 sps:$4 sm:$0xff]  }
 0x382   :  { %11044 = vmatmul.mubr.bf16.vlgmr.msra.gmra.mrb[12].mxu0 %v19854_v13  ;;  %11216 = vmatmul.mubr.bf16.vlgmr.msra.gmra.mrb[12].mxu1 %v19854_v13 }
 0x383   :  { %11055 = vmatpush1.bf16.msra.mxu0 %v18159_v37  ;;  %11227 = vmatpush1.bf16.msra.mxu1 %v18162_v25  ;;  %v18219_v37 = vld [vmem:[%s25145_s1 + $0x2100] ss:$100 sps:$4 sm:$0xff]   ;;  %v18222_v25 = vld [vmem:[%s25145_s1 + $0x2108] ss:$100 sps:$4 sm:$0xff]  }
 0x384   :  { %11056 = vmatprep.subr.bf16.mxu0 %v18167_v8  ;;  %11228 = vmatprep.subr.bf16.mxu1 %v18170_v26  ;;  %v18227_v8 = vld [vmem:[%s25145_s1 + $0x21cc] ss:$100 sps:$4 sm:$0xff]   ;;  %v18230_v26 = vld [vmem:[%s25145_s1 + $0x21d4] ss:$100 sps:$4 sm:$0xff]  }
 0x385   :  { %11086 = vmatprep.mubr.bf16.mxu0 %v19874_v18  ;;  %11258 = vmatprep.mubr.bf16.mxu1 %v19874_v18 }
 0x387   :  { %11057 = vmatpush1.bf16.msra.mxu0 %v18165_v38  ;;  %11229 = vmatpush1.bf16.msra.mxu1 %v18168_v39  ;;  %v18225_v38 = vld [vmem:[%s25145_s1 + $0x21c8] ss:$100 sps:$4 sm:$0xff]   ;;  %v18228_v39 = vld [vmem:[%s25145_s1 + $0x21d0] ss:$100 sps:$4 sm:$0xff]  }
 0x388   :  { %11058 = vmatprep.subr.bf16.mxu0 %v18173_v40  ;;  %11230 = vmatprep.subr.bf16.mxu1 %v18176_v41  ;;  %v18233_v40 = vld [vmem:[%s25145_s1 + $0x2294] ss:$100 sps:$4 sm:$0xff]   ;;  %v18236_v41 = vld [vmem:[%s25145_s1 + $0x229c] ss:$100 sps:$4 sm:$0xff]  }
 0x38b   :  { %11059 = vmatpush1.bf16.msra.mxu0 %v18171_v42  ;;  %11231 = vmatpush1.bf16.msra.mxu1 %v18174_v43  ;;  %v18231_v42 = vld [vmem:[%s25145_s1 + $0x2290] ss:$100 sps:$4 sm:$0xff]   ;;  %v18234_v43 = vld [vmem:[%s25145_s1 + $0x2298] ss:$100 sps:$4 sm:$0xff]  }
 0x38c   :  { %11060 = vmatprep.subr.bf16.mxu0 %v18179_v44  ;;  %11232 = vmatprep.subr.bf16.mxu1 %v18182_v45  ;;  %v18239_v44 = vld [vmem:[%s25145_s1 + $0x235c] ss:$100 sps:$4 sm:$0xff]   ;;  %v18242_v45 = vld [vmem:[%s25145_s1 + $0x2364] ss:$100 sps:$4 sm:$0xff]  }
 0x38f   :  { %11061 = vmatpush1.bf16.msra.mxu0 %v18177_v46  ;;  %11233 = vmatpush1.bf16.msra.mxu1 %v18180_v47  ;;  %v18237_v46 = vld [vmem:[%s25145_s1 + $0x2358] ss:$100 sps:$4 sm:$0xff]   ;;  %v18240_v47 = vld [vmem:[%s25145_s1 + $0x2360] ss:$100 sps:$4 sm:$0xff]  }
 0x390   :  { %11062 = vmatprep.subr.bf16.mxu0 %v18185_v48  ;;  %11234 = vmatprep.subr.bf16.mxu1 %v18188_v49  ;;  %v18245_v48 = vld [vmem:[%s25145_s1 + $0x2424] ss:$100 sps:$4 sm:$0xff]   ;;  %v18248_v49 = vld [vmem:[%s25145_s1 + $0x242c] ss:$100 sps:$4 sm:$0xff]  }
 0x393   :  { %11063 = vmatpush1.bf16.msra.mxu0 %v18183_v51  ;;  %11235 = vmatpush1.bf16.msra.mxu1 %v18186_v52  ;;  %v18243_v51 = vld [vmem:[%s25145_s1 + $0x2420] ss:$100 sps:$4 sm:$0xff]   ;;  %v18246_v52 = vld [vmem:[%s25145_s1 + $0x2428] ss:$100 sps:$4 sm:$0xff]  }
 0x394   :  { %11064 = vmatprep.subr.bf16.mxu0 %v18191_v53  ;;  %11236 = vmatprep.subr.bf16.mxu1 %v18194_v54  ;;  %v18251_v53 = vld [vmem:[%s25145_s1 + $0x24ec] ss:$100 sps:$4 sm:$0xff]   ;;  %v18254_v54 = vld [vmem:[%s25145_s1 + $0x24f4] ss:$100 sps:$4 sm:$0xff]  }
 0x397   :  { %11065 = vmatpush1.bf16.msra.mxu0 %v18189_v55  ;;  %11237 = vmatpush1.bf16.msra.mxu1 %v18192_v56  ;;  %v18249_v55 = vld [vmem:[%s25145_s1 + $0x24e8] ss:$100 sps:$4 sm:$0xff]   ;;  %v18252_v56 = vld [vmem:[%s25145_s1 + $0x24f0] ss:$100 sps:$4 sm:$0xff]  }
 0x398   :  { %11066 = vmatprep.subr.bf16.mxu0 %v18197_v57  ;;  %11238 = vmatprep.subr.bf16.mxu1 %v18200_v58  ;;  %v18257_v57 = vld [vmem:[%s25145_s1 + $0x25b4] ss:$100 sps:$4 sm:$0xff]   ;;  %v18260_v58 = vld [vmem:[%s25145_s1 + $0x25bc] ss:$100 sps:$4 sm:$0xff]  }
 0x39b   :  { %11067 = vmatpush1.bf16.msra.mxu0 %v18195_v59  ;;  %11239 = vmatpush1.bf16.msra.mxu1 %v18198_v60  ;;  %v18255_v59 = vld [vmem:[%s25145_s1 + $0x25b0] ss:$100 sps:$4 sm:$0xff]   ;;  %v18258_v60 = vld [vmem:[%s25145_s1 + $0x25b8] ss:$100 sps:$4 sm:$0xff]  }
 0x39c   :  { %11068 = vmatprep.subr.bf16.mxu0 %v18203_v61  ;;  %11240 = vmatprep.subr.bf16.mxu1 %v18206_v62  ;;  %v18263_v61 = vld [vmem:[%s25145_s1 + $0x267c] ss:$100 sps:$4 sm:$0xff]   ;;  %v18266_v62 = vld [vmem:[%s25145_s1 + $0x2684] ss:$100 sps:$4 sm:$0xff]  }
 0x39f   :  { %11069 = vmatpush1.bf16.msra.mxu0 %v18201_v63  ;;  %11241 = vmatpush1.bf16.msra.mxu1 %v18204_v0  ;;  %v18261_v63 = vld [vmem:[%s25145_s1 + $0x2678] ss:$100 sps:$4 sm:$0xff]   ;;  %v18264_v0 = vld [vmem:[%s25145_s1 + $0x2680] ss:$100 sps:$4 sm:$0xff]  }
 0x3a0   :  { %11070 = vmatprep.subr.bf16.mxu0 %v18209_v1  ;;  %11242 = vmatprep.subr.bf16.mxu1 %v18212_v2  ;;  %v18269_v1 = vld [vmem:[%s25145_s1 + $0x2744] ss:$100 sps:$4 sm:$0xff]   ;;  %v18272_v2 = vld [vmem:[%s25145_s1 + $0x274c] ss:$100 sps:$4 sm:$0xff]  }
 0x3a3   :  { %11071 = vmatpush1.bf16.msra.mxu0 %v18207_v6  ;;  %11243 = vmatpush1.bf16.msra.mxu1 %v18210_v7  ;;  %v18267_v6 = vld [vmem:[%s25145_s1 + $0x2740] ss:$100 sps:$4 sm:$0xff]   ;;  %v18270_v7 = vld [vmem:[%s25145_s1 + $0x2748] ss:$100 sps:$4 sm:$0xff]  }
 0x3a4   :  { %11072 = vmatprep.subr.bf16.mxu0 %v18215_v11  ;;  %11244 = vmatprep.subr.bf16.mxu1 %v18218_v12  ;;  %v18275_v11 = vld [vmem:[%s25145_s1 + $0x280c] ss:$100 sps:$4 sm:$0xff]   ;;  %v18278_v12 = vld [vmem:[%s25145_s1 + $0x2814] ss:$100 sps:$4 sm:$0xff]  }
 0x3a7   :  { %11073 = vmatpush1.bf16.msra.mxu0 %v18213_v14  ;;  %11245 = vmatpush1.bf16.msra.mxu1 %v18216_v20  ;;  %v18273_v14 = vld [vmem:[%s25145_s1 + $0x2808] ss:$100 sps:$4 sm:$0xff]   ;;  %v18276_v20 = vld [vmem:[%s25145_s1 + $0x2810] ss:$100 sps:$4 sm:$0xff]  }
 0x3a8   :  { %11074 = vmatprep.subr.bf16.mxu0 %v18221_v29  ;;  %11246 = vmatprep.subr.bf16.mxu1 %v18224_v32  ;;  %v18281_v29 = vld [vmem:[%s25145_s1 + $0x28d4] ss:$100 sps:$4 sm:$0xff]   ;;  %v18284_v32 = vld [vmem:[%s25145_s1 + $0x28dc] ss:$100 sps:$4 sm:$0xff]  }
 0x3ab   :  { %11075 = vmatpush1.bf16.msra.mxu0 %v18219_v37  ;;  %11247 = vmatpush1.bf16.msra.mxu1 %v18222_v25  ;;  %v18279_v37 = vld [vmem:[%s25145_s1 + $0x28d0] ss:$100 sps:$4 sm:$0xff]   ;;  %v18282_v25 = vld [vmem:[%s25145_s1 + $0x28d8] ss:$100 sps:$4 sm:$0xff]  }
 0x3ac   :  { %11076 = vmatprep.subr.bf16.mxu0 %v18227_v8  ;;  %11248 = vmatprep.subr.bf16.mxu1 %v18230_v26  ;;  %v1700_v8 = vld [vmem:[%s25147_s2 + $0x8] sm:$0xff]  ;;  %v18287_v26 = vld [vmem:[%s25145_s1 + $0x299c] ss:$100 sps:$4 sm:$0xff]  }
 0x3af   :  { %11077 = vmatpush1.bf16.msra.mxu0 %v18225_v38  ;;  %11249 = vmatpush1.bf16.msra.mxu1 %v18228_v39  ;;  %v18290_v38 = vld [vmem:[%s25145_s1 + $0x29a4] ss:$100 sps:$4 sm:$0xff]   ;;  %v1742_v39 = vrot.slane %v1700_v8, %v20924_v15 }
 0x3b0   :  { %11078 = vmatprep.subr.bf16.mxu0 %v18233_v40  ;;  %11250 = vmatprep.subr.bf16.mxu1 %v18236_v41  ;;  %v1750_v40 = vrot.slane %v1700_v8, %v20927_v19  ;;  %v1746_v41 = vrot.slane %v1700_v8, %v20936_v22 }
 0x3b3   :  { %11079 = vmatpush1.bf16.msra.mxu0 %v18231_v42  ;;  %11251 = vmatpush1.bf16.msra.mxu1 %v18234_v43  ;;  %v1754_v42 = vrot.slane %v1700_v8, %v20939_v23  ;;  %v18285_v43 = vld [vmem:[%s25145_s1 + $0x2998] ss:$100 sps:$4 sm:$0xff]   ;;  %v18300_v8 = vld [vmem:[%s25145_s1 + $0x2b30] ss:$100 sps:$4 sm:$0xff]  }
 0x3b4   :  { %11080 = vmatprep.subr.bf16.mxu0 %v18239_v44  ;;  %11252 = vmatprep.subr.bf16.mxu1 %v18242_v45  ;;  %v18288_v44 = vld [vmem:[%s25145_s1 + $0x29a0] ss:$100 sps:$4 sm:$0xff]  }
 0x3b5   :  { %v18293_v45 = vld [vmem:[%s25145_s1 + $0x2a64] ss:$100 sps:$4 sm:$0xff]  }
 0x3b7   :  { %11081 = vmatpush1.bf16.msra.mxu0 %v18237_v46  ;;  %11253 = vmatpush1.bf16.msra.mxu1 %v18240_v47  ;;  %v18296_v46 = vld [vmem:[%s25145_s1 + $0x2a6c] ss:$100 sps:$4 sm:$0xff]  }
 0x3b8   :  { %11082 = vmatprep.subr.bf16.mxu0 %v18245_v48  ;;  %11254 = vmatprep.subr.bf16.mxu1 %v18248_v49 }
 0x3bb   :  { %11083 = vmatpush1.bf16.msra.mxu0 %v18243_v51  ;;  %11255 = vmatpush1.bf16.msra.mxu1 %v18246_v52 }
 0x3bc   :  { %11084 = vmatprep.subr.bf16.mxu0 %v18251_v53  ;;  %11256 = vmatprep.subr.bf16.mxu1 %v18254_v54 }
 0x3bf   :  { %11085 = vmatpush1.bf16.msra.mxu0 %v18249_v55  ;;  %11257 = vmatpush1.bf16.msra.mxu1 %v18252_v56 }
 0x3c0   :  { %11097 = vmatprep.subr.bf16.mxu0 %v18257_v57  ;;  %11269 = vmatprep.subr.bf16.mxu1 %v18260_v58  ;;  %v18291_v58 = vld [vmem:[%s25145_s1 + $0x2a60] ss:$100 sps:$4 sm:$0xff]  }
 0x3c2   :  { %11087 = vmatmul.mubr.bf16.vlgmr.msra.gmra.mrb[12].mxu0 %v20068_v24  ;;  %11259 = vmatmul.mubr.bf16.vlgmr.msra.gmra.mrb[12].mxu1 %v20068_v24 }
 0x3c3   :  { %11098 = vmatpush1.bf16.msra.mxu0 %v18255_v59  ;;  %11270 = vmatpush1.bf16.msra.mxu1 %v18258_v60  ;;  %v18294_v59 = vld [vmem:[%s25145_s1 + $0x2a68] ss:$100 sps:$4 sm:$0xff]  }
 0x3c4   :  { %11099 = vmatprep.subr.bf16.mxu0 %v18263_v61  ;;  %11271 = vmatprep.subr.bf16.mxu1 %v18266_v62 }
 0x3c5   :  { %11129 = vmatprep.mubr.bf16.mxu0 %v20088_v17  ;;  %11301 = vmatprep.mubr.bf16.mxu1 %v20088_v17 }
 0x3c7   :  { %11100 = vmatpush1.bf16.msra.mxu0 %v18261_v63  ;;  %11272 = vmatpush1.bf16.msra.mxu1 %v18264_v0  ;;  %v18299_v0 = vld [vmem:[%s25145_s1 + $0x2b2c] ss:$100 sps:$4 sm:$0xff]  }
 0x3c8   :  { %11101 = vmatprep.subr.bf16.mxu0 %v18269_v1  ;;  %11273 = vmatprep.subr.bf16.mxu1 %v18272_v2  ;;  %v18302_v1 = vld [vmem:[%s25145_s1 + $0x2b34] ss:$100 sps:$4 sm:$0xff]  }
 0x3cb   :  { %11102 = vmatpush1.bf16.msra.mxu0 %v18267_v6  ;;  %11274 = vmatpush1.bf16.msra.mxu1 %v18270_v7 }
 0x3cc   :  { %11103 = vmatprep.subr.bf16.mxu0 %v18275_v11  ;;  %11275 = vmatprep.subr.bf16.mxu1 %v18278_v12 }
 0x3cf   :  { %11104 = vmatpush1.bf16.msra.mxu0 %v18273_v14  ;;  %11276 = vmatpush1.bf16.msra.mxu1 %v18276_v20  ;;  %v18297_v20 = vld [vmem:[%s25145_s1 + $0x2b28] ss:$100 sps:$4 sm:$0xff]  }
 0x3d0   :  { %11105 = vmatprep.subr.bf16.mxu0 %v18281_v29  ;;  %11277 = vmatprep.subr.bf16.mxu1 %v18284_v32 }
 0x3d3   :  { %11106 = vmatpush1.bf16.msra.mxu0 %v18279_v37  ;;  %11278 = vmatpush1.bf16.msra.mxu1 %v18282_v25 }
 0x3d4   :  { %11107 = vmatprep.subr.bf16.mxu0 %v18287_v26  ;;  %11279 = vmatprep.subr.bf16.mxu1 %v18290_v38 }
 0x3d5   :  { %v10787_v47 = vpop.f32.mrb[8].mxu0  ;;  %v10959_v48 = vpop.f32.mrb[8].mxu1 }
 0x3d6   :  { %v16637_v49 = vadd.f32 %v10787_v47, %v1742_v39  ;;  %v16641_v51 = vadd.f32 %v10959_v48, %v1750_v40  ;;  %v10789_v52 = vpop.f32.mrb[9].mxu0  ;;  %v10961_v53 = vpop.f32.mrb[9].mxu1  ;;  %v18309_v47 = vld [vmem:[%s25145_s1 + $0x2cb8] ss:$100 sps:$4 sm:$0xff]   ;;  %v18312_v48 = vld [vmem:[%s25145_s1 + $0x2cc0] ss:$100 sps:$4 sm:$0xff]  }
 0x3d7   :  { %v16638_v54 = vadd.f32 %v10789_v52, %v1746_v41  ;;  %v16642_v55 = vadd.f32 %v10961_v53, %v1754_v42  ;;  %v10791_v56 = vpop.f32.mrb[10].mxu0  ;;  %v10963_v57 = vpop.f32.mrb[10].mxu1  ;;  %11108 = vmatpush1.bf16.msra.mxu0 %v18285_v43  ;;  %11280 = vmatpush1.bf16.msra.mxu1 %v18288_v44  ;;  %v18303_v43 = vld [vmem:[%s25145_s1 + $0x2bf0] ss:$100 sps:$4 sm:$0xff]   ;;  %v18306_v44 = vld [vmem:[%s25145_s1 + $0x2bf8] ss:$100 sps:$4 sm:$0xff]  }
 0x3d8   :  { %v16639_v60 = vadd.f32 %v10791_v56, %v1742_v39  ;;  %v16643_v61 = vadd.f32 %v10963_v57, %v1750_v40  ;;  %v10793_v62 = vpop.f32.mrb[11].mxu0  ;;  %v10965_v63 = vpop.f32.mrb[11].mxu1  ;;  %11109 = vmatprep.subr.bf16.mxu0 %v18293_v45  ;;  %11281 = vmatprep.subr.bf16.mxu1 %v18296_v46  ;;  %v12172_v7 = vmax.f32 %v16637_v49, 0.0  ;;  %v12174_v11 = vmax.f32 %v16641_v51, 0.0  ;;  %v18305_v39 = vld [vmem:[%s25145_s1 + $0x2bf4] ss:$100 sps:$4 sm:$0xff]  }
 0x3d9   :  { %v16640_v2 = vadd.f32 %v10793_v62, %v1746_v41  ;;  %v16644_v6 = vadd.f32 %v10965_v63, %v1754_v42  ;;  %v12173_v29 = vmax.f32 %v16638_v54, 0.0  ;;  %v12175_v32 = vmax.f32 %v16642_v55, 0.0  ;;  %v18308_v40 = vld [vmem:[%s25145_s1 + $0x2bfc] ss:$100 sps:$4 sm:$0xff]   ;;  %v18314_v46 = vld [vmem:[%s25145_s1 + $0x2cc4] ss:$100 sps:$4 sm:$0xff]  }
 0x3da   :  { %v12197_v12 = vmax.f32 %v16639_v60, 0.0  ;;  %v12199_v14 = vmax.f32 %v16643_v61, 0.0  ;;  %v18311_v45 = vld [vmem:[%s25145_s1 + $0x2cbc] ss:$100 sps:$4 sm:$0xff]   ;;  %v18317_v49 = vld [vmem:[%s25145_s1 + $0x2d84] ss:$100 sps:$4 sm:$0xff]  }
 0x3db   :  { %v12198_v37 = vmax.f32 %v16640_v2, 0.0  ;;  %v12200_v25 = vmax.f32 %v16644_v6, 0.0  ;;  %11110 = vmatpush1.bf16.msra.mxu0 %v18291_v58  ;;  %11282 = vmatpush1.bf16.msra.mxu1 %v18294_v59  ;;  %v18320_v51 = vld [vmem:[%s25145_s1 + $0x2d8c] ss:$100 sps:$4 sm:$0xff]   ;;  %v18315_v52 = vld [vmem:[%s25145_s1 + $0x2d80] ss:$100 sps:$4 sm:$0xff]  }
 0x3dc   :  { %v22591_v26 = vpack.c.bf16 %v12197_v12, %v12172_v7  ;;  %v22593_v38 = vpack.c.bf16 %v12199_v14, %v12174_v11  ;;  %11111 = vmatprep.subr.bf16.mxu0 %v18299_v0  ;;  %11283 = vmatprep.subr.bf16.mxu1 %v18302_v1  ;;  %v18318_v53 = vld [vmem:[%s25145_s1 + $0x2d88] ss:$100 sps:$4 sm:$0xff]   ;;  %v18326_v55 = vld [vmem:[%s25145_s1 + $0x2e54] ss:$100 sps:$4 sm:$0xff]   ;;  %v18332_v59 = vld [vmem:[%s25145_s1 + $0x2f1c] ss:$100 sps:$4 sm:$0xff]  }
 0x3dd   :  { %v22601_v41 = vpack.c.bf16 %v12198_v37, %v12173_v29  ;;  %v22603_v42 = vpack.c.bf16 %v12200_v25, %v12175_v32  ;;  %v18323_v54 = vld [vmem:[%s25145_s1 + $0x2e4c] ss:$100 sps:$4 sm:$0xff]   ;;  %v18329_v58 = vld [vmem:[%s25145_s1 + $0x2f14] ss:$100 sps:$4 sm:$0xff]   ;;  %v18335_v62 = vld [vmem:[%s25145_s1 + $0x2fdc] ss:$100 sps:$4 sm:$0xff]  }
 0x3de   :  { %v18321_v56 = vld [vmem:[%s25145_s1 + $0x2e48] ss:$100 sps:$4 sm:$0xff]   ;;  %v18324_v57 = vld [vmem:[%s25145_s1 + $0x2e50] ss:$100 sps:$4 sm:$0xff]   ;;  %v18330_v61 = vld [vmem:[%s25145_s1 + $0x2f18] ss:$100 sps:$4 sm:$0xff]  }
 0x3df   :  { %11112 = vmatpush1.bf16.msra.mxu0 %v18297_v20  ;;  %11284 = vmatpush1.bf16.msra.mxu1 %v18300_v8  ;;  %v18327_v60 = vld [vmem:[%s25145_s1 + $0x2f10] ss:$100 sps:$4 sm:$0xff]   ;;  %v18338_v63 = vld [vmem:[%s25145_s1 + $0x2fe4] ss:$100 sps:$4 sm:$0xff]   ;;  %v18333_v0 = vld [vmem:[%s25145_s1 + $0x2fd8] ss:$100 sps:$4 sm:$0xff]  }
 0x3e0   :  { %11113 = vmatprep.subr.bf16.mxu0 %v18305_v39  ;;  %11285 = vmatprep.subr.bf16.mxu1 %v18308_v40  ;;  %v18336_v1 = vld [vmem:[%s25145_s1 + $0x2fe0] ss:$100 sps:$4 sm:$0xff]   ;;  %v18344_v6 = vld [vmem:[%s25145_s1 + $0x30ac] ss:$100 sps:$4 sm:$0xff]   ;;  %v18350_v14 = vld [vmem:[%s25145_s1 + $0x3174] ss:$100 sps:$4 sm:$0xff]  }
 0x3e1   :  { %v18341_v2 = vld [vmem:[%s25145_s1 + $0x30a4] ss:$100 sps:$4 sm:$0xff]   ;;  %v18347_v12 = vld [vmem:[%s25145_s1 + $0x316c] ss:$100 sps:$4 sm:$0xff]   ;;  %v18362_v40 = vld [vmem:[%s25145_s1 + $0x114] ss:$100 sps:$4 sm:$0xff]  }
 0x3e2   :  { %v18339_v7 = vld [vmem:[%s25145_s1 + $0x30a0] ss:$100 sps:$4 sm:$0xff]   ;;  %v18342_v11 = vld [vmem:[%s25145_s1 + $0x30a8] ss:$100 sps:$4 sm:$0xff]   ;;  %v18348_v29 = vld [vmem:[%s25145_s1 + $0x3170] ss:$100 sps:$4 sm:$0xff]  }
 0x3e3   :  { %11114 = vmatpush1.bf16.msra.mxu0 %v18303_v43  ;;  %11286 = vmatpush1.bf16.msra.mxu1 %v18306_v44  ;;  %v18345_v20 = vld [vmem:[%s25145_s1 + $0x3168] ss:$100 sps:$4 sm:$0xff]   ;;  %v18351_v25 = vld [vmem:[%s25145_s1 + $0x40] ss:$100 sps:$4 sm:$0xff]   ;;  %v18360_v44 = vld [vmem:[%s25145_s1 + $0x110] ss:$100 sps:$4 sm:$0xff]  }
 0x3e4   :  { %11115 = vmatprep.subr.bf16.mxu0 %v18311_v45  ;;  %11287 = vmatprep.subr.bf16.mxu1 %v18314_v46  ;;  %v18353_v32 = vld [vmem:[%s25145_s1 + $0x44] ss:$100 sps:$4 sm:$0xff]   ;;  %v18356_v37 = vld [vmem:[%s25145_s1 + $0x4c] ss:$100 sps:$4 sm:$0xff]   ;;  %v18365_v45 = vld [vmem:[%s25145_s1 + $0x1d4] ss:$100 sps:$4 sm:$0xff]  }
 0x3e5   :  { %v18354_v8 = vld [vmem:[%s25145_s1 + $0x48] ss:$100 sps:$4 sm:$0xff]   ;;  %v18368_v46 = vld [vmem:[%s25145_s1 + $0x1dc] ss:$100 sps:$4 sm:$0xff]  }
 0x3e6   :  { %v18359_v39 = vld [vmem:[%s25145_s1 + $0x10c] ss:$100 sps:$4 sm:$0xff]  }
 0x3e7   :  { %11116 = vmatpush1.bf16.msra.mxu0 %v18309_v47  ;;  %11288 = vmatpush1.bf16.msra.mxu1 %v18312_v48  ;;  %v18357_v43 = vld [vmem:[%s25145_s1 + $0x108] ss:$100 sps:$4 sm:$0xff]   ;;  %v18363_v47 = vld [vmem:[%s25145_s1 + $0x1d0] ss:$100 sps:$4 sm:$0xff]   ;;  %v18366_v48 = vld [vmem:[%s25145_s1 + $0x1d8] ss:$100 sps:$4 sm:$0xff]  }
 0x3e8   :  { %11117 = vmatprep.subr.bf16.mxu0 %v18317_v49  ;;  %11289 = vmatprep.subr.bf16.mxu1 %v18320_v51  ;;  %v18371_v49 = vld [vmem:[%s25145_s1 + $0x29c] ss:$100 sps:$4 sm:$0xff]   ;;  %v18374_v51 = vld [vmem:[%s25145_s1 + $0x2a4] ss:$100 sps:$4 sm:$0xff]  }
 0x3eb   :  { %11118 = vmatpush1.bf16.msra.mxu0 %v18315_v52  ;;  %11290 = vmatpush1.bf16.msra.mxu1 %v18318_v53  ;;  %v18369_v52 = vld [vmem:[%s25145_s1 + $0x298] ss:$100 sps:$4 sm:$0xff]   ;;  %v18372_v53 = vld [vmem:[%s25145_s1 + $0x2a0] ss:$100 sps:$4 sm:$0xff]  }
 0x3ec   :  { %11119 = vmatprep.subr.bf16.mxu0 %v18323_v54  ;;  %11291 = vmatprep.subr.bf16.mxu1 %v18326_v55  ;;  %v18377_v54 = vld [vmem:[%s25145_s1 + $0x364] ss:$100 sps:$4 sm:$0xff]   ;;  %v18380_v55 = vld [vmem:[%s25145_s1 + $0x36c] ss:$100 sps:$4 sm:$0xff]  }
 0x3ef   :  { %11120 = vmatpush1.bf16.msra.mxu0 %v18321_v56  ;;  %11292 = vmatpush1.bf16.msra.mxu1 %v18324_v57  ;;  %v18375_v56 = vld [vmem:[%s25145_s1 + $0x360] ss:$100 sps:$4 sm:$0xff]   ;;  %v18378_v57 = vld [vmem:[%s25145_s1 + $0x368] ss:$100 sps:$4 sm:$0xff]  }
 0x3f0   :  { %11121 = vmatprep.subr.bf16.mxu0 %v18329_v58  ;;  %11293 = vmatprep.subr.bf16.mxu1 %v18332_v59  ;;  %v18383_v58 = vld [vmem:[%s25145_s1 + $0x42c] ss:$100 sps:$4 sm:$0xff]   ;;  %v18386_v59 = vld [vmem:[%s25145_s1 + $0x434] ss:$100 sps:$4 sm:$0xff]  }
 0x3f3   :  { %11122 = vmatpush1.bf16.msra.mxu0 %v18327_v60  ;;  %11294 = vmatpush1.bf16.msra.mxu1 %v18330_v61  ;;  %v18381_v60 = vld [vmem:[%s25145_s1 + $0x428] ss:$100 sps:$4 sm:$0xff]   ;;  %v18384_v61 = vld [vmem:[%s25145_s1 + $0x430] ss:$100 sps:$4 sm:$0xff]  }
 0x3f4   :  { %11123 = vmatprep.subr.bf16.mxu0 %v18335_v62  ;;  %11295 = vmatprep.subr.bf16.mxu1 %v18338_v63  ;;  %v18389_v62 = vld [vmem:[%s25145_s1 + $0x4f4] ss:$100 sps:$4 sm:$0xff]   ;;  %v18392_v63 = vld [vmem:[%s25145_s1 + $0x4fc] ss:$100 sps:$4 sm:$0xff]  }
 0x3f7   :  { %11124 = vmatpush1.bf16.msra.mxu0 %v18333_v0  ;;  %11296 = vmatpush1.bf16.msra.mxu1 %v18336_v1  ;;  %v18387_v0 = vld [vmem:[%s25145_s1 + $0x4f0] ss:$100 sps:$4 sm:$0xff]   ;;  %v18390_v1 = vld [vmem:[%s25145_s1 + $0x4f8] ss:$100 sps:$4 sm:$0xff]  }
 0x3f8   :  { %11125 = vmatprep.subr.bf16.mxu0 %v18341_v2  ;;  %11297 = vmatprep.subr.bf16.mxu1 %v18344_v6  ;;  %v18395_v2 = vld [vmem:[%s25145_s1 + $0x5bc] ss:$100 sps:$4 sm:$0xff]   ;;  %v18398_v6 = vld [vmem:[%s25145_s1 + $0x5c4] ss:$100 sps:$4 sm:$0xff]  }
 0x3fb   :  { %11126 = vmatpush1.bf16.msra.mxu0 %v18339_v7  ;;  %11298 = vmatpush1.bf16.msra.mxu1 %v18342_v11  ;;  %v18393_v7 = vld [vmem:[%s25145_s1 + $0x5b8] ss:$100 sps:$4 sm:$0xff]   ;;  %v18396_v11 = vld [vmem:[%s25145_s1 + $0x5c0] ss:$100 sps:$4 sm:$0xff]  }
 0x3fc   :  { %11127 = vmatprep.subr.bf16.mxu0 %v18347_v12  ;;  %11299 = vmatprep.subr.bf16.mxu1 %v18350_v14  ;;  %v18401_v12 = vld [vmem:[%s25145_s1 + $0x684] ss:$100 sps:$4 sm:$0xff]   ;;  %v18404_v14 = vld [vmem:[%s25145_s1 + $0x68c] ss:$100 sps:$4 sm:$0xff]  }
 0x3ff   :  { %11128 = vmatpush1.bf16.msra.mxu0 %v18345_v20  ;;  %11300 = vmatpush1.bf16.msra.mxu1 %v18348_v29  ;;  %v18399_v20 = vld [vmem:[%s25145_s1 + $0x680] ss:$100 sps:$4 sm:$0xff]   ;;  %v18402_v29 = vld [vmem:[%s25145_s1 + $0x688] ss:$100 sps:$4 sm:$0xff]  }
 0x400   :  { %11312 = vmatprep.subr.bf16.mxu0 %v18353_v32  ;;  %11484 = vmatprep.subr.bf16.mxu1 %v18356_v37  ;;  %v18407_v32 = vld [vmem:[%s25145_s1 + $0x74c] ss:$100 sps:$4 sm:$0xff]   ;;  %v18410_v37 = vld [vmem:[%s25145_s1 + $0x754] ss:$100 sps:$4 sm:$0xff]  }
 0x402   :  { %11130 = vmatmul.mubr.bf16.vlgmr.msra.gmra.mrb[12].mxu0 %v20276_v33  ;;  %11302 = vmatmul.mubr.bf16.vlgmr.msra.gmra.mrb[12].mxu1 %v20276_v33 }
 0x403   :  { %11313 = vmatpush1.bf16.msra.mxu0 %v18351_v25  ;;  %11485 = vmatpush1.bf16.msra.mxu1 %v18354_v8  ;;  %v18405_v25 = vld [vmem:[%s25145_s1 + $0x748] ss:$100 sps:$4 sm:$0xff]   ;;  %v18408_v8 = vld [vmem:[%s25145_s1 + $0x750] ss:$100 sps:$4 sm:$0xff]  }
 0x404   :  { %11314 = vmatprep.subr.bf16.mxu0 %v18359_v39  ;;  %11486 = vmatprep.subr.bf16.mxu1 %v18362_v40  ;;  %v18413_v39 = vld [vmem:[%s25145_s1 + $0x814] ss:$100 sps:$4 sm:$0xff]   ;;  %v18416_v40 = vld [vmem:[%s25145_s1 + $0x81c] ss:$100 sps:$4 sm:$0xff]  }
 0x405   :  { %11344 = vmatprep.mubr.bf16.mxu0 %v19576_v50  ;;  %11516 = vmatprep.mubr.bf16.mxu1 %v19576_v50 }
 0x407   :  { %11315 = vmatpush1.bf16.msra.mxu0 %v18357_v43  ;;  %11487 = vmatpush1.bf16.msra.mxu1 %v18360_v44  ;;  %v18411_v43 = vld [vmem:[%s25145_s1 + $0x810] ss:$100 sps:$4 sm:$0xff]   ;;  %v18414_v44 = vld [vmem:[%s25145_s1 + $0x818] ss:$100 sps:$4 sm:$0xff]  }
 0x408   :  { %11316 = vmatprep.subr.bf16.mxu0 %v18365_v45  ;;  %11488 = vmatprep.subr.bf16.mxu1 %v18368_v46  ;;  %v18419_v45 = vld [vmem:[%s25145_s1 + $0x8dc] ss:$100 sps:$4 sm:$0xff]   ;;  %v18422_v46 = vld [vmem:[%s25145_s1 + $0x8e4] ss:$100 sps:$4 sm:$0xff]  }
 0x40b   :  { %11317 = vmatpush1.bf16.msra.mxu0 %v18363_v47  ;;  %11489 = vmatpush1.bf16.msra.mxu1 %v18366_v48  ;;  %v18417_v47 = vld [vmem:[%s25145_s1 + $0x8d8] ss:$100 sps:$4 sm:$0xff]   ;;  %v18420_v48 = vld [vmem:[%s25145_s1 + $0x8e0] ss:$100 sps:$4 sm:$0xff]  }
 0x40c   :  { %11318 = vmatprep.subr.bf16.mxu0 %v18371_v49  ;;  %11490 = vmatprep.subr.bf16.mxu1 %v18374_v51  ;;  %v18425_v49 = vld [vmem:[%s25145_s1 + $0x9a4] ss:$100 sps:$4 sm:$0xff]   ;;  %v18428_v51 = vld [vmem:[%s25145_s1 + $0x9ac] ss:$100 sps:$4 sm:$0xff]  }
 0x40f   :  { %11319 = vmatpush1.bf16.msra.mxu0 %v18369_v52  ;;  %11491 = vmatpush1.bf16.msra.mxu1 %v18372_v53  ;;  %v18423_v52 = vld [vmem:[%s25145_s1 + $0x9a0] ss:$100 sps:$4 sm:$0xff]   ;;  %v18426_v53 = vld [vmem:[%s25145_s1 + $0x9a8] ss:$100 sps:$4 sm:$0xff]  }
 0x410   :  { %11320 = vmatprep.subr.bf16.mxu0 %v18377_v54  ;;  %11492 = vmatprep.subr.bf16.mxu1 %v18380_v55  ;;  %v18431_v54 = vld [vmem:[%s25145_s1 + $0xa6c] ss:$100 sps:$4 sm:$0xff]   ;;  %v18434_v55 = vld [vmem:[%s25145_s1 + $0xa74] ss:$100 sps:$4 sm:$0xff]  }
 0x413   :  { %11321 = vmatpush1.bf16.msra.mxu0 %v18375_v56  ;;  %11493 = vmatpush1.bf16.msra.mxu1 %v18378_v57  ;;  %v18429_v56 = vld [vmem:[%s25145_s1 + $0xa68] ss:$100 sps:$4 sm:$0xff]   ;;  %v18432_v57 = vld [vmem:[%s25145_s1 + $0xa70] ss:$100 sps:$4 sm:$0xff]  }
 0x414   :  { %11322 = vmatprep.subr.bf16.mxu0 %v18383_v58  ;;  %11494 = vmatprep.subr.bf16.mxu1 %v18386_v59  ;;  %v18437_v58 = vld [vmem:[%s25145_s1 + $0xb34] ss:$100 sps:$4 sm:$0xff]   ;;  %v18440_v59 = vld [vmem:[%s25145_s1 + $0xb3c] ss:$100 sps:$4 sm:$0xff]  }
 0x417   :  { %11323 = vmatpush1.bf16.msra.mxu0 %v18381_v60  ;;  %11495 = vmatpush1.bf16.msra.mxu1 %v18384_v61  ;;  %v18435_v60 = vld [vmem:[%s25145_s1 + $0xb30] ss:$100 sps:$4 sm:$0xff]   ;;  %v18438_v61 = vld [vmem:[%s25145_s1 + $0xb38] ss:$100 sps:$4 sm:$0xff]  }
 0x418   :  { %11324 = vmatprep.subr.bf16.mxu0 %v18389_v62  ;;  %11496 = vmatprep.subr.bf16.mxu1 %v18392_v63  ;;  %v18443_v62 = vld [vmem:[%s25145_s1 + $0xbfc] ss:$100 sps:$4 sm:$0xff]   ;;  %v18446_v63 = vld [vmem:[%s25145_s1 + $0xc04] ss:$100 sps:$4 sm:$0xff]  }
 0x41b   :  { %11325 = vmatpush1.bf16.msra.mxu0 %v18387_v0  ;;  %11497 = vmatpush1.bf16.msra.mxu1 %v18390_v1  ;;  %v18441_v0 = vld [vmem:[%s25145_s1 + $0xbf8] ss:$100 sps:$4 sm:$0xff]   ;;  %v18444_v1 = vld [vmem:[%s25145_s1 + $0xc00] ss:$100 sps:$4 sm:$0xff]  }
 0x41c   :  { %11326 = vmatprep.subr.bf16.mxu0 %v18395_v2  ;;  %11498 = vmatprep.subr.bf16.mxu1 %v18398_v6  ;;  %v18449_v2 = vld [vmem:[%s25145_s1 + $0xcc4] ss:$100 sps:$4 sm:$0xff]   ;;  %v18452_v6 = vld [vmem:[%s25145_s1 + $0xccc] ss:$100 sps:$4 sm:$0xff]  }
 0x41f   :  { %11327 = vmatpush1.bf16.msra.mxu0 %v18393_v7  ;;  %11499 = vmatpush1.bf16.msra.mxu1 %v18396_v11  ;;  %v18447_v7 = vld [vmem:[%s25145_s1 + $0xcc0] ss:$100 sps:$4 sm:$0xff]   ;;  %v18450_v11 = vld [vmem:[%s25145_s1 + $0xcc8] ss:$100 sps:$4 sm:$0xff]  }
 0x420   :  { %11328 = vmatprep.subr.bf16.mxu0 %v18401_v12  ;;  %11500 = vmatprep.subr.bf16.mxu1 %v18404_v14  ;;  %v18455_v12 = vld [vmem:[%s25145_s1 + $0xd8c] ss:$100 sps:$4 sm:$0xff]   ;;  %v18458_v14 = vld [vmem:[%s25145_s1 + $0xd94] ss:$100 sps:$4 sm:$0xff]  }
 0x423   :  { %11329 = vmatpush1.bf16.msra.mxu0 %v18399_v20  ;;  %11501 = vmatpush1.bf16.msra.mxu1 %v18402_v29  ;;  %v18453_v20 = vld [vmem:[%s25145_s1 + $0xd88] ss:$100 sps:$4 sm:$0xff]   ;;  %v18456_v29 = vld [vmem:[%s25145_s1 + $0xd90] ss:$100 sps:$4 sm:$0xff]  }
 0x424   :  { %11330 = vmatprep.subr.bf16.mxu0 %v18407_v32  ;;  %11502 = vmatprep.subr.bf16.mxu1 %v18410_v37  ;;  %v18461_v32 = vld [vmem:[%s25145_s1 + $0xe54] ss:$100 sps:$4 sm:$0xff]   ;;  %v18464_v37 = vld [vmem:[%s25145_s1 + $0xe5c] ss:$100 sps:$4 sm:$0xff]  }
 0x427   :  { %11331 = vmatpush1.bf16.msra.mxu0 %v18405_v25  ;;  %11503 = vmatpush1.bf16.msra.mxu1 %v18408_v8  ;;  %v18459_v25 = vld [vmem:[%s25145_s1 + $0xe50] ss:$100 sps:$4 sm:$0xff]   ;;  %v18462_v8 = vld [vmem:[%s25145_s1 + $0xe58] ss:$100 sps:$4 sm:$0xff]  }
 0x428   :  { %11332 = vmatprep.subr.bf16.mxu0 %v18413_v39  ;;  %11504 = vmatprep.subr.bf16.mxu1 %v18416_v40  ;;  %v18467_v39 = vld [vmem:[%s25145_s1 + $0xf1c] ss:$100 sps:$4 sm:$0xff]   ;;  %v18470_v40 = vld [vmem:[%s25145_s1 + $0xf24] ss:$100 sps:$4 sm:$0xff]  }
 0x42b   :  { %11333 = vmatpush1.bf16.msra.mxu0 %v18411_v43  ;;  %11505 = vmatpush1.bf16.msra.mxu1 %v18414_v44  ;;  %v18465_v43 = vld [vmem:[%s25145_s1 + $0xf18] ss:$100 sps:$4 sm:$0xff]   ;;  %v18468_v44 = vld [vmem:[%s25145_s1 + $0xf20] ss:$100 sps:$4 sm:$0xff]  }
 0x42c   :  { %11334 = vmatprep.subr.bf16.mxu0 %v18419_v45  ;;  %11506 = vmatprep.subr.bf16.mxu1 %v18422_v46  ;;  %v18473_v45 = vld [vmem:[%s25145_s1 + $0xfe4] ss:$100 sps:$4 sm:$0xff]   ;;  %v18476_v46 = vld [vmem:[%s25145_s1 + $0xfec] ss:$100 sps:$4 sm:$0xff]  }
 0x42f   :  { %11335 = vmatpush1.bf16.msra.mxu0 %v18417_v47  ;;  %11507 = vmatpush1.bf16.msra.mxu1 %v18420_v48  ;;  %v18471_v47 = vld [vmem:[%s25145_s1 + $0xfe0] ss:$100 sps:$4 sm:$0xff]   ;;  %v18474_v48 = vld [vmem:[%s25145_s1 + $0xfe8] ss:$100 sps:$4 sm:$0xff]  }
 0x430   :  { %11336 = vmatprep.subr.bf16.mxu0 %v18425_v49  ;;  %11508 = vmatprep.subr.bf16.mxu1 %v18428_v51  ;;  %v18479_v49 = vld [vmem:[%s25145_s1 + $0x10ac] ss:$100 sps:$4 sm:$0xff]   ;;  %v18482_v51 = vld [vmem:[%s25145_s1 + $0x10b4] ss:$100 sps:$4 sm:$0xff]  }
 0x433   :  { %11337 = vmatpush1.bf16.msra.mxu0 %v18423_v52  ;;  %11509 = vmatpush1.bf16.msra.mxu1 %v18426_v53  ;;  %v18477_v52 = vld [vmem:[%s25145_s1 + $0x10a8] ss:$100 sps:$4 sm:$0xff]   ;;  %v18480_v53 = vld [vmem:[%s25145_s1 + $0x10b0] ss:$100 sps:$4 sm:$0xff]  }
 0x434   :  { %11338 = vmatprep.subr.bf16.mxu0 %v18431_v54  ;;  %11510 = vmatprep.subr.bf16.mxu1 %v18434_v55  ;;  %v18485_v54 = vld [vmem:[%s25145_s1 + $0x1174] ss:$100 sps:$4 sm:$0xff]   ;;  %v18488_v55 = vld [vmem:[%s25145_s1 + $0x117c] ss:$100 sps:$4 sm:$0xff]  }
 0x437   :  { %11339 = vmatpush1.bf16.msra.mxu0 %v18429_v56  ;;  %11511 = vmatpush1.bf16.msra.mxu1 %v18432_v57  ;;  %v18483_v56 = vld [vmem:[%s25145_s1 + $0x1170] ss:$100 sps:$4 sm:$0xff]   ;;  %v18486_v57 = vld [vmem:[%s25145_s1 + $0x1178] ss:$100 sps:$4 sm:$0xff]  }
 0x438   :  { %11340 = vmatprep.subr.bf16.mxu0 %v18437_v58  ;;  %11512 = vmatprep.subr.bf16.mxu1 %v18440_v59  ;;  %v18491_v58 = vld [vmem:[%s25145_s1 + $0x123c] ss:$100 sps:$4 sm:$0xff]   ;;  %v18494_v59 = vld [vmem:[%s25145_s1 + $0x1244] ss:$100 sps:$4 sm:$0xff]  }
 0x43b   :  { %11341 = vmatpush1.bf16.msra.mxu0 %v18435_v60  ;;  %11513 = vmatpush1.bf16.msra.mxu1 %v18438_v61  ;;  %v18489_v60 = vld [vmem:[%s25145_s1 + $0x1238] ss:$100 sps:$4 sm:$0xff]   ;;  %v18492_v61 = vld [vmem:[%s25145_s1 + $0x1240] ss:$100 sps:$4 sm:$0xff]  }
 0x43c   :  { %11342 = vmatprep.subr.bf16.mxu0 %v18443_v62  ;;  %11514 = vmatprep.subr.bf16.mxu1 %v18446_v63  ;;  %v18497_v62 = vld [vmem:[%s25145_s1 + $0x1304] ss:$100 sps:$4 sm:$0xff]   ;;  %v18500_v63 = vld [vmem:[%s25145_s1 + $0x130c] ss:$100 sps:$4 sm:$0xff]  }
 0x43f   :  { %11343 = vmatpush1.bf16.msra.mxu0 %v18441_v0  ;;  %11515 = vmatpush1.bf16.msra.mxu1 %v18444_v1  ;;  %v18495_v0 = vld [vmem:[%s25145_s1 + $0x1300] ss:$100 sps:$4 sm:$0xff]   ;;  %v18498_v1 = vld [vmem:[%s25145_s1 + $0x1308] ss:$100 sps:$4 sm:$0xff]  }
 0x440   :  { %11355 = vmatprep.subr.bf16.mxu0 %v18449_v2  ;;  %11527 = vmatprep.subr.bf16.mxu1 %v18452_v6  ;;  %v18503_v2 = vld [vmem:[%s25145_s1 + $0x13cc] ss:$100 sps:$4 sm:$0xff]   ;;  %v18506_v6 = vld [vmem:[%s25145_s1 + $0x13d4] ss:$100 sps:$4 sm:$0xff]  }
 0x442   :  { %11345 = vmatmul.mubr.bf16.vlgmr.msra.gmra.mrb[16].mxu0 %v19634_v5  ;;  %11517 = vmatmul.mubr.bf16.vlgmr.msra.gmra.mrb[16].mxu1 %v19634_v5 }
 0x443   :  { %11356 = vmatpush1.bf16.msra.mxu0 %v18447_v7  ;;  %11528 = vmatpush1.bf16.msra.mxu1 %v18450_v11  ;;  %v18501_v7 = vld [vmem:[%s25145_s1 + $0x13c8] ss:$100 sps:$4 sm:$0xff]   ;;  %v18504_v11 = vld [vmem:[%s25145_s1 + $0x13d0] ss:$100 sps:$4 sm:$0xff]  }
 0x444   :  { %11357 = vmatprep.subr.bf16.mxu0 %v18455_v12  ;;  %11529 = vmatprep.subr.bf16.mxu1 %v18458_v14  ;;  %v18509_v12 = vld [vmem:[%s25145_s1 + $0x1494] ss:$100 sps:$4 sm:$0xff]   ;;  %v18512_v14 = vld [vmem:[%s25145_s1 + $0x149c] ss:$100 sps:$4 sm:$0xff]  }
 0x445   :  { %11387 = vmatprep.mubr.bf16.mxu0 %v19728_v34  ;;  %11559 = vmatprep.mubr.bf16.mxu1 %v19728_v34 }
 0x447   :  { %11358 = vmatpush1.bf16.msra.mxu0 %v18453_v20  ;;  %11530 = vmatpush1.bf16.msra.mxu1 %v18456_v29  ;;  %v18507_v20 = vld [vmem:[%s25145_s1 + $0x1490] ss:$100 sps:$4 sm:$0xff]   ;;  %v18510_v29 = vld [vmem:[%s25145_s1 + $0x1498] ss:$100 sps:$4 sm:$0xff]  }
 0x448   :  { %11359 = vmatprep.subr.bf16.mxu0 %v18461_v32  ;;  %11531 = vmatprep.subr.bf16.mxu1 %v18464_v37  ;;  %v18515_v32 = vld [vmem:[%s25145_s1 + $0x155c] ss:$100 sps:$4 sm:$0xff]   ;;  %v18518_v37 = vld [vmem:[%s25145_s1 + $0x1564] ss:$100 sps:$4 sm:$0xff]  }
 0x44b   :  { %11360 = vmatpush1.bf16.msra.mxu0 %v18459_v25  ;;  %11532 = vmatpush1.bf16.msra.mxu1 %v18462_v8  ;;  %v18513_v25 = vld [vmem:[%s25145_s1 + $0x1558] ss:$100 sps:$4 sm:$0xff]   ;;  %v18516_v8 = vld [vmem:[%s25145_s1 + $0x1560] ss:$100 sps:$4 sm:$0xff]  }
 0x44c   :  { %11361 = vmatprep.subr.bf16.mxu0 %v18467_v39  ;;  %11533 = vmatprep.subr.bf16.mxu1 %v18470_v40  ;;  %v18521_v39 = vld [vmem:[%s25145_s1 + $0x1624] ss:$100 sps:$4 sm:$0xff]   ;;  %v18524_v40 = vld [vmem:[%s25145_s1 + $0x162c] ss:$100 sps:$4 sm:$0xff]  }
 0x44f   :  { %11362 = vmatpush1.bf16.msra.mxu0 %v18465_v43  ;;  %11534 = vmatpush1.bf16.msra.mxu1 %v18468_v44  ;;  %v18519_v43 = vld [vmem:[%s25145_s1 + $0x1620] ss:$100 sps:$4 sm:$0xff]   ;;  %v18522_v44 = vld [vmem:[%s25145_s1 + $0x1628] ss:$100 sps:$4 sm:$0xff]  }
 0x450   :  { %11363 = vmatprep.subr.bf16.mxu0 %v18473_v45  ;;  %11535 = vmatprep.subr.bf16.mxu1 %v18476_v46  ;;  %v18527_v45 = vld [vmem:[%s25145_s1 + $0x16ec] ss:$100 sps:$4 sm:$0xff]   ;;  %v18530_v46 = vld [vmem:[%s25145_s1 + $0x16f4] ss:$100 sps:$4 sm:$0xff]  }
 0x453   :  { %11364 = vmatpush1.bf16.msra.mxu0 %v18471_v47  ;;  %11536 = vmatpush1.bf16.msra.mxu1 %v18474_v48  ;;  %v18525_v47 = vld [vmem:[%s25145_s1 + $0x16e8] ss:$100 sps:$4 sm:$0xff]   ;;  %v18528_v48 = vld [vmem:[%s25145_s1 + $0x16f0] ss:$100 sps:$4 sm:$0xff]  }
 0x454   :  { %11365 = vmatprep.subr.bf16.mxu0 %v18479_v49  ;;  %11537 = vmatprep.subr.bf16.mxu1 %v18482_v51  ;;  %v18533_v49 = vld [vmem:[%s25145_s1 + $0x17b4] ss:$100 sps:$4 sm:$0xff]   ;;  %v18536_v51 = vld [vmem:[%s25145_s1 + $0x17bc] ss:$100 sps:$4 sm:$0xff]  }
 0x457   :  { %11366 = vmatpush1.bf16.msra.mxu0 %v18477_v52  ;;  %11538 = vmatpush1.bf16.msra.mxu1 %v18480_v53  ;;  %v18531_v52 = vld [vmem:[%s25145_s1 + $0x17b0] ss:$100 sps:$4 sm:$0xff]   ;;  %v18534_v53 = vld [vmem:[%s25145_s1 + $0x17b8] ss:$100 sps:$4 sm:$0xff]  }
 0x458   :  { %11367 = vmatprep.subr.bf16.mxu0 %v18485_v54  ;;  %11539 = vmatprep.subr.bf16.mxu1 %v18488_v55  ;;  %v18539_v54 = vld [vmem:[%s25145_s1 + $0x187c] ss:$100 sps:$4 sm:$0xff]   ;;  %v18542_v55 = vld [vmem:[%s25145_s1 + $0x1884] ss:$100 sps:$4 sm:$0xff]  }
 0x45b   :  { %11368 = vmatpush1.bf16.msra.mxu0 %v18483_v56  ;;  %11540 = vmatpush1.bf16.msra.mxu1 %v18486_v57  ;;  %v18537_v56 = vld [vmem:[%s25145_s1 + $0x1878] ss:$100 sps:$4 sm:$0xff]   ;;  %v18540_v57 = vld [vmem:[%s25145_s1 + $0x1880] ss:$100 sps:$4 sm:$0xff]  }
 0x45c   :  { %11369 = vmatprep.subr.bf16.mxu0 %v18491_v58  ;;  %11541 = vmatprep.subr.bf16.mxu1 %v18494_v59  ;;  %v18545_v58 = vld [vmem:[%s25145_s1 + $0x1944] ss:$100 sps:$4 sm:$0xff]   ;;  %v18548_v59 = vld [vmem:[%s25145_s1 + $0x194c] ss:$100 sps:$4 sm:$0xff]  }
 0x45f   :  { %11370 = vmatpush1.bf16.msra.mxu0 %v18489_v60  ;;  %11542 = vmatpush1.bf16.msra.mxu1 %v18492_v61  ;;  %v18543_v60 = vld [vmem:[%s25145_s1 + $0x1940] ss:$100 sps:$4 sm:$0xff]   ;;  %v18546_v61 = vld [vmem:[%s25145_s1 + $0x1948] ss:$100 sps:$4 sm:$0xff]  }
 0x460   :  { %11371 = vmatprep.subr.bf16.mxu0 %v18497_v62  ;;  %11543 = vmatprep.subr.bf16.mxu1 %v18500_v63  ;;  %v18551_v62 = vld [vmem:[%s25145_s1 + $0x1a0c] ss:$100 sps:$4 sm:$0xff]   ;;  %v18554_v63 = vld [vmem:[%s25145_s1 + $0x1a14] ss:$100 sps:$4 sm:$0xff]  }
 0x463   :  { %11372 = vmatpush1.bf16.msra.mxu0 %v18495_v0  ;;  %11544 = vmatpush1.bf16.msra.mxu1 %v18498_v1  ;;  %v18549_v0 = vld [vmem:[%s25145_s1 + $0x1a08] ss:$100 sps:$4 sm:$0xff]   ;;  %v18552_v1 = vld [vmem:[%s25145_s1 + $0x1a10] ss:$100 sps:$4 sm:$0xff]  }
 0x464   :  { %11373 = vmatprep.subr.bf16.mxu0 %v18503_v2  ;;  %11545 = vmatprep.subr.bf16.mxu1 %v18506_v6  ;;  %v18557_v2 = vld [vmem:[%s25145_s1 + $0x1ad4] ss:$100 sps:$4 sm:$0xff]   ;;  %v18560_v6 = vld [vmem:[%s25145_s1 + $0x1adc] ss:$100 sps:$4 sm:$0xff]  }
 0x467   :  { %11374 = vmatpush1.bf16.msra.mxu0 %v18501_v7  ;;  %11546 = vmatpush1.bf16.msra.mxu1 %v18504_v11  ;;  %v18555_v7 = vld [vmem:[%s25145_s1 + $0x1ad0] ss:$100 sps:$4 sm:$0xff]   ;;  %v18558_v11 = vld [vmem:[%s25145_s1 + $0x1ad8] ss:$100 sps:$4 sm:$0xff]  }
 0x468   :  { %11375 = vmatprep.subr.bf16.mxu0 %v18509_v12  ;;  %11547 = vmatprep.subr.bf16.mxu1 %v18512_v14  ;;  %v18563_v12 = vld [vmem:[%s25145_s1 + $0x1b9c] ss:$100 sps:$4 sm:$0xff]   ;;  %v18566_v14 = vld [vmem:[%s25145_s1 + $0x1ba4] ss:$100 sps:$4 sm:$0xff]  }
 0x46b   :  { %11376 = vmatpush1.bf16.msra.mxu0 %v18507_v20  ;;  %11548 = vmatpush1.bf16.msra.mxu1 %v18510_v29  ;;  %v18561_v20 = vld [vmem:[%s25145_s1 + $0x1b98] ss:$100 sps:$4 sm:$0xff]   ;;  %v18564_v29 = vld [vmem:[%s25145_s1 + $0x1ba0] ss:$100 sps:$4 sm:$0xff]  }
 0x46c   :  { %11377 = vmatprep.subr.bf16.mxu0 %v18515_v32  ;;  %11549 = vmatprep.subr.bf16.mxu1 %v18518_v37  ;;  %v18569_v32 = vld [vmem:[%s25145_s1 + $0x1c64] ss:$100 sps:$4 sm:$0xff]   ;;  %v18572_v37 = vld [vmem:[%s25145_s1 + $0x1c6c] ss:$100 sps:$4 sm:$0xff]  }
 0x46f   :  { %11378 = vmatpush1.bf16.msra.mxu0 %v18513_v25  ;;  %11550 = vmatpush1.bf16.msra.mxu1 %v18516_v8  ;;  %v18567_v25 = vld [vmem:[%s25145_s1 + $0x1c60] ss:$100 sps:$4 sm:$0xff]   ;;  %v18570_v8 = vld [vmem:[%s25145_s1 + $0x1c68] ss:$100 sps:$4 sm:$0xff]  }
 0x470   :  { %11379 = vmatprep.subr.bf16.mxu0 %v18521_v39  ;;  %11551 = vmatprep.subr.bf16.mxu1 %v18524_v40  ;;  %v18575_v39 = vld [vmem:[%s25145_s1 + $0x1d2c] ss:$100 sps:$4 sm:$0xff]   ;;  %v18578_v40 = vld [vmem:[%s25145_s1 + $0x1d34] ss:$100 sps:$4 sm:$0xff]  }
 0x473   :  { %11380 = vmatpush1.bf16.msra.mxu0 %v18519_v43  ;;  %11552 = vmatpush1.bf16.msra.mxu1 %v18522_v44  ;;  %v18573_v43 = vld [vmem:[%s25145_s1 + $0x1d28] ss:$100 sps:$4 sm:$0xff]   ;;  %v18576_v44 = vld [vmem:[%s25145_s1 + $0x1d30] ss:$100 sps:$4 sm:$0xff]  }
 0x474   :  { %11381 = vmatprep.subr.bf16.mxu0 %v18527_v45  ;;  %11553 = vmatprep.subr.bf16.mxu1 %v18530_v46  ;;  %v18581_v45 = vld [vmem:[%s25145_s1 + $0x1df4] ss:$100 sps:$4 sm:$0xff]   ;;  %v18584_v46 = vld [vmem:[%s25145_s1 + $0x1dfc] ss:$100 sps:$4 sm:$0xff]  }
 0x477   :  { %11382 = vmatpush1.bf16.msra.mxu0 %v18525_v47  ;;  %11554 = vmatpush1.bf16.msra.mxu1 %v18528_v48  ;;  %v18579_v47 = vld [vmem:[%s25145_s1 + $0x1df0] ss:$100 sps:$4 sm:$0xff]   ;;  %v18582_v48 = vld [vmem:[%s25145_s1 + $0x1df8] ss:$100 sps:$4 sm:$0xff]  }
 0x478   :  { %11383 = vmatprep.subr.bf16.mxu0 %v18533_v49  ;;  %11555 = vmatprep.subr.bf16.mxu1 %v18536_v51  ;;  %v18587_v49 = vld [vmem:[%s25145_s1 + $0x1ebc] ss:$100 sps:$4 sm:$0xff]   ;;  %v18590_v51 = vld [vmem:[%s25145_s1 + $0x1ec4] ss:$100 sps:$4 sm:$0xff]  }
 0x47b   :  { %11384 = vmatpush1.bf16.msra.mxu0 %v18531_v52  ;;  %11556 = vmatpush1.bf16.msra.mxu1 %v18534_v53  ;;  %v18585_v52 = vld [vmem:[%s25145_s1 + $0x1eb8] ss:$100 sps:$4 sm:$0xff]   ;;  %v18588_v53 = vld [vmem:[%s25145_s1 + $0x1ec0] ss:$100 sps:$4 sm:$0xff]  }
 0x47c   :  { %11385 = vmatprep.subr.bf16.mxu0 %v18539_v54  ;;  %11557 = vmatprep.subr.bf16.mxu1 %v18542_v55  ;;  %v18593_v54 = vld [vmem:[%s25145_s1 + $0x1f84] ss:$100 sps:$4 sm:$0xff]   ;;  %v18596_v55 = vld [vmem:[%s25145_s1 + $0x1f8c] ss:$100 sps:$4 sm:$0xff]  }
 0x47f   :  { %11386 = vmatpush1.bf16.msra.mxu0 %v18537_v56  ;;  %11558 = vmatpush1.bf16.msra.mxu1 %v18540_v57  ;;  %v18591_v56 = vld [vmem:[%s25145_s1 + $0x1f80] ss:$100 sps:$4 sm:$0xff]   ;;  %v18594_v57 = vld [vmem:[%s25145_s1 + $0x1f88] ss:$100 sps:$4 sm:$0xff]  }
 0x480   :  { %11398 = vmatprep.subr.bf16.mxu0 %v18545_v58  ;;  %11570 = vmatprep.subr.bf16.mxu1 %v18548_v59  ;;  %v18599_v58 = vld [vmem:[%s25145_s1 + $0x204c] ss:$100 sps:$4 sm:$0xff]   ;;  %v18602_v59 = vld [vmem:[%s25145_s1 + $0x2054] ss:$100 sps:$4 sm:$0xff]  }
 0x482   :  { %11388 = vmatmul.mubr.bf16.vlgmr.msra.gmra.mrb[16].mxu0 %v19854_v13  ;;  %11560 = vmatmul.mubr.bf16.vlgmr.msra.gmra.mrb[16].mxu1 %v19854_v13 }
 0x483   :  { %11399 = vmatpush1.bf16.msra.mxu0 %v18543_v60  ;;  %11571 = vmatpush1.bf16.msra.mxu1 %v18546_v61  ;;  %v18597_v60 = vld [vmem:[%s25145_s1 + $0x2048] ss:$100 sps:$4 sm:$0xff]   ;;  %v18600_v61 = vld [vmem:[%s25145_s1 + $0x2050] ss:$100 sps:$4 sm:$0xff]  }
 0x484   :  { %11400 = vmatprep.subr.bf16.mxu0 %v18551_v62  ;;  %11572 = vmatprep.subr.bf16.mxu1 %v18554_v63  ;;  %v18605_v62 = vld [vmem:[%s25145_s1 + $0x2114] ss:$100 sps:$4 sm:$0xff]   ;;  %v18608_v63 = vld [vmem:[%s25145_s1 + $0x211c] ss:$100 sps:$4 sm:$0xff]  }
 0x485   :  { %11430 = vmatprep.mubr.bf16.mxu0 %v19874_v18  ;;  %11602 = vmatprep.mubr.bf16.mxu1 %v19874_v18 }
 0x487   :  { %11401 = vmatpush1.bf16.msra.mxu0 %v18549_v0  ;;  %11573 = vmatpush1.bf16.msra.mxu1 %v18552_v1  ;;  %v18603_v0 = vld [vmem:[%s25145_s1 + $0x2110] ss:$100 sps:$4 sm:$0xff]   ;;  %v18606_v1 = vld [vmem:[%s25145_s1 + $0x2118] ss:$100 sps:$4 sm:$0xff]  }
 0x488   :  { %11402 = vmatprep.subr.bf16.mxu0 %v18557_v2  ;;  %11574 = vmatprep.subr.bf16.mxu1 %v18560_v6  ;;  %v18611_v2 = vld [vmem:[%s25145_s1 + $0x21dc] ss:$100 sps:$4 sm:$0xff]   ;;  %v18614_v6 = vld [vmem:[%s25145_s1 + $0x21e4] ss:$100 sps:$4 sm:$0xff]  }
 0x48b   :  { %11403 = vmatpush1.bf16.msra.mxu0 %v18555_v7  ;;  %11575 = vmatpush1.bf16.msra.mxu1 %v18558_v11  ;;  %v18609_v7 = vld [vmem:[%s25145_s1 + $0x21d8] ss:$100 sps:$4 sm:$0xff]   ;;  %v18612_v11 = vld [vmem:[%s25145_s1 + $0x21e0] ss:$100 sps:$4 sm:$0xff]  }
 0x48c   :  { %11404 = vmatprep.subr.bf16.mxu0 %v18563_v12  ;;  %11576 = vmatprep.subr.bf16.mxu1 %v18566_v14  ;;  %v18617_v12 = vld [vmem:[%s25145_s1 + $0x22a4] ss:$100 sps:$4 sm:$0xff]   ;;  %v18620_v14 = vld [vmem:[%s25145_s1 + $0x22ac] ss:$100 sps:$4 sm:$0xff]  }
 0x48f   :  { %11405 = vmatpush1.bf16.msra.mxu0 %v18561_v20  ;;  %11577 = vmatpush1.bf16.msra.mxu1 %v18564_v29  ;;  %v18615_v20 = vld [vmem:[%s25145_s1 + $0x22a0] ss:$100 sps:$4 sm:$0xff]   ;;  %v18618_v29 = vld [vmem:[%s25145_s1 + $0x22a8] ss:$100 sps:$4 sm:$0xff]  }
 0x490   :  { %11406 = vmatprep.subr.bf16.mxu0 %v18569_v32  ;;  %11578 = vmatprep.subr.bf16.mxu1 %v18572_v37  ;;  %v18623_v32 = vld [vmem:[%s25145_s1 + $0x236c] ss:$100 sps:$4 sm:$0xff]   ;;  %v18626_v37 = vld [vmem:[%s25145_s1 + $0x2374] ss:$100 sps:$4 sm:$0xff]  }
 0x493   :  { %11407 = vmatpush1.bf16.msra.mxu0 %v18567_v25  ;;  %11579 = vmatpush1.bf16.msra.mxu1 %v18570_v8  ;;  %v18621_v25 = vld [vmem:[%s25145_s1 + $0x2368] ss:$100 sps:$4 sm:$0xff]   ;;  %v18624_v8 = vld [vmem:[%s25145_s1 + $0x2370] ss:$100 sps:$4 sm:$0xff]  }
 0x494   :  { %11408 = vmatprep.subr.bf16.mxu0 %v18575_v39  ;;  %11580 = vmatprep.subr.bf16.mxu1 %v18578_v40  ;;  %v18629_v39 = vld [vmem:[%s25145_s1 + $0x2434] ss:$100 sps:$4 sm:$0xff]   ;;  %v18632_v40 = vld [vmem:[%s25145_s1 + $0x243c] ss:$100 sps:$4 sm:$0xff]  }
 0x497   :  { %11409 = vmatpush1.bf16.msra.mxu0 %v18573_v43  ;;  %11581 = vmatpush1.bf16.msra.mxu1 %v18576_v44  ;;  %v18627_v43 = vld [vmem:[%s25145_s1 + $0x2430] ss:$100 sps:$4 sm:$0xff]   ;;  %v18630_v44 = vld [vmem:[%s25145_s1 + $0x2438] ss:$100 sps:$4 sm:$0xff]  }
 0x498   :  { %11410 = vmatprep.subr.bf16.mxu0 %v18581_v45  ;;  %11582 = vmatprep.subr.bf16.mxu1 %v18584_v46  ;;  %v18635_v45 = vld [vmem:[%s25145_s1 + $0x24fc] ss:$100 sps:$4 sm:$0xff]   ;;  %v18638_v46 = vld [vmem:[%s25145_s1 + $0x2504] ss:$100 sps:$4 sm:$0xff]  }
 0x49b   :  { %11411 = vmatpush1.bf16.msra.mxu0 %v18579_v47  ;;  %11583 = vmatpush1.bf16.msra.mxu1 %v18582_v48  ;;  %v18633_v47 = vld [vmem:[%s25145_s1 + $0x24f8] ss:$100 sps:$4 sm:$0xff]   ;;  %v18636_v48 = vld [vmem:[%s25145_s1 + $0x2500] ss:$100 sps:$4 sm:$0xff]  }
 0x49c   :  { %11412 = vmatprep.subr.bf16.mxu0 %v18587_v49  ;;  %11584 = vmatprep.subr.bf16.mxu1 %v18590_v51  ;;  %v18641_v49 = vld [vmem:[%s25145_s1 + $0x25c4] ss:$100 sps:$4 sm:$0xff]   ;;  %v18644_v51 = vld [vmem:[%s25145_s1 + $0x25cc] ss:$100 sps:$4 sm:$0xff]  }
 0x49f   :  { %11413 = vmatpush1.bf16.msra.mxu0 %v18585_v52  ;;  %11585 = vmatpush1.bf16.msra.mxu1 %v18588_v53  ;;  %v18639_v52 = vld [vmem:[%s25145_s1 + $0x25c0] ss:$100 sps:$4 sm:$0xff]   ;;  %v18642_v53 = vld [vmem:[%s25145_s1 + $0x25c8] ss:$100 sps:$4 sm:$0xff]  }
 0x4a0   :  { %11414 = vmatprep.subr.bf16.mxu0 %v18593_v54  ;;  %11586 = vmatprep.subr.bf16.mxu1 %v18596_v55  ;;  %v18647_v54 = vld [vmem:[%s25145_s1 + $0x268c] ss:$100 sps:$4 sm:$0xff]   ;;  %v18650_v55 = vld [vmem:[%s25145_s1 + $0x2694] ss:$100 sps:$4 sm:$0xff]  }
 0x4a3   :  { %11415 = vmatpush1.bf16.msra.mxu0 %v18591_v56  ;;  %11587 = vmatpush1.bf16.msra.mxu1 %v18594_v57  ;;  %v18645_v56 = vld [vmem:[%s25145_s1 + $0x2688] ss:$100 sps:$4 sm:$0xff]   ;;  %v18648_v57 = vld [vmem:[%s25145_s1 + $0x2690] ss:$100 sps:$4 sm:$0xff]  }
 0x4a4   :  { %11416 = vmatprep.subr.bf16.mxu0 %v18599_v58  ;;  %11588 = vmatprep.subr.bf16.mxu1 %v18602_v59  ;;  %v18653_v58 = vld [vmem:[%s25145_s1 + $0x2754] ss:$100 sps:$4 sm:$0xff]   ;;  %v18656_v59 = vld [vmem:[%s25145_s1 + $0x275c] ss:$100 sps:$4 sm:$0xff]  }
 0x4a7   :  { %11417 = vmatpush1.bf16.msra.mxu0 %v18597_v60  ;;  %11589 = vmatpush1.bf16.msra.mxu1 %v18600_v61  ;;  %v18651_v60 = vld [vmem:[%s25145_s1 + $0x2750] ss:$100 sps:$4 sm:$0xff]   ;;  %v18654_v61 = vld [vmem:[%s25145_s1 + $0x2758] ss:$100 sps:$4 sm:$0xff]  }
 0x4a8   :  { %11418 = vmatprep.subr.bf16.mxu0 %v18605_v62  ;;  %11590 = vmatprep.subr.bf16.mxu1 %v18608_v63  ;;  %v18659_v62 = vld [vmem:[%s25145_s1 + $0x281c] ss:$100 sps:$4 sm:$0xff]   ;;  %v18662_v63 = vld [vmem:[%s25145_s1 + $0x2824] ss:$100 sps:$4 sm:$0xff]  }
 0x4ab   :  { %11419 = vmatpush1.bf16.msra.mxu0 %v18603_v0  ;;  %11591 = vmatpush1.bf16.msra.mxu1 %v18606_v1  ;;  %v18657_v0 = vld [vmem:[%s25145_s1 + $0x2818] ss:$100 sps:$4 sm:$0xff]   ;;  %v18660_v1 = vld [vmem:[%s25145_s1 + $0x2820] ss:$100 sps:$4 sm:$0xff]  }
 0x4ac   :  { %11420 = vmatprep.subr.bf16.mxu0 %v18611_v2  ;;  %11592 = vmatprep.subr.bf16.mxu1 %v18614_v6  ;;  %v18665_v2 = vld [vmem:[%s25145_s1 + $0x28e4] ss:$100 sps:$4 sm:$0xff]   ;;  %v18668_v6 = vld [vmem:[%s25145_s1 + $0x28ec] ss:$100 sps:$4 sm:$0xff]  }
 0x4af   :  { %11421 = vmatpush1.bf16.msra.mxu0 %v18609_v7  ;;  %11593 = vmatpush1.bf16.msra.mxu1 %v18612_v11  ;;  %v18663_v7 = vld [vmem:[%s25145_s1 + $0x28e0] ss:$100 sps:$4 sm:$0xff]   ;;  %v18666_v11 = vld [vmem:[%s25145_s1 + $0x28e8] ss:$100 sps:$4 sm:$0xff]  }
 0x4b0   :  { %11422 = vmatprep.subr.bf16.mxu0 %v18617_v12  ;;  %11594 = vmatprep.subr.bf16.mxu1 %v18620_v14  ;;  %v18671_v12 = vld [vmem:[%s25145_s1 + $0x29ac] ss:$100 sps:$4 sm:$0xff]   ;;  %v18674_v14 = vld [vmem:[%s25145_s1 + $0x29b4] ss:$100 sps:$4 sm:$0xff]  }
 0x4b3   :  { %11423 = vmatpush1.bf16.msra.mxu0 %v18615_v20  ;;  %11595 = vmatpush1.bf16.msra.mxu1 %v18618_v29  ;;  %v19382_v20 = vld [vmem:[%s25147_s2 + $0x8] sm:$0xff] }
 0x4b4   :  { %11424 = vmatprep.subr.bf16.mxu0 %v18623_v32  ;;  %11596 = vmatprep.subr.bf16.mxu1 %v18626_v37  ;;  %v1758_v29 = vrot.slane %v19382_v20, %v21735_v16  ;;  %v1766_v32 = vrot.slane %v19382_v20, %v21738_v28  ;;  %v1762_v37 = vrot.slane %v19382_v20, %v21744_v30 }
 0x4b7   :  { %11425 = vmatpush1.bf16.msra.mxu0 %v18621_v25  ;;  %11597 = vmatpush1.bf16.msra.mxu1 %v18624_v8  ;;  %v1770_v25 = vrot.slane %v19382_v20, %v21747_v31  ;;  %v18669_v8 = vld [vmem:[%s25145_s1 + $0x29a8] ss:$100 sps:$4 sm:$0xff]  }
 0x4b8   :  { %11426 = vmatprep.subr.bf16.mxu0 %v18629_v39  ;;  %11598 = vmatprep.subr.bf16.mxu1 %v18632_v40  ;;  %v18672_v39 = vld [vmem:[%s25145_s1 + $0x29b0] ss:$100 sps:$4 sm:$0xff]  }
 0x4b9   :  { %v18677_v40 = vld [vmem:[%s25145_s1 + $0x2a74] ss:$100 sps:$4 sm:$0xff]  }
 0x4bb   :  { %11427 = vmatpush1.bf16.msra.mxu0 %v18627_v43  ;;  %11599 = vmatpush1.bf16.msra.mxu1 %v18630_v44  ;;  %v18680_v43 = vld [vmem:[%s25145_s1 + $0x2a7c] ss:$100 sps:$4 sm:$0xff]  }
 0x4bc   :  { %11428 = vmatprep.subr.bf16.mxu0 %v18635_v45  ;;  %11600 = vmatprep.subr.bf16.mxu1 %v18638_v46 }
 0x4bf   :  { %11429 = vmatpush1.bf16.msra.mxu0 %v18633_v47  ;;  %11601 = vmatpush1.bf16.msra.mxu1 %v18636_v48 }
 0x4c0   :  { %11441 = vmatprep.subr.bf16.mxu0 %v18641_v49  ;;  %11613 = vmatprep.subr.bf16.mxu1 %v18644_v51 }
 0x4c2   :  { %11431 = vmatmul.mubr.bf16.vlgmr.msra.gmra.mrb[16].mxu0 %v20068_v24  ;;  %11603 = vmatmul.mubr.bf16.vlgmr.msra.gmra.mrb[16].mxu1 %v20068_v24 }
 0x4c3   :  { %11442 = vmatpush1.bf16.msra.mxu0 %v18639_v52  ;;  %11614 = vmatpush1.bf16.msra.mxu1 %v18642_v53 }
 0x4c4   :  { %11443 = vmatprep.subr.bf16.mxu0 %v18647_v54  ;;  %11615 = vmatprep.subr.bf16.mxu1 %v18650_v55  ;;  %v18675_v55 = vld [vmem:[%s25145_s1 + $0x2a70] ss:$100 sps:$4 sm:$0xff]  }
 0x4c5   :  { %11473 = vmatprep.mubr.bf16.mxu0 %v20088_v17  ;;  %11645 = vmatprep.mubr.bf16.mxu1 %v20088_v17 }
 0x4c7   :  { %11444 = vmatpush1.bf16.msra.mxu0 %v18645_v56  ;;  %11616 = vmatpush1.bf16.msra.mxu1 %v18648_v57  ;;  %v18678_v56 = vld [vmem:[%s25145_s1 + $0x2a78] ss:$100 sps:$4 sm:$0xff]  }
 0x4c8   :  { %11445 = vmatprep.subr.bf16.mxu0 %v18653_v58  ;;  %11617 = vmatprep.subr.bf16.mxu1 %v18656_v59 }
 0x4cb   :  { %11446 = vmatpush1.bf16.msra.mxu0 %v18651_v60  ;;  %11618 = vmatpush1.bf16.msra.mxu1 %v18654_v61  ;;  %v18683_v61 = vld [vmem:[%s25145_s1 + $0x2b3c] ss:$100 sps:$4 sm:$0xff]  }
 0x4cc   :  { %11447 = vmatprep.subr.bf16.mxu0 %v18659_v62  ;;  %11619 = vmatprep.subr.bf16.mxu1 %v18662_v63  ;;  %v18686_v62 = vld [vmem:[%s25145_s1 + $0x2b44] ss:$100 sps:$4 sm:$0xff]  }
 0x4cf   :  { %11448 = vmatpush1.bf16.msra.mxu0 %v18657_v0  ;;  %11620 = vmatpush1.bf16.msra.mxu1 %v18660_v1 }
 0x4d0   :  { %11449 = vmatprep.subr.bf16.mxu0 %v18665_v2  ;;  %11621 = vmatprep.subr.bf16.mxu1 %v18668_v6 }
 0x4d3   :  { %11450 = vmatpush1.bf16.msra.mxu0 %v18663_v7  ;;  %11622 = vmatpush1.bf16.msra.mxu1 %v18666_v11  ;;  %v18681_v11 = vld [vmem:[%s25145_s1 + $0x2b38] ss:$100 sps:$4 sm:$0xff]  }
 0x4d4   :  { %11451 = vmatprep.subr.bf16.mxu0 %v18671_v12  ;;  %11623 = vmatprep.subr.bf16.mxu1 %v18674_v14 }
 0x4d5   :  { %v11131_v44 = vpop.f32.mrb[12].mxu0  ;;  %v11303_v45 = vpop.f32.mrb[12].mxu1 }
 0x4d6   :  { %v16645_v46 = vadd.f32 %v11131_v44, %v1758_v29  ;;  %v16649_v47 = vadd.f32 %v11303_v45, %v1766_v32  ;;  %v11133_v48 = vpop.f32.mrb[13].mxu0  ;;  %v11305_v49 = vpop.f32.mrb[13].mxu1  ;;  %v18687_v44 = vld [vmem:[%s25145_s1 + $0x2c00] ss:$100 sps:$4 sm:$0xff]   ;;  %v18690_v45 = vld [vmem:[%s25145_s1 + $0x2c08] ss:$100 sps:$4 sm:$0xff]  }
 0x4d7   :  { %v16646_v51 = vadd.f32 %v11133_v48, %v1762_v37  ;;  %v16650_v52 = vadd.f32 %v11305_v49, %v1770_v25  ;;  %v11135_v53 = vpop.f32.mrb[14].mxu0  ;;  %v11307_v54 = vpop.f32.mrb[14].mxu1  ;;  %11452 = vmatpush1.bf16.msra.mxu0 %v18669_v8  ;;  %11624 = vmatpush1.bf16.msra.mxu1 %v18672_v39  ;;  %v18689_v8 = vld [vmem:[%s25145_s1 + $0x2c04] ss:$100 sps:$4 sm:$0xff]   ;;  %v18692_v39 = vld [vmem:[%s25145_s1 + $0x2c0c] ss:$100 sps:$4 sm:$0xff]  }
 0x4d8   :  { %v16647_v57 = vadd.f32 %v11135_v53, %v1758_v29  ;;  %v16651_v58 = vadd.f32 %v11307_v54, %v1766_v32  ;;  %v11137_v59 = vpop.f32.mrb[15].mxu0  ;;  %v11309_v60 = vpop.f32.mrb[15].mxu1  ;;  %11453 = vmatprep.subr.bf16.mxu0 %v18677_v40  ;;  %11625 = vmatprep.subr.bf16.mxu1 %v18680_v43  ;;  %v12176_v1 = vmax.f32 %v16645_v46, 0.0  ;;  %v12178_v2 = vmax.f32 %v16649_v47, 0.0  ;;  %v18684_v32 = vld [vmem:[%s25145_s1 + $0x2b40] ss:$100 sps:$4 sm:$0xff]  }
 0x4d9   :  { %v16648_v63 = vadd.f32 %v11137_v59, %v1762_v37  ;;  %v16652_v0 = vadd.f32 %v11309_v60, %v1770_v25  ;;  %v12177_v12 = vmax.f32 %v16646_v51, 0.0  ;;  %v12179_v14 = vmax.f32 %v16650_v52, 0.0  ;;  %v18695_v46 = vld [vmem:[%s25145_s1 + $0x2ccc] ss:$100 sps:$4 sm:$0xff]   ;;  %v18698_v47 = vld [vmem:[%s25145_s1 + $0x2cd4] ss:$100 sps:$4 sm:$0xff]  }
 0x4da   :  { %v12201_v6 = vmax.f32 %v16647_v57, 0.0  ;;  %v12203_v7 = vmax.f32 %v16651_v58, 0.0  ;;  %v18693_v48 = vld [vmem:[%s25145_s1 + $0x2cc8] ss:$100 sps:$4 sm:$0xff]   ;;  %v18696_v49 = vld [vmem:[%s25145_s1 + $0x2cd0] ss:$100 sps:$4 sm:$0xff]  }
 0x4db   :  { %v12202_v20 = vmax.f32 %v16648_v63, 0.0  ;;  %v12204_v29 = vmax.f32 %v16652_v0, 0.0  ;;  %11454 = vmatpush1.bf16.msra.mxu0 %v18675_v55  ;;  %11626 = vmatpush1.bf16.msra.mxu1 %v18678_v56  ;;  %v18701_v51 = vld [vmem:[%s25145_s1 + $0x2d94] ss:$100 sps:$4 sm:$0xff]   ;;  %v18704_v52 = vld [vmem:[%s25145_s1 + $0x2d9c] ss:$100 sps:$4 sm:$0xff]  }
 0x4dc   :  { %v23390_v37 = vpack.c.bf16 %v12201_v6, %v12176_v1  ;;  %v23392_v25 = vpack.c.bf16 %v12203_v7, %v12178_v2  ;;  %11455 = vmatprep.subr.bf16.mxu0 %v18683_v61  ;;  %11627 = vmatprep.subr.bf16.mxu1 %v18686_v62  ;;  %v18699_v53 = vld [vmem:[%s25145_s1 + $0x2d90] ss:$100 sps:$4 sm:$0xff]   ;;  %v18702_v54 = vld [vmem:[%s25145_s1 + $0x2d98] ss:$100 sps:$4 sm:$0xff]   ;;  %v18710_v56 = vld [vmem:[%s25145_s1 + $0x2e64] ss:$100 sps:$4 sm:$0xff]  }
 0x4dd   :  { %v23400_v40 = vpack.c.bf16 %v12202_v20, %v12177_v12  ;;  %v23402_v43 = vpack.c.bf16 %v12204_v29, %v12179_v14  ;;  %v18707_v55 = vld [vmem:[%s25145_s1 + $0x2e5c] ss:$100 sps:$4 sm:$0xff]   ;;  %v18713_v59 = vld [vmem:[%s25145_s1 + $0x2f24] ss:$100 sps:$4 sm:$0xff]   ;;  %v18716_v60 = vld [vmem:[%s25145_s1 + $0x2f2c] ss:$100 sps:$4 sm:$0xff]  }
 0x4de   :  { %v18705_v57 = vld [vmem:[%s25145_s1 + $0x2e58] ss:$100 sps:$4 sm:$0xff]   ;;  %v18708_v58 = vld [vmem:[%s25145_s1 + $0x2e60] ss:$100 sps:$4 sm:$0xff]   ;;  %v18714_v62 = vld [vmem:[%s25145_s1 + $0x2f28] ss:$100 sps:$4 sm:$0xff]  }
 0x4df   :  { %11456 = vmatpush1.bf16.msra.mxu0 %v18681_v11  ;;  %11628 = vmatpush1.bf16.msra.mxu1 %v18684_v32  ;;  %v18711_v61 = vld [vmem:[%s25145_s1 + $0x2f20] ss:$100 sps:$4 sm:$0xff]   ;;  %v18719_v63 = vld [vmem:[%s25145_s1 + $0x2fec] ss:$100 sps:$4 sm:$0xff]   ;;  %v18722_v0 = vld [vmem:[%s25145_s1 + $0x2ff4] ss:$100 sps:$4 sm:$0xff]  }
 0x4e0   :  { %11457 = vmatprep.subr.bf16.mxu0 %v18689_v8  ;;  %11629 = vmatprep.subr.bf16.mxu1 %v18692_v39  ;;  %v18717_v1 = vld [vmem:[%s25145_s1 + $0x2fe8] ss:$100 sps:$4 sm:$0xff]   ;;  %v18720_v2 = vld [vmem:[%s25145_s1 + $0x2ff0] ss:$100 sps:$4 sm:$0xff]   ;;  %v18728_v7 = vld [vmem:[%s25145_s1 + $0x30bc] ss:$100 sps:$4 sm:$0xff]  }
 0x4e1   :  { %v18725_v6 = vld [vmem:[%s25145_s1 + $0x30b4] ss:$100 sps:$4 sm:$0xff]   ;;  %v18731_v14 = vld [vmem:[%s25145_s1 + $0x317c] ss:$100 sps:$4 sm:$0xff]   ;;  %v18734_v20 = vld [vmem:[%s25145_s1 + $0x3184] ss:$100 sps:$4 sm:$0xff]  }
 0x4e2   :  { %v18723_v11 = vld [vmem:[%s25145_s1 + $0x30b0] ss:$100 sps:$4 sm:$0xff]   ;;  %v18726_v12 = vld [vmem:[%s25145_s1 + $0x30b8] ss:$100 sps:$4 sm:$0xff]   ;;  %v18732_v32 = vld [vmem:[%s25145_s1 + $0x3180] ss:$100 sps:$4 sm:$0xff]  }
 0x4e3   :  { %11458 = vmatpush1.bf16.msra.mxu0 %v18687_v44  ;;  %11630 = vmatpush1.bf16.msra.mxu1 %v18690_v45  ;;  %v18729_v29 = vld [vmem:[%s25145_s1 + $0x3178] ss:$100 sps:$4 sm:$0xff]   ;;  %v18735_v44 = vld [vmem:[%s25145_s1 + $0x50] ss:$100 sps:$4 sm:$0xff]  }
 0x4e4   :  { %11459 = vmatprep.subr.bf16.mxu0 %v18695_v46  ;;  %11631 = vmatprep.subr.bf16.mxu1 %v18698_v47  ;;  %v18737_v8 = vld [vmem:[%s25145_s1 + $0x54] ss:$100 sps:$4 sm:$0xff]   ;;  %v18740_v39 = vld [vmem:[%s25145_s1 + $0x5c] ss:$100 sps:$4 sm:$0xff]   ;;  %v18746_v47 = vld [vmem:[%s25145_s1 + $0x124] ss:$100 sps:$4 sm:$0xff]  }
 0x4e5   :  { %v18738_v45 = vld [vmem:[%s25145_s1 + $0x58] ss:$100 sps:$4 sm:$0xff]  }
 0x4e6   :  { %v18743_v46 = vld [vmem:[%s25145_s1 + $0x11c] ss:$100 sps:$4 sm:$0xff]  }
 0x4e7   :  { %11460 = vmatpush1.bf16.msra.mxu0 %v18693_v48  ;;  %11632 = vmatpush1.bf16.msra.mxu1 %v18696_v49  ;;  %v18741_v48 = vld [vmem:[%s25145_s1 + $0x118] ss:$100 sps:$4 sm:$0xff]   ;;  %v18744_v49 = vld [vmem:[%s25145_s1 + $0x120] ss:$100 sps:$4 sm:$0xff]  }
 0x4e8   :  { %11461 = vmatprep.subr.bf16.mxu0 %v18701_v51  ;;  %11633 = vmatprep.subr.bf16.mxu1 %v18704_v52  ;;  %v18749_v51 = vld [vmem:[%s25145_s1 + $0x1e4] ss:$100 sps:$4 sm:$0xff]   ;;  %v18752_v52 = vld [vmem:[%s25145_s1 + $0x1ec] ss:$100 sps:$4 sm:$0xff]  }
 0x4eb   :  { %11462 = vmatpush1.bf16.msra.mxu0 %v18699_v53  ;;  %11634 = vmatpush1.bf16.msra.mxu1 %v18702_v54  ;;  %v18747_v53 = vld [vmem:[%s25145_s1 + $0x1e0] ss:$100 sps:$4 sm:$0xff]   ;;  %v18750_v54 = vld [vmem:[%s25145_s1 + $0x1e8] ss:$100 sps:$4 sm:$0xff]  }
 0x4ec   :  { %11463 = vmatprep.subr.bf16.mxu0 %v18707_v55  ;;  %11635 = vmatprep.subr.bf16.mxu1 %v18710_v56  ;;  %v18755_v55 = vld [vmem:[%s25145_s1 + $0x2ac] ss:$100 sps:$4 sm:$0xff]   ;;  %v18758_v56 = vld [vmem:[%s25145_s1 + $0x2b4] ss:$100 sps:$4 sm:$0xff]  }
 0x4ef   :  { %11464 = vmatpush1.bf16.msra.mxu0 %v18705_v57  ;;  %11636 = vmatpush1.bf16.msra.mxu1 %v18708_v58  ;;  %v18753_v57 = vld [vmem:[%s25145_s1 + $0x2a8] ss:$100 sps:$4 sm:$0xff]   ;;  %v18756_v58 = vld [vmem:[%s25145_s1 + $0x2b0] ss:$100 sps:$4 sm:$0xff]  }
 0x4f0   :  { %11465 = vmatprep.subr.bf16.mxu0 %v18713_v59  ;;  %11637 = vmatprep.subr.bf16.mxu1 %v18716_v60  ;;  %v18761_v59 = vld [vmem:[%s25145_s1 + $0x374] ss:$100 sps:$4 sm:$0xff]   ;;  %v18764_v60 = vld [vmem:[%s25145_s1 + $0x37c] ss:$100 sps:$4 sm:$0xff]  }
 0x4f3   :  { %11466 = vmatpush1.bf16.msra.mxu0 %v18711_v61  ;;  %11638 = vmatpush1.bf16.msra.mxu1 %v18714_v62  ;;  %v18759_v61 = vld [vmem:[%s25145_s1 + $0x370] ss:$100 sps:$4 sm:$0xff]   ;;  %v18762_v62 = vld [vmem:[%s25145_s1 + $0x378] ss:$100 sps:$4 sm:$0xff]  }
 0x4f4   :  { %11467 = vmatprep.subr.bf16.mxu0 %v18719_v63  ;;  %11639 = vmatprep.subr.bf16.mxu1 %v18722_v0  ;;  %v18767_v63 = vld [vmem:[%s25145_s1 + $0x43c] ss:$100 sps:$4 sm:$0xff]   ;;  %v18770_v0 = vld [vmem:[%s25145_s1 + $0x444] ss:$100 sps:$4 sm:$0xff]  }
 0x4f7   :  { %11468 = vmatpush1.bf16.msra.mxu0 %v18717_v1  ;;  %11640 = vmatpush1.bf16.msra.mxu1 %v18720_v2  ;;  %v18765_v1 = vld [vmem:[%s25145_s1 + $0x438] ss:$100 sps:$4 sm:$0xff]   ;;  %v18768_v2 = vld [vmem:[%s25145_s1 + $0x440] ss:$100 sps:$4 sm:$0xff]  }
 0x4f8   :  { %11469 = vmatprep.subr.bf16.mxu0 %v18725_v6  ;;  %11641 = vmatprep.subr.bf16.mxu1 %v18728_v7  ;;  %v18773_v6 = vld [vmem:[%s25145_s1 + $0x504] ss:$100 sps:$4 sm:$0xff]   ;;  %v18776_v7 = vld [vmem:[%s25145_s1 + $0x50c] ss:$100 sps:$4 sm:$0xff]  }
 0x4fb   :  { %11470 = vmatpush1.bf16.msra.mxu0 %v18723_v11  ;;  %11642 = vmatpush1.bf16.msra.mxu1 %v18726_v12  ;;  %v18771_v11 = vld [vmem:[%s25145_s1 + $0x500] ss:$100 sps:$4 sm:$0xff]   ;;  %v18774_v12 = vld [vmem:[%s25145_s1 + $0x508] ss:$100 sps:$4 sm:$0xff]  }
 0x4fc   :  { %11471 = vmatprep.subr.bf16.mxu0 %v18731_v14  ;;  %11643 = vmatprep.subr.bf16.mxu1 %v18734_v20  ;;  %v18779_v14 = vld [vmem:[%s25145_s1 + $0x5cc] ss:$100 sps:$4 sm:$0xff]   ;;  %v18782_v20 = vld [vmem:[%s25145_s1 + $0x5d4] ss:$100 sps:$4 sm:$0xff]  }
 0x4ff   :  { %11472 = vmatpush1.bf16.msra.mxu0 %v18729_v29  ;;  %11644 = vmatpush1.bf16.msra.mxu1 %v18732_v32  ;;  %v18777_v29 = vld [vmem:[%s25145_s1 + $0x5c8] ss:$100 sps:$4 sm:$0xff]   ;;  %v18780_v32 = vld [vmem:[%s25145_s1 + $0x5d0] ss:$100 sps:$4 sm:$0xff]  }
 0x500   :  { %11656 = vmatprep.subr.bf16.mxu0 %v18737_v8  ;;  %11828 = vmatprep.subr.bf16.mxu1 %v18740_v39  ;;  %v18785_v8 = vld [vmem:[%s25145_s1 + $0x694] ss:$100 sps:$4 sm:$0xff]   ;;  %v18788_v39 = vld [vmem:[%s25145_s1 + $0x69c] ss:$100 sps:$4 sm:$0xff]  }
 0x502   :  { %11474 = vmatmul.mubr.bf16.vlgmr.msra.gmra.mrb[16].mxu0 %v20276_v33  ;;  %11646 = vmatmul.mubr.bf16.vlgmr.msra.gmra.mrb[16].mxu1 %v20276_v33 }
 0x503   :  { %11657 = vmatpush1.bf16.msra.mxu0 %v18735_v44  ;;  %11829 = vmatpush1.bf16.msra.mxu1 %v18738_v45  ;;  %v18783_v44 = vld [vmem:[%s25145_s1 + $0x690] ss:$100 sps:$4 sm:$0xff]   ;;  %v18786_v45 = vld [vmem:[%s25145_s1 + $0x698] ss:$100 sps:$4 sm:$0xff]  }
 0x504   :  { %11658 = vmatprep.subr.bf16.mxu0 %v18743_v46  ;;  %11830 = vmatprep.subr.bf16.mxu1 %v18746_v47  ;;  %v18791_v46 = vld [vmem:[%s25145_s1 + $0x75c] ss:$100 sps:$4 sm:$0xff]   ;;  %v18794_v47 = vld [vmem:[%s25145_s1 + $0x764] ss:$100 sps:$4 sm:$0xff]  }
 0x505   :  { %11688 = vmatprep.mubr.bf16.mxu0 %v19576_v50  ;;  %11860 = vmatprep.mubr.bf16.mxu1 %v19576_v50 }
 0x507   :  { %11659 = vmatpush1.bf16.msra.mxu0 %v18741_v48  ;;  %11831 = vmatpush1.bf16.msra.mxu1 %v18744_v49  ;;  %v18789_v48 = vld [vmem:[%s25145_s1 + $0x758] ss:$100 sps:$4 sm:$0xff]   ;;  %v18792_v49 = vld [vmem:[%s25145_s1 + $0x760] ss:$100 sps:$4 sm:$0xff]  }
 0x508   :  { %11660 = vmatprep.subr.bf16.mxu0 %v18749_v51  ;;  %11832 = vmatprep.subr.bf16.mxu1 %v18752_v52  ;;  %v18797_v51 = vld [vmem:[%s25145_s1 + $0x824] ss:$100 sps:$4 sm:$0xff]   ;;  %v18800_v52 = vld [vmem:[%s25145_s1 + $0x82c] ss:$100 sps:$4 sm:$0xff]  }
 0x50b   :  { %11661 = vmatpush1.bf16.msra.mxu0 %v18747_v53  ;;  %11833 = vmatpush1.bf16.msra.mxu1 %v18750_v54  ;;  %v18795_v53 = vld [vmem:[%s25145_s1 + $0x820] ss:$100 sps:$4 sm:$0xff]   ;;  %v18798_v54 = vld [vmem:[%s25145_s1 + $0x828] ss:$100 sps:$4 sm:$0xff]  }
 0x50c   :  { %11662 = vmatprep.subr.bf16.mxu0 %v18755_v55  ;;  %11834 = vmatprep.subr.bf16.mxu1 %v18758_v56  ;;  %v18803_v55 = vld [vmem:[%s25145_s1 + $0x8ec] ss:$100 sps:$4 sm:$0xff]   ;;  %v18806_v56 = vld [vmem:[%s25145_s1 + $0x8f4] ss:$100 sps:$4 sm:$0xff]  }
 0x50f   :  { %11663 = vmatpush1.bf16.msra.mxu0 %v18753_v57  ;;  %11835 = vmatpush1.bf16.msra.mxu1 %v18756_v58  ;;  %v18801_v57 = vld [vmem:[%s25145_s1 + $0x8e8] ss:$100 sps:$4 sm:$0xff]   ;;  %v18804_v58 = vld [vmem:[%s25145_s1 + $0x8f0] ss:$100 sps:$4 sm:$0xff]  }
 0x510   :  { %11664 = vmatprep.subr.bf16.mxu0 %v18761_v59  ;;  %11836 = vmatprep.subr.bf16.mxu1 %v18764_v60  ;;  %v18809_v59 = vld [vmem:[%s25145_s1 + $0x9b4] ss:$100 sps:$4 sm:$0xff]   ;;  %v18812_v60 = vld [vmem:[%s25145_s1 + $0x9bc] ss:$100 sps:$4 sm:$0xff]  }
 0x513   :  { %11665 = vmatpush1.bf16.msra.mxu0 %v18759_v61  ;;  %11837 = vmatpush1.bf16.msra.mxu1 %v18762_v62  ;;  %v18807_v61 = vld [vmem:[%s25145_s1 + $0x9b0] ss:$100 sps:$4 sm:$0xff]   ;;  %v18810_v62 = vld [vmem:[%s25145_s1 + $0x9b8] ss:$100 sps:$4 sm:$0xff]  }
 0x514   :  { %11666 = vmatprep.subr.bf16.mxu0 %v18767_v63  ;;  %11838 = vmatprep.subr.bf16.mxu1 %v18770_v0  ;;  %v18815_v63 = vld [vmem:[%s25145_s1 + $0xa7c] ss:$100 sps:$4 sm:$0xff]   ;;  %v18818_v0 = vld [vmem:[%s25145_s1 + $0xa84] ss:$100 sps:$4 sm:$0xff]  }
 0x517   :  { %11667 = vmatpush1.bf16.msra.mxu0 %v18765_v1  ;;  %11839 = vmatpush1.bf16.msra.mxu1 %v18768_v2  ;;  %v18813_v1 = vld [vmem:[%s25145_s1 + $0xa78] ss:$100 sps:$4 sm:$0xff]   ;;  %v18816_v2 = vld [vmem:[%s25145_s1 + $0xa80] ss:$100 sps:$4 sm:$0xff]  }
 0x518   :  { %11668 = vmatprep.subr.bf16.mxu0 %v18773_v6  ;;  %11840 = vmatprep.subr.bf16.mxu1 %v18776_v7  ;;  %v18821_v6 = vld [vmem:[%s25145_s1 + $0xb44] ss:$100 sps:$4 sm:$0xff]   ;;  %v18824_v7 = vld [vmem:[%s25145_s1 + $0xb4c] ss:$100 sps:$4 sm:$0xff]  }
 0x51b   :  { %11669 = vmatpush1.bf16.msra.mxu0 %v18771_v11  ;;  %11841 = vmatpush1.bf16.msra.mxu1 %v18774_v12  ;;  %v18819_v11 = vld [vmem:[%s25145_s1 + $0xb40] ss:$100 sps:$4 sm:$0xff]   ;;  %v18822_v12 = vld [vmem:[%s25145_s1 + $0xb48] ss:$100 sps:$4 sm:$0xff]  }
 0x51c   :  { %11670 = vmatprep.subr.bf16.mxu0 %v18779_v14  ;;  %11842 = vmatprep.subr.bf16.mxu1 %v18782_v20  ;;  %v18827_v14 = vld [vmem:[%s25145_s1 + $0xc0c] ss:$100 sps:$4 sm:$0xff]   ;;  %v18830_v20 = vld [vmem:[%s25145_s1 + $0xc14] ss:$100 sps:$4 sm:$0xff]  }
 0x51f   :  { %11671 = vmatpush1.bf16.msra.mxu0 %v18777_v29  ;;  %11843 = vmatpush1.bf16.msra.mxu1 %v18780_v32  ;;  %v18825_v29 = vld [vmem:[%s25145_s1 + $0xc08] ss:$100 sps:$4 sm:$0xff]   ;;  %v18828_v32 = vld [vmem:[%s25145_s1 + $0xc10] ss:$100 sps:$4 sm:$0xff]  }
 0x520   :  { %11672 = vmatprep.subr.bf16.mxu0 %v18785_v8  ;;  %11844 = vmatprep.subr.bf16.mxu1 %v18788_v39  ;;  %v18833_v8 = vld [vmem:[%s25145_s1 + $0xcd4] ss:$100 sps:$4 sm:$0xff]   ;;  %v18836_v39 = vld [vmem:[%s25145_s1 + $0xcdc] ss:$100 sps:$4 sm:$0xff]  }
 0x523   :  { %11673 = vmatpush1.bf16.msra.mxu0 %v18783_v44  ;;  %11845 = vmatpush1.bf16.msra.mxu1 %v18786_v45  ;;  %v18831_v44 = vld [vmem:[%s25145_s1 + $0xcd0] ss:$100 sps:$4 sm:$0xff]   ;;  %v18834_v45 = vld [vmem:[%s25145_s1 + $0xcd8] ss:$100 sps:$4 sm:$0xff]  }
 0x524   :  { %11674 = vmatprep.subr.bf16.mxu0 %v18791_v46  ;;  %11846 = vmatprep.subr.bf16.mxu1 %v18794_v47  ;;  %v18839_v46 = vld [vmem:[%s25145_s1 + $0xd9c] ss:$100 sps:$4 sm:$0xff]   ;;  %v18842_v47 = vld [vmem:[%s25145_s1 + $0xda4] ss:$100 sps:$4 sm:$0xff]  }
 0x527   :  { %11675 = vmatpush1.bf16.msra.mxu0 %v18789_v48  ;;  %11847 = vmatpush1.bf16.msra.mxu1 %v18792_v49  ;;  %v18837_v48 = vld [vmem:[%s25145_s1 + $0xd98] ss:$100 sps:$4 sm:$0xff]   ;;  %v18840_v49 = vld [vmem:[%s25145_s1 + $0xda0] ss:$100 sps:$4 sm:$0xff]  }
 0x528   :  { %11676 = vmatprep.subr.bf16.mxu0 %v18797_v51  ;;  %11848 = vmatprep.subr.bf16.mxu1 %v18800_v52  ;;  %v18845_v51 = vld [vmem:[%s25145_s1 + $0xe64] ss:$100 sps:$4 sm:$0xff]   ;;  %v18848_v52 = vld [vmem:[%s25145_s1 + $0xe6c] ss:$100 sps:$4 sm:$0xff]  }
 0x52b   :  { %11677 = vmatpush1.bf16.msra.mxu0 %v18795_v53  ;;  %11849 = vmatpush1.bf16.msra.mxu1 %v18798_v54  ;;  %v18843_v53 = vld [vmem:[%s25145_s1 + $0xe60] ss:$100 sps:$4 sm:$0xff]   ;;  %v18846_v54 = vld [vmem:[%s25145_s1 + $0xe68] ss:$100 sps:$4 sm:$0xff]  }
 0x52c   :  { %11678 = vmatprep.subr.bf16.mxu0 %v18803_v55  ;;  %11850 = vmatprep.subr.bf16.mxu1 %v18806_v56  ;;  %v18851_v55 = vld [vmem:[%s25145_s1 + $0xf2c] ss:$100 sps:$4 sm:$0xff]   ;;  %v18854_v56 = vld [vmem:[%s25145_s1 + $0xf34] ss:$100 sps:$4 sm:$0xff]  }
 0x52f   :  { %11679 = vmatpush1.bf16.msra.mxu0 %v18801_v57  ;;  %11851 = vmatpush1.bf16.msra.mxu1 %v18804_v58  ;;  %v18849_v57 = vld [vmem:[%s25145_s1 + $0xf28] ss:$100 sps:$4 sm:$0xff]   ;;  %v18852_v58 = vld [vmem:[%s25145_s1 + $0xf30] ss:$100 sps:$4 sm:$0xff]  }
 0x530   :  { %11680 = vmatprep.subr.bf16.mxu0 %v18809_v59  ;;  %11852 = vmatprep.subr.bf16.mxu1 %v18812_v60  ;;  %v18857_v59 = vld [vmem:[%s25145_s1 + $0xff4] ss:$100 sps:$4 sm:$0xff]   ;;  %v18860_v60 = vld [vmem:[%s25145_s1 + $0xffc] ss:$100 sps:$4 sm:$0xff]  }
 0x533   :  { %11681 = vmatpush1.bf16.msra.mxu0 %v18807_v61  ;;  %11853 = vmatpush1.bf16.msra.mxu1 %v18810_v62  ;;  %v18855_v61 = vld [vmem:[%s25145_s1 + $0xff0] ss:$100 sps:$4 sm:$0xff]   ;;  %v18858_v62 = vld [vmem:[%s25145_s1 + $0xff8] ss:$100 sps:$4 sm:$0xff]  }
 0x534   :  { %11682 = vmatprep.subr.bf16.mxu0 %v18815_v63  ;;  %11854 = vmatprep.subr.bf16.mxu1 %v18818_v0  ;;  %v18863_v63 = vld [vmem:[%s25145_s1 + $0x10bc] ss:$100 sps:$4 sm:$0xff]   ;;  %v18866_v0 = vld [vmem:[%s25145_s1 + $0x10c4] ss:$100 sps:$4 sm:$0xff]  }
 0x537   :  { %11683 = vmatpush1.bf16.msra.mxu0 %v18813_v1  ;;  %11855 = vmatpush1.bf16.msra.mxu1 %v18816_v2  ;;  %v18861_v1 = vld [vmem:[%s25145_s1 + $0x10b8] ss:$100 sps:$4 sm:$0xff]   ;;  %v18864_v2 = vld [vmem:[%s25145_s1 + $0x10c0] ss:$100 sps:$4 sm:$0xff]  }
 0x538   :  { %11684 = vmatprep.subr.bf16.mxu0 %v18821_v6  ;;  %11856 = vmatprep.subr.bf16.mxu1 %v18824_v7  ;;  %v18869_v6 = vld [vmem:[%s25145_s1 + $0x1184] ss:$100 sps:$4 sm:$0xff]   ;;  %v18872_v7 = vld [vmem:[%s25145_s1 + $0x118c] ss:$100 sps:$4 sm:$0xff]  }
 0x53b   :  { %11685 = vmatpush1.bf16.msra.mxu0 %v18819_v11  ;;  %11857 = vmatpush1.bf16.msra.mxu1 %v18822_v12  ;;  %v18867_v11 = vld [vmem:[%s25145_s1 + $0x1180] ss:$100 sps:$4 sm:$0xff]   ;;  %v18870_v12 = vld [vmem:[%s25145_s1 + $0x1188] ss:$100 sps:$4 sm:$0xff]  }
 0x53c   :  { %11686 = vmatprep.subr.bf16.mxu0 %v18827_v14  ;;  %11858 = vmatprep.subr.bf16.mxu1 %v18830_v20  ;;  %v18875_v14 = vld [vmem:[%s25145_s1 + $0x124c] ss:$100 sps:$4 sm:$0xff]   ;;  %v18878_v20 = vld [vmem:[%s25145_s1 + $0x1254] ss:$100 sps:$4 sm:$0xff]  }
 0x53f   :  { %11687 = vmatpush1.bf16.msra.mxu0 %v18825_v29  ;;  %11859 = vmatpush1.bf16.msra.mxu1 %v18828_v32  ;;  %v18873_v29 = vld [vmem:[%s25145_s1 + $0x1248] ss:$100 sps:$4 sm:$0xff]   ;;  %v18876_v32 = vld [vmem:[%s25145_s1 + $0x1250] ss:$100 sps:$4 sm:$0xff]  }
 0x540   :  { %11699 = vmatprep.subr.bf16.mxu0 %v18833_v8  ;;  %11871 = vmatprep.subr.bf16.mxu1 %v18836_v39  ;;  %v18881_v8 = vld [vmem:[%s25145_s1 + $0x1314] ss:$100 sps:$4 sm:$0xff]   ;;  %v18884_v39 = vld [vmem:[%s25145_s1 + $0x131c] ss:$100 sps:$4 sm:$0xff]  }
 0x542   :  { %11689 = vmatmul.mubr.bf16.vlgmr.msra.gmra.mrb[20].mxu0 %v19634_v5  ;;  %11861 = vmatmul.mubr.bf16.vlgmr.msra.gmra.mrb[20].mxu1 %v19634_v5 }
 0x543   :  { %11700 = vmatpush1.bf16.msra.mxu0 %v18831_v44  ;;  %11872 = vmatpush1.bf16.msra.mxu1 %v18834_v45  ;;  %v18879_v44 = vld [vmem:[%s25145_s1 + $0x1310] ss:$100 sps:$4 sm:$0xff]   ;;  %v18882_v45 = vld [vmem:[%s25145_s1 + $0x1318] ss:$100 sps:$4 sm:$0xff]  }
 0x544   :  { %11701 = vmatprep.subr.bf16.mxu0 %v18839_v46  ;;  %11873 = vmatprep.subr.bf16.mxu1 %v18842_v47  ;;  %v18887_v46 = vld [vmem:[%s25145_s1 + $0x13dc] ss:$100 sps:$4 sm:$0xff]   ;;  %v18890_v47 = vld [vmem:[%s25145_s1 + $0x13e4] ss:$100 sps:$4 sm:$0xff]  }
 0x545   :  { %11731 = vmatprep.mubr.bf16.mxu0 %v19728_v34  ;;  %11903 = vmatprep.mubr.bf16.mxu1 %v19728_v34 }
 0x547   :  { %11702 = vmatpush1.bf16.msra.mxu0 %v18837_v48  ;;  %11874 = vmatpush1.bf16.msra.mxu1 %v18840_v49  ;;  %v18885_v48 = vld [vmem:[%s25145_s1 + $0x13d8] ss:$100 sps:$4 sm:$0xff]   ;;  %v18888_v49 = vld [vmem:[%s25145_s1 + $0x13e0] ss:$100 sps:$4 sm:$0xff]  }
 0x548   :  { %11703 = vmatprep.subr.bf16.mxu0 %v18845_v51  ;;  %11875 = vmatprep.subr.bf16.mxu1 %v18848_v52  ;;  %v18893_v51 = vld [vmem:[%s25145_s1 + $0x14a4] ss:$100 sps:$4 sm:$0xff]   ;;  %v18896_v52 = vld [vmem:[%s25145_s1 + $0x14ac] ss:$100 sps:$4 sm:$0xff]  }
 0x54b   :  { %11704 = vmatpush1.bf16.msra.mxu0 %v18843_v53  ;;  %11876 = vmatpush1.bf16.msra.mxu1 %v18846_v54  ;;  %v18891_v53 = vld [vmem:[%s25145_s1 + $0x14a0] ss:$100 sps:$4 sm:$0xff]   ;;  %v18894_v54 = vld [vmem:[%s25145_s1 + $0x14a8] ss:$100 sps:$4 sm:$0xff]  }
 0x54c   :  { %11705 = vmatprep.subr.bf16.mxu0 %v18851_v55  ;;  %11877 = vmatprep.subr.bf16.mxu1 %v18854_v56  ;;  %v18899_v55 = vld [vmem:[%s25145_s1 + $0x156c] ss:$100 sps:$4 sm:$0xff]   ;;  %v18902_v56 = vld [vmem:[%s25145_s1 + $0x1574] ss:$100 sps:$4 sm:$0xff]  }
 0x54f   :  { %11706 = vmatpush1.bf16.msra.mxu0 %v18849_v57  ;;  %11878 = vmatpush1.bf16.msra.mxu1 %v18852_v58  ;;  %v18897_v57 = vld [vmem:[%s25145_s1 + $0x1568] ss:$100 sps:$4 sm:$0xff]   ;;  %v18900_v58 = vld [vmem:[%s25145_s1 + $0x1570] ss:$100 sps:$4 sm:$0xff]  }
 0x550   :  { %11707 = vmatprep.subr.bf16.mxu0 %v18857_v59  ;;  %11879 = vmatprep.subr.bf16.mxu1 %v18860_v60  ;;  %v18905_v59 = vld [vmem:[%s25145_s1 + $0x1634] ss:$100 sps:$4 sm:$0xff]   ;;  %v18908_v60 = vld [vmem:[%s25145_s1 + $0x163c] ss:$100 sps:$4 sm:$0xff]  }
 0x553   :  { %11708 = vmatpush1.bf16.msra.mxu0 %v18855_v61  ;;  %11880 = vmatpush1.bf16.msra.mxu1 %v18858_v62  ;;  %v18903_v61 = vld [vmem:[%s25145_s1 + $0x1630] ss:$100 sps:$4 sm:$0xff]   ;;  %v18906_v62 = vld [vmem:[%s25145_s1 + $0x1638] ss:$100 sps:$4 sm:$0xff]  }
 0x554   :  { %11709 = vmatprep.subr.bf16.mxu0 %v18863_v63  ;;  %11881 = vmatprep.subr.bf16.mxu1 %v18866_v0  ;;  %v18911_v63 = vld [vmem:[%s25145_s1 + $0x16fc] ss:$100 sps:$4 sm:$0xff]   ;;  %v18914_v0 = vld [vmem:[%s25145_s1 + $0x1704] ss:$100 sps:$4 sm:$0xff]  }
 0x557   :  { %11710 = vmatpush1.bf16.msra.mxu0 %v18861_v1  ;;  %11882 = vmatpush1.bf16.msra.mxu1 %v18864_v2  ;;  %v18909_v1 = vld [vmem:[%s25145_s1 + $0x16f8] ss:$100 sps:$4 sm:$0xff]   ;;  %v18912_v2 = vld [vmem:[%s25145_s1 + $0x1700] ss:$100 sps:$4 sm:$0xff]  }
 0x558   :  { %11711 = vmatprep.subr.bf16.mxu0 %v18869_v6  ;;  %11883 = vmatprep.subr.bf16.mxu1 %v18872_v7  ;;  %v18917_v6 = vld [vmem:[%s25145_s1 + $0x17c4] ss:$100 sps:$4 sm:$0xff]   ;;  %v18920_v7 = vld [vmem:[%s25145_s1 + $0x17cc] ss:$100 sps:$4 sm:$0xff]  }
 0x55b   :  { %11712 = vmatpush1.bf16.msra.mxu0 %v18867_v11  ;;  %11884 = vmatpush1.bf16.msra.mxu1 %v18870_v12  ;;  %v18915_v11 = vld [vmem:[%s25145_s1 + $0x17c0] ss:$100 sps:$4 sm:$0xff]   ;;  %v18918_v12 = vld [vmem:[%s25145_s1 + $0x17c8] ss:$100 sps:$4 sm:$0xff]  }
 0x55c   :  { %11713 = vmatprep.subr.bf16.mxu0 %v18875_v14  ;;  %11885 = vmatprep.subr.bf16.mxu1 %v18878_v20  ;;  %v18923_v14 = vld [vmem:[%s25145_s1 + $0x188c] ss:$100 sps:$4 sm:$0xff]   ;;  %v18926_v20 = vld [vmem:[%s25145_s1 + $0x1894] ss:$100 sps:$4 sm:$0xff]  }
 0x55f   :  { %11714 = vmatpush1.bf16.msra.mxu0 %v18873_v29  ;;  %11886 = vmatpush1.bf16.msra.mxu1 %v18876_v32  ;;  %v18921_v29 = vld [vmem:[%s25145_s1 + $0x1888] ss:$100 sps:$4 sm:$0xff]   ;;  %v18924_v32 = vld [vmem:[%s25145_s1 + $0x1890] ss:$100 sps:$4 sm:$0xff]  }
 0x560   :  { %11715 = vmatprep.subr.bf16.mxu0 %v18881_v8  ;;  %11887 = vmatprep.subr.bf16.mxu1 %v18884_v39  ;;  %v18929_v8 = vld [vmem:[%s25145_s1 + $0x1954] ss:$100 sps:$4 sm:$0xff]   ;;  %v18932_v39 = vld [vmem:[%s25145_s1 + $0x195c] ss:$100 sps:$4 sm:$0xff]  }
 0x563   :  { %11716 = vmatpush1.bf16.msra.mxu0 %v18879_v44  ;;  %11888 = vmatpush1.bf16.msra.mxu1 %v18882_v45  ;;  %v18927_v44 = vld [vmem:[%s25145_s1 + $0x1950] ss:$100 sps:$4 sm:$0xff]   ;;  %v18930_v45 = vld [vmem:[%s25145_s1 + $0x1958] ss:$100 sps:$4 sm:$0xff]  }
 0x564   :  { %11717 = vmatprep.subr.bf16.mxu0 %v18887_v46  ;;  %11889 = vmatprep.subr.bf16.mxu1 %v18890_v47  ;;  %v18935_v46 = vld [vmem:[%s25145_s1 + $0x1a1c] ss:$100 sps:$4 sm:$0xff]   ;;  %v18938_v47 = vld [vmem:[%s25145_s1 + $0x1a24] ss:$100 sps:$4 sm:$0xff]  }
 0x567   :  { %11718 = vmatpush1.bf16.msra.mxu0 %v18885_v48  ;;  %11890 = vmatpush1.bf16.msra.mxu1 %v18888_v49  ;;  %v18933_v48 = vld [vmem:[%s25145_s1 + $0x1a18] ss:$100 sps:$4 sm:$0xff]   ;;  %v18936_v49 = vld [vmem:[%s25145_s1 + $0x1a20] ss:$100 sps:$4 sm:$0xff]  }
 0x568   :  { %11719 = vmatprep.subr.bf16.mxu0 %v18893_v51  ;;  %11891 = vmatprep.subr.bf16.mxu1 %v18896_v52  ;;  %v18941_v51 = vld [vmem:[%s25145_s1 + $0x1ae4] ss:$100 sps:$4 sm:$0xff]   ;;  %v18944_v52 = vld [vmem:[%s25145_s1 + $0x1aec] ss:$100 sps:$4 sm:$0xff]  }
 0x56b   :  { %11720 = vmatpush1.bf16.msra.mxu0 %v18891_v53  ;;  %11892 = vmatpush1.bf16.msra.mxu1 %v18894_v54  ;;  %v18939_v53 = vld [vmem:[%s25145_s1 + $0x1ae0] ss:$100 sps:$4 sm:$0xff]   ;;  %v18942_v54 = vld [vmem:[%s25145_s1 + $0x1ae8] ss:$100 sps:$4 sm:$0xff]  }
 0x56c   :  { %11721 = vmatprep.subr.bf16.mxu0 %v18899_v55  ;;  %11893 = vmatprep.subr.bf16.mxu1 %v18902_v56  ;;  %v18947_v55 = vld [vmem:[%s25145_s1 + $0x1bac] ss:$100 sps:$4 sm:$0xff]   ;;  %v18950_v56 = vld [vmem:[%s25145_s1 + $0x1bb4] ss:$100 sps:$4 sm:$0xff]  }
 0x56f   :  { %11722 = vmatpush1.bf16.msra.mxu0 %v18897_v57  ;;  %11894 = vmatpush1.bf16.msra.mxu1 %v18900_v58  ;;  %v18945_v57 = vld [vmem:[%s25145_s1 + $0x1ba8] ss:$100 sps:$4 sm:$0xff]   ;;  %v18948_v58 = vld [vmem:[%s25145_s1 + $0x1bb0] ss:$100 sps:$4 sm:$0xff]  }
 0x570   :  { %11723 = vmatprep.subr.bf16.mxu0 %v18905_v59  ;;  %11895 = vmatprep.subr.bf16.mxu1 %v18908_v60  ;;  %v18953_v59 = vld [vmem:[%s25145_s1 + $0x1c74] ss:$100 sps:$4 sm:$0xff]   ;;  %v18956_v60 = vld [vmem:[%s25145_s1 + $0x1c7c] ss:$100 sps:$4 sm:$0xff]  }
 0x573   :  { %11724 = vmatpush1.bf16.msra.mxu0 %v18903_v61  ;;  %11896 = vmatpush1.bf16.msra.mxu1 %v18906_v62  ;;  %v18951_v61 = vld [vmem:[%s25145_s1 + $0x1c70] ss:$100 sps:$4 sm:$0xff]   ;;  %v18954_v62 = vld [vmem:[%s25145_s1 + $0x1c78] ss:$100 sps:$4 sm:$0xff]  }
 0x574   :  { %11725 = vmatprep.subr.bf16.mxu0 %v18911_v63  ;;  %11897 = vmatprep.subr.bf16.mxu1 %v18914_v0  ;;  %v18959_v63 = vld [vmem:[%s25145_s1 + $0x1d3c] ss:$100 sps:$4 sm:$0xff]   ;;  %v18962_v0 = vld [vmem:[%s25145_s1 + $0x1d44] ss:$100 sps:$4 sm:$0xff]  }
 0x577   :  { %11726 = vmatpush1.bf16.msra.mxu0 %v18909_v1  ;;  %11898 = vmatpush1.bf16.msra.mxu1 %v18912_v2  ;;  %v18957_v1 = vld [vmem:[%s25145_s1 + $0x1d38] ss:$100 sps:$4 sm:$0xff]   ;;  %v18960_v2 = vld [vmem:[%s25145_s1 + $0x1d40] ss:$100 sps:$4 sm:$0xff]  }
 0x578   :  { %11727 = vmatprep.subr.bf16.mxu0 %v18917_v6  ;;  %11899 = vmatprep.subr.bf16.mxu1 %v18920_v7  ;;  %v18965_v6 = vld [vmem:[%s25145_s1 + $0x1e04] ss:$100 sps:$4 sm:$0xff]   ;;  %v18968_v7 = vld [vmem:[%s25145_s1 + $0x1e0c] ss:$100 sps:$4 sm:$0xff]  }
 0x57b   :  { %11728 = vmatpush1.bf16.msra.mxu0 %v18915_v11  ;;  %11900 = vmatpush1.bf16.msra.mxu1 %v18918_v12  ;;  %v18963_v11 = vld [vmem:[%s25145_s1 + $0x1e00] ss:$100 sps:$4 sm:$0xff]   ;;  %v18966_v12 = vld [vmem:[%s25145_s1 + $0x1e08] ss:$100 sps:$4 sm:$0xff]  }
 0x57c   :  { %11729 = vmatprep.subr.bf16.mxu0 %v18923_v14  ;;  %11901 = vmatprep.subr.bf16.mxu1 %v18926_v20  ;;  %v18971_v14 = vld [vmem:[%s25145_s1 + $0x1ecc] ss:$100 sps:$4 sm:$0xff]   ;;  %v18974_v20 = vld [vmem:[%s25145_s1 + $0x1ed4] ss:$100 sps:$4 sm:$0xff]  }
 0x57f   :  { %11730 = vmatpush1.bf16.msra.mxu0 %v18921_v29  ;;  %11902 = vmatpush1.bf16.msra.mxu1 %v18924_v32  ;;  %v18969_v29 = vld [vmem:[%s25145_s1 + $0x1ec8] ss:$100 sps:$4 sm:$0xff]   ;;  %v18972_v32 = vld [vmem:[%s25145_s1 + $0x1ed0] ss:$100 sps:$4 sm:$0xff]  }
 0x580   :  { %11742 = vmatprep.subr.bf16.mxu0 %v18929_v8  ;;  %11914 = vmatprep.subr.bf16.mxu1 %v18932_v39  ;;  %v18977_v8 = vld [vmem:[%s25145_s1 + $0x1f94] ss:$100 sps:$4 sm:$0xff]   ;;  %v18980_v39 = vld [vmem:[%s25145_s1 + $0x1f9c] ss:$100 sps:$4 sm:$0xff]  }
 0x582   :  { %11732 = vmatmul.mubr.bf16.vlgmr.msra.gmra.mrb[20].mxu0 %v19854_v13  ;;  %11904 = vmatmul.mubr.bf16.vlgmr.msra.gmra.mrb[20].mxu1 %v19854_v13 }
 0x583   :  { %11743 = vmatpush1.bf16.msra.mxu0 %v18927_v44  ;;  %11915 = vmatpush1.bf16.msra.mxu1 %v18930_v45  ;;  %v18975_v44 = vld [vmem:[%s25145_s1 + $0x1f90] ss:$100 sps:$4 sm:$0xff]   ;;  %v18978_v45 = vld [vmem:[%s25145_s1 + $0x1f98] ss:$100 sps:$4 sm:$0xff]  }
 0x584   :  { %11744 = vmatprep.subr.bf16.mxu0 %v18935_v46  ;;  %11916 = vmatprep.subr.bf16.mxu1 %v18938_v47  ;;  %v18983_v46 = vld [vmem:[%s25145_s1 + $0x205c] ss:$100 sps:$4 sm:$0xff]   ;;  %v18986_v47 = vld [vmem:[%s25145_s1 + $0x2064] ss:$100 sps:$4 sm:$0xff]  }
 0x585   :  { %11774 = vmatprep.mubr.bf16.mxu0 %v19874_v18  ;;  %11946 = vmatprep.mubr.bf16.mxu1 %v19874_v18 }
 0x587   :  { %11745 = vmatpush1.bf16.msra.mxu0 %v18933_v48  ;;  %11917 = vmatpush1.bf16.msra.mxu1 %v18936_v49  ;;  %v18981_v48 = vld [vmem:[%s25145_s1 + $0x2058] ss:$100 sps:$4 sm:$0xff]   ;;  %v18984_v49 = vld [vmem:[%s25145_s1 + $0x2060] ss:$100 sps:$4 sm:$0xff]  }
 0x588   :  { %11746 = vmatprep.subr.bf16.mxu0 %v18941_v51  ;;  %11918 = vmatprep.subr.bf16.mxu1 %v18944_v52  ;;  %v18989_v51 = vld [vmem:[%s25145_s1 + $0x2124] ss:$100 sps:$4 sm:$0xff]   ;;  %v18992_v52 = vld [vmem:[%s25145_s1 + $0x212c] ss:$100 sps:$4 sm:$0xff]  }
 0x58b   :  { %11747 = vmatpush1.bf16.msra.mxu0 %v18939_v53  ;;  %11919 = vmatpush1.bf16.msra.mxu1 %v18942_v54  ;;  %v18987_v53 = vld [vmem:[%s25145_s1 + $0x2120] ss:$100 sps:$4 sm:$0xff]   ;;  %v18990_v54 = vld [vmem:[%s25145_s1 + $0x2128] ss:$100 sps:$4 sm:$0xff]  }
 0x58c   :  { %11748 = vmatprep.subr.bf16.mxu0 %v18947_v55  ;;  %11920 = vmatprep.subr.bf16.mxu1 %v18950_v56  ;;  %v18995_v55 = vld [vmem:[%s25145_s1 + $0x21ec] ss:$100 sps:$4 sm:$0xff]   ;;  %v18998_v56 = vld [vmem:[%s25145_s1 + $0x21f4] ss:$100 sps:$4 sm:$0xff]  }
 0x58f   :  { %11749 = vmatpush1.bf16.msra.mxu0 %v18945_v57  ;;  %11921 = vmatpush1.bf16.msra.mxu1 %v18948_v58  ;;  %v18993_v57 = vld [vmem:[%s25145_s1 + $0x21e8] ss:$100 sps:$4 sm:$0xff]   ;;  %v18996_v58 = vld [vmem:[%s25145_s1 + $0x21f0] ss:$100 sps:$4 sm:$0xff]  }
 0x590   :  { %11750 = vmatprep.subr.bf16.mxu0 %v18953_v59  ;;  %11922 = vmatprep.subr.bf16.mxu1 %v18956_v60  ;;  %v19001_v59 = vld [vmem:[%s25145_s1 + $0x22b4] ss:$100 sps:$4 sm:$0xff]   ;;  %v19004_v60 = vld [vmem:[%s25145_s1 + $0x22bc] ss:$100 sps:$4 sm:$0xff]  }
 0x593   :  { %11751 = vmatpush1.bf16.msra.mxu0 %v18951_v61  ;;  %11923 = vmatpush1.bf16.msra.mxu1 %v18954_v62  ;;  %v18999_v61 = vld [vmem:[%s25145_s1 + $0x22b0] ss:$100 sps:$4 sm:$0xff]   ;;  %v19002_v62 = vld [vmem:[%s25145_s1 + $0x22b8] ss:$100 sps:$4 sm:$0xff]  }
 0x594   :  { %11752 = vmatprep.subr.bf16.mxu0 %v18959_v63  ;;  %11924 = vmatprep.subr.bf16.mxu1 %v18962_v0  ;;  %v19007_v63 = vld [vmem:[%s25145_s1 + $0x237c] ss:$100 sps:$4 sm:$0xff]   ;;  %v19010_v0 = vld [vmem:[%s25145_s1 + $0x2384] ss:$100 sps:$4 sm:$0xff]  }
 0x597   :  { %11753 = vmatpush1.bf16.msra.mxu0 %v18957_v1  ;;  %11925 = vmatpush1.bf16.msra.mxu1 %v18960_v2  ;;  %v19005_v1 = vld [vmem:[%s25145_s1 + $0x2378] ss:$100 sps:$4 sm:$0xff]   ;;  %v19008_v2 = vld [vmem:[%s25145_s1 + $0x2380] ss:$100 sps:$4 sm:$0xff]  }
 0x598   :  { %11754 = vmatprep.subr.bf16.mxu0 %v18965_v6  ;;  %11926 = vmatprep.subr.bf16.mxu1 %v18968_v7  ;;  %v19013_v6 = vld [vmem:[%s25145_s1 + $0x2444] ss:$100 sps:$4 sm:$0xff]   ;;  %v19016_v7 = vld [vmem:[%s25145_s1 + $0x244c] ss:$100 sps:$4 sm:$0xff]  }
 0x59b   :  { %11755 = vmatpush1.bf16.msra.mxu0 %v18963_v11  ;;  %11927 = vmatpush1.bf16.msra.mxu1 %v18966_v12  ;;  %v19011_v11 = vld [vmem:[%s25145_s1 + $0x2440] ss:$100 sps:$4 sm:$0xff]   ;;  %v19014_v12 = vld [vmem:[%s25145_s1 + $0x2448] ss:$100 sps:$4 sm:$0xff]  }
 0x59c   :  { %11756 = vmatprep.subr.bf16.mxu0 %v18971_v14  ;;  %11928 = vmatprep.subr.bf16.mxu1 %v18974_v20  ;;  %v19019_v14 = vld [vmem:[%s25145_s1 + $0x250c] ss:$100 sps:$4 sm:$0xff]   ;;  %v19022_v20 = vld [vmem:[%s25145_s1 + $0x2514] ss:$100 sps:$4 sm:$0xff]  }
 0x59f   :  { %11757 = vmatpush1.bf16.msra.mxu0 %v18969_v29  ;;  %11929 = vmatpush1.bf16.msra.mxu1 %v18972_v32  ;;  %v19017_v29 = vld [vmem:[%s25145_s1 + $0x2508] ss:$100 sps:$4 sm:$0xff]   ;;  %v19020_v32 = vld [vmem:[%s25145_s1 + $0x2510] ss:$100 sps:$4 sm:$0xff]  }
 0x5a0   :  { %11758 = vmatprep.subr.bf16.mxu0 %v18977_v8  ;;  %11930 = vmatprep.subr.bf16.mxu1 %v18980_v39  ;;  %v19025_v8 = vld [vmem:[%s25145_s1 + $0x25d4] ss:$100 sps:$4 sm:$0xff]   ;;  %v19028_v39 = vld [vmem:[%s25145_s1 + $0x25dc] ss:$100 sps:$4 sm:$0xff]  }
 0x5a3   :  { %11759 = vmatpush1.bf16.msra.mxu0 %v18975_v44  ;;  %11931 = vmatpush1.bf16.msra.mxu1 %v18978_v45  ;;  %v19023_v44 = vld [vmem:[%s25145_s1 + $0x25d0] ss:$100 sps:$4 sm:$0xff]   ;;  %v19026_v45 = vld [vmem:[%s25145_s1 + $0x25d8] ss:$100 sps:$4 sm:$0xff]  }
 0x5a4   :  { %11760 = vmatprep.subr.bf16.mxu0 %v18983_v46  ;;  %11932 = vmatprep.subr.bf16.mxu1 %v18986_v47  ;;  %v19031_v46 = vld [vmem:[%s25145_s1 + $0x269c] ss:$100 sps:$4 sm:$0xff]   ;;  %v19034_v47 = vld [vmem:[%s25145_s1 + $0x26a4] ss:$100 sps:$4 sm:$0xff]  }
 0x5a7   :  { %11761 = vmatpush1.bf16.msra.mxu0 %v18981_v48  ;;  %11933 = vmatpush1.bf16.msra.mxu1 %v18984_v49  ;;  %v19029_v48 = vld [vmem:[%s25145_s1 + $0x2698] ss:$100 sps:$4 sm:$0xff]   ;;  %v19032_v49 = vld [vmem:[%s25145_s1 + $0x26a0] ss:$100 sps:$4 sm:$0xff]  }
 0x5a8   :  { %11762 = vmatprep.subr.bf16.mxu0 %v18989_v51  ;;  %11934 = vmatprep.subr.bf16.mxu1 %v18992_v52  ;;  %v19037_v51 = vld [vmem:[%s25145_s1 + $0x2764] ss:$100 sps:$4 sm:$0xff]   ;;  %v19040_v52 = vld [vmem:[%s25145_s1 + $0x276c] ss:$100 sps:$4 sm:$0xff]  }
 0x5ab   :  { %11763 = vmatpush1.bf16.msra.mxu0 %v18987_v53  ;;  %11935 = vmatpush1.bf16.msra.mxu1 %v18990_v54  ;;  %v19035_v53 = vld [vmem:[%s25145_s1 + $0x2760] ss:$100 sps:$4 sm:$0xff]   ;;  %v19038_v54 = vld [vmem:[%s25145_s1 + $0x2768] ss:$100 sps:$4 sm:$0xff]  }
 0x5ac   :  { %11764 = vmatprep.subr.bf16.mxu0 %v18995_v55  ;;  %11936 = vmatprep.subr.bf16.mxu1 %v18998_v56  ;;  %v19043_v55 = vld [vmem:[%s25145_s1 + $0x282c] ss:$100 sps:$4 sm:$0xff]   ;;  %v19046_v56 = vld [vmem:[%s25145_s1 + $0x2834] ss:$100 sps:$4 sm:$0xff]  }
 0x5af   :  { %11765 = vmatpush1.bf16.msra.mxu0 %v18993_v57  ;;  %11937 = vmatpush1.bf16.msra.mxu1 %v18996_v58  ;;  %v19041_v57 = vld [vmem:[%s25145_s1 + $0x2828] ss:$100 sps:$4 sm:$0xff]   ;;  %v19044_v58 = vld [vmem:[%s25145_s1 + $0x2830] ss:$100 sps:$4 sm:$0xff]  }
 0x5b0   :  { %11766 = vmatprep.subr.bf16.mxu0 %v19001_v59  ;;  %11938 = vmatprep.subr.bf16.mxu1 %v19004_v60  ;;  %v19049_v59 = vld [vmem:[%s25145_s1 + $0x28f4] ss:$100 sps:$4 sm:$0xff]   ;;  %v19052_v60 = vld [vmem:[%s25145_s1 + $0x28fc] ss:$100 sps:$4 sm:$0xff]  }
 0x5b3   :  { %11767 = vmatpush1.bf16.msra.mxu0 %v18999_v61  ;;  %11939 = vmatpush1.bf16.msra.mxu1 %v19002_v62  ;;  %v19047_v61 = vld [vmem:[%s25145_s1 + $0x28f0] ss:$100 sps:$4 sm:$0xff]   ;;  %v19050_v62 = vld [vmem:[%s25145_s1 + $0x28f8] ss:$100 sps:$4 sm:$0xff]  }
 0x5b4   :  { %11768 = vmatprep.subr.bf16.mxu0 %v19007_v63  ;;  %11940 = vmatprep.subr.bf16.mxu1 %v19010_v0  ;;  %v1701_v63 = vld [vmem:[%s25147_s2 + $0x10] sm:$0xff]  ;;  %v19055_v0 = vld [vmem:[%s25145_s1 + $0x29bc] ss:$100 sps:$4 sm:$0xff]  }
 0x5b7   :  { %11769 = vmatpush1.bf16.msra.mxu0 %v19005_v1  ;;  %11941 = vmatpush1.bf16.msra.mxu1 %v19008_v2  ;;  %v19058_v1 = vld [vmem:[%s25145_s1 + $0x29c4] ss:$100 sps:$4 sm:$0xff]   ;;  %v19053_v2 = vld [vmem:[%s25145_s1 + $0x29b8] ss:$100 sps:$4 sm:$0xff]  }
 0x5b8   :  { %11770 = vmatprep.subr.bf16.mxu0 %v19013_v6  ;;  %11942 = vmatprep.subr.bf16.mxu1 %v19016_v7  ;;  %v1774_v6 = vrot.slane %v1701_v63, %v20924_v15  ;;  %v1782_v7 = vrot.slane %v1701_v63, %v20927_v19  ;;  %v19064_v15 = vld [vmem:[%s25145_s1 + $0x2a8c] ss:$100 sps:$4 sm:$0xff]  }
 0x5bb   :  { %11771 = vmatpush1.bf16.msra.mxu0 %v19011_v11  ;;  %11943 = vmatpush1.bf16.msra.mxu1 %v19014_v12  ;;  %v19056_v11 = vld [vmem:[%s25145_s1 + $0x29c0] ss:$100 sps:$4 sm:$0xff]   ;;  %v1778_v12 = vrot.slane %v1701_v63, %v20936_v22  ;;  %v19062_v22 = vld [vmem:[%s25145_s1 + $0x2a88] ss:$100 sps:$4 sm:$0xff]  }
 0x5bc   :  { %11772 = vmatprep.subr.bf16.mxu0 %v19019_v14  ;;  %11944 = vmatprep.subr.bf16.mxu1 %v19022_v20  ;;  %v1786_v14 = vrot.slane %v1701_v63, %v20939_v23  ;;  %v19061_v20 = vld [vmem:[%s25145_s1 + $0x2a84] ss:$100 sps:$4 sm:$0xff]  }
 0x5bf   :  { %11773 = vmatpush1.bf16.msra.mxu0 %v19017_v29  ;;  %11945 = vmatpush1.bf16.msra.mxu1 %v19020_v32  ;;  %v19059_v32 = vld [vmem:[%s25145_s1 + $0x2a80] ss:$100 sps:$4 sm:$0xff]  }
 0x5c0   :  { %11785 = vmatprep.subr.bf16.mxu0 %v19025_v8  ;;  %11957 = vmatprep.subr.bf16.mxu1 %v19028_v39 }
 0x5c2   :  { %11775 = vmatmul.mubr.bf16.vlgmr.msra.gmra.mrb[20].mxu0 %v20068_v24  ;;  %11947 = vmatmul.mubr.bf16.vlgmr.msra.gmra.mrb[20].mxu1 %v20068_v24 }
 0x5c3   :  { %11786 = vmatpush1.bf16.msra.mxu0 %v19023_v44  ;;  %11958 = vmatpush1.bf16.msra.mxu1 %v19026_v45  ;;  %v19067_v45 = vld [vmem:[%s25145_s1 + $0x2b4c] ss:$100 sps:$4 sm:$0xff]  }
 0x5c4   :  { %11787 = vmatprep.subr.bf16.mxu0 %v19031_v46  ;;  %11959 = vmatprep.subr.bf16.mxu1 %v19034_v47 }
 0x5c5   :  { %11817 = vmatprep.mubr.bf16.mxu0 %v20088_v17  ;;  %11989 = vmatprep.mubr.bf16.mxu1 %v20088_v17 }
 0x5c7   :  { %11788 = vmatpush1.bf16.msra.mxu0 %v19029_v48  ;;  %11960 = vmatpush1.bf16.msra.mxu1 %v19032_v49 }
 0x5c8   :  { %11789 = vmatprep.subr.bf16.mxu0 %v19037_v51  ;;  %11961 = vmatprep.subr.bf16.mxu1 %v19040_v52 }
 0x5cb   :  { %11790 = vmatpush1.bf16.msra.mxu0 %v19035_v53  ;;  %11962 = vmatpush1.bf16.msra.mxu1 %v19038_v54 }
 0x5cc   :  { %11791 = vmatprep.subr.bf16.mxu0 %v19043_v55  ;;  %11963 = vmatprep.subr.bf16.mxu1 %v19046_v56  ;;  %v19070_v55 = vld [vmem:[%s25145_s1 + $0x2b54] ss:$100 sps:$4 sm:$0xff]  }
 0x5cf   :  { %11792 = vmatpush1.bf16.msra.mxu0 %v19041_v57  ;;  %11964 = vmatpush1.bf16.msra.mxu1 %v19044_v58 }
 0x5d0   :  { %11793 = vmatprep.subr.bf16.mxu0 %v19049_v59  ;;  %11965 = vmatprep.subr.bf16.mxu1 %v19052_v60  ;;  %v19065_v60 = vld [vmem:[%s25145_s1 + $0x2b48] ss:$100 sps:$4 sm:$0xff]  }
 0x5d3   :  { %11794 = vmatpush1.bf16.msra.mxu0 %v19047_v61  ;;  %11966 = vmatpush1.bf16.msra.mxu1 %v19050_v62  ;;  %v19068_v61 = vld [vmem:[%s25145_s1 + $0x2b50] ss:$100 sps:$4 sm:$0xff]  }
 0x5d4   :  { %11795 = vmatprep.subr.bf16.mxu0 %v19055_v0  ;;  %11967 = vmatprep.subr.bf16.mxu1 %v19058_v1  ;;  %v19073_v0 = vld [vmem:[%s25145_s1 + $0x2c14] ss:$100 sps:$4 sm:$0xff]   ;;  %v19076_v1 = vld [vmem:[%s25145_s1 + $0x2c1c] ss:$100 sps:$4 sm:$0xff]  }
 0x5d5   :  { %v11475_v19 = vpop.f32.mrb[16].mxu0  ;;  %v11647_v29 = vpop.f32.mrb[16].mxu1 }
 0x5d6   :  { %v16653_v23 = vadd.f32 %v11475_v19, %v1774_v6  ;;  %v16657_v8 = vadd.f32 %v11647_v29, %v1782_v7  ;;  %v11477_v39 = vpop.f32.mrb[17].mxu0  ;;  %v11649_v44 = vpop.f32.mrb[17].mxu1  ;;  %v19071_v19 = vld [vmem:[%s25145_s1 + $0x2c10] ss:$100 sps:$4 sm:$0xff]   ;;  %v19074_v29 = vld [vmem:[%s25145_s1 + $0x2c18] ss:$100 sps:$4 sm:$0xff]  }
 0x5d7   :  { %v16654_v46 = vadd.f32 %v11477_v39, %v1778_v12  ;;  %v16658_v47 = vadd.f32 %v11649_v44, %v1786_v14  ;;  %v11479_v48 = vpop.f32.mrb[18].mxu0  ;;  %v11651_v49 = vpop.f32.mrb[18].mxu1  ;;  %11796 = vmatpush1.bf16.msra.mxu0 %v19053_v2  ;;  %11968 = vmatpush1.bf16.msra.mxu1 %v19056_v11  ;;  %v19085_v39 = vld [vmem:[%s25145_s1 + $0x2da4] ss:$100 sps:$4 sm:$0xff]   ;;  %v19088_v44 = vld [vmem:[%s25145_s1 + $0x2dac] ss:$100 sps:$4 sm:$0xff]  }
 0x5d8   :  { %v16655_v51 = vadd.f32 %v11479_v48, %v1774_v6  ;;  %v16659_v52 = vadd.f32 %v11651_v49, %v1782_v7  ;;  %v11481_v53 = vpop.f32.mrb[19].mxu0  ;;  %v11653_v54 = vpop.f32.mrb[19].mxu1  ;;  %11797 = vmatprep.subr.bf16.mxu0 %v19061_v20  ;;  %11969 = vmatprep.subr.bf16.mxu1 %v19064_v15  ;;  %v12180_v56 = vmax.f32 %v16653_v23, 0.0  ;;  %v12182_v57 = vmax.f32 %v16657_v8, 0.0  ;;  %v19077_v23 = vld [vmem:[%s25145_s1 + $0x2cd8] ss:$100 sps:$4 sm:$0xff]  }
 0x5d9   :  { %v16656_v58 = vadd.f32 %v11481_v53, %v1778_v12  ;;  %v16660_v59 = vadd.f32 %v11653_v54, %v1786_v14  ;;  %v12181_v2 = vmax.f32 %v16654_v46, 0.0  ;;  %v12183_v6 = vmax.f32 %v16658_v47, 0.0  ;;  %v19080_v8 = vld [vmem:[%s25145_s1 + $0x2ce0] ss:$100 sps:$4 sm:$0xff]   ;;  %v19086_v46 = vld [vmem:[%s25145_s1 + $0x2da8] ss:$100 sps:$4 sm:$0xff]  }
 0x5da   :  { %v12205_v62 = vmax.f32 %v16655_v51, 0.0  ;;  %v12207_v63 = vmax.f32 %v16659_v52, 0.0  ;;  %v19091_v47 = vld [vmem:[%s25145_s1 + $0x2e6c] ss:$100 sps:$4 sm:$0xff]   ;;  %v19094_v48 = vld [vmem:[%s25145_s1 + $0x2e74] ss:$100 sps:$4 sm:$0xff]  }
 0x5db   :  { %v12206_v7 = vmax.f32 %v16656_v58, 0.0  ;;  %v12208_v11 = vmax.f32 %v16660_v59, 0.0  ;;  %11798 = vmatpush1.bf16.msra.mxu0 %v19059_v32  ;;  %11970 = vmatpush1.bf16.msra.mxu1 %v19062_v22  ;;  %v19079_v32 = vld [vmem:[%s25145_s1 + $0x2cdc] ss:$100 sps:$4 sm:$0xff]   ;;  %v19082_v22 = vld [vmem:[%s25145_s1 + $0x2ce4] ss:$100 sps:$4 sm:$0xff]  }
 0x5dc   :  { %v24195_v12 = vpack.c.bf16 %v12205_v62, %v12180_v56  ;;  %v24197_v14 = vpack.c.bf16 %v12207_v63, %v12182_v57  ;;  %11799 = vmatprep.subr.bf16.mxu0 %v19067_v45  ;;  %11971 = vmatprep.subr.bf16.mxu1 %v19070_v55  ;;  %v19083_v45 = vld [vmem:[%s25145_s1 + $0x2da0] ss:$100 sps:$4 sm:$0xff]   ;;  %v19089_v49 = vld [vmem:[%s25145_s1 + $0x2e68] ss:$100 sps:$4 sm:$0xff]   ;;  %v19092_v51 = vld [vmem:[%s25145_s1 + $0x2e70] ss:$100 sps:$4 sm:$0xff]  }
 0x5dd   :  { %v24199_v20 = vpack.c.bf16 %v12206_v7, %v12181_v2  ;;  %v24201_v15 = vpack.c.bf16 %v12208_v11, %v12183_v6  ;;  %v19097_v52 = vld [vmem:[%s25145_s1 + $0x2f34] ss:$100 sps:$4 sm:$0xff]   ;;  %v19100_v53 = vld [vmem:[%s25145_s1 + $0x2f3c] ss:$100 sps:$4 sm:$0xff]   ;;  %v19106_v57 = vld [vmem:[%s25145_s1 + $0x3004] ss:$100 sps:$4 sm:$0xff]  }
 0x5de   :  { %v19095_v54 = vld [vmem:[%s25145_s1 + $0x2f30] ss:$100 sps:$4 sm:$0xff]   ;;  %v19098_v55 = vld [vmem:[%s25145_s1 + $0x2f38] ss:$100 sps:$4 sm:$0xff]   ;;  %v19104_v59 = vld [vmem:[%s25145_s1 + $0x3000] ss:$100 sps:$4 sm:$0xff]  }
 0x5df   :  { %11800 = vmatpush1.bf16.msra.mxu0 %v19065_v60  ;;  %11972 = vmatpush1.bf16.msra.mxu1 %v19068_v61  ;;  %v19103_v56 = vld [vmem:[%s25145_s1 + $0x2ffc] ss:$100 sps:$4 sm:$0xff]   ;;  %v19109_v60 = vld [vmem:[%s25145_s1 + $0x30c4] ss:$100 sps:$4 sm:$0xff]   ;;  %v19112_v61 = vld [vmem:[%s25145_s1 + $0x30cc] ss:$100 sps:$4 sm:$0xff]  }
 0x5e0   :  { %11801 = vmatprep.subr.bf16.mxu0 %v19073_v0  ;;  %11973 = vmatprep.subr.bf16.mxu1 %v19076_v1  ;;  %v19101_v58 = vld [vmem:[%s25145_s1 + $0x2ff8] ss:$100 sps:$4 sm:$0xff]   ;;  %v19107_v62 = vld [vmem:[%s25145_s1 + $0x30c0] ss:$100 sps:$4 sm:$0xff]   ;;  %v19110_v63 = vld [vmem:[%s25145_s1 + $0x30c8] ss:$100 sps:$4 sm:$0xff]  }
 0x5e1   :  { %v19115_v0 = vld [vmem:[%s25145_s1 + $0x318c] ss:$100 sps:$4 sm:$0xff]   ;;  %v19118_v1 = vld [vmem:[%s25145_s1 + $0x3194] ss:$100 sps:$4 sm:$0xff]   ;;  %v19119_v7 = vld [vmem:[%s25145_s1 + $0x6a0] ss:$100 sps:$4 sm:$0xff]  }
 0x5e2   :  { %v19113_v2 = vld [vmem:[%s25145_s1 + $0x3188] ss:$100 sps:$4 sm:$0xff]   ;;  %v19116_v6 = vld [vmem:[%s25145_s1 + $0x3190] ss:$100 sps:$4 sm:$0xff]   ;;  %v19120_v11 = vld [vmem:[%s25145_s1 + $0x1320] ss:$100 sps:$4 sm:$0xff]  }
 0x5e3   :  { %11802 = vmatpush1.bf16.msra.mxu0 %v19071_v19  ;;  %11974 = vmatpush1.bf16.msra.mxu1 %v19074_v29  ;;  %v19121_v19 = vld [vmem:[%s25145_s1 + $0x60] ss:$100 sps:$4 sm:$0xff]  }
 0x5e4   :  { %11803 = vmatprep.subr.bf16.mxu0 %v19079_v32  ;;  %11975 = vmatprep.subr.bf16.mxu1 %v19082_v22  ;;  %v19122_v29 = vld [vmem:[%s25145_s1 + $0xce0] ss:$100 sps:$4 sm:$0xff]   ;;  %v19123_v32 = vld [vmem:[%s25145_s1 + $0x768] ss:$100 sps:$4 sm:$0xff]  }
 0x5e5   :  { %v19124_v22 = vld [vmem:[%s25145_s1 + $0x13e8] ss:$100 sps:$4 sm:$0xff]  }
 0x5e7   :  { %11804 = vmatpush1.bf16.msra.mxu0 %v19077_v23  ;;  %11976 = vmatpush1.bf16.msra.mxu1 %v19080_v8  ;;  %v19125_v23 = vld [vmem:[%s25145_s1 + $0x128] ss:$100 sps:$4 sm:$0xff]  }
 0x5e8   :  { %11805 = vmatprep.subr.bf16.mxu0 %v19085_v39  ;;  %11977 = vmatprep.subr.bf16.mxu1 %v19088_v44  ;;  %v19126_v8 = vld [vmem:[%s25145_s1 + $0xda8] ss:$100 sps:$4 sm:$0xff]   ;;  %v19127_v39 = vld [vmem:[%s25145_s1 + $0x830] ss:$100 sps:$4 sm:$0xff]  }
 0x5e9   :  { %v19128_v44 = vld [vmem:[%s25145_s1 + $0x14b0] ss:$100 sps:$4 sm:$0xff]  }
 0x5eb   :  { %11806 = vmatpush1.bf16.msra.mxu0 %v19083_v45  ;;  %11978 = vmatpush1.bf16.msra.mxu1 %v19086_v46  ;;  %v19129_v45 = vld [vmem:[%s25145_s1 + $0x1f0] ss:$100 sps:$4 sm:$0xff]  }
 0x5ec   :  { %11807 = vmatprep.subr.bf16.mxu0 %v19091_v47  ;;  %11979 = vmatprep.subr.bf16.mxu1 %v19094_v48  ;;  %v19130_v46 = vld [vmem:[%s25145_s1 + $0xe70] ss:$100 sps:$4 sm:$0xff]   ;;  %v19131_v47 = vld [vmem:[%s25145_s1 + $0x8f8] ss:$100 sps:$4 sm:$0xff]  }
 0x5ed   :  { %v19132_v48 = vld [vmem:[%s25145_s1 + $0x1578] ss:$100 sps:$4 sm:$0xff]  }
 0x5ef   :  { %11808 = vmatpush1.bf16.msra.mxu0 %v19089_v49  ;;  %11980 = vmatpush1.bf16.msra.mxu1 %v19092_v51  ;;  %v19135_v49 = vld [vmem:[%s25145_s1 + $0x9c0] ss:$100 sps:$4 sm:$0xff]  }
 0x5f0   :  { %11809 = vmatprep.subr.bf16.mxu0 %v19097_v52  ;;  %11981 = vmatprep.subr.bf16.mxu1 %v19100_v53  ;;  %v19136_v51 = vld [vmem:[%s25145_s1 + $0x1640] ss:$100 sps:$4 sm:$0xff]  }
 0x5f1   :  { %v19137_v52 = vld [vmem:[%s25145_s1 + $0x380] ss:$100 sps:$4 sm:$0xff]  }
 0x5f2   :  { %v19138_v53 = vld [vmem:[%s25145_s1 + $0x1000] ss:$100 sps:$4 sm:$0xff]  }
 0x5f3   :  { %11810 = vmatpush1.bf16.msra.mxu0 %v19095_v54  ;;  %11982 = vmatpush1.bf16.msra.mxu1 %v19098_v55  ;;  %v19139_v54 = vld [vmem:[%s25145_s1 + $0xa88] ss:$100 sps:$4 sm:$0xff]  }
 0x5f4   :  { %11811 = vmatprep.subr.bf16.mxu0 %v19103_v56  ;;  %11983 = vmatprep.subr.bf16.mxu1 %v19106_v57  ;;  %v19140_v55 = vld [vmem:[%s25145_s1 + $0x1708] ss:$100 sps:$4 sm:$0xff]  }
 0x5f5   :  { %v19141_v56 = vld [vmem:[%s25145_s1 + $0x448] ss:$100 sps:$4 sm:$0xff]  }
 0x5f6   :  { %v19142_v57 = vld [vmem:[%s25145_s1 + $0x10c8] ss:$100 sps:$4 sm:$0xff]  }
 0x5f7   :  { %11812 = vmatpush1.bf16.msra.mxu0 %v19101_v58  ;;  %11984 = vmatpush1.bf16.msra.mxu1 %v19104_v59  ;;  %v19143_v58 = vld [vmem:[%s25145_s1 + $0xb50] ss:$100 sps:$4 sm:$0xff]  }
 0x5f8   :  { %11813 = vmatprep.subr.bf16.mxu0 %v19109_v60  ;;  %11985 = vmatprep.subr.bf16.mxu1 %v19112_v61  ;;  %v19144_v59 = vld [vmem:[%s25145_s1 + $0x17d0] ss:$100 sps:$4 sm:$0xff]  }
 0x5f9   :  { %v19145_v60 = vld [vmem:[%s25145_s1 + $0x510] ss:$100 sps:$4 sm:$0xff]  }
 0x5fa   :  { %v19146_v61 = vld [vmem:[%s25145_s1 + $0x1190] ss:$100 sps:$4 sm:$0xff]  }
 0x5fb   :  { %11814 = vmatpush1.bf16.msra.mxu0 %v19107_v62  ;;  %11986 = vmatpush1.bf16.msra.mxu1 %v19110_v63  ;;  %v19147_v62 = vld [vmem:[%s25145_s1 + $0xc18] ss:$100 sps:$4 sm:$0xff]  }
 0x5fc   :  { %11815 = vmatprep.subr.bf16.mxu0 %v19115_v0  ;;  %11987 = vmatprep.subr.bf16.mxu1 %v19118_v1  ;;  %v19148_v63 = vld [vmem:[%s25145_s1 + $0x1898] ss:$100 sps:$4 sm:$0xff]  }
 0x5fd   :  { %v19149_v0 = vld [vmem:[%s25145_s1 + $0x5d8] ss:$100 sps:$4 sm:$0xff]  }
 0x5fe   :  { %v19150_v1 = vld [vmem:[%s25145_s1 + $0x1258] ss:$100 sps:$4 sm:$0xff]  }
 0x5ff   :  { %11816 = vmatpush1.bf16.msra.mxu0 %v19113_v2  ;;  %11988 = vmatpush1.bf16.msra.mxu1 %v19116_v6  ;;  %v19151_v2 = vld [vmem:[%s25145_s1 + $0x1fa0] ss:$100 sps:$4 sm:$0xff]  }
 0x600   :  { %16241 = vmatprep.subr.bf16.mxu0 %v19119_v7  ;;  %16263 = vmatprep.subr.bf16.mxu1 %v19120_v11  ;;  %v19152_v6 = vld [vmem:[%s25145_s1 + $0x2c20] ss:$100 sps:$4 sm:$0xff]  }
 0x601   :  { %v19153_v7 = vld [vmem:[%s25145_s1 + $0x1960] ss:$100 sps:$4 sm:$0xff]  }
 0x602   :  { %11818 = vmatmul.mubr.bf16.vlgmr.msra.gmra.mrb[20].mxu0 %v20276_v33  ;;  %11990 = vmatmul.mubr.bf16.vlgmr.msra.gmra.mrb[20].mxu1 %v20276_v33  ;;  %v19154_v11 = vld [vmem:[%s25145_s1 + $0x25e0] ss:$100 sps:$4 sm:$0xff]  }
 0x603   :  { %16242 = vmatpush3.bf16.msra.mxu0 %v19121_v19  ;;  %16264 = vmatpush3.bf16.msra.mxu1 %v19122_v29  ;;  %v19155_v19 = vld [vmem:[%s25145_s1 + $0x2068] ss:$100 sps:$4 sm:$0xff]  }
 0x604   :  { %16243 = vmatprep.subr.bf16.mxu0 %v19123_v32  ;;  %16265 = vmatprep.subr.bf16.mxu1 %v19124_v22  ;;  %v19156_v29 = vld [vmem:[%s25145_s1 + $0x2ce8] ss:$100 sps:$4 sm:$0xff]  }
 0x605   :  { %12032 = vmatprep.mubr.bf16.mxu0 %v19576_v50  ;;  %12073 = vmatprep.mubr.bf16.mxu1 %v19728_v34  ;;  %v19133_v50 = vld [vmem:[%s25145_s1 + $0x2b8] ss:$100 sps:$4 sm:$0xff]   ;;  %v19157_v32 = vld [vmem:[%s25145_s1 + $0x1a28] ss:$100 sps:$4 sm:$0xff]  }
 0x606   :  { %v19134_v34 = vld [vmem:[%s25145_s1 + $0xf38] ss:$100 sps:$4 sm:$0xff]   ;;  %v19158_v22 = vld [vmem:[%s25145_s1 + $0x26a8] ss:$100 sps:$4 sm:$0xff]  }
 0x607   :  { %16244 = vmatpush3.bf16.msra.mxu0 %v19125_v23  ;;  %16266 = vmatpush3.bf16.msra.mxu1 %v19126_v8  ;;  %v19159_v23 = vld [vmem:[%s25145_s1 + $0x2130] ss:$100 sps:$4 sm:$0xff]  }
 0x608   :  { %16245 = vmatprep.subr.bf16.mxu0 %v19127_v39  ;;  %16267 = vmatprep.subr.bf16.mxu1 %v19128_v44  ;;  %v19160_v8 = vld [vmem:[%s25145_s1 + $0x2db0] ss:$100 sps:$4 sm:$0xff]   ;;  %v19163_v39 = vld [vmem:[%s25145_s1 + $0x21f8] ss:$100 sps:$4 sm:$0xff]  }
 0x609   :  { %v19164_v44 = vld [vmem:[%s25145_s1 + $0x2e78] ss:$100 sps:$4 sm:$0xff]  }
 0x60b   :  { %16246 = vmatpush3.bf16.msra.mxu0 %v19129_v45  ;;  %16268 = vmatpush3.bf16.msra.mxu1 %v19130_v46  ;;  %v19167_v45 = vld [vmem:[%s25145_s1 + $0x22c0] ss:$100 sps:$4 sm:$0xff]  }
 0x60c   :  { %16247 = vmatprep.subr.bf16.mxu0 %v19131_v47  ;;  %16269 = vmatprep.subr.bf16.mxu1 %v19132_v48  ;;  %v19168_v46 = vld [vmem:[%s25145_s1 + $0x2f40] ss:$100 sps:$4 sm:$0xff]  }
 0x60d   :  { %v19169_v47 = vld [vmem:[%s25145_s1 + $0x1c80] ss:$100 sps:$4 sm:$0xff]  }
 0x60e   :  { %v19170_v48 = vld [vmem:[%s25145_s1 + $0x2900] ss:$100 sps:$4 sm:$0xff]  }
 0x60f   :  { %16248 = vmatpush3.bf16.msra.mxu0 %v19133_v50  ;;  %16270 = vmatpush3.bf16.msra.mxu1 %v19134_v34  ;;  %v19171_v50 = vld [vmem:[%s25145_s1 + $0x2388] ss:$100 sps:$4 sm:$0xff]  }
 0x610   :  { %16249 = vmatprep.subr.bf16.mxu0 %v19135_v49  ;;  %16271 = vmatprep.subr.bf16.mxu1 %v19136_v51  ;;  %v19172_v34 = vld [vmem:[%s25145_s1 + $0x3008] ss:$100 sps:$4 sm:$0xff]  }
 0x611   :  { %v19173_v49 = vld [vmem:[%s25145_s1 + $0x1d48] ss:$100 sps:$4 sm:$0xff]  }
 0x612   :  { %v19174_v51 = vld [vmem:[%s25145_s1 + $0x29c8] ss:$100 sps:$4 sm:$0xff]  }
 0x613   :  { %16250 = vmatpush3.bf16.msra.mxu0 %v19137_v52  ;;  %16272 = vmatpush3.bf16.msra.mxu1 %v19138_v53  ;;  %v19175_v52 = vld [vmem:[%s25145_s1 + $0x2450] ss:$100 sps:$4 sm:$0xff]  }
 0x614   :  { %16251 = vmatprep.subr.bf16.mxu0 %v19139_v54  ;;  %16273 = vmatprep.subr.bf16.mxu1 %v19140_v55  ;;  %v19176_v53 = vld [vmem:[%s25145_s1 + $0x30d0] ss:$100 sps:$4 sm:$0xff]  }
 0x615   :  { %v19177_v54 = vld [vmem:[%s25145_s1 + $0x1e10] ss:$100 sps:$4 sm:$0xff]  }
 0x616   :  { %v19178_v55 = vld [vmem:[%s25145_s1 + $0x2a90] ss:$100 sps:$4 sm:$0xff]  }
 0x617   :  { %16252 = vmatpush3.bf16.msra.mxu0 %v19141_v56  ;;  %16274 = vmatpush3.bf16.msra.mxu1 %v19142_v57  ;;  %v19179_v56 = vld [vmem:[%s25145_s1 + $0x2518] ss:$100 sps:$4 sm:$0xff]  }
 0x618   :  { %16253 = vmatprep.subr.bf16.mxu0 %v19143_v58  ;;  %16275 = vmatprep.subr.bf16.mxu1 %v19144_v59  ;;  %v19180_v57 = vld [vmem:[%s25145_s1 + $0x3198] ss:$100 sps:$4 sm:$0xff]  }
 0x619   :  { %v19181_v58 = vld [vmem:[%s25145_s1 + $0x1ed8] ss:$100 sps:$4 sm:$0xff]  }
 0x61a   :  { %v19182_v59 = vld [vmem:[%s25145_s1 + $0x2b58] ss:$100 sps:$4 sm:$0xff]  }
 0x61b   :  { %16254 = vmatpush3.bf16.msra.mxu0 %v19145_v60  ;;  %16276 = vmatpush3.bf16.msra.mxu1 %v19146_v61  ;;  %v19183_v60 = vld [vmem:[%s25148_s3 + $0x40] sm:$0xff]  }
 0x61c   :  { %16255 = vmatprep.subr.bf16.mxu0 %v19147_v62  ;;  %16277 = vmatprep.subr.bf16.mxu1 %v19148_v63  ;;  %v19184_v61 = vld [vmem:[%s25148_s3 + $0xc0] sm:$0xff]  }
 0x61d   :  { %v19185_v62 = vld [vmem:[%s25148_s3] sm:$0xff]  }
 0x61e   :  { %v19186_v63 = vld [vmem:[%s25148_s3 + $0x80] sm:$0xff]  }
 0x61f   :  { %16256 = vmatpush3.bf16.msra.mxu0 %v19149_v0  ;;  %16278 = vmatpush3.bf16.msra.mxu1 %v19150_v1  ;;  %v19187_v0 = vld [vmem:[%s25148_s3 + $0x48] sm:$0xff]  }
 0x620   :  { %16285 = vmatprep.subr.bf16.mxu0 %v19151_v2  ;;  %16307 = vmatprep.subr.bf16.mxu1 %v19152_v6  ;;  %v19188_v1 = vld [vmem:[%s25148_s3 + $0xc8] sm:$0xff]  }
 0x621   :  { %v19189_v2 = vld [vmem:[%s25148_s3 + $0x8] sm:$0xff]  }
 0x622   :  { %12033 = vmatmul.mubr.bf16.vlgmr.msra.gmra.mrb[24].mxu0 %v19634_v5  ;;  %12074 = vmatmul.mubr.bf16.vlgmr.msra.gmra.mrb[24].mxu1 %v19854_v13  ;;  %v19161_v5 = vld [vmem:[%s25145_s1 + $0x1af0] ss:$100 sps:$4 sm:$0xff]   ;;  %v19190_v6 = vld [vmem:[%s25148_s3 + $0x88] sm:$0xff]  }
 0x623   :  { %16286 = vmatpush3.bf16.msra.mxu0 %v19153_v7  ;;  %16308 = vmatpush3.bf16.msra.mxu1 %v19154_v11  ;;  %v19162_v13 = vld [vmem:[%s25145_s1 + $0x2770] ss:$100 sps:$4 sm:$0xff]   ;;  %v19196_v11 = vld [vmem:[%s25148_s3 + $0xd8] sm:$0xff]  }
 0x624   :  { %16287 = vmatprep.subr.bf16.mxu0 %v19155_v19  ;;  %16309 = vmatprep.subr.bf16.mxu1 %v19156_v29  ;;  %v19194_v7 = vld [vmem:[%s25148_s3 + $0x90] sm:$0xff]   ;;  %v19197_v19 = vld [vmem:[%s25148_s3 + $0x18] sm:$0xff]  }
 0x625   :  { %12114 = vmatprep.mubr.bf16.mxu0 %v19874_v18  ;;  %12155 = vmatprep.mubr.bf16.mxu1 %v20088_v17  ;;  %v19165_v18 = vld [vmem:[%s25145_s1 + $0x1bb8] ss:$100 sps:$4 sm:$0xff]  }
 0x626   :  { %v19166_v17 = vld [vmem:[%s25145_s1 + $0x2838] ss:$100 sps:$4 sm:$0xff]  }
 0x627   :  { %16288 = vmatpush3.bf16.msra.mxu0 %v19157_v32  ;;  %16310 = vmatpush3.bf16.msra.mxu1 %v19158_v22  ;;  %v19198_v29 = vld [vmem:[%s25148_s3 + $0x98] sm:$0xff]   ;;  %v19199_v32 = vld [vmem:[%s25148_s3 + $0x60] sm:$0xff]  }
 0x628   :  { %16289 = vmatprep.subr.bf16.mxu0 %v19159_v23  ;;  %16311 = vmatprep.subr.bf16.mxu1 %v19160_v8  ;;  %v19200_v22 = vld [vmem:[%s25148_s3 + $0xe0] sm:$0xff]  }
 0x629   :  { %v19201_v23 = vld [vmem:[%s25148_s3 + $0x20] sm:$0xff]  }
 0x62a   :  { %v19202_v8 = vld [vmem:[%s25148_s3 + $0xa0] sm:$0xff]  }
 0x62b   :  { %16290 = vmatpush3.bf16.msra.mxu0 %v19161_v5  ;;  %16312 = vmatpush3.bf16.msra.mxu1 %v19162_v13  ;;  %v19203_v5 = vld [vmem:[%s25148_s3 + $0x68] sm:$0xff]  }
 0x62c   :  { %16291 = vmatprep.subr.bf16.mxu0 %v19163_v39  ;;  %16313 = vmatprep.subr.bf16.mxu1 %v19164_v44  ;;  %v19204_v13 = vld [vmem:[%s25148_s3 + $0xe8] sm:$0xff]  }
 0x62d   :  { %v19205_v39 = vld [vmem:[%s25148_s3 + $0x28] sm:$0xff]  }
 0x62e   :  { %v19206_v44 = vld [vmem:[%s25148_s3 + $0xa8] sm:$0xff]  }
 0x62f   :  { %16292 = vmatpush3.bf16.msra.mxu0 %v19165_v18  ;;  %16314 = vmatpush3.bf16.msra.mxu1 %v19166_v17  ;;  %v19207_v18 = vld [vmem:[%s25148_s3 + $0x70] sm:$0xff]  }
 0x630   :  { %16293 = vmatprep.subr.bf16.mxu0 %v19167_v45  ;;  %16315 = vmatprep.subr.bf16.mxu1 %v19168_v46  ;;  %v19208_v17 = vld [vmem:[%s25148_s3 + $0xf0] sm:$0xff]  }
 0x631   :  { %v19209_v45 = vld [vmem:[%s25148_s3 + $0x30] sm:$0xff]  }
 0x632   :  { %v19210_v46 = vld [vmem:[%s25148_s3 + $0xb0] sm:$0xff]  }
 0x633   :  { %16294 = vmatpush3.bf16.msra.mxu0 %v19169_v47  ;;  %16316 = vmatpush3.bf16.msra.mxu1 %v19170_v48  ;;  %v19211_v47 = vld [vmem:[%s25148_s3 + $0x78] sm:$0xff]  }
 0x634   :  { %16295 = vmatprep.subr.bf16.mxu0 %v19171_v50  ;;  %16317 = vmatprep.subr.bf16.mxu1 %v19172_v34  ;;  %v19212_v48 = vld [vmem:[%s25148_s3 + $0xf8] sm:$0xff]  }
 0x635   :  { %v19213_v50 = vld [vmem:[%s25148_s3 + $0x38] sm:$0xff]  }
 0x636   :  { %v19214_v34 = vld [vmem:[%s25148_s3 + $0xb8] sm:$0xff]  }
 0x637   :  { %16296 = vmatpush3.bf16.msra.mxu0 %v19173_v49  ;;  %16318 = vmatpush3.bf16.msra.mxu1 %v19174_v51  ;;  %v19215_v49 = vld [vmem:[%s25148_s3 + $0x140] sm:$0xff]  }
 0x638   :  { %16297 = vmatprep.subr.bf16.mxu0 %v19175_v52  ;;  %16319 = vmatprep.subr.bf16.mxu1 %v19176_v53  ;;  %v19216_v51 = vld [vmem:[%s25148_s3 + $0x1c0] sm:$0xff]  }
 0x639   :  { %v19217_v52 = vld [vmem:[%s25148_s3 + $0x100] sm:$0xff]  }
 0x63a   :  { %v19218_v53 = vld [vmem:[%s25148_s3 + $0x180] sm:$0xff]  }
 0x63b   :  { %16298 = vmatpush3.bf16.msra.mxu0 %v19177_v54  ;;  %16320 = vmatpush3.bf16.msra.mxu1 %v19178_v55  ;;  %v19219_v54 = vld [vmem:[%s25148_s3 + $0x148] sm:$0xff]  }
 0x63c   :  { %16299 = vmatprep.subr.bf16.mxu0 %v19179_v56  ;;  %16321 = vmatprep.subr.bf16.mxu1 %v19180_v57  ;;  %v19220_v55 = vld [vmem:[%s25148_s3 + $0x1c8] sm:$0xff]  }
 0x63d   :  { %v19221_v56 = vld [vmem:[%s25148_s3 + $0x108] sm:$0xff]  }
 0x63e   :  { %v19222_v57 = vld [vmem:[%s25148_s3 + $0x188] sm:$0xff]  }
 0x63f   :  { %16300 = vmatpush3.bf16.msra.mxu0 %v19181_v58  ;;  %16322 = vmatpush3.bf16.msra.mxu1 %v19182_v59  ;;  %v19223_v58 = vld [vmem:[%s25148_s3 + $0x150] sm:$0xff]   ;;  %v19228_v59 = vld [vmem:[%s25148_s3 + $0x1d8] sm:$0xff]  }
 0x640   :  { %16329 = vmatprep.subr.bf16.mxu0 %v19183_v60  ;;  %16351 = vmatprep.subr.bf16.mxu1 %v19184_v61  ;;  %v19229_v60 = vld [vmem:[%s25148_s3 + $0x118] sm:$0xff]  }
 0x641   :  { %v19230_v61 = vld [vmem:[%s25148_s3 + $0x198] sm:$0xff]  }
 0x642   :  { %12115 = vmatmul.mubr.bf16.vlgmr.msra.gmra.mrb[28].mxu0 %v20068_v24  ;;  %12156 = vmatmul.mubr.bf16.vlgmr.msra.gmra.mrb[28].mxu1 %v20276_v33  ;;  %v19191_v24 = vld [vmem:[%s25148_s3 + $0x50] sm:$0xff]  }
 0x643   :  { %16330 = vmatpush3.bf16.msra.mxu0 %v19185_v62  ;;  %13850 = vmatprep.mubr.bf16.mxu0 %v20991_v9  ;;  %v19192_v33 = vld [vmem:[%s25148_s3 + $0xd0] sm:$0xff]   ;;  %v19231_v62 = vld [vmem:[%s25148_s3 + $0x160] sm:$0xff]  }
 0x644   :  { %16352 = vmatpush3.bf16.msra.mxu1 %v19186_v63  ;;  %13891 = vmatprep.mubr.bf16.mxu1 %v20993_v10  ;;  %v19193_v9 = vld [vmem:[%s25148_s3 + $0x10] sm:$0xff]   ;;  %v19195_v10 = vld [vmem:[%s25148_s3 + $0x58] sm:$0xff]   ;;  %v19232_v63 = vld [vmem:[%s25148_s3 + $0x1e0] sm:$0xff]  }
 0x645   :  { %16331 = vmatprep.subr.bf16.mxu0 %v19187_v0  ;;  %16353 = vmatprep.subr.bf16.mxu1 %v19188_v1  ;;  %v19233_v0 = vld [vmem:[%s25148_s3 + $0x120] sm:$0xff]  }
 0x646   :  { %v19234_v1 = vld [vmem:[%s25148_s3 + $0x1a0] sm:$0xff]  }
 0x647   :  { %16332 = vmatpush3.bf16.msra.mxu0 %v19189_v2  ;;  %v19235_v2 = vld [vmem:[%s25148_s3 + $0x168] sm:$0xff]  }
 0x648   :  { %16354 = vmatpush3.bf16.msra.mxu1 %v19190_v6  ;;  %16333 = vmatprep.subr.bf16.mxu0 %v19191_v24  ;;  %v19236_v6 = vld [vmem:[%s25148_s3 + $0x1e8] sm:$0xff]  }
 0x649   :  { %16355 = vmatprep.subr.bf16.mxu1 %v19192_v33  ;;  %v19237_v24 = vld [vmem:[%s25148_s3 + $0x128] sm:$0xff]  }
 0x64a   :  { %v19238_v33 = vld [vmem:[%s25148_s3 + $0x1a8] sm:$0xff]  }
 0x64b   :  { %16334 = vmatpush3.bf16.msra.mxu0 %v19193_v9  ;;  %v19239_v9 = vld [vmem:[%s25148_s3 + $0x170] sm:$0xff]  }
 0x64c   :  { %16356 = vmatpush3.bf16.msra.mxu1 %v19194_v7  ;;  %16335 = vmatprep.subr.bf16.mxu0 %v19195_v10  ;;  %v19240_v7 = vld [vmem:[%s25148_s3 + $0x1f0] sm:$0xff]  }
 0x64d   :  { %16357 = vmatprep.subr.bf16.mxu1 %v19196_v11  ;;  %v19241_v10 = vld [vmem:[%s25148_s3 + $0x130] sm:$0xff]  }
 0x64e   :  { %v19242_v11 = vld [vmem:[%s25148_s3 + $0x1b0] sm:$0xff]  }
 0x64f   :  { %16336 = vmatpush3.bf16.msra.mxu0 %v19197_v19  ;;  %v19243_v19 = vld [vmem:[%s25148_s3 + $0x178] sm:$0xff]  }
 0x650   :  { %16358 = vmatpush3.bf16.msra.mxu1 %v19198_v29  ;;  %16337 = vmatprep.subr.bf16.mxu0 %v19199_v32  ;;  %v19244_v29 = vld [vmem:[%s25148_s3 + $0x1f8] sm:$0xff]  }
 0x651   :  { %16359 = vmatprep.subr.bf16.mxu1 %v19200_v22  ;;  %v19245_v32 = vld [vmem:[%s25148_s3 + $0x138] sm:$0xff]  }
 0x652   :  { %v19246_v22 = vld [vmem:[%s25148_s3 + $0x1b8] sm:$0xff]  }
 0x653   :  { %16338 = vmatpush3.bf16.msra.mxu0 %v19201_v23  ;;  %v19247_v23 = vld [vmem:[%s25148_s3 + $0x240] sm:$0xff]  }
 0x654   :  { %16360 = vmatpush3.bf16.msra.mxu1 %v19202_v8  ;;  %16339 = vmatprep.subr.bf16.mxu0 %v19203_v5  ;;  %v19248_v8 = vld [vmem:[%s25148_s3 + $0x2c0] sm:$0xff]  }
 0x655   :  { %16361 = vmatprep.subr.bf16.mxu1 %v19204_v13  ;;  %v19249_v5 = vld [vmem:[%s25148_s3 + $0x200] sm:$0xff]  }
 0x656   :  { %v19250_v13 = vld [vmem:[%s25148_s3 + $0x280] sm:$0xff]  }
 0x657   :  { %16340 = vmatpush3.bf16.msra.mxu0 %v19205_v39  ;;  %v19251_v39 = vld [vmem:[%s25148_s3 + $0x248] sm:$0xff]  }
 0x658   :  { %16362 = vmatpush3.bf16.msra.mxu1 %v19206_v44  ;;  %16341 = vmatprep.subr.bf16.mxu0 %v19207_v18  ;;  %v19252_v44 = vld [vmem:[%s25148_s3 + $0x2c8] sm:$0xff]  }
 0x659   :  { %16363 = vmatprep.subr.bf16.mxu1 %v19208_v17  ;;  %v19253_v18 = vld [vmem:[%s25148_s3 + $0x208] sm:$0xff]  }
 0x65a   :  { %v19254_v17 = vld [vmem:[%s25148_s3 + $0x288] sm:$0xff]  }
 0x65b   :  { %16342 = vmatpush3.bf16.msra.mxu0 %v19209_v45  ;;  %v19255_v45 = vld [vmem:[%s25148_s3 + $0x250] sm:$0xff]  }
 0x65c   :  { %16364 = vmatpush3.bf16.msra.mxu1 %v19210_v46  ;;  %16343 = vmatprep.subr.bf16.mxu0 %v19211_v47  ;;  %v19260_v46 = vld [vmem:[%s25148_s3 + $0x2d8] sm:$0xff]  }
 0x65d   :  { %16365 = vmatprep.subr.bf16.mxu1 %v19212_v48  ;;  %v19261_v47 = vld [vmem:[%s25148_s3 + $0x218] sm:$0xff]  }
 0x65e   :  { %v19262_v48 = vld [vmem:[%s25148_s3 + $0x298] sm:$0xff]  }
 0x65f   :  { %16344 = vmatpush3.bf16.msra.mxu0 %v19213_v50  ;;  %v19263_v50 = vld [vmem:[%s25148_s3 + $0x260] sm:$0xff]  }
 0x660   :  { %16366 = vmatpush3.bf16.msra.mxu1 %v19214_v34  ;;  %16373 = vmatprep.subr.bf16.mxu0 %v19215_v49  ;;  %v19264_v34 = vld [vmem:[%s25148_s3 + $0x2e0] sm:$0xff]  }
 0x661   :  { %16395 = vmatprep.subr.bf16.mxu1 %v19216_v51  ;;  %v19265_v49 = vld [vmem:[%s25148_s3 + $0x220] sm:$0xff]  }
 0x662   :  { %13851 = vmatmul.mubr.bf16.vlgmr.msra.gmra.mrb[32].mxu0 %v20981_v3  ;;  %v19224_v3 = vld [vmem:[%s25148_s3 + $0x1d0] sm:$0xff]   ;;  %v19266_v51 = vld [vmem:[%s25148_s3 + $0x2a0] sm:$0xff]  }
 0x663   :  { %13892 = vmatmul.mubr.bf16.vlgmr.msra.gmra.mrb[32].mxu1 %v20983_v4  ;;  %16374 = vmatpush3.bf16.msra.mxu0 %v19217_v52  ;;  %v19225_v4 = vld [vmem:[%s25148_s3 + $0x110] sm:$0xff]   ;;  %v19267_v52 = vld [vmem:[%s25148_s3 + $0x268] sm:$0xff]  }
 0x664   :  { %13932 = vmatprep.mubr.bf16.mxu0 %v21802_v35  ;;  %16396 = vmatpush3.bf16.msra.mxu1 %v19218_v53  ;;  %v19226_v35 = vld [vmem:[%s25148_s3 + $0x190] sm:$0xff]   ;;  %v19268_v53 = vld [vmem:[%s25148_s3 + $0x2e8] sm:$0xff]  }
 0x665   :  { %13973 = vmatprep.mubr.bf16.mxu1 %v21804_v36  ;;  %16375 = vmatprep.subr.bf16.mxu0 %v19219_v54  ;;  %v19227_v36 = vld [vmem:[%s25148_s3 + $0x158] sm:$0xff]   ;;  %v19269_v54 = vld [vmem:[%s25148_s3 + $0x228] sm:$0xff]  }
 0x666   :  { %16397 = vmatprep.subr.bf16.mxu1 %v19220_v55  ;;  %v19270_v55 = vld [vmem:[%s25148_s3 + $0x2a8] sm:$0xff]  }
 0x667   :  { %16376 = vmatpush3.bf16.msra.mxu0 %v19221_v56  ;;  %v19271_v56 = vld [vmem:[%s25148_s3 + $0x270] sm:$0xff]  }
 0x668   :  { %16398 = vmatpush3.bf16.msra.mxu1 %v19222_v57  ;;  %16377 = vmatprep.subr.bf16.mxu0 %v19223_v58  ;;  %v19272_v57 = vld [vmem:[%s25148_s3 + $0x2f0] sm:$0xff]  }
 0x669   :  { %16399 = vmatprep.subr.bf16.mxu1 %v19224_v3  ;;  %v19273_v58 = vld [vmem:[%s25148_s3 + $0x230] sm:$0xff]  }
 0x66a   :  { %v19274_v3 = vld [vmem:[%s25148_s3 + $0x2b0] sm:$0xff]  }
 0x66b   :  { %16378 = vmatpush3.bf16.msra.mxu0 %v19225_v4  ;;  %v19275_v4 = vld [vmem:[%s25148_s3 + $0x278] sm:$0xff]  }
 0x66c   :  { %16400 = vmatpush3.bf16.msra.mxu1 %v19226_v35  ;;  %16379 = vmatprep.subr.bf16.mxu0 %v19227_v36  ;;  %v19276_v35 = vld [vmem:[%s25148_s3 + $0x2f8] sm:$0xff]  }
 0x66d   :  { %16401 = vmatprep.subr.bf16.mxu1 %v19228_v59  ;;  %v19277_v36 = vld [vmem:[%s25148_s3 + $0x238] sm:$0xff]  }
 0x66e   :  { %v19278_v59 = vld [vmem:[%s25148_s3 + $0x2b8] sm:$0xff]  }
 0x66f   :  { %16380 = vmatpush3.bf16.msra.mxu0 %v19229_v60  ;;  %v19279_v60 = vld [vmem:[%s25148_s3 + $0x340] sm:$0xff]  }
 0x670   :  { %16402 = vmatpush3.bf16.msra.mxu1 %v19230_v61  ;;  %16381 = vmatprep.subr.bf16.mxu0 %v19231_v62  ;;  %v19280_v61 = vld [vmem:[%s25148_s3 + $0x3c0] sm:$0xff]  }
 0x671   :  { %16403 = vmatprep.subr.bf16.mxu1 %v19232_v63  ;;  %v19281_v62 = vld [vmem:[%s25148_s3 + $0x300] sm:$0xff]  }
 0x672   :  { %v19282_v63 = vld [vmem:[%s25148_s3 + $0x380] sm:$0xff]  }
 0x673   :  { %16382 = vmatpush3.bf16.msra.mxu0 %v19233_v0  ;;  %v19283_v0 = vld [vmem:[%s25148_s3 + $0x348] sm:$0xff]  }
 0x674   :  { %16404 = vmatpush3.bf16.msra.mxu1 %v19234_v1  ;;  %16383 = vmatprep.subr.bf16.mxu0 %v19235_v2  ;;  %v19284_v1 = vld [vmem:[%s25148_s3 + $0x3c8] sm:$0xff]  }
 0x675   :  { %16405 = vmatprep.subr.bf16.mxu1 %v19236_v6  ;;  %v19285_v2 = vld [vmem:[%s25148_s3 + $0x308] sm:$0xff]  }
 0x676   :  { %v19286_v6 = vld [vmem:[%s25148_s3 + $0x388] sm:$0xff]  }
 0x677   :  { %16384 = vmatpush3.bf16.msra.mxu0 %v19237_v24  ;;  %v19290_v24 = vld [vmem:[%s25148_s3 + $0x390] sm:$0xff]  }
 0x678   :  { %16406 = vmatpush3.bf16.msra.mxu1 %v19238_v33  ;;  %16385 = vmatprep.subr.bf16.mxu0 %v19239_v9  ;;  %v19292_v33 = vld [vmem:[%s25148_s3 + $0x3d8] sm:$0xff]  }
 0x679   :  { %16407 = vmatprep.subr.bf16.mxu1 %v19240_v7  ;;  %v19293_v9 = vld [vmem:[%s25148_s3 + $0x318] sm:$0xff]  }
 0x67a   :  { %v19294_v7 = vld [vmem:[%s25148_s3 + $0x398] sm:$0xff]  }
 0x67b   :  { %16386 = vmatpush3.bf16.msra.mxu0 %v19241_v10  ;;  %v19295_v10 = vld [vmem:[%s25148_s3 + $0x360] sm:$0xff]  }
 0x67c   :  { %16408 = vmatpush3.bf16.msra.mxu1 %v19242_v11  ;;  %16387 = vmatprep.subr.bf16.mxu0 %v19243_v19  ;;  %v19296_v11 = vld [vmem:[%s25148_s3 + $0x3e0] sm:$0xff]  }
 0x67d   :  { %16409 = vmatprep.subr.bf16.mxu1 %v19244_v29  ;;  %v19297_v19 = vld [vmem:[%s25148_s3 + $0x320] sm:$0xff]  }
 0x67e   :  { %v19298_v29 = vld [vmem:[%s25148_s3 + $0x3a0] sm:$0xff]  }
 0x67f   :  { %16388 = vmatpush3.bf16.msra.mxu0 %v19245_v32  ;;  %v19299_v32 = vld [vmem:[%s25148_s3 + $0x368] sm:$0xff]  }
 0x680   :  { %16410 = vmatpush3.bf16.msra.mxu1 %v19246_v22  ;;  %16417 = vmatprep.subr.bf16.mxu0 %v19247_v23  ;;  %v19300_v22 = vld [vmem:[%s25148_s3 + $0x3e8] sm:$0xff]  }
 0x681   :  { %16439 = vmatprep.subr.bf16.mxu1 %v19248_v8  ;;  %v19301_v23 = vld [vmem:[%s25148_s3 + $0x328] sm:$0xff]  }
 0x682   :  { %13933 = vmatmul.mubr.bf16.vlgmr.msra.gmra.mrb[36].mxu0 %v21792_v21  ;;  %v19256_v21 = vld [vmem:[%s25148_s3 + $0x2d0] sm:$0xff]   ;;  %v19302_v8 = vld [vmem:[%s25148_s3 + $0x3a8] sm:$0xff]  }
 0x683   :  { %13974 = vmatmul.mubr.bf16.vlgmr.msra.gmra.mrb[36].mxu1 %v21794_v27  ;;  %16418 = vmatpush3.bf16.msra.mxu0 %v19249_v5  ;;  %v19257_v27 = vld [vmem:[%s25148_s3 + $0x210] sm:$0xff]  }
 0x684   :  { %14014 = vmatprep.mubr.bf16.mxu0 %v22601_v41  ;;  %16440 = vmatpush3.bf16.msra.mxu1 %v19250_v13  ;;  %v19258_v41 = vld [vmem:[%s25148_s3 + $0x290] sm:$0xff]  }
 0x685   :  { %14055 = vmatprep.mubr.bf16.mxu1 %v22603_v42  ;;  %16419 = vmatprep.subr.bf16.mxu0 %v19251_v39  ;;  %v19259_v42 = vld [vmem:[%s25148_s3 + $0x258] sm:$0xff]   ;;  %v19303_v5 = vld [vmem:[%s25148_s3 + $0x370] sm:$0xff]  }
 0x686   :  { %16441 = vmatprep.subr.bf16.mxu1 %v19252_v44  ;;  %v19304_v13 = vld [vmem:[%s25148_s3 + $0x3f0] sm:$0xff]  }
 0x687   :  { %16420 = vmatpush3.bf16.msra.mxu0 %v19253_v18  ;;  %v19305_v39 = vld [vmem:[%s25148_s3 + $0x330] sm:$0xff]   ;;  %v19307_v18 = vld [vmem:[%s25148_s3 + $0x378] sm:$0xff]  }
 0x688   :  { %16442 = vmatpush3.bf16.msra.mxu1 %v19254_v17  ;;  %16421 = vmatprep.subr.bf16.mxu0 %v19255_v45  ;;  %v19306_v44 = vld [vmem:[%s25148_s3 + $0x3b0] sm:$0xff]   ;;  %v19308_v17 = vld [vmem:[%s25148_s3 + $0x3f8] sm:$0xff]  }
 0x689   :  { %16443 = vmatprep.subr.bf16.mxu1 %v19256_v21  ;;  %v19309_v45 = vld [vmem:[%s25148_s3 + $0x338] sm:$0xff]  }
 0x68a   :  { %v19310_v21 = vld [vmem:[%s25148_s3 + $0x3b8] sm:$0xff]  }
 0x68b   :  { %16422 = vmatpush3.bf16.msra.mxu0 %v19257_v27  ;;  %v19311_v27 = vld [vmem:[%s25148_s3 + $0x440] sm:$0xff]  }
 0x68c   :  { %16444 = vmatpush3.bf16.msra.mxu1 %v19258_v41  ;;  %16423 = vmatprep.subr.bf16.mxu0 %v19259_v42  ;;  %v19312_v41 = vld [vmem:[%s25148_s3 + $0x4c0] sm:$0xff]  }
 0x68d   :  { %16445 = vmatprep.subr.bf16.mxu1 %v19260_v46  ;;  %v19313_v42 = vld [vmem:[%s25148_s3 + $0x400] sm:$0xff]  }
 0x68e   :  { %v19314_v46 = vld [vmem:[%s25148_s3 + $0x480] sm:$0xff]  }
 0x68f   :  { %16424 = vmatpush3.bf16.msra.mxu0 %v19261_v47  ;;  %v19315_v47 = vld [vmem:[%s25148_s3 + $0x448] sm:$0xff]  }
 0x690   :  { %16446 = vmatpush3.bf16.msra.mxu1 %v19262_v48  ;;  %16425 = vmatprep.subr.bf16.mxu0 %v19263_v50  ;;  %v19316_v48 = vld [vmem:[%s25148_s3 + $0x4c8] sm:$0xff]  }
 0x691   :  { %16447 = vmatprep.subr.bf16.mxu1 %v19264_v34  ;;  %v19317_v50 = vld [vmem:[%s25148_s3 + $0x408] sm:$0xff]  }
 0x692   :  { %v19318_v34 = vld [vmem:[%s25148_s3 + $0x488] sm:$0xff]  }
 0x693   :  { %16426 = vmatpush3.bf16.msra.mxu0 %v19265_v49  ;;  %v19322_v49 = vld [vmem:[%s25148_s3 + $0x490] sm:$0xff]  }
 0x694   :  { %16448 = vmatpush3.bf16.msra.mxu1 %v19266_v51  ;;  %16427 = vmatprep.subr.bf16.mxu0 %v19267_v52  ;;  %v19324_v51 = vld [vmem:[%s25148_s3 + $0x4d8] sm:$0xff]  }
 0x695   :  { %16449 = vmatprep.subr.bf16.mxu1 %v19268_v53  ;;  %v19325_v52 = vld [vmem:[%s25148_s3 + $0x418] sm:$0xff]  }
 0x696   :  { %v19326_v53 = vld [vmem:[%s25148_s3 + $0x498] sm:$0xff]  }
 0x697   :  { %16428 = vmatpush3.bf16.msra.mxu0 %v19269_v54  ;;  %v19327_v54 = vld [vmem:[%s25148_s3 + $0x460] sm:$0xff]  }
 0x698   :  { %16450 = vmatpush3.bf16.msra.mxu1 %v19270_v55  ;;  %16429 = vmatprep.subr.bf16.mxu0 %v19271_v56  ;;  %v19328_v55 = vld [vmem:[%s25148_s3 + $0x4e0] sm:$0xff]  }
 0x699   :  { %16451 = vmatprep.subr.bf16.mxu1 %v19272_v57  ;;  %v19329_v56 = vld [vmem:[%s25148_s3 + $0x420] sm:$0xff]  }
 0x69a   :  { %v19330_v57 = vld [vmem:[%s25148_s3 + $0x4a0] sm:$0xff]  }
 0x69b   :  { %16430 = vmatpush3.bf16.msra.mxu0 %v19273_v58  ;;  %v19331_v58 = vld [vmem:[%s25148_s3 + $0x468] sm:$0xff]  }
 0x69c   :  { %16452 = vmatpush3.bf16.msra.mxu1 %v19274_v3  ;;  %16431 = vmatprep.subr.bf16.mxu0 %v19275_v4  ;;  %v19332_v3 = vld [vmem:[%s25148_s3 + $0x4e8] sm:$0xff]   ;;  %v19383_v4 = vld [vmem:[%s25147_s2 + $0x10] sm:$0xff] }
 0x69d   :  { %16453 = vmatprep.subr.bf16.mxu1 %v19276_v35  ;;  %v1790_v35 = vrot.slane %v19383_v4, %v21735_v16  ;;  %v19335_v16 = vld [vmem:[%s25148_s3 + $0x470] sm:$0xff]  }
 0x69f   :  { %16432 = vmatpush3.bf16.msra.mxu0 %v19277_v36  ;;  %v1798_v36 = vrot.slane %v19383_v4, %v21738_v28 }
 0x6a0   :  { %16454 = vmatpush3.bf16.msra.mxu1 %v19278_v59  ;;  %16461 = vmatprep.subr.bf16.mxu0 %v19279_v60  ;;  %v1794_v59 = vrot.slane %v19383_v4, %v21744_v30  ;;  %v1802_v60 = vrot.slane %v19383_v4, %v21747_v31  ;;  %v19336_v30 = vld [vmem:[%s25148_s3 + $0x4f0] sm:$0xff]   ;;  %v19364_v4 = vld [vmem:[%s25148_s3 + $0x5e8] sm:$0xff]  }
 0x6a1   :  { %16483 = vmatprep.subr.bf16.mxu1 %v19280_v61  ;;  %v19333_v61 = vld [vmem:[%s25148_s3 + $0x428] sm:$0xff]  }
 0x6a2   :  { %14015 = vmatmul.mubr.bf16.vlgmr.msra.gmra.mrb[40].mxu0 %v22591_v26  ;;  %v19287_v26 = vld [vmem:[%s25148_s3 + $0x350] sm:$0xff]  }
 0x6a3   :  { %14056 = vmatmul.mubr.bf16.vlgmr.msra.gmra.mrb[40].mxu1 %v22593_v38  ;;  %16462 = vmatpush3.bf16.msra.mxu0 %v19281_v62  ;;  %v19288_v38 = vld [vmem:[%s25148_s3 + $0x3d0] sm:$0xff]   ;;  %v19334_v62 = vld [vmem:[%s25148_s3 + $0x4a8] sm:$0xff]  }
 0x6a4   :  { %14096 = vmatprep.mubr.bf16.mxu0 %v23400_v40  ;;  %16484 = vmatpush3.bf16.msra.mxu1 %v19282_v63  ;;  %v19289_v40 = vld [vmem:[%s25148_s3 + $0x310] sm:$0xff]  }
 0x6a5   :  { %14137 = vmatprep.mubr.bf16.mxu1 %v23402_v43  ;;  %16463 = vmatprep.subr.bf16.mxu0 %v19283_v0  ;;  %v19291_v43 = vld [vmem:[%s25148_s3 + $0x358] sm:$0xff]  }
 0x6a6   :  { %16485 = vmatprep.subr.bf16.mxu1 %v19284_v1 }
 0x6a7   :  { %16464 = vmatpush3.bf16.msra.mxu0 %v19285_v2 }
 0x6a8   :  { %16486 = vmatpush3.bf16.msra.mxu1 %v19286_v6  ;;  %16465 = vmatprep.subr.bf16.mxu0 %v19287_v26 }
 0x6a9   :  { %16487 = vmatprep.subr.bf16.mxu1 %v19288_v38 }
 0x6ab   :  { %16466 = vmatpush3.bf16.msra.mxu0 %v19289_v40 }
 0x6ac   :  { %16488 = vmatpush3.bf16.msra.mxu1 %v19290_v24  ;;  %16467 = vmatprep.subr.bf16.mxu0 %v19291_v43  ;;  %v19337_v24 = vld [vmem:[%s25148_s3 + $0x430] sm:$0xff]  }
 0x6ad   :  { %16489 = vmatprep.subr.bf16.mxu1 %v19292_v33 }
 0x6af   :  { %16468 = vmatpush3.bf16.msra.mxu0 %v19293_v9 }
 0x6b0   :  { %16490 = vmatpush3.bf16.msra.mxu1 %v19294_v7  ;;  %16469 = vmatprep.subr.bf16.mxu0 %v19295_v10  ;;  %v19338_v10 = vld [vmem:[%s25148_s3 + $0x4b0] sm:$0xff]  }
 0x6b1   :  { %16491 = vmatprep.subr.bf16.mxu1 %v19296_v11  ;;  %v19339_v11 = vld [vmem:[%s25148_s3 + $0x478] sm:$0xff]  }
 0x6b3   :  { %16470 = vmatpush3.bf16.msra.mxu0 %v19297_v19 }
 0x6b4   :  { %16492 = vmatpush3.bf16.msra.mxu1 %v19298_v29  ;;  %16471 = vmatprep.subr.bf16.mxu0 %v19299_v32  ;;  %v19340_v32 = vld [vmem:[%s25148_s3 + $0x4f8] sm:$0xff]  }
 0x6b5   :  { %16493 = vmatprep.subr.bf16.mxu1 %v19300_v22 }
 0x6b7   :  { %16472 = vmatpush3.bf16.msra.mxu0 %v19301_v23 }
 0x6b8   :  { %16494 = vmatpush3.bf16.msra.mxu1 %v19302_v8  ;;  %16473 = vmatprep.subr.bf16.mxu0 %v19303_v5 }
 0x6b9   :  { %16495 = vmatprep.subr.bf16.mxu1 %v19304_v13 }
 0x6bb   :  { %16474 = vmatpush3.bf16.msra.mxu0 %v19305_v39 }
 0x6bc   :  { %16496 = vmatpush3.bf16.msra.mxu1 %v19306_v44  ;;  %16475 = vmatprep.subr.bf16.mxu0 %v19307_v18 }
 0x6bd   :  { %16497 = vmatprep.subr.bf16.mxu1 %v19308_v17  ;;  %v19341_v17 = vld [vmem:[%s25148_s3 + $0x438] sm:$0xff]  }
 0x6bf   :  { %16476 = vmatpush3.bf16.msra.mxu0 %v19309_v45 }
 0x6c0   :  { %16498 = vmatpush3.bf16.msra.mxu1 %v19310_v21  ;;  %16505 = vmatprep.subr.bf16.mxu0 %v19311_v27  ;;  %v19342_v27 = vld [vmem:[%s25148_s3 + $0x4b8] sm:$0xff]  }
 0x6c1   :  { %16527 = vmatprep.subr.bf16.mxu1 %v19312_v41  ;;  %v19343_v41 = vld [vmem:[%s25148_s3 + $0x540] sm:$0xff]  }
 0x6c2   :  { %14097 = vmatmul.mubr.bf16.vlgmr.msra.gmra.mrb[44].mxu0 %v23390_v37  ;;  %v19319_v37 = vld [vmem:[%s25148_s3 + $0x450] sm:$0xff]  }
 0x6c3   :  { %14138 = vmatmul.mubr.bf16.vlgmr.msra.gmra.mrb[44].mxu1 %v23392_v25  ;;  %16506 = vmatpush3.bf16.msra.mxu0 %v19313_v42  ;;  %v19320_v25 = vld [vmem:[%s25148_s3 + $0x4d0] sm:$0xff]  }
 0x6c4   :  { %14178 = vmatprep.mubr.bf16.mxu0 %v24199_v20  ;;  %16528 = vmatpush3.bf16.msra.mxu1 %v19314_v46  ;;  %v19321_v20 = vld [vmem:[%s25148_s3 + $0x410] sm:$0xff]  }
 0x6c5   :  { %14219 = vmatprep.mubr.bf16.mxu1 %v24201_v15  ;;  %16507 = vmatprep.subr.bf16.mxu0 %v19315_v47  ;;  %v19323_v15 = vld [vmem:[%s25148_s3 + $0x458] sm:$0xff]   ;;  %v19344_v47 = vld [vmem:[%s25148_s3 + $0x5c0] sm:$0xff]  }
 0x6c6   :  { %16529 = vmatprep.subr.bf16.mxu1 %v19316_v48  ;;  %v19345_v48 = vld [vmem:[%s25148_s3 + $0x500] sm:$0xff]  }
 0x6c7   :  { %16508 = vmatpush3.bf16.msra.mxu0 %v19317_v50  ;;  %v19346_v50 = vld [vmem:[%s25148_s3 + $0x580] sm:$0xff]  }
 0x6c8   :  { %16530 = vmatpush3.bf16.msra.mxu1 %v19318_v34  ;;  %16509 = vmatprep.subr.bf16.mxu0 %v19319_v37  ;;  %v19347_v34 = vld [vmem:[%s25148_s3 + $0x548] sm:$0xff]  }
 0x6c9   :  { %16531 = vmatprep.subr.bf16.mxu1 %v19320_v25  ;;  %v19348_v37 = vld [vmem:[%s25148_s3 + $0x5c8] sm:$0xff]  }
 0x6ca   :  { %v19349_v25 = vld [vmem:[%s25148_s3 + $0x508] sm:$0xff]  }
 0x6cb   :  { %16510 = vmatpush3.bf16.msra.mxu0 %v19321_v20  ;;  %v19350_v20 = vld [vmem:[%s25148_s3 + $0x588] sm:$0xff]  }
 0x6cc   :  { %16532 = vmatpush3.bf16.msra.mxu1 %v19322_v49  ;;  %16511 = vmatprep.subr.bf16.mxu0 %v19323_v15  ;;  %v19353_v49 = vld [vmem:[%s25148_s3 + $0x510] sm:$0xff]  }
 0x6cd   :  { %16533 = vmatprep.subr.bf16.mxu1 %v19324_v51  ;;  %v19354_v15 = vld [vmem:[%s25148_s3 + $0x590] sm:$0xff]   ;;  %v19355_v51 = vld [vmem:[%s25148_s3 + $0x558] sm:$0xff]  }
 0x6cf   :  { %16512 = vmatpush3.bf16.msra.mxu0 %v19325_v52  ;;  %v19356_v52 = vld [vmem:[%s25148_s3 + $0x5d8] sm:$0xff]  }
 0x6d0   :  { %16534 = vmatpush3.bf16.msra.mxu1 %v19326_v53  ;;  %16513 = vmatprep.subr.bf16.mxu0 %v19327_v54  ;;  %v19357_v53 = vld [vmem:[%s25148_s3 + $0x518] sm:$0xff]  }
 0x6d1   :  { %16535 = vmatprep.subr.bf16.mxu1 %v19328_v55  ;;  %v19358_v54 = vld [vmem:[%s25148_s3 + $0x598] sm:$0xff]   ;;  %v19359_v55 = vld [vmem:[%s25148_s3 + $0x560] sm:$0xff]  }
 0x6d3   :  { %16514 = vmatpush3.bf16.msra.mxu0 %v19329_v56  ;;  %v19360_v56 = vld [vmem:[%s25148_s3 + $0x5e0] sm:$0xff]  }
 0x6d4   :  { %16536 = vmatpush3.bf16.msra.mxu1 %v19330_v57  ;;  %16515 = vmatprep.subr.bf16.mxu0 %v19331_v58  ;;  %v19361_v57 = vld [vmem:[%s25148_s3 + $0x520] sm:$0xff]  }
 0x6d5   :  { %v11819_v28 = vpop.f32.mrb[20].mxu0  ;;  %v11991_v63 = vpop.f32.mrb[20].mxu1  ;;  %16537 = vmatprep.subr.bf16.mxu1 %v19332_v3  ;;  %v19362_v58 = vld [vmem:[%s25148_s3 + $0x5a0] sm:$0xff]   ;;  %v19363_v3 = vld [vmem:[%s25148_s3 + $0x568] sm:$0xff]  }
 0x6d6   :  { %v16661_v31 = vadd.f32 %v11819_v28, %v1790_v35  ;;  %v16665_v0 = vadd.f32 %v11991_v63, %v1798_v36  ;;  %v11821_v1 = vpop.f32.mrb[21].mxu0  ;;  %v11993_v2 = vpop.f32.mrb[21].mxu1 }
 0x6d7   :  { %v16662_v6 = vadd.f32 %v11821_v1, %v1794_v59  ;;  %v16666_v26 = vadd.f32 %v11993_v2, %v1802_v60  ;;  %v11823_v38 = vpop.f32.mrb[22].mxu0  ;;  %v11995_v40 = vpop.f32.mrb[22].mxu1  ;;  %16516 = vmatpush3.bf16.msra.mxu0 %v19333_v61  ;;  %v19369_v2 = vld [vmem:[%s25148_s3 + $0x530] sm:$0xff]  }
 0x6d8   :  { %v16663_v43 = vadd.f32 %v11823_v38, %v1790_v35  ;;  %v16667_v33 = vadd.f32 %v11995_v40, %v1798_v36  ;;  %16538 = vmatpush3.bf16.msra.mxu1 %v19334_v62  ;;  %v11825_v9 = vpop.f32.mrb[23].mxu0  ;;  %v11997_v7 = vpop.f32.mrb[23].mxu1  ;;  %16517 = vmatprep.subr.bf16.mxu0 %v19335_v16  ;;  %v12184_v22 = vmax.f32 %v16661_v31, 0.0  ;;  %v12186_v23 = vmax.f32 %v16665_v0, 0.0  ;;  %v19365_v35 = vld [vmem:[%s25148_s3 + $0x528] sm:$0xff]   ;;  %v19368_v62 = vld [vmem:[%s25148_s3 + $0x5f0] sm:$0xff]  }
 0x6d9   :  { %v16664_v19 = vadd.f32 %v11825_v9, %v1794_v59  ;;  %v16668_v29 = vadd.f32 %v11997_v7, %v1802_v60  ;;  %16539 = vmatprep.subr.bf16.mxu1 %v19336_v30  ;;  %v12185_v13 = vmax.f32 %v16662_v6, 0.0  ;;  %v12187_v39 = vmax.f32 %v16666_v26, 0.0  ;;  %v19366_v36 = vld [vmem:[%s25148_s3 + $0x5a8] sm:$0xff]   ;;  %v19367_v59 = vld [vmem:[%s25148_s3 + $0x570] sm:$0xff]   ;;  %v14430_v16 = vld [vmem:[%s25147_s2 + $0x18] ss:$0 sm:$0xff] }
 0x6da   :  { %v12209_v8 = vmax.f32 %v16663_v43, 0.0  ;;  %v12211_v5 = vmax.f32 %v16667_v33, 0.0  ;;  %v19370_v38 = vld [vmem:[%s25148_s3 + $0x5b0] sm:$0xff]   ;;  %v19371_v40 = vld [vmem:[%s25148_s3 + $0x578] sm:$0xff]  }
 0x6db   :  { %v12210_v44 = vmax.f32 %v16664_v19, 0.0  ;;  %v12212_v18 = vmax.f32 %v16668_v29, 0.0  ;;  %16518 = vmatpush3.bf16.msra.mxu0 %v19337_v24  ;;  %v19372_v9 = vld [vmem:[%s25148_s3 + $0x5f8] sm:$0xff]  }
 0x6dc   :  { %v24997_v45 = vpack.c.bf16 %v12209_v8, %v12184_v22  ;;  %v24999_v21 = vpack.c.bf16 %v12211_v5, %v12186_v23  ;;  %16540 = vmatpush3.bf16.msra.mxu1 %v19338_v10  ;;  %16519 = vmatprep.subr.bf16.mxu0 %v19339_v11  ;;  %v19373_v11 = vld [vmem:[%s25148_s3 + $0x538] sm:$0xff]   ;;  %v19384_v22 = vmov 0.0   ;;  %v19376_v23 = vld [vmem:[%s25148_s3 + $0x608] sm:$0xff]   ;;  %v19377_v8 = vld [vmem:[%s25148_s3 + $0x610] sm:$0xff]  }
 0x6dd   :  { %v12235_v42 = vpack.c.bf16 %v12210_v44, %v12185_v13  ;;  %v12237_v46 = vpack.c.bf16 %v12212_v18, %v12187_v39  ;;  %16541 = vmatprep.subr.bf16.mxu1 %v19340_v32  ;;  %v19374_v19 = vld [vmem:[%s25148_s3 + $0x5b8] sm:$0xff]   ;;  %v19375_v32 = vld [vmem:[%s25148_s3 + $0x600] sm:$0xff]  }
 0x6de   :  { %v19378_v5 = vld [vmem:[%s25148_s3 + $0x618] sm:$0xff]  }
 0x6df   :  { %16520 = vmatpush3.bf16.msra.mxu0 %v19341_v17 }
 0x6e0   :  { %16542 = vmatpush3.bf16.msra.mxu1 %v19342_v27  ;;  %16549 = vmatprep.subr.bf16.mxu0 %v19343_v41 }
 0x6e1   :  { %16571 = vmatprep.subr.bf16.mxu1 %v19344_v47 }
 0x6e2   :  { %14179 = vmatmul.mubr.bf16.vlgmr.msra.gmra.mrb[48].mxu0 %v24195_v12  ;;  %v19351_v12 = vld [vmem:[%s25148_s3 + $0x550] sm:$0xff]  }
 0x6e3   :  { %14220 = vmatmul.mubr.bf16.vlgmr.msra.gmra.mrb[48].mxu1 %v24197_v14  ;;  %16550 = vmatpush3.bf16.msra.mxu0 %v19345_v48  ;;  %v19352_v14 = vld [vmem:[%s25148_s3 + $0x5d0] sm:$0xff]  }
 0x6e4   :  { %14260 = vmatprep.mubr.bf16.mxu0 %v12235_v42  ;;  %16572 = vmatpush3.bf16.msra.mxu1 %v19346_v50 }
 0x6e5   :  { %14301 = vmatprep.mubr.bf16.mxu1 %v12237_v46  ;;  %16551 = vmatprep.subr.bf16.mxu0 %v19347_v34 }
 0x6e6   :  { %16573 = vmatprep.subr.bf16.mxu1 %v19348_v37 }
 0x6e7   :  { %16552 = vmatpush3.bf16.msra.mxu0 %v19349_v25 }
 0x6e8   :  { %16574 = vmatpush3.bf16.msra.mxu1 %v19350_v20  ;;  %16553 = vmatprep.subr.bf16.mxu0 %v19351_v12 }
 0x6e9   :  { %16575 = vmatprep.subr.bf16.mxu1 %v19352_v14 }
 0x6eb   :  { %16554 = vmatpush3.bf16.msra.mxu0 %v19353_v49 }
 0x6ec   :  { %16576 = vmatpush3.bf16.msra.mxu1 %v19354_v15  ;;  %16555 = vmatprep.subr.bf16.mxu0 %v19355_v51  ;;  %v16039_v15 = vld [vmem:[%s25149_s4] ss:$0 sm:$0xff] }
 0x6ed   :  { %16577 = vmatprep.subr.bf16.mxu1 %v19356_v52 }
 0x6ef   :  { %16556 = vmatpush3.bf16.msra.mxu0 %v19357_v53 }
 0x6f0   :  { %16578 = vmatpush3.bf16.msra.mxu1 %v19358_v54  ;;  %16557 = vmatprep.subr.bf16.mxu0 %v19359_v55 }
 0x6f1   :  { %16579 = vmatprep.subr.bf16.mxu1 %v19360_v56 }
 0x6f3   :  { %16558 = vmatpush3.bf16.msra.mxu0 %v19361_v57 }
 0x6f4   :  { %16580 = vmatpush3.bf16.msra.mxu1 %v19362_v58  ;;  %16559 = vmatprep.subr.bf16.mxu0 %v19363_v3 }
 0x6f5   :  { %v16257_v60 = vpop.f32.mrb[24].mxu0  ;;  %v16279_v61 = vpop.f32.mrb[24].mxu1  ;;  %16581 = vmatprep.subr.bf16.mxu1 %v19364_v4 }
 0x6f6   :  { %v16258_v28 = vpop.f32.mrb[25].mxu0  ;;  %v16280_v63 = vpop.f32.mrb[25].mxu1 }
 0x6f7   :  { %v16259_v30 = vadd.f32 %v16258_v28, %v16257_v60  ;;  %v16281_v31 = vadd.f32 %v16280_v63, %v16279_v61  ;;  %v16260_v0 = vpop.f32.mrb[26].mxu0  ;;  %v16282_v1 = vpop.f32.mrb[26].mxu1  ;;  %16560 = vmatpush3.bf16.msra.mxu0 %v19365_v35 }
 0x6f8   :  { %16582 = vmatpush3.bf16.msra.mxu1 %v19366_v36  ;;  %v16261_v6 = vpop.f32.mrb[27].mxu0  ;;  %v16283_v26 = vpop.f32.mrb[27].mxu1  ;;  %16561 = vmatprep.subr.bf16.mxu0 %v19367_v59 }
 0x6f9   :  { %v12035_v24 = vadd.f32 %v16259_v30, %v14430_v16  ;;  %v16262_v43 = vadd.f32 %v16261_v6, %v16260_v0  ;;  %v16284_v33 = vadd.f32 %v16283_v26, %v16282_v1  ;;  %16583 = vmatprep.subr.bf16.mxu1 %v19368_v62 }
 0x6fb   :  { %v12076_v7 = vadd.f32 %v16281_v31, %v12035_v24  ;;  %v12038_v10 = vadd.f32 %v16262_v43, %v14430_v16  ;;  %16562 = vmatpush3.bf16.msra.mxu0 %v19369_v2 }
 0x6fc   :  { %16584 = vmatpush3.bf16.msra.mxu1 %v19370_v38  ;;  %16563 = vmatprep.subr.bf16.mxu0 %v19371_v40 }
 0x6fd   :  { %v12079_v29 = vadd.f32 %v16284_v33, %v12038_v10  ;;  %16585 = vmatprep.subr.bf16.mxu1 %v19372_v9 }
 0x6ff   :  { %16564 = vmatpush3.bf16.msra.mxu0 %v19373_v11 }
 0x700   :  { %16586 = vmatpush3.bf16.msra.mxu1 %v19374_v19  ;;  %16601 = vmatprep.subr.bf16.mxu0 %v19384_v22 }
 0x701   :  { %16613 = vmatprep.subr.bf16.mxu1 %v19384_v22 }
 0x702   :  { %14261 = vmatmul.mubr.bf16.vlgmr.msra.gmra.mrb[52].mxu0 %v24997_v45 }
 0x703   :  { %14302 = vmatmul.mubr.bf16.vlgmr.msra.gmra.mrb[52].mxu1 %v24999_v21  ;;  %16602 = vmatpush3.bf16.msra.mxu0 %v19375_v32 }
 0x704   :  { %16603 = vmatprep.subr.bf16.mxu0 %v19384_v22  ;;  %16609 = vmatprep.mubr.msk.bf16.mxu0 %vm19385_vm0, %v19384_v22 }
 0x705   :  { %16617 = vmatprep.mubr.msk.bf16.mxu1 %vm19385_vm0, %v19384_v22 }
 0x707   :  { %16604 = vmatpush3.bf16.msra.mxu0 %v19376_v23 }
 0x708   :  { %16605 = vmatprep.subr.bf16.mxu0 %v19384_v22 }
 0x70b   :  { %16606 = vmatpush3.bf16.msra.mxu0 %v19377_v8 }
 0x70c   :  { %16607 = vmatprep.subr.bf16.mxu0 %v19384_v22 }
 0x70f   :  { %16608 = vmatpush3.bf16.msra.mxu0 %v19378_v5 }
 0x715   :  { %v16301_v13 = vpop.f32.mrb[28].mxu0  ;;  %v16323_v39 = vpop.f32.mrb[28].mxu1 }
 0x716   :  { %v16302_v44 = vpop.f32.mrb[29].mxu0  ;;  %v16324_v18 = vpop.f32.mrb[29].mxu1 }
 0x717   :  { %v16303_v17 = vadd.f32 %v16302_v44, %v16301_v13  ;;  %v16325_v45 = vadd.f32 %v16324_v18, %v16323_v39  ;;  %v16304_v21 = vpop.f32.mrb[30].mxu0  ;;  %v16326_v27 = vpop.f32.mrb[30].mxu1  ;;  %v19379_v39 = vld [vmem:[%s25150_s5] sm:$0xff]  }
 0x718   :  { %v16305_v41 = vpop.f32.mrb[31].mxu0  ;;  %v16327_v42 = vpop.f32.mrb[31].mxu1  ;;  %16614 = vmatpush3.bf16.msra.mxu1 %v19379_v39 }
 0x719   :  { %v12117_v46 = vadd.f32 %v16303_v17, %v12076_v7  ;;  %v16306_v47 = vadd.f32 %v16305_v41, %v16304_v21  ;;  %v16328_v48 = vadd.f32 %v16327_v42, %v16326_v27  ;;  %16615 = vmatprep.subr.bf16.mxu1 %v19384_v22 }
 0x71b   :  { %v12158_v50 = vadd.f32 %v16325_v45, %v12117_v46  ;;  %v12120_v34 = vadd.f32 %v16306_v47, %v12079_v29  ;;  %v19380_v45 = vld [vmem:[%s25150_s5 + $0x8] sm:$0xff]  }
 0x71c   :  { %16616 = vmatpush3.bf16.msra.mxu1 %v19380_v45 }
 0x71d   :  { %v12161_v37 = vadd.f32 %v16328_v48, %v12120_v34  ;;  %v12188_v25 = vmax.f32 %v12158_v50, 0.0 }
 0x71f   :  { %v12213_v20 = vmax.f32 %v12161_v37, 0.0 }
 0x721   :  { %v12238_v12 = vpack.c.bf16 %v12213_v20, %v12188_v25 }
 0x723   :  { %16610 = vmatmul.mubr.msk.bf16.vlgmr.msra.gmra.mrb[56].mxu0 %vm13814_vm1, %v12238_v12 }
 0x735   :  { %v16345_v14 = vpop.f32.mrb[32].mxu0 }
 0x736   :  { %v16367_v49 = vpop.f32.mrb[32].mxu1  ;;  %v16346_v51 = vpop.f32.mrb[33].mxu0 }
 0x737   :  { %v16347_v52 = vadd.f32 %v16346_v51, %v16345_v14  ;;  %v16368_v53 = vpop.f32.mrb[33].mxu1  ;;  %v16348_v54 = vpop.f32.mrb[34].mxu0 }
 0x738   :  { %v16369_v55 = vadd.f32 %v16368_v53, %v16367_v49  ;;  %v16370_v56 = vpop.f32.mrb[34].mxu1  ;;  %v16349_v57 = vpop.f32.mrb[35].mxu0 }
 0x739   :  { %v13853_v58 = vadd.f32 %v16347_v52, %v16039_v15  ;;  %v16350_v3 = vadd.f32 %v16349_v57, %v16348_v54  ;;  %v16371_v4 = vpop.f32.mrb[35].mxu1 }
 0x73a   :  { %v16372_v35 = vadd.f32 %v16371_v4, %v16370_v56 }
 0x73b   :  { %v13894_v36 = vadd.f32 %v16369_v55, %v13853_v58  ;;  %v13856_v59 = vadd.f32 %v16350_v3, %v16039_v15 }
 0x73d   :  { %v13897_v60 = vadd.f32 %v16372_v35, %v13856_v59 }
 0x755   :  { %v16389_v61 = vpop.f32.mrb[36].mxu0 }
 0x756   :  { %v16411_v62 = vpop.f32.mrb[36].mxu1  ;;  %v16390_v16 = vpop.f32.mrb[37].mxu0 }
 0x757   :  { %v16391_v28 = vadd.f32 %v16390_v16, %v16389_v61  ;;  %v16412_v63 = vpop.f32.mrb[37].mxu1  ;;  %v16392_v30 = vpop.f32.mrb[38].mxu0 }
 0x758   :  { %v16413_v31 = vadd.f32 %v16412_v63, %v16411_v62  ;;  %v16414_v0 = vpop.f32.mrb[38].mxu1  ;;  %v16393_v1 = vpop.f32.mrb[39].mxu0 }
 0x759   :  { %v13935_v2 = vadd.f32 %v16391_v28, %v13894_v36  ;;  %v16394_v6 = vadd.f32 %v16393_v1, %v16392_v30  ;;  %v16415_v26 = vpop.f32.mrb[39].mxu1 }
 0x75a   :  { %v16416_v38 = vadd.f32 %v16415_v26, %v16414_v0 }
 0x75b   :  { %v13976_v40 = vadd.f32 %v16413_v31, %v13935_v2  ;;  %v13938_v24 = vadd.f32 %v16394_v6, %v13897_v60 }
 0x75d   :  { %v13979_v43 = vadd.f32 %v16416_v38, %v13938_v24 }
 0x775   :  { %v16433_v33 = vpop.f32.mrb[40].mxu0 }
 0x776   :  { %v16455_v9 = vpop.f32.mrb[40].mxu1  ;;  %v16434_v7 = vpop.f32.mrb[41].mxu0 }
 0x777   :  { %v16435_v10 = vadd.f32 %v16434_v7, %v16433_v33  ;;  %v16456_v11 = vpop.f32.mrb[41].mxu1  ;;  %v16436_v19 = vpop.f32.mrb[42].mxu0 }
 0x778   :  { %v16457_v29 = vadd.f32 %v16456_v11, %v16455_v9  ;;  %v16458_v32 = vpop.f32.mrb[42].mxu1  ;;  %v16437_v23 = vpop.f32.mrb[43].mxu0 }
 0x779   :  { %v14017_v8 = vadd.f32 %v16435_v10, %v13976_v40  ;;  %v16438_v5 = vadd.f32 %v16437_v23, %v16436_v19  ;;  %v16459_v13 = vpop.f32.mrb[43].mxu1 }
 0x77a   :  { %v16460_v44 = vadd.f32 %v16459_v13, %v16458_v32  ;;  %v16237_v13 = vld [vmem:[%s25151_s6] ss:$0 sm:$0xff] }
 0x77b   :  { %v14058_v18 = vadd.f32 %v16457_v29, %v14017_v8  ;;  %v14020_v17 = vadd.f32 %v16438_v5, %v13979_v43 }
 0x77d   :  { %v14061_v21 = vadd.f32 %v16460_v44, %v14020_v17 }
 0x795   :  { %v16477_v27 = vpop.f32.mrb[44].mxu0 }
 0x796   :  { %v16499_v41 = vpop.f32.mrb[44].mxu1  ;;  %v16478_v42 = vpop.f32.mrb[45].mxu0 }
 0x797   :  { %v16479_v46 = vadd.f32 %v16478_v42, %v16477_v27  ;;  %v16500_v47 = vpop.f32.mrb[45].mxu1  ;;  %v16480_v48 = vpop.f32.mrb[46].mxu0 }
 0x798   :  { %v16501_v50 = vadd.f32 %v16500_v47, %v16499_v41  ;;  %v16502_v34 = vpop.f32.mrb[46].mxu1  ;;  %v16481_v37 = vpop.f32.mrb[47].mxu0 }
 0x799   :  { %v14099_v25 = vadd.f32 %v16479_v46, %v14058_v18  ;;  %v16482_v20 = vadd.f32 %v16481_v37, %v16480_v48  ;;  %v16503_v12 = vpop.f32.mrb[47].mxu1 }
 0x79a   :  { %v16504_v14 = vadd.f32 %v16503_v12, %v16502_v34 }
 0x79b   :  { %v14140_v22 = vadd.f32 %v16501_v50, %v14099_v25  ;;  %v14102_v49 = vadd.f32 %v16482_v20, %v14061_v21 }
 0x79d   :  { %v14143_v15 = vadd.f32 %v16504_v14, %v14102_v49 }
 0x7b5   :  { %v16521_v51 = vpop.f32.mrb[48].mxu0 }
 0x7b6   :  { %v16543_v52 = vpop.f32.mrb[48].mxu1  ;;  %v16522_v53 = vpop.f32.mrb[49].mxu0 }
 0x7b7   :  { %v16523_v54 = vadd.f32 %v16522_v53, %v16521_v51  ;;  %v16544_v55 = vpop.f32.mrb[49].mxu1  ;;  %v16524_v56 = vpop.f32.mrb[50].mxu0 }
 0x7b8   :  { %v16545_v57 = vadd.f32 %v16544_v55, %v16543_v52  ;;  %v16546_v58 = vpop.f32.mrb[50].mxu1  ;;  %v16525_v3 = vpop.f32.mrb[51].mxu0 }
 0x7b9   :  { %v14181_v4 = vadd.f32 %v16523_v54, %v14140_v22  ;;  %v16526_v35 = vadd.f32 %v16525_v3, %v16524_v56  ;;  %v16547_v36 = vpop.f32.mrb[51].mxu1 }
 0x7ba   :  { %v16548_v59 = vadd.f32 %v16547_v36, %v16546_v58 }
 0x7bb   :  { %v14222_v60 = vadd.f32 %v16545_v57, %v14181_v4  ;;  %v14184_v61 = vadd.f32 %v16526_v35, %v14143_v15 }
 0x7bd   :  { %v14225_v62 = vadd.f32 %v16548_v59, %v14184_v61 }
 0x7d5   :  { %v16565_v16 = vpop.f32.mrb[52].mxu0 }
 0x7d6   :  { %v16587_v28 = vpop.f32.mrb[52].mxu1  ;;  %v16566_v63 = vpop.f32.mrb[53].mxu0 }
 0x7d7   :  { %v16567_v30 = vadd.f32 %v16566_v63, %v16565_v16  ;;  %v16588_v31 = vpop.f32.mrb[53].mxu1  ;;  %v16568_v0 = vpop.f32.mrb[54].mxu0 }
 0x7d8   :  { %v16589_v1 = vadd.f32 %v16588_v31, %v16587_v28  ;;  %v16590_v2 = vpop.f32.mrb[54].mxu1  ;;  %v16569_v6 = vpop.f32.mrb[55].mxu0 }
 0x7d9   :  { %v14263_v26 = vadd.f32 %v16567_v30, %v14222_v60  ;;  %v16570_v38 = vadd.f32 %v16569_v6, %v16568_v0  ;;  %v16591_v40 = vpop.f32.mrb[55].mxu1 }
 0x7da   :  { %v16592_v24 = vadd.f32 %v16591_v40, %v16590_v2 }
 0x7db   :  { %v14266_v43 = vadd.f32 %v16570_v38, %v14225_v62  ;;  %v14304_v33 = vadd.f32 %v16589_v1, %v14263_v26 }
 0x7dd   :  { %v14307_v9 = vadd.f32 %v16592_v24, %v14266_v43 }
 0x7f6   :  { %v14344_v7 = vpop.f32.mrb[56].mxu0 }
 0x7f7   :  { %v14345_v10 = vadd.f32 %v14344_v7, %v14304_v33  ;;  %v16611_v11 = vpop.f32.mrb[57].mxu0 }
 0x7f8   :  { %v14347_v19 = vpop.f32.mrb[58].mxu0 }
 0x7f9   :  { %v14348_v29 = vadd.f32 %v14347_v19, %v14307_v9  ;;  %v16612_v32 = vpop.f32.mrb[59].mxu0  ;;  %v14351_v23 = vmax.f32 %v14345_v10, 0.0 }
 0x7fb   :  { %v14352_v8 = vmax.f32 %v14348_v29, 0.0 }
 0x7fd   :  { %v14353_v5 = vpack.c.bf16 %v14352_v8, %v14351_v23 }
 0x7ff   :  { %16618 = vmatmul.mubr.msk.bf16.vlgmr.msra.gmra.mrb[56].mxu1 %vm14377_vm2, %v14353_v5 }
 0x8d2   :  { %v14415_v39 = vpop.f32.mrb[56].mxu1 }
 0x8d3   :  { %v14416_v44 = vadd.f32 %v16237_v13, %v14415_v39  ;;  %v16619_v18 = vpop.f32.mrb[57].mxu1 }
 0x8d4   :  { %v14418_v17 = vpop.f32.mrb[58].mxu1 }
 0x8d5   :  { %v14422_v45 = vmax.f32 %v14416_v44, 0.0  ;;  %v14419_v21 = vadd.f32 %v16237_v13, %v14418_v17  ;;  %v16620_v27 = vpop.f32.mrb[59].mxu1 }
 0x8d7   :  { %14424 = vst.msk [vmem:[%s25152_s7] sm:$0xff] %vm14377_vm2, %v14422_v45  ;;  %v14423_v41 = vmax.f32 %v14419_v21, 0.0 }
 0x8d9   :  { %14425 = vst.msk [vmem:[%s25152_s7 + $0x8] sm:$0xff] %vm14377_vm2, %v14423_v41 }

</bundles_post_ra>
